<compile_context>
chip_gen: v7x
topology: tpu7x:2x2x1
jax: 0.10.0
libtpu: 0.0.40
codegen_flags: <defaults>
</compile_context>

<pallas_src>
import functools

import numpy as np

import jax
import jax.numpy as jnp
from jax import lax
from jax.experimental import pallas as pl
from jax.experimental.pallas import tpu as pltpu


# ----------------------------- host-side tables -----------------------------

@functools.lru_cache(maxsize=None)
def _tap_tables(h, w, k, pad):
    """Per-tap flat shift + validity mask of a stride-1 k x k conv at (h, w).

    shifts[t] = (dy-pad)*w + (dx-pad)  with t = dy*k + dx, so that
    patch_t[o] = x_flat[o + shifts[t]] wherever mask[t, o] == 1.
    """
    taps = k * k
    mask = np.zeros((taps, h * w), np.float32)
    shifts = []
    oy = np.arange(h)[:, None]
    ox = np.arange(w)[None, :]
    for dy in range(k):
        for dx in range(k):
            t = dy * k + dx
            shifts.append((dy - pad) * w + (dx - pad))
            ok = ((oy + dy - pad >= 0) & (oy + dy - pad < h) &
                  (ox + dx - pad >= 0) & (ox + dx - pad < w))
            mask[t] = ok.reshape(-1).astype(np.float32)
    return tuple(shifts), mask


def _gather_sel(h, w, k, pad):
    """(k*k, h*w, h*w) 0/1 selection tensors: patch_t = x @ S[t]."""
    shifts, mask = _tap_tables(h, w, k, pad)
    hw = h * w
    s = np.zeros((k * k, hw, hw), np.float32)
    dst = np.arange(hw)
    for t, sh in enumerate(shifts):
        ok = mask[t] > 0
        s[t, (dst + sh)[ok], dst[ok]] = 1.0
    return s


def _upsample_sel(h, w):
    """(h*w, 4*h*w) 0/1: nearest 2x upsample as a single matmul x_up = x @ U."""
    hh, ww = 2 * h, 2 * w
    u = np.zeros((h * w, hh * ww), np.float32)
    oy = np.arange(hh)[:, None]
    ox = np.arange(ww)[None, :]
    src = ((oy // 2) * w + (ox // 2)).reshape(-1)
    dst = (oy * ww + ox).reshape(-1)
    u[src, dst] = 1.0
    return u


def _head_sel():
    """(16, 16) one-hot tap table for Conv2d(k=4, pad=3) applied to a 1x1 input."""
    s = np.zeros((16, 16), np.float32)
    for dy in range(4):
        for dx in range(4):
            s[dy * 4 + dx, (3 - dy) * 4 + (3 - dx)] = 1.0
    return s


@functools.lru_cache(maxsize=1)
def _probe_roll_convention():
    """Probe pltpu.roll's direction on this backend.

    Returns "jnp" (roll(x, a)[i] == x[i - a], i.e. jnp.roll semantics),
    "neg" (roll(x, a)[i] == x[i + a]), or None if roll is unusable, in which
    case every conv falls back to the selection-matmul path.
    """
    try:
        x = jnp.tile(jnp.arange(128, dtype=jnp.float32)[None, :], (8, 1))

        def kern(x_ref, o_ref):
            o_ref[...] = pltpu.roll(x_ref[...], shift=3, axis=1)

        y = np.asarray(jax.block_until_ready(
            pl.pallas_call(kern,
                           out_shape=jax.ShapeDtypeStruct((8, 128), jnp.float32))(x)))
        xn = np.asarray(x)
        if np.array_equal(y, np.roll(xn, 3, axis=1)):
            return "jnp"
        if np.array_equal(y, np.roll(xn, -3, axis=1)):
            return "neg"
        return None
    except Exception:  # noqa: BLE001 - any lowering issue -> safe fallback
        return None


# ------------------------------ params helpers -------------------------------

def init_progen_params(key, layer_depth=3, uper_feat_exp=5):
    """Random parameters. Logical conv weight layout: (kh, kw, Cin, Cout)."""
    mf = 2 ** uper_feat_exp
    kit = iter(jax.random.split(key, 256))

    def nrm(shape, scale=1.0):
        return scale * jax.random.normal(next(kit), shape, jnp.float32)

    def conv_param(cin, cout, k, eq=True):
        s = (2.0 / (cin * k * k)) ** 0.5 if eq else 1.0     # equalized-LR scale
        return {"wl": (nrm((k, k, cin, cout)) * s).astype(jnp.bfloat16),
                "b": nrm((cout, 1), 0.1).astype(jnp.float32)}

    params = {"layer_depth": layer_depth, "max_filter": mf}
    params["fc"] = {"w": (nrm((mf, mf)) * (2.0 / mf) ** 0.5).astype(jnp.bfloat16),
                    "b": nrm((mf, 1), 0.1).astype(jnp.float32)}
    params["first"] = (conv_param(mf, mf, 4, eq=False),     # plain nn.Conv2d
                       conv_param(mf, mf, 3, eq=True))
    blocks = []
    for i in range(layer_depth):
        if i > 3:
            cin = 2 ** (uper_feat_exp - i + 4)
            cout = 2 ** (uper_feat_exp - i - 1 + 4)
        else:
            cin = cout = mf
        blocks.append((conv_param(cin, cout, 3), conv_param(cout, cout, 3)))
    params["blocks"] = blocks
    params["to_rgb"] = [
        conv_param(2 ** (uper_feat_exp - i + 4) if i > 4 else mf, 3, 1)
        for i in range(layer_depth + 1)]
    return params


def _stacked_weight(conv):
    """(Cout, k*k*Cin) bf16 with column t*Cin+ci = Wl[dy, dx, ci, :], t = dy*k+dx."""
    wl = conv["wl"]
    k, _, cin, cout = wl.shape
    return wl.transpose(3, 0, 1, 2).reshape(cout, k * k * cin)


def _oihw_weight(conv):
    return conv["wl"].astype(jnp.float32).transpose(3, 2, 0, 1)


# ----------------------------- fused forward build ---------------------------

def make_progen_forward(params, depth, alpha=1.0, tanh=False, roll_conv="auto"):
    """Build the fully fused ProGen forward: one pallas_call, grid=(batch,)."""
    assert depth <= params["layer_depth"]
    if roll_conv == "auto":
        roll_conv = _probe_roll_convention()
    mf = params["max_filter"]
    fade = (depth != 0) and (alpha < 1.0)

    inputs, specs = [], []
    flops, trans = 0, 0

    def add(a, dtype=None):
        a = jnp.asarray(a, dtype=dtype) if dtype is not None else jnp.asarray(a)
        inputs.append(a)
        nd = a.ndim
        specs.append(pl.BlockSpec(a.shape, lambda i, _nd=nd: (0,) * _nd))
        return len(inputs) - 1

    def plan_conv(h, w):
        """Static plan for a 3x3 / pad 1 conv at (h, w): roll+mask or gather."""
        shifts, mask = _tap_tables(h, w, 3, 1)
        hw = h * w
        if roll_conv is not None and hw % 128 == 0:
            amts = tuple(((-s) % hw) if roll_conv == "jnp" else (s % hw)
                         for s in shifts)
            return {"mode": "roll", "amts": amts, "tbl": add(mask, jnp.float32)}
        return {"mode": "gather",
                "tbl": add(_gather_sel(h, w, 3, 1), jnp.bfloat16)}

    # --- head: fc -> Conv(4,1,3) -> LReLU -> EqConv(3,1,1) -> PN -> LReLU ----
    fc_w = add(params["fc"]["w"])
    fc_b = add(params["fc"]["b"])
    c1, c2 = params["first"]
    c1_w = add(_stacked_weight(c1))
    c1_b = add(c1["b"])
    sel_h = add(_head_sel(), jnp.bfloat16)
    c2_w = add(_stacked_weight(c2))
    c2_b = add(c2["b"])
    head_plan = plan_conv(4, 4)
    flops += 2 * mf * mf + 2 * mf * (16 * mf) * 16
    flops += 9 * 2 * mf * 16 * 16 + 2 * mf * (9 * mf) * 16
    trans += 16

    # --- blocks: Up2x -> conv -> PN -> LReLU -> conv -> PN -> LReLU ----------
    res, cur_c = 4, mf
    block_plans = []
    for i in range(depth):
        ca, cb = params["blocks"][i]
        cout = int(ca["wl"].shape[3])
        hw_in, hw_out = res * res, 4 * res * res
        bp = {"u": add(_upsample_sel(res, res), jnp.bfloat16),
              "plan": plan_conv(2 * res, 2 * res),
              "wa": add(_stacked_weight(ca)), "ba": add(ca["b"]),
              "wb": add(_stacked_weight(cb)), "bb": add(cb["b"])}
        block_plans.append(bp)
        gat = 0 if bp["plan"]["mode"] == "roll" else 9 * 2 * hw_out * hw_out
        flops += 2 * cur_c * hw_in * hw_out                        # upsample matmul
        flops += cur_c * gat + 2 * cout * (9 * cur_c) * hw_out     # conv_a
        flops += cout * gat + 2 * cout * (9 * cout) * hw_out       # conv_b
        trans += 2 * hw_out
        cur_c, res = cout, 2 * res
    hw_final = res * res

    # --- to-RGB (+ fade-in branch reusing the last block's upsample) ---------
    rgb = params["to_rgb"][depth]
    rgb_w = add(_stacked_weight(rgb))
    rgb_b = add(rgb["b"])
    flops += 2 * 3 * cur_c * hw_final
    fade_ws = None
    if fade:
        rgbp = params["to_rgb"][depth - 1]
        fade_ws = (add(_stacked_weight(rgbp)), add(rgbp["b"]))
        flops += 2 * 3 * int(rgbp["wl"].shape[2]) * hw_final

    n_const = len(inputs)

    # ------------------------------- kernel body -----------------------------
    def kernel(x_ref, *rest):
        cr = rest[:n_const]
        o_ref = rest[n_const]

        def finish(acc, b_idx, do_pn, do_lrelu):
            acc = acc + cr[b_idx][...]                      # bias (f32)
            if do_pn:   # pixelNorm over channels (sublane axis)
                acc = acc * lax.rsqrt(
                    jnp.mean(acc * acc, axis=0, keepdims=True) + 1e-8)
            if do_lrelu:                                    # LeakyReLU(0.2), f32
                acc = jnp.where(acc >= 0, acc, 0.2 * acc)
            return acc

        def conv3x3(x, plan, w_idx, b_idx):
            """3x3 / pad 1 conv on x (C, HW) f32 -> (Cout, HW) f32 (+PN+LReLU).

            Builds the 9 shifted taps (XLU rolls + boundary mask, or 0/1 gather
            matmuls for small HW), stacks them to (9*Cin, HW) bf16 and does a
            single MXU matmul with the (Cout, 9*Cin) stacked weight.
            """
            hw = x.shape[-1]
            patches = []
            if plan["mode"] == "roll":
                m_ref = cr[plan["tbl"]]
                for t, amt in enumerate(plan["amts"]):
                    r = x if amt == 0 else pltpu.roll(x, shift=amt, axis=1)
                    patches.append((r * m_ref[t:t + 1, :]).astype(jnp.bfloat16))
            else:
                s_ref = cr[plan["tbl"]]
                x_bf = x.astype(jnp.bfloat16)
                for t in range(9):
                    patches.append(
                        jnp.dot(x_bf, s_ref[t],
                                preferred_element_type=jnp.float32
                                ).astype(jnp.bfloat16))
            p = jnp.concatenate(patches, axis=0)            # (9*Cin, HW) bf16
            acc = jnp.dot(cr[w_idx][...], p, preferred_element_type=jnp.float32)
            return finish(acc, b_idx, True, True)

        # ---- head ----
        x_col = x_ref[0]                                    # (mf, 1) bf16
        h = jnp.dot(cr[fc_w][...], x_col, preferred_element_type=jnp.float32)
        h = (h + cr[fc_b][...]).astype(jnp.bfloat16)        # EqLinear
        sel_ref = cr[sel_h]
        # Conv2d(mf, mf, 4, 1, 3) on a 1x1 input: one-hot taps -> stacked K=16*Cin
        p = jnp.concatenate([h * sel_ref[t:t + 1, :] for t in range(16)], axis=0)
        acc = jnp.dot(cr[c1_w][...], p, preferred_element_type=jnp.float32)
        h = finish(acc, c1_b, False, True)                  # LReLU, no PN
        h = conv3x3(h, head_plan, c2_w, c2_b)               # EqConv -> PN -> LReLU

        # ---- blocks ----
        up_last = None
        for bp in block_plans:
            x_bf = h.astype(jnp.bfloat16)
            up = jnp.dot(x_bf, cr[bp["u"]][...],            # 2x nearest upsample
                         preferred_element_type=jnp.float32)
            up_last = up                                    # == Up2x(before_x)
            h = conv3x3(up, bp["plan"], bp["wa"], bp["ba"])
            h = conv3x3(h, bp["plan"], bp["wb"], bp["bb"])

        # ---- to-RGB (+ fade-in blend) ----
        out = jnp.dot(cr[rgb_w][...], h.astype(jnp.bfloat16),
                      preferred_element_type=jnp.float32) + cr[rgb_b][...]
        if fade_ws is not None:
            prev = jnp.dot(cr[fade_ws[0]][...], up_last.astype(jnp.bfloat16),
                           preferred_element_type=jnp.float32) + cr[fade_ws[1]][...]
            out = (1.0 - alpha) * prev + alpha * out
        if tanh:
            out = jnp.tanh(out)
        o_ref[0] = out.astype(o_ref.dtype)

    const_inputs = tuple(inputs)
    const_specs = list(specs)
    final_res = res

    def forward(x):
        n = x.shape[0]
        x_col = x.astype(jnp.bfloat16).reshape(n, mf, 1)
        nbytes = sum(int(np.prod(a.shape)) * a.dtype.itemsize for a in const_inputs)
        nbytes += x_col.size * 2 + n * 3 * hw_final * 4
        out = pl.pallas_call(
            kernel,
            out_shape=jax.ShapeDtypeStruct((n, 3, hw_final), jnp.float32),
            grid=(n,),
            in_specs=[pl.BlockSpec((1, mf, 1), lambda i: (i, 0, 0))] + const_specs,
            out_specs=pl.BlockSpec((1, 3, hw_final), lambda i: (i, 0, 0)),
            compiler_params=pltpu.CompilerParams(
                dimension_semantics=("parallel",)),
            cost_estimate=pl.CostEstimate(flops=int(n * flops),
                                          transcendentals=int(n * trans),
                                          bytes_accessed=int(nbytes)),
        )(x_col, *const_inputs)
        # transposed (N, 3, H*W) layout is already channel-first: free reshape.
        return out.reshape(n, 3, final_res, final_res)

    return forward


# ------------------------------ pure-JAX reference ---------------------------

def progen_reference(params, x, depth, alpha=1.0, tanh=False):
    """f32-activation reference matching the PyTorch module (same bf16 weights)."""
    mf = params["max_filter"]
    n = x.shape[0]

    def conv(h, c, pad):
        y = lax.conv_general_dilated(h, _oihw_weight(c), (1, 1),
                                     [(pad, pad), (pad, pad)],
                                     dimension_numbers=("NCHW", "OIHW", "NCHW"))
        return y + c["b"].reshape(1, -1, 1, 1)

    lrelu = lambda h: jnp.where(h >= 0, h, 0.2 * h)
    pnorm = lambda h: h * lax.rsqrt(jnp.mean(h * h, axis=1, keepdims=True) + 1e-8)
    up2 = lambda h: jnp.repeat(jnp.repeat(h, 2, axis=2), 2, axis=3)

    xq = x.astype(jnp.bfloat16).astype(jnp.float32)
    h = xq @ params["fc"]["w"].astype(jnp.float32).T + params["fc"]["b"][:, 0]
    h = h.reshape(n, mf, 1, 1)
    c1, c2 = params["first"]
    h = lrelu(conv(h, c1, 3))
    h = lrelu(pnorm(conv(h, c2, 1)))
    before = None
    for i in range(depth):
        before = h
        ca, cb = params["blocks"][i]
        h = lrelu(pnorm(conv(up2(h), ca, 1)))
        h = lrelu(pnorm(conv(h, cb, 1)))
    out = conv(h, params["to_rgb"][depth], 0)
    if depth != 0 and alpha < 1:
        prev = conv(up2(before), params["to_rgb"][depth - 1], 0)
        out = (1.0 - alpha) * prev + alpha * out
    return jnp.tanh(out) if tanh else out


# ----------------------------------- main ------------------------------------

if __name__ == "__main__":
    # Small synthetic ProGen: layer_depth=3, Uper_feat_Exp=5 -> max_filter=32.
    layer_depth, uper_feat_exp = 3, 5
    key = jax.random.PRNGKey(0)
    pkey, xkey = jax.random.split(key)
    params = init_progen_params(pkey, layer_depth, uper_feat_exp)

    bs = 2
    x = jax.random.normal(xkey, (bs, 2 ** uper_feat_exp), jnp.float32)

    depth, alpha = 2, 0.5            # exercises the fused fade-in path too
    fwd = jax.jit(make_progen_forward(params, depth, alpha, tanh=False))
    out = jax.block_until_ready(fwd(x))

    hw = 4 * (2 ** depth)            # 4x4 base, x2 per block
    assert out.shape == (bs, 3, hw, hw), out.shape
    assert bool(jnp.all(jnp.isfinite(out)))

    ref = np.asarray(progen_reference(params, x, depth, alpha, tanh=False))
    np.testing.assert_allclose(np.asarray(out), ref, rtol=0.1, atol=0.1)
    print("KERNEL_OK")
</pallas_src>

<mosaic_0001>
module attributes {stable_mosaic.version = 11 : i64} {
  func.func @kern(%arg0: memref<8x128xf32, #tpu.memory_space<vmem>>, %arg1: memref<8x128xf32, #tpu.memory_space<vmem>>) attributes {dimension_semantics = [], scalar_prefetch = 0 : i64, scratch_operands = 0 : i64, tpu.core_type = #tpu.core_type<tc>} {
    %c0 = arith.constant 0 : index
    %c0_0 = arith.constant 0 : index
    %0 = vector.load %arg0[%c0, %c0_0] : memref<8x128xf32, #tpu.memory_space<vmem>>, vector<8x128xf32>
    %c3_i32 = arith.constant 3 : i32
    %1 = tpu.dynamic_rotate %0 by %c3_i32 dim 1 : vector<8x128xf32>, i32 -> vector<8x128xf32>
    %c0_1 = arith.constant 0 : index
    %c0_2 = arith.constant 0 : index
    %2 = vector.load %arg1[%c0_1, %c0_2] : memref<8x128xf32, #tpu.memory_space<vmem>>, vector<8x128xf32>
    tpu.vector_store %arg1[%c0_1, %c0_2], %1 {strides = array<i32>} : memref<8x128xf32, #tpu.memory_space<vmem>>, vector<8x128xf32>,
    return
  }
}

module attributes {stable_mosaic.version = 11 : i64} {
  func.func @kernel(%arg0: i32, %arg1: memref<1x32x1xbf16, #tpu.memory_space<vmem>>, %arg2: memref<32x32xbf16, #tpu.memory_space<vmem>>, %arg3: memref<32x1xf32, #tpu.memory_space<vmem>>, %arg4: memref<32x512xbf16, #tpu.memory_space<vmem>>, %arg5: memref<32x1xf32, #tpu.memory_space<vmem>>, %arg6: memref<16x16xbf16, #tpu.memory_space<vmem>>, %arg7: memref<32x288xbf16, #tpu.memory_space<vmem>>, %arg8: memref<32x1xf32, #tpu.memory_space<vmem>>, %arg9: memref<9x16x16xbf16, #tpu.memory_space<vmem>>, %arg10: memref<16x64xbf16, #tpu.memory_space<vmem>>, %arg11: memref<9x64x64xbf16, #tpu.memory_space<vmem>>, %arg12: memref<32x288xbf16, #tpu.memory_space<vmem>>, %arg13: memref<32x1xf32, #tpu.memory_space<vmem>>, %arg14: memref<32x288xbf16, #tpu.memory_space<vmem>>, %arg15: memref<32x1xf32, #tpu.memory_space<vmem>>, %arg16: memref<64x256xbf16, #tpu.memory_space<vmem>>, %arg17: memref<9x256x256xbf16, #tpu.memory_space<vmem>>, %arg18: memref<32x288xbf16, #tpu.memory_space<vmem>>, %arg19: memref<32x1xf32, #tpu.memory_space<vmem>>, %arg20: memref<32x288xbf16, #tpu.memory_space<vmem>>, %arg21: memref<32x1xf32, #tpu.memory_space<vmem>>, %arg22: memref<3x32xbf16, #tpu.memory_space<vmem>>, %arg23: memref<3x1xf32, #tpu.memory_space<vmem>>, %arg24: memref<3x32xbf16, #tpu.memory_space<vmem>>, %arg25: memref<3x1xf32, #tpu.memory_space<vmem>>, %arg26: memref<1x3x256xf32, #tpu.memory_space<vmem>>) attributes {dimension_semantics = [#tpu.dimension_semantics<parallel>], iteration_bounds = array<i64: 2>, scalar_prefetch = 0 : i64, scratch_operands = 0 : i64, tpu.core_type = #tpu.core_type<tc>, window_params = [{transform_indices = @transform_0, window_bounds = array<i64: 1, 32, 1>}, {pipeline_mode = #tpu.pipeline_mode<synchronous>, transform_indices = @transform_1, window_bounds = array<i64: 32, 32>}, {pipeline_mode = #tpu.pipeline_mode<synchronous>, transform_indices = @transform_2, window_bounds = array<i64: 32, 1>}, {pipeline_mode = #tpu.pipeline_mode<synchronous>, transform_indices = @transform_3, window_bounds = array<i64: 32, 512>}, {pipeline_mode = #tpu.pipeline_mode<synchronous>, transform_indices = @transform_4, window_bounds = array<i64: 32, 1>}, {pipeline_mode = #tpu.pipeline_mode<synchronous>, transform_indices = @transform_5, window_bounds = array<i64: 16, 16>}, {pipeline_mode = #tpu.pipeline_mode<synchronous>, transform_indices = @transform_6, window_bounds = array<i64: 32, 288>}, {pipeline_mode = #tpu.pipeline_mode<synchronous>, transform_indices = @transform_7, window_bounds = array<i64: 32, 1>}, {pipeline_mode = #tpu.pipeline_mode<synchronous>, transform_indices = @transform_8, window_bounds = array<i64: 9, 16, 16>}, {pipeline_mode = #tpu.pipeline_mode<synchronous>, transform_indices = @transform_9, window_bounds = array<i64: 16, 64>}, {pipeline_mode = #tpu.pipeline_mode<synchronous>, transform_indices = @transform_10, window_bounds = array<i64: 9, 64, 64>}, {pipeline_mode = #tpu.pipeline_mode<synchronous>, transform_indices = @transform_11, window_bounds = array<i64: 32, 288>}, {pipeline_mode = #tpu.pipeline_mode<synchronous>, transform_indices = @transform_12, window_bounds = array<i64: 32, 1>}, {pipeline_mode = #tpu.pipeline_mode<synchronous>, transform_indices = @transform_13, window_bounds = array<i64: 32, 288>}, {pipeline_mode = #tpu.pipeline_mode<synchronous>, transform_indices = @transform_14, window_bounds = array<i64: 32, 1>}, {pipeline_mode = #tpu.pipeline_mode<synchronous>, transform_indices = @transform_15, window_bounds = array<i64: 64, 256>}, {pipeline_mode = #tpu.pipeline_mode<synchronous>, transform_indices = @transform_16, window_bounds = array<i64: 9, 256, 256>}, {pipeline_mode = #tpu.pipeline_mode<synchronous>, transform_indices = @transform_17, window_bounds = array<i64: 32, 288>}, {pipeline_mode = #tpu.pipeline_mode<synchronous>, transform_indices = @transform_18, window_bounds = array<i64: 32, 1>}, {pipeline_mode = #tpu.pipeline_mode<synchronous>, transform_indices = @transform_19, window_bounds = array<i64: 32, 288>}, {pipeline_mode = #tpu.pipeline_mode<synchronous>, transform_indices = @transform_20, window_bounds = array<i64: 32, 1>}, {pipeline_mode = #tpu.pipeline_mode<synchronous>, transform_indices = @transform_21, window_bounds = array<i64: 3, 32>}, {pipeline_mode = #tpu.pipeline_mode<synchronous>, transform_indices = @transform_22, window_bounds = array<i64: 3, 1>}, {pipeline_mode = #tpu.pipeline_mode<synchronous>, transform_indices = @transform_23, window_bounds = array<i64: 3, 32>}, {pipeline_mode = #tpu.pipeline_mode<synchronous>, transform_indices = @transform_24, window_bounds = array<i64: 3, 1>}, {transform_indices = @transform_25, window_bounds = array<i64: 1, 3, 256>}]} {
    %c0 = arith.constant 0 : index
    %c0_0 = arith.constant 0 : index
    %c0_1 = arith.constant 0 : index
    %0 = vector.load %arg1[%c0, %c0_0, %c0_1] : memref<1x32x1xbf16, #tpu.memory_space<vmem>>, vector<1x32x1xbf16>
    %1 = vector.shape_cast %0 : vector<1x32x1xbf16> to vector<32x1xbf16>
    %c0_2 = arith.constant 0 : index
    %c0_3 = arith.constant 0 : index
    %2 = vector.load %arg2[%c0_2, %c0_3] : memref<32x32xbf16, #tpu.memory_space<vmem>>, vector<32x32xbf16>
    %cst = arith.constant dense<0.000000e+00> : vector<32x1xf32>
    %3 = tpu.matmul %2, %1, %cst {dimension_numbers = #tpu.dot_dimension_numbers<[1], [0], [0], [1], [0, 0, 1, 1], [], []>} : vector<32x32xbf16>, vector<32x1xbf16>, vector<32x1xf32> -> vector<32x1xf32>
    %c0_4 = arith.constant 0 : index
    %c0_5 = arith.constant 0 : index
    %4 = vector.load %arg3[%c0_4, %c0_5] : memref<32x1xf32, #tpu.memory_space<vmem>>, vector<32x1xf32>
    %5 = arith.addf %3, %4 : vector<32x1xf32>
    %6 = arith.truncf %5 : vector<32x1xf32> to vector<32x1xbf16>
    %c0_6 = arith.constant 0 : index
    %c0_7 = arith.constant 0 : index
    %7 = vector.load %arg6[%c0_6, %c0_7] : memref<16x16xbf16, #tpu.memory_space<vmem>>, vector<1x16xbf16>
    %8 = vector.broadcast %6 : vector<32x1xbf16> to vector<32x16xbf16>
    %9 = vector.broadcast %7 : vector<1x16xbf16> to vector<32x16xbf16>
    %10 = arith.mulf %8, %9 : vector<32x16xbf16>
    %c1 = arith.constant 1 : index
    %c0_8 = arith.constant 0 : index
    %11 = vector.load %arg6[%c1, %c0_8] : memref<16x16xbf16, #tpu.memory_space<vmem>>, vector<1x16xbf16>
    %12 = vector.broadcast %6 : vector<32x1xbf16> to vector<32x16xbf16>
    %13 = vector.broadcast %11 : vector<1x16xbf16> to vector<32x16xbf16>
    %14 = arith.mulf %12, %13 : vector<32x16xbf16>
    %c2 = arith.constant 2 : index
    %c0_9 = arith.constant 0 : index
    %15 = vector.load %arg6[%c2, %c0_9] : memref<16x16xbf16, #tpu.memory_space<vmem>>, vector<1x16xbf16>
    %16 = vector.broadcast %6 : vector<32x1xbf16> to vector<32x16xbf16>
    %17 = vector.broadcast %15 : vector<1x16xbf16> to vector<32x16xbf16>
    %18 = arith.mulf %16, %17 : vector<32x16xbf16>
    %c3 = arith.constant 3 : index
    %c0_10 = arith.constant 0 : index
    %19 = vector.load %arg6[%c3, %c0_10] : memref<16x16xbf16, #tpu.memory_space<vmem>>, vector<1x16xbf16>
    %20 = vector.broadcast %6 : vector<32x1xbf16> to vector<32x16xbf16>
    %21 = vector.broadcast %19 : vector<1x16xbf16> to vector<32x16xbf16>
    %22 = arith.mulf %20, %21 : vector<32x16xbf16>
    %c4 = arith.constant 4 : index
    %c0_11 = arith.constant 0 : index
    %23 = vector.load %arg6[%c4, %c0_11] : memref<16x16xbf16, #tpu.memory_space<vmem>>, vector<1x16xbf16>
    %24 = vector.broadcast %6 : vector<32x1xbf16> to vector<32x16xbf16>
    %25 = vector.broadcast %23 : vector<1x16xbf16> to vector<32x16xbf16>
    %26 = arith.mulf %24, %25 : vector<32x16xbf16>
    %c5 = arith.constant 5 : index
    %c0_12 = arith.constant 0 : index
    %27 = vector.load %arg6[%c5, %c0_12] : memref<16x16xbf16, #tpu.memory_space<vmem>>, vector<1x16xbf16>
    %28 = vector.broadcast %6 : vector<32x1xbf16> to vector<32x16xbf16>
    %29 = vector.broadcast %27 : vector<1x16xbf16> to vector<32x16xbf16>
    %30 = arith.mulf %28, %29 : vector<32x16xbf16>
    %c6 = arith.constant 6 : index
    %c0_13 = arith.constant 0 : index
    %31 = vector.load %arg6[%c6, %c0_13] : memref<16x16xbf16, #tpu.memory_space<vmem>>, vector<1x16xbf16>
    %32 = vector.broadcast %6 : vector<32x1xbf16> to vector<32x16xbf16>
    %33 = vector.broadcast %31 : vector<1x16xbf16> to vector<32x16xbf16>
    %34 = arith.mulf %32, %33 : vector<32x16xbf16>
    %c7 = arith.constant 7 : index
    %c0_14 = arith.constant 0 : index
    %35 = vector.load %arg6[%c7, %c0_14] : memref<16x16xbf16, #tpu.memory_space<vmem>>, vector<1x16xbf16>
    %36 = vector.broadcast %6 : vector<32x1xbf16> to vector<32x16xbf16>
    %37 = vector.broadcast %35 : vector<1x16xbf16> to vector<32x16xbf16>
    %38 = arith.mulf %36, %37 : vector<32x16xbf16>
    %c8 = arith.constant 8 : index
    %c0_15 = arith.constant 0 : index
    %39 = vector.load %arg6[%c8, %c0_15] : memref<16x16xbf16, #tpu.memory_space<vmem>>, vector<1x16xbf16>
    %40 = vector.broadcast %6 : vector<32x1xbf16> to vector<32x16xbf16>
    %41 = vector.broadcast %39 : vector<1x16xbf16> to vector<32x16xbf16>
    %42 = arith.mulf %40, %41 : vector<32x16xbf16>
    %c9 = arith.constant 9 : index
    %c0_16 = arith.constant 0 : index
    %43 = vector.load %arg6[%c9, %c0_16] : memref<16x16xbf16, #tpu.memory_space<vmem>>, vector<1x16xbf16>
    %44 = vector.broadcast %6 : vector<32x1xbf16> to vector<32x16xbf16>
    %45 = vector.broadcast %43 : vector<1x16xbf16> to vector<32x16xbf16>
    %46 = arith.mulf %44, %45 : vector<32x16xbf16>
    %c10 = arith.constant 10 : index
    %c0_17 = arith.constant 0 : index
    %47 = vector.load %arg6[%c10, %c0_17] : memref<16x16xbf16, #tpu.memory_space<vmem>>, vector<1x16xbf16>
    %48 = vector.broadcast %6 : vector<32x1xbf16> to vector<32x16xbf16>
    %49 = vector.broadcast %47 : vector<1x16xbf16> to vector<32x16xbf16>
    %50 = arith.mulf %48, %49 : vector<32x16xbf16>
    %c11 = arith.constant 11 : index
    %c0_18 = arith.constant 0 : index
    %51 = vector.load %arg6[%c11, %c0_18] : memref<16x16xbf16, #tpu.memory_space<vmem>>, vector<1x16xbf16>
    %52 = vector.broadcast %6 : vector<32x1xbf16> to vector<32x16xbf16>
    %53 = vector.broadcast %51 : vector<1x16xbf16> to vector<32x16xbf16>
    %54 = arith.mulf %52, %53 : vector<32x16xbf16>
    %c12 = arith.constant 12 : index
    %c0_19 = arith.constant 0 : index
    %55 = vector.load %arg6[%c12, %c0_19] : memref<16x16xbf16, #tpu.memory_space<vmem>>, vector<1x16xbf16>
    %56 = vector.broadcast %6 : vector<32x1xbf16> to vector<32x16xbf16>
    %57 = vector.broadcast %55 : vector<1x16xbf16> to vector<32x16xbf16>
    %58 = arith.mulf %56, %57 : vector<32x16xbf16>
    %c13 = arith.constant 13 : index
    %c0_20 = arith.constant 0 : index
    %59 = vector.load %arg6[%c13, %c0_20] : memref<16x16xbf16, #tpu.memory_space<vmem>>, vector<1x16xbf16>
    %60 = vector.broadcast %6 : vector<32x1xbf16> to vector<32x16xbf16>
    %61 = vector.broadcast %59 : vector<1x16xbf16> to vector<32x16xbf16>
    %62 = arith.mulf %60, %61 : vector<32x16xbf16>
    %c14 = arith.constant 14 : index
    %c0_21 = arith.constant 0 : index
    %63 = vector.load %arg6[%c14, %c0_21] : memref<16x16xbf16, #tpu.memory_space<vmem>>, vector<1x16xbf16>
    %64 = vector.broadcast %6 : vector<32x1xbf16> to vector<32x16xbf16>
    %65 = vector.broadcast %63 : vector<1x16xbf16> to vector<32x16xbf16>
    %66 = arith.mulf %64, %65 : vector<32x16xbf16>
    %c15 = arith.constant 15 : index
    %c0_22 = arith.constant 0 : index
    %67 = vector.load %arg6[%c15, %c0_22] : memref<16x16xbf16, #tpu.memory_space<vmem>>, vector<1x16xbf16>
    %68 = vector.broadcast %6 : vector<32x1xbf16> to vector<32x16xbf16>
    %69 = vector.broadcast %67 : vector<1x16xbf16> to vector<32x16xbf16>
    %70 = arith.mulf %68, %69 : vector<32x16xbf16>
    %71 = tpu.concatenate %10, %14, %18, %22, %26, %30, %34, %38, %42, %46, %50, %54, %58, %62, %66, %70 in 0 : vector<32x16xbf16>, vector<32x16xbf16>, vector<32x16xbf16>, vector<32x16xbf16>, vector<32x16xbf16>, vector<32x16xbf16>, vector<32x16xbf16>, vector<32x16xbf16>, vector<32x16xbf16>, vector<32x16xbf16>, vector<32x16xbf16>, vector<32x16xbf16>, vector<32x16xbf16>, vector<32x16xbf16>, vector<32x16xbf16>, vector<32x16xbf16> -> vector<512x16xbf16>
    %c0_23 = arith.constant 0 : index
    %c0_24 = arith.constant 0 : index
    %72 = vector.load %arg4[%c0_23, %c0_24] : memref<32x512xbf16, #tpu.memory_space<vmem>>, vector<32x512xbf16>
    %cst_25 = arith.constant dense<0.000000e+00> : vector<32x16xf32>
    %73 = tpu.matmul %72, %71, %cst_25 {dimension_numbers = #tpu.dot_dimension_numbers<[1], [0], [0], [1], [0, 0, 1, 1], [], []>} : vector<32x512xbf16>, vector<512x16xbf16>, vector<32x16xf32> -> vector<32x16xf32>
    %c0_26 = arith.constant 0 : index
    %c0_27 = arith.constant 0 : index
    %74 = vector.load %arg5[%c0_26, %c0_27] : memref<32x1xf32, #tpu.memory_space<vmem>>, vector<32x1xf32>
    %75 = vector.broadcast %74 : vector<32x1xf32> to vector<32x16xf32>
    %76 = arith.addf %73, %75 : vector<32x16xf32>
    %cst_28 = arith.constant 0.000000e+00 : f32
    %77 = vector.broadcast %cst_28 : f32 to vector<32x16xf32>
    %78 = arith.cmpf oge, %76, %77 : vector<32x16xf32>
    %cst_29 = arith.constant 2.000000e-01 : f32
    %79 = vector.broadcast %cst_29 : f32 to vector<32x16xf32>
    %80 = arith.mulf %79, %76 : vector<32x16xf32>
    %81 = arith.select %78, %76, %80 : vector<32x16xi1>, vector<32x16xf32>
    %82 = arith.truncf %81 : vector<32x16xf32> to vector<32x16xbf16>
    %c0_30 = arith.constant 0 : index
    %c0_31 = arith.constant 0 : index
    %c0_32 = arith.constant 0 : index
    %83 = vector.load %arg9[%c0_30, %c0_31, %c0_32] : memref<9x16x16xbf16, #tpu.memory_space<vmem>>, vector<1x16x16xbf16>
    %84 = vector.shape_cast %83 : vector<1x16x16xbf16> to vector<16x16xbf16>
    %cst_33 = arith.constant dense<0.000000e+00> : vector<32x16xf32>
    %85 = tpu.matmul %82, %84, %cst_33 {dimension_numbers = #tpu.dot_dimension_numbers<[1], [0], [0], [1], [0, 0, 1, 1], [], []>} : vector<32x16xbf16>, vector<16x16xbf16>, vector<32x16xf32> -> vector<32x16xf32>
    %86 = arith.truncf %85 : vector<32x16xf32> to vector<32x16xbf16>
    %c1_34 = arith.constant 1 : index
    %c0_35 = arith.constant 0 : index
    %c0_36 = arith.constant 0 : index
    %87 = vector.load %arg9[%c1_34, %c0_35, %c0_36] : memref<9x16x16xbf16, #tpu.memory_space<vmem>>, vector<1x16x16xbf16>
    %88 = vector.shape_cast %87 : vector<1x16x16xbf16> to vector<16x16xbf16>
    %cst_37 = arith.constant dense<0.000000e+00> : vector<32x16xf32>
    %89 = tpu.matmul %82, %88, %cst_37 {dimension_numbers = #tpu.dot_dimension_numbers<[1], [0], [0], [1], [0, 0, 1, 1], [], []>} : vector<32x16xbf16>, vector<16x16xbf16>, vector<32x16xf32> -> vector<32x16xf32>
    %90 = arith.truncf %89 : vector<32x16xf32> to vector<32x16xbf16>
    %c2_38 = arith.constant 2 : index
    %c0_39 = arith.constant 0 : index
    %c0_40 = arith.constant 0 : index
    %91 = vector.load %arg9[%c2_38, %c0_39, %c0_40] : memref<9x16x16xbf16, #tpu.memory_space<vmem>>, vector<1x16x16xbf16>
    %92 = vector.shape_cast %91 : vector<1x16x16xbf16> to vector<16x16xbf16>
    %cst_41 = arith.constant dense<0.000000e+00> : vector<32x16xf32>
    %93 = tpu.matmul %82, %92, %cst_41 {dimension_numbers = #tpu.dot_dimension_numbers<[1], [0], [0], [1], [0, 0, 1, 1], [], []>} : vector<32x16xbf16>, vector<16x16xbf16>, vector<32x16xf32> -> vector<32x16xf32>
    %94 = arith.truncf %93 : vector<32x16xf32> to vector<32x16xbf16>
    %c3_42 = arith.constant 3 : index
    %c0_43 = arith.constant 0 : index
    %c0_44 = arith.constant 0 : index
    %95 = vector.load %arg9[%c3_42, %c0_43, %c0_44] : memref<9x16x16xbf16, #tpu.memory_space<vmem>>, vector<1x16x16xbf16>
    %96 = vector.shape_cast %95 : vector<1x16x16xbf16> to vector<16x16xbf16>
    %cst_45 = arith.constant dense<0.000000e+00> : vector<32x16xf32>
    %97 = tpu.matmul %82, %96, %cst_45 {dimension_numbers = #tpu.dot_dimension_numbers<[1], [0], [0], [1], [0, 0, 1, 1], [], []>} : vector<32x16xbf16>, vector<16x16xbf16>, vector<32x16xf32> -> vector<32x16xf32>
    %98 = arith.truncf %97 : vector<32x16xf32> to vector<32x16xbf16>
    %c4_46 = arith.constant 4 : index
    %c0_47 = arith.constant 0 : index
    %c0_48 = arith.constant 0 : index
    %99 = vector.load %arg9[%c4_46, %c0_47, %c0_48] : memref<9x16x16xbf16, #tpu.memory_space<vmem>>, vector<1x16x16xbf16>
    %100 = vector.shape_cast %99 : vector<1x16x16xbf16> to vector<16x16xbf16>
    %cst_49 = arith.constant dense<0.000000e+00> : vector<32x16xf32>
    %101 = tpu.matmul %82, %100, %cst_49 {dimension_numbers = #tpu.dot_dimension_numbers<[1], [0], [0], [1], [0, 0, 1, 1], [], []>} : vector<32x16xbf16>, vector<16x16xbf16>, vector<32x16xf32> -> vector<32x16xf32>
    %102 = arith.truncf %101 : vector<32x16xf32> to vector<32x16xbf16>
    %c5_50 = arith.constant 5 : index
    %c0_51 = arith.constant 0 : index
    %c0_52 = arith.constant 0 : index
    %103 = vector.load %arg9[%c5_50, %c0_51, %c0_52] : memref<9x16x16xbf16, #tpu.memory_space<vmem>>, vector<1x16x16xbf16>
    %104 = vector.shape_cast %103 : vector<1x16x16xbf16> to vector<16x16xbf16>
    %cst_53 = arith.constant dense<0.000000e+00> : vector<32x16xf32>
    %105 = tpu.matmul %82, %104, %cst_53 {dimension_numbers = #tpu.dot_dimension_numbers<[1], [0], [0], [1], [0, 0, 1, 1], [], []>} : vector<32x16xbf16>, vector<16x16xbf16>, vector<32x16xf32> -> vector<32x16xf32>
    %106 = arith.truncf %105 : vector<32x16xf32> to vector<32x16xbf16>
    %c6_54 = arith.constant 6 : index
    %c0_55 = arith.constant 0 : index
    %c0_56 = arith.constant 0 : index
    %107 = vector.load %arg9[%c6_54, %c0_55, %c0_56] : memref<9x16x16xbf16, #tpu.memory_space<vmem>>, vector<1x16x16xbf16>
    %108 = vector.shape_cast %107 : vector<1x16x16xbf16> to vector<16x16xbf16>
    %cst_57 = arith.constant dense<0.000000e+00> : vector<32x16xf32>
    %109 = tpu.matmul %82, %108, %cst_57 {dimension_numbers = #tpu.dot_dimension_numbers<[1], [0], [0], [1], [0, 0, 1, 1], [], []>} : vector<32x16xbf16>, vector<16x16xbf16>, vector<32x16xf32> -> vector<32x16xf32>
    %110 = arith.truncf %109 : vector<32x16xf32> to vector<32x16xbf16>
    %c7_58 = arith.constant 7 : index
    %c0_59 = arith.constant 0 : index
    %c0_60 = arith.constant 0 : index
    %111 = vector.load %arg9[%c7_58, %c0_59, %c0_60] : memref<9x16x16xbf16, #tpu.memory_space<vmem>>, vector<1x16x16xbf16>
    %112 = vector.shape_cast %111 : vector<1x16x16xbf16> to vector<16x16xbf16>
    %cst_61 = arith.constant dense<0.000000e+00> : vector<32x16xf32>
    %113 = tpu.matmul %82, %112, %cst_61 {dimension_numbers = #tpu.dot_dimension_numbers<[1], [0], [0], [1], [0, 0, 1, 1], [], []>} : vector<32x16xbf16>, vector<16x16xbf16>, vector<32x16xf32> -> vector<32x16xf32>
    %114 = arith.truncf %113 : vector<32x16xf32> to vector<32x16xbf16>
    %c8_62 = arith.constant 8 : index
    %c0_63 = arith.constant 0 : index
    %c0_64 = arith.constant 0 : index
    %115 = vector.load %arg9[%c8_62, %c0_63, %c0_64] : memref<9x16x16xbf16, #tpu.memory_space<vmem>>, vector<1x16x16xbf16>
    %116 = vector.shape_cast %115 : vector<1x16x16xbf16> to vector<16x16xbf16>
    %cst_65 = arith.constant dense<0.000000e+00> : vector<32x16xf32>
    %117 = tpu.matmul %82, %116, %cst_65 {dimension_numbers = #tpu.dot_dimension_numbers<[1], [0], [0], [1], [0, 0, 1, 1], [], []>} : vector<32x16xbf16>, vector<16x16xbf16>, vector<32x16xf32> -> vector<32x16xf32>
    %118 = arith.truncf %117 : vector<32x16xf32> to vector<32x16xbf16>
    %119 = tpu.concatenate %86, %90, %94, %98, %102, %106, %110, %114, %118 in 0 : vector<32x16xbf16>, vector<32x16xbf16>, vector<32x16xbf16>, vector<32x16xbf16>, vector<32x16xbf16>, vector<32x16xbf16>, vector<32x16xbf16>, vector<32x16xbf16>, vector<32x16xbf16> -> vector<288x16xbf16>
    %c0_66 = arith.constant 0 : index
    %c0_67 = arith.constant 0 : index
    %120 = vector.load %arg7[%c0_66, %c0_67] : memref<32x288xbf16, #tpu.memory_space<vmem>>, vector<32x288xbf16>
    %cst_68 = arith.constant dense<0.000000e+00> : vector<32x16xf32>
    %121 = tpu.matmul %120, %119, %cst_68 {dimension_numbers = #tpu.dot_dimension_numbers<[1], [0], [0], [1], [0, 0, 1, 1], [], []>} : vector<32x288xbf16>, vector<288x16xbf16>, vector<32x16xf32> -> vector<32x16xf32>
    %c0_69 = arith.constant 0 : index
    %c0_70 = arith.constant 0 : index
    %122 = vector.load %arg8[%c0_69, %c0_70] : memref<32x1xf32, #tpu.memory_space<vmem>>, vector<32x1xf32>
    %123 = vector.broadcast %122 : vector<32x1xf32> to vector<32x16xf32>
    %124 = arith.addf %121, %123 : vector<32x16xf32>
    %125 = arith.mulf %124, %124 : vector<32x16xf32>
    %cst_71 = arith.constant dense<0.000000e+00> : vector<16xf32>
    %126 = vector.multi_reduction <add>, %125, %cst_71 [0] : vector<32x16xf32> to vector<16xf32>
    %127 = vector.shape_cast %126 : vector<16xf32> to vector<1x16xf32>
    %cst_72 = arith.constant 3.200000e+01 : f32
    %128 = vector.broadcast %cst_72 : f32 to vector<1x16xf32>
    %129 = arith.divf %127, %128 : vector<1x16xf32>
    %cst_73 = arith.constant 9.99999993E-9 : f32
    %130 = vector.broadcast %cst_73 : f32 to vector<1x16xf32>
    %131 = arith.addf %129, %130 : vector<1x16xf32>
    %132 = math.rsqrt %131 : vector<1x16xf32>
    %133 = vector.broadcast %132 : vector<1x16xf32> to vector<32x16xf32>
    %134 = arith.mulf %124, %133 : vector<32x16xf32>
    %cst_74 = arith.constant 0.000000e+00 : f32
    %135 = vector.broadcast %cst_74 : f32 to vector<32x16xf32>
    %136 = arith.cmpf oge, %134, %135 : vector<32x16xf32>
    %cst_75 = arith.constant 2.000000e-01 : f32
    %137 = vector.broadcast %cst_75 : f32 to vector<32x16xf32>
    %138 = arith.mulf %137, %134 : vector<32x16xf32>
    %139 = arith.select %136, %134, %138 : vector<32x16xi1>, vector<32x16xf32>
    %140 = arith.truncf %139 : vector<32x16xf32> to vector<32x16xbf16>
    %c0_76 = arith.constant 0 : index
    %c0_77 = arith.constant 0 : index
    %141 = vector.load %arg10[%c0_76, %c0_77] : memref<16x64xbf16, #tpu.memory_space<vmem>>, vector<16x64xbf16>
    %cst_78 = arith.constant dense<0.000000e+00> : vector<32x64xf32>
    %142 = tpu.matmul %140, %141, %cst_78 {dimension_numbers = #tpu.dot_dimension_numbers<[1], [0], [0], [1], [0, 0, 1, 1], [], []>} : vector<32x16xbf16>, vector<16x64xbf16>, vector<32x64xf32> -> vector<32x64xf32>
    %143 = arith.truncf %142 : vector<32x64xf32> to vector<32x64xbf16>
    %c0_79 = arith.constant 0 : index
    %c0_80 = arith.constant 0 : index
    %c0_81 = arith.constant 0 : index
    %144 = vector.load %arg11[%c0_79, %c0_80, %c0_81] : memref<9x64x64xbf16, #tpu.memory_space<vmem>>, vector<1x64x64xbf16>
    %145 = vector.shape_cast %144 : vector<1x64x64xbf16> to vector<64x64xbf16>
    %cst_82 = arith.constant dense<0.000000e+00> : vector<32x64xf32>
    %146 = tpu.matmul %143, %145, %cst_82 {dimension_numbers = #tpu.dot_dimension_numbers<[1], [0], [0], [1], [0, 0, 1, 1], [], []>} : vector<32x64xbf16>, vector<64x64xbf16>, vector<32x64xf32> -> vector<32x64xf32>
    %147 = arith.truncf %146 : vector<32x64xf32> to vector<32x64xbf16>
    %c1_83 = arith.constant 1 : index
    %c0_84 = arith.constant 0 : index
    %c0_85 = arith.constant 0 : index
    %148 = vector.load %arg11[%c1_83, %c0_84, %c0_85] : memref<9x64x64xbf16, #tpu.memory_space<vmem>>, vector<1x64x64xbf16>
    %149 = vector.shape_cast %148 : vector<1x64x64xbf16> to vector<64x64xbf16>
    %cst_86 = arith.constant dense<0.000000e+00> : vector<32x64xf32>
    %150 = tpu.matmul %143, %149, %cst_86 {dimension_numbers = #tpu.dot_dimension_numbers<[1], [0], [0], [1], [0, 0, 1, 1], [], []>} : vector<32x64xbf16>, vector<64x64xbf16>, vector<32x64xf32> -> vector<32x64xf32>
    %151 = arith.truncf %150 : vector<32x64xf32> to vector<32x64xbf16>
    %c2_87 = arith.constant 2 : index
    %c0_88 = arith.constant 0 : index
    %c0_89 = arith.constant 0 : index
    %152 = vector.load %arg11[%c2_87, %c0_88, %c0_89] : memref<9x64x64xbf16, #tpu.memory_space<vmem>>, vector<1x64x64xbf16>
    %153 = vector.shape_cast %152 : vector<1x64x64xbf16> to vector<64x64xbf16>
    %cst_90 = arith.constant dense<0.000000e+00> : vector<32x64xf32>
    %154 = tpu.matmul %143, %153, %cst_90 {dimension_numbers = #tpu.dot_dimension_numbers<[1], [0], [0], [1], [0, 0, 1, 1], [], []>} : vector<32x64xbf16>, vector<64x64xbf16>, vector<32x64xf32> -> vector<32x64xf32>
    %155 = arith.truncf %154 : vector<32x64xf32> to vector<32x64xbf16>
    %c3_91 = arith.constant 3 : index
    %c0_92 = arith.constant 0 : index
    %c0_93 = arith.constant 0 : index
    %156 = vector.load %arg11[%c3_91, %c0_92, %c0_93] : memref<9x64x64xbf16, #tpu.memory_space<vmem>>, vector<1x64x64xbf16>
    %157 = vector.shape_cast %156 : vector<1x64x64xbf16> to vector<64x64xbf16>
    %cst_94 = arith.constant dense<0.000000e+00> : vector<32x64xf32>
    %158 = tpu.matmul %143, %157, %cst_94 {dimension_numbers = #tpu.dot_dimension_numbers<[1], [0], [0], [1], [0, 0, 1, 1], [], []>} : vector<32x64xbf16>, vector<64x64xbf16>, vector<32x64xf32> -> vector<32x64xf32>
    %159 = arith.truncf %158 : vector<32x64xf32> to vector<32x64xbf16>
    %c4_95 = arith.constant 4 : index
    %c0_96 = arith.constant 0 : index
    %c0_97 = arith.constant 0 : index
    %160 = vector.load %arg11[%c4_95, %c0_96, %c0_97] : memref<9x64x64xbf16, #tpu.memory_space<vmem>>, vector<1x64x64xbf16>
    %161 = vector.shape_cast %160 : vector<1x64x64xbf16> to vector<64x64xbf16>
    %cst_98 = arith.constant dense<0.000000e+00> : vector<32x64xf32>
    %162 = tpu.matmul %143, %161, %cst_98 {dimension_numbers = #tpu.dot_dimension_numbers<[1], [0], [0], [1], [0, 0, 1, 1], [], []>} : vector<32x64xbf16>, vector<64x64xbf16>, vector<32x64xf32> -> vector<32x64xf32>
    %163 = arith.truncf %162 : vector<32x64xf32> to vector<32x64xbf16>
    %c5_99 = arith.constant 5 : index
    %c0_100 = arith.constant 0 : index
    %c0_101 = arith.constant 0 : index
    %164 = vector.load %arg11[%c5_99, %c0_100, %c0_101] : memref<9x64x64xbf16, #tpu.memory_space<vmem>>, vector<1x64x64xbf16>
    %165 = vector.shape_cast %164 : vector<1x64x64xbf16> to vector<64x64xbf16>
    %cst_102 = arith.constant dense<0.000000e+00> : vector<32x64xf32>
    %166 = tpu.matmul %143, %165, %cst_102 {dimension_numbers = #tpu.dot_dimension_numbers<[1], [0], [0], [1], [0, 0, 1, 1], [], []>} : vector<32x64xbf16>, vector<64x64xbf16>, vector<32x64xf32> -> vector<32x64xf32>
    %167 = arith.truncf %166 : vector<32x64xf32> to vector<32x64xbf16>
    %c6_103 = arith.constant 6 : index
    %c0_104 = arith.constant 0 : index
    %c0_105 = arith.constant 0 : index
    %168 = vector.load %arg11[%c6_103, %c0_104, %c0_105] : memref<9x64x64xbf16, #tpu.memory_space<vmem>>, vector<1x64x64xbf16>
    %169 = vector.shape_cast %168 : vector<1x64x64xbf16> to vector<64x64xbf16>
    %cst_106 = arith.constant dense<0.000000e+00> : vector<32x64xf32>
    %170 = tpu.matmul %143, %169, %cst_106 {dimension_numbers = #tpu.dot_dimension_numbers<[1], [0], [0], [1], [0, 0, 1, 1], [], []>} : vector<32x64xbf16>, vector<64x64xbf16>, vector<32x64xf32> -> vector<32x64xf32>
    %171 = arith.truncf %170 : vector<32x64xf32> to vector<32x64xbf16>
    %c7_107 = arith.constant 7 : index
    %c0_108 = arith.constant 0 : index
    %c0_109 = arith.constant 0 : index
    %172 = vector.load %arg11[%c7_107, %c0_108, %c0_109] : memref<9x64x64xbf16, #tpu.memory_space<vmem>>, vector<1x64x64xbf16>
    %173 = vector.shape_cast %172 : vector<1x64x64xbf16> to vector<64x64xbf16>
    %cst_110 = arith.constant dense<0.000000e+00> : vector<32x64xf32>
    %174 = tpu.matmul %143, %173, %cst_110 {dimension_numbers = #tpu.dot_dimension_numbers<[1], [0], [0], [1], [0, 0, 1, 1], [], []>} : vector<32x64xbf16>, vector<64x64xbf16>, vector<32x64xf32> -> vector<32x64xf32>
    %175 = arith.truncf %174 : vector<32x64xf32> to vector<32x64xbf16>
    %c8_111 = arith.constant 8 : index
    %c0_112 = arith.constant 0 : index
    %c0_113 = arith.constant 0 : index
    %176 = vector.load %arg11[%c8_111, %c0_112, %c0_113] : memref<9x64x64xbf16, #tpu.memory_space<vmem>>, vector<1x64x64xbf16>
    %177 = vector.shape_cast %176 : vector<1x64x64xbf16> to vector<64x64xbf16>
    %cst_114 = arith.constant dense<0.000000e+00> : vector<32x64xf32>
    %178 = tpu.matmul %143, %177, %cst_114 {dimension_numbers = #tpu.dot_dimension_numbers<[1], [0], [0], [1], [0, 0, 1, 1], [], []>} : vector<32x64xbf16>, vector<64x64xbf16>, vector<32x64xf32> -> vector<32x64xf32>
    %179 = arith.truncf %178 : vector<32x64xf32> to vector<32x64xbf16>
    %180 = tpu.concatenate %147, %151, %155, %159, %163, %167, %171, %175, %179 in 0 : vector<32x64xbf16>, vector<32x64xbf16>, vector<32x64xbf16>, vector<32x64xbf16>, vector<32x64xbf16>, vector<32x64xbf16>, vector<32x64xbf16>, vector<32x64xbf16>, vector<32x64xbf16> -> vector<288x64xbf16>
    %c0_115 = arith.constant 0 : index
    %c0_116 = arith.constant 0 : index
    %181 = vector.load %arg12[%c0_115, %c0_116] : memref<32x288xbf16, #tpu.memory_space<vmem>>, vector<32x288xbf16>
    %cst_117 = arith.constant dense<0.000000e+00> : vector<32x64xf32>
    %182 = tpu.matmul %181, %180, %cst_117 {dimension_numbers = #tpu.dot_dimension_numbers<[1], [0], [0], [1], [0, 0, 1, 1], [], []>} : vector<32x288xbf16>, vector<288x64xbf16>, vector<32x64xf32> -> vector<32x64xf32>
    %c0_118 = arith.constant 0 : index
    %c0_119 = arith.constant 0 : index
    %183 = vector.load %arg13[%c0_118, %c0_119] : memref<32x1xf32, #tpu.memory_space<vmem>>, vector<32x1xf32>
    %184 = vector.broadcast %183 : vector<32x1xf32> to vector<32x64xf32>
    %185 = arith.addf %182, %184 : vector<32x64xf32>
    %186 = arith.mulf %185, %185 : vector<32x64xf32>
    %cst_120 = arith.constant dense<0.000000e+00> : vector<64xf32>
    %187 = vector.multi_reduction <add>, %186, %cst_120 [0] : vector<32x64xf32> to vector<64xf32>
    %188 = vector.shape_cast %187 : vector<64xf32> to vector<1x64xf32>
    %cst_121 = arith.constant 3.200000e+01 : f32
    %189 = vector.broadcast %cst_121 : f32 to vector<1x64xf32>
    %190 = arith.divf %188, %189 : vector<1x64xf32>
    %cst_122 = arith.constant 9.99999993E-9 : f32
    %191 = vector.broadcast %cst_122 : f32 to vector<1x64xf32>
    %192 = arith.addf %190, %191 : vector<1x64xf32>
    %193 = math.rsqrt %192 : vector<1x64xf32>
    %194 = vector.broadcast %193 : vector<1x64xf32> to vector<32x64xf32>
    %195 = arith.mulf %185, %194 : vector<32x64xf32>
    %cst_123 = arith.constant 0.000000e+00 : f32
    %196 = vector.broadcast %cst_123 : f32 to vector<32x64xf32>
    %197 = arith.cmpf oge, %195, %196 : vector<32x64xf32>
    %cst_124 = arith.constant 2.000000e-01 : f32
    %198 = vector.broadcast %cst_124 : f32 to vector<32x64xf32>
    %199 = arith.mulf %198, %195 : vector<32x64xf32>
    %200 = arith.select %197, %195, %199 : vector<32x64xi1>, vector<32x64xf32>
    %201 = arith.truncf %200 : vector<32x64xf32> to vector<32x64xbf16>
    %c0_125 = arith.constant 0 : index
    %c0_126 = arith.constant 0 : index
    %c0_127 = arith.constant 0 : index
    %202 = vector.load %arg11[%c0_125, %c0_126, %c0_127] : memref<9x64x64xbf16, #tpu.memory_space<vmem>>, vector<1x64x64xbf16>
    %203 = vector.shape_cast %202 : vector<1x64x64xbf16> to vector<64x64xbf16>
    %cst_128 = arith.constant dense<0.000000e+00> : vector<32x64xf32>
    %204 = tpu.matmul %201, %203, %cst_128 {dimension_numbers = #tpu.dot_dimension_numbers<[1], [0], [0], [1], [0, 0, 1, 1], [], []>} : vector<32x64xbf16>, vector<64x64xbf16>, vector<32x64xf32> -> vector<32x64xf32>
    %205 = arith.truncf %204 : vector<32x64xf32> to vector<32x64xbf16>
    %c1_129 = arith.constant 1 : index
    %c0_130 = arith.constant 0 : index
    %c0_131 = arith.constant 0 : index
    %206 = vector.load %arg11[%c1_129, %c0_130, %c0_131] : memref<9x64x64xbf16, #tpu.memory_space<vmem>>, vector<1x64x64xbf16>
    %207 = vector.shape_cast %206 : vector<1x64x64xbf16> to vector<64x64xbf16>
    %cst_132 = arith.constant dense<0.000000e+00> : vector<32x64xf32>
    %208 = tpu.matmul %201, %207, %cst_132 {dimension_numbers = #tpu.dot_dimension_numbers<[1], [0], [0], [1], [0, 0, 1, 1], [], []>} : vector<32x64xbf16>, vector<64x64xbf16>, vector<32x64xf32> -> vector<32x64xf32>
    %209 = arith.truncf %208 : vector<32x64xf32> to vector<32x64xbf16>
    %c2_133 = arith.constant 2 : index
    %c0_134 = arith.constant 0 : index
    %c0_135 = arith.constant 0 : index
    %210 = vector.load %arg11[%c2_133, %c0_134, %c0_135] : memref<9x64x64xbf16, #tpu.memory_space<vmem>>, vector<1x64x64xbf16>
    %211 = vector.shape_cast %210 : vector<1x64x64xbf16> to vector<64x64xbf16>
    %cst_136 = arith.constant dense<0.000000e+00> : vector<32x64xf32>
    %212 = tpu.matmul %201, %211, %cst_136 {dimension_numbers = #tpu.dot_dimension_numbers<[1], [0], [0], [1], [0, 0, 1, 1], [], []>} : vector<32x64xbf16>, vector<64x64xbf16>, vector<32x64xf32> -> vector<32x64xf32>
    %213 = arith.truncf %212 : vector<32x64xf32> to vector<32x64xbf16>
    %c3_137 = arith.constant 3 : index
    %c0_138 = arith.constant 0 : index
    %c0_139 = arith.constant 0 : index
    %214 = vector.load %arg11[%c3_137, %c0_138, %c0_139] : memref<9x64x64xbf16, #tpu.memory_space<vmem>>, vector<1x64x64xbf16>
    %215 = vector.shape_cast %214 : vector<1x64x64xbf16> to vector<64x64xbf16>
    %cst_140 = arith.constant dense<0.000000e+00> : vector<32x64xf32>
    %216 = tpu.matmul %201, %215, %cst_140 {dimension_numbers = #tpu.dot_dimension_numbers<[1], [0], [0], [1], [0, 0, 1, 1], [], []>} : vector<32x64xbf16>, vector<64x64xbf16>, vector<32x64xf32> -> vector<32x64xf32>
    %217 = arith.truncf %216 : vector<32x64xf32> to vector<32x64xbf16>
    %c4_141 = arith.constant 4 : index
    %c0_142 = arith.constant 0 : index
    %c0_143 = arith.constant 0 : index
    %218 = vector.load %arg11[%c4_141, %c0_142, %c0_143] : memref<9x64x64xbf16, #tpu.memory_space<vmem>>, vector<1x64x64xbf16>
    %219 = vector.shape_cast %218 : vector<1x64x64xbf16> to vector<64x64xbf16>
    %cst_144 = arith.constant dense<0.000000e+00> : vector<32x64xf32>
    %220 = tpu.matmul %201, %219, %cst_144 {dimension_numbers = #tpu.dot_dimension_numbers<[1], [0], [0], [1], [0, 0, 1, 1], [], []>} : vector<32x64xbf16>, vector<64x64xbf16>, vector<32x64xf32> -> vector<32x64xf32>
    %221 = arith.truncf %220 : vector<32x64xf32> to vector<32x64xbf16>
    %c5_145 = arith.constant 5 : index
    %c0_146 = arith.constant 0 : index
    %c0_147 = arith.constant 0 : index
    %222 = vector.load %arg11[%c5_145, %c0_146, %c0_147] : memref<9x64x64xbf16, #tpu.memory_space<vmem>>, vector<1x64x64xbf16>
    %223 = vector.shape_cast %222 : vector<1x64x64xbf16> to vector<64x64xbf16>
    %cst_148 = arith.constant dense<0.000000e+00> : vector<32x64xf32>
    %224 = tpu.matmul %201, %223, %cst_148 {dimension_numbers = #tpu.dot_dimension_numbers<[1], [0], [0], [1], [0, 0, 1, 1], [], []>} : vector<32x64xbf16>, vector<64x64xbf16>, vector<32x64xf32> -> vector<32x64xf32>
    %225 = arith.truncf %224 : vector<32x64xf32> to vector<32x64xbf16>
    %c6_149 = arith.constant 6 : index
    %c0_150 = arith.constant 0 : index
    %c0_151 = arith.constant 0 : index
    %226 = vector.load %arg11[%c6_149, %c0_150, %c0_151] : memref<9x64x64xbf16, #tpu.memory_space<vmem>>, vector<1x64x64xbf16>
    %227 = vector.shape_cast %226 : vector<1x64x64xbf16> to vector<64x64xbf16>
    %cst_152 = arith.constant dense<0.000000e+00> : vector<32x64xf32>
    %228 = tpu.matmul %201, %227, %cst_152 {dimension_numbers = #tpu.dot_dimension_numbers<[1], [0], [0], [1], [0, 0, 1, 1], [], []>} : vector<32x64xbf16>, vector<64x64xbf16>, vector<32x64xf32> -> vector<32x64xf32>
    %229 = arith.truncf %228 : vector<32x64xf32> to vector<32x64xbf16>
    %c7_153 = arith.constant 7 : index
    %c0_154 = arith.constant 0 : index
    %c0_155 = arith.constant 0 : index
    %230 = vector.load %arg11[%c7_153, %c0_154, %c0_155] : memref<9x64x64xbf16, #tpu.memory_space<vmem>>, vector<1x64x64xbf16>
    %231 = vector.shape_cast %230 : vector<1x64x64xbf16> to vector<64x64xbf16>
    %cst_156 = arith.constant dense<0.000000e+00> : vector<32x64xf32>
    %232 = tpu.matmul %201, %231, %cst_156 {dimension_numbers = #tpu.dot_dimension_numbers<[1], [0], [0], [1], [0, 0, 1, 1], [], []>} : vector<32x64xbf16>, vector<64x64xbf16>, vector<32x64xf32> -> vector<32x64xf32>
    %233 = arith.truncf %232 : vector<32x64xf32> to vector<32x64xbf16>
    %c8_157 = arith.constant 8 : index
    %c0_158 = arith.constant 0 : index
    %c0_159 = arith.constant 0 : index
    %234 = vector.load %arg11[%c8_157, %c0_158, %c0_159] : memref<9x64x64xbf16, #tpu.memory_space<vmem>>, vector<1x64x64xbf16>
    %235 = vector.shape_cast %234 : vector<1x64x64xbf16> to vector<64x64xbf16>
    %cst_160 = arith.constant dense<0.000000e+00> : vector<32x64xf32>
    %236 = tpu.matmul %201, %235, %cst_160 {dimension_numbers = #tpu.dot_dimension_numbers<[1], [0], [0], [1], [0, 0, 1, 1], [], []>} : vector<32x64xbf16>, vector<64x64xbf16>, vector<32x64xf32> -> vector<32x64xf32>
    %237 = arith.truncf %236 : vector<32x64xf32> to vector<32x64xbf16>
    %238 = tpu.concatenate %205, %209, %213, %217, %221, %225, %229, %233, %237 in 0 : vector<32x64xbf16>, vector<32x64xbf16>, vector<32x64xbf16>, vector<32x64xbf16>, vector<32x64xbf16>, vector<32x64xbf16>, vector<32x64xbf16>, vector<32x64xbf16>, vector<32x64xbf16> -> vector<288x64xbf16>
    %c0_161 = arith.constant 0 : index
    %c0_162 = arith.constant 0 : index
    %239 = vector.load %arg14[%c0_161, %c0_162] : memref<32x288xbf16, #tpu.memory_space<vmem>>, vector<32x288xbf16>
    %cst_163 = arith.constant dense<0.000000e+00> : vector<32x64xf32>
    %240 = tpu.matmul %239, %238, %cst_163 {dimension_numbers = #tpu.dot_dimension_numbers<[1], [0], [0], [1], [0, 0, 1, 1], [], []>} : vector<32x288xbf16>, vector<288x64xbf16>, vector<32x64xf32> -> vector<32x64xf32>
    %c0_164 = arith.constant 0 : index
    %c0_165 = arith.constant 0 : index
    %241 = vector.load %arg15[%c0_164, %c0_165] : memref<32x1xf32, #tpu.memory_space<vmem>>, vector<32x1xf32>
    %242 = vector.broadcast %241 : vector<32x1xf32> to vector<32x64xf32>
    %243 = arith.addf %240, %242 : vector<32x64xf32>
    %244 = arith.mulf %243, %243 : vector<32x64xf32>
    %cst_166 = arith.constant dense<0.000000e+00> : vector<64xf32>
    %245 = vector.multi_reduction <add>, %244, %cst_166 [0] : vector<32x64xf32> to vector<64xf32>
    %246 = vector.shape_cast %245 : vector<64xf32> to vector<1x64xf32>
    %cst_167 = arith.constant 3.200000e+01 : f32
    %247 = vector.broadcast %cst_167 : f32 to vector<1x64xf32>
    %248 = arith.divf %246, %247 : vector<1x64xf32>
    %cst_168 = arith.constant 9.99999993E-9 : f32
    %249 = vector.broadcast %cst_168 : f32 to vector<1x64xf32>
    %250 = arith.addf %248, %249 : vector<1x64xf32>
    %251 = math.rsqrt %250 : vector<1x64xf32>
    %252 = vector.broadcast %251 : vector<1x64xf32> to vector<32x64xf32>
    %253 = arith.mulf %243, %252 : vector<32x64xf32>
    %cst_169 = arith.constant 0.000000e+00 : f32
    %254 = vector.broadcast %cst_169 : f32 to vector<32x64xf32>
    %255 = arith.cmpf oge, %253, %254 : vector<32x64xf32>
    %cst_170 = arith.constant 2.000000e-01 : f32
    %256 = vector.broadcast %cst_170 : f32 to vector<32x64xf32>
    %257 = arith.mulf %256, %253 : vector<32x64xf32>
    %258 = arith.select %255, %253, %257 : vector<32x64xi1>, vector<32x64xf32>
    %259 = arith.truncf %258 : vector<32x64xf32> to vector<32x64xbf16>
    %c0_171 = arith.constant 0 : index
    %c0_172 = arith.constant 0 : index
    %260 = vector.load %arg16[%c0_171, %c0_172] : memref<64x256xbf16, #tpu.memory_space<vmem>>, vector<64x256xbf16>
    %cst_173 = arith.constant dense<0.000000e+00> : vector<32x256xf32>
    %261 = tpu.matmul %259, %260, %cst_173 {dimension_numbers = #tpu.dot_dimension_numbers<[1], [0], [0], [1], [0, 0, 1, 1], [], []>} : vector<32x64xbf16>, vector<64x256xbf16>, vector<32x256xf32> -> vector<32x256xf32>
    %262 = arith.truncf %261 : vector<32x256xf32> to vector<32x256xbf16>
    %c0_174 = arith.constant 0 : index
    %c0_175 = arith.constant 0 : index
    %c0_176 = arith.constant 0 : index
    %263 = vector.load %arg17[%c0_174, %c0_175, %c0_176] : memref<9x256x256xbf16, #tpu.memory_space<vmem>>, vector<1x256x256xbf16>
    %264 = vector.shape_cast %263 : vector<1x256x256xbf16> to vector<256x256xbf16>
    %cst_177 = arith.constant dense<0.000000e+00> : vector<32x256xf32>
    %265 = tpu.matmul %262, %264, %cst_177 {dimension_numbers = #tpu.dot_dimension_numbers<[1], [0], [0], [1], [0, 0, 1, 1], [], []>} : vector<32x256xbf16>, vector<256x256xbf16>, vector<32x256xf32> -> vector<32x256xf32>
    %266 = arith.truncf %265 : vector<32x256xf32> to vector<32x256xbf16>
    %c1_178 = arith.constant 1 : index
    %c0_179 = arith.constant 0 : index
    %c0_180 = arith.constant 0 : index
    %267 = vector.load %arg17[%c1_178, %c0_179, %c0_180] : memref<9x256x256xbf16, #tpu.memory_space<vmem>>, vector<1x256x256xbf16>
    %268 = vector.shape_cast %267 : vector<1x256x256xbf16> to vector<256x256xbf16>
    %cst_181 = arith.constant dense<0.000000e+00> : vector<32x256xf32>
    %269 = tpu.matmul %262, %268, %cst_181 {dimension_numbers = #tpu.dot_dimension_numbers<[1], [0], [0], [1], [0, 0, 1, 1], [], []>} : vector<32x256xbf16>, vector<256x256xbf16>, vector<32x256xf32> -> vector<32x256xf32>
    %270 = arith.truncf %269 : vector<32x256xf32> to vector<32x256xbf16>
    %c2_182 = arith.constant 2 : index
    %c0_183 = arith.constant 0 : index
    %c0_184 = arith.constant 0 : index
    %271 = vector.load %arg17[%c2_182, %c0_183, %c0_184] : memref<9x256x256xbf16, #tpu.memory_space<vmem>>, vector<1x256x256xbf16>
    %272 = vector.shape_cast %271 : vector<1x256x256xbf16> to vector<256x256xbf16>
    %cst_185 = arith.constant dense<0.000000e+00> : vector<32x256xf32>
    %273 = tpu.matmul %262, %272, %cst_185 {dimension_numbers = #tpu.dot_dimension_numbers<[1], [0], [0], [1], [0, 0, 1, 1], [], []>} : vector<32x256xbf16>, vector<256x256xbf16>, vector<32x256xf32> -> vector<32x256xf32>
    %274 = arith.truncf %273 : vector<32x256xf32> to vector<32x256xbf16>
    %c3_186 = arith.constant 3 : index
    %c0_187 = arith.constant 0 : index
    %c0_188 = arith.constant 0 : index
    %275 = vector.load %arg17[%c3_186, %c0_187, %c0_188] : memref<9x256x256xbf16, #tpu.memory_space<vmem>>, vector<1x256x256xbf16>
    %276 = vector.shape_cast %275 : vector<1x256x256xbf16> to vector<256x256xbf16>
    %cst_189 = arith.constant dense<0.000000e+00> : vector<32x256xf32>
    %277 = tpu.matmul %262, %276, %cst_189 {dimension_numbers = #tpu.dot_dimension_numbers<[1], [0], [0], [1], [0, 0, 1, 1], [], []>} : vector<32x256xbf16>, vector<256x256xbf16>, vector<32x256xf32> -> vector<32x256xf32>
    %278 = arith.truncf %277 : vector<32x256xf32> to vector<32x256xbf16>
    %c4_190 = arith.constant 4 : index
    %c0_191 = arith.constant 0 : index
    %c0_192 = arith.constant 0 : index
    %279 = vector.load %arg17[%c4_190, %c0_191, %c0_192] : memref<9x256x256xbf16, #tpu.memory_space<vmem>>, vector<1x256x256xbf16>
    %280 = vector.shape_cast %279 : vector<1x256x256xbf16> to vector<256x256xbf16>
    %cst_193 = arith.constant dense<0.000000e+00> : vector<32x256xf32>
    %281 = tpu.matmul %262, %280, %cst_193 {dimension_numbers = #tpu.dot_dimension_numbers<[1], [0], [0], [1], [0, 0, 1, 1], [], []>} : vector<32x256xbf16>, vector<256x256xbf16>, vector<32x256xf32> -> vector<32x256xf32>
    %282 = arith.truncf %281 : vector<32x256xf32> to vector<32x256xbf16>
    %c5_194 = arith.constant 5 : index
    %c0_195 = arith.constant 0 : index
    %c0_196 = arith.constant 0 : index
    %283 = vector.load %arg17[%c5_194, %c0_195, %c0_196] : memref<9x256x256xbf16, #tpu.memory_space<vmem>>, vector<1x256x256xbf16>
    %284 = vector.shape_cast %283 : vector<1x256x256xbf16> to vector<256x256xbf16>
    %cst_197 = arith.constant dense<0.000000e+00> : vector<32x256xf32>
    %285 = tpu.matmul %262, %284, %cst_197 {dimension_numbers = #tpu.dot_dimension_numbers<[1], [0], [0], [1], [0, 0, 1, 1], [], []>} : vector<32x256xbf16>, vector<256x256xbf16>, vector<32x256xf32> -> vector<32x256xf32>
    %286 = arith.truncf %285 : vector<32x256xf32> to vector<32x256xbf16>
    %c6_198 = arith.constant 6 : index
    %c0_199 = arith.constant 0 : index
    %c0_200 = arith.constant 0 : index
    %287 = vector.load %arg17[%c6_198, %c0_199, %c0_200] : memref<9x256x256xbf16, #tpu.memory_space<vmem>>, vector<1x256x256xbf16>
    %288 = vector.shape_cast %287 : vector<1x256x256xbf16> to vector<256x256xbf16>
    %cst_201 = arith.constant dense<0.000000e+00> : vector<32x256xf32>
    %289 = tpu.matmul %262, %288, %cst_201 {dimension_numbers = #tpu.dot_dimension_numbers<[1], [0], [0], [1], [0, 0, 1, 1], [], []>} : vector<32x256xbf16>, vector<256x256xbf16>, vector<32x256xf32> -> vector<32x256xf32>
    %290 = arith.truncf %289 : vector<32x256xf32> to vector<32x256xbf16>
    %c7_202 = arith.constant 7 : index
    %c0_203 = arith.constant 0 : index
    %c0_204 = arith.constant 0 : index
    %291 = vector.load %arg17[%c7_202, %c0_203, %c0_204] : memref<9x256x256xbf16, #tpu.memory_space<vmem>>, vector<1x256x256xbf16>
    %292 = vector.shape_cast %291 : vector<1x256x256xbf16> to vector<256x256xbf16>
    %cst_205 = arith.constant dense<0.000000e+00> : vector<32x256xf32>
    %293 = tpu.matmul %262, %292, %cst_205 {dimension_numbers = #tpu.dot_dimension_numbers<[1], [0], [0], [1], [0, 0, 1, 1], [], []>} : vector<32x256xbf16>, vector<256x256xbf16>, vector<32x256xf32> -> vector<32x256xf32>
    %294 = arith.truncf %293 : vector<32x256xf32> to vector<32x256xbf16>
    %c8_206 = arith.constant 8 : index
    %c0_207 = arith.constant 0 : index
    %c0_208 = arith.constant 0 : index
    %295 = vector.load %arg17[%c8_206, %c0_207, %c0_208] : memref<9x256x256xbf16, #tpu.memory_space<vmem>>, vector<1x256x256xbf16>
    %296 = vector.shape_cast %295 : vector<1x256x256xbf16> to vector<256x256xbf16>
    %cst_209 = arith.constant dense<0.000000e+00> : vector<32x256xf32>
    %297 = tpu.matmul %262, %296, %cst_209 {dimension_numbers = #tpu.dot_dimension_numbers<[1], [0], [0], [1], [0, 0, 1, 1], [], []>} : vector<32x256xbf16>, vector<256x256xbf16>, vector<32x256xf32> -> vector<32x256xf32>
    %298 = arith.truncf %297 : vector<32x256xf32> to vector<32x256xbf16>
    %299 = tpu.concatenate %266, %270, %274, %278, %282, %286, %290, %294, %298 in 0 : vector<32x256xbf16>, vector<32x256xbf16>, vector<32x256xbf16>, vector<32x256xbf16>, vector<32x256xbf16>, vector<32x256xbf16>, vector<32x256xbf16>, vector<32x256xbf16>, vector<32x256xbf16> -> vector<288x256xbf16>
    %c0_210 = arith.constant 0 : index
    %c0_211 = arith.constant 0 : index
    %300 = vector.load %arg18[%c0_210, %c0_211] : memref<32x288xbf16, #tpu.memory_space<vmem>>, vector<32x288xbf16>
    %cst_212 = arith.constant dense<0.000000e+00> : vector<32x256xf32>
    %301 = tpu.matmul %300, %299, %cst_212 {dimension_numbers = #tpu.dot_dimension_numbers<[1], [0], [0], [1], [0, 0, 1, 1], [], []>} : vector<32x288xbf16>, vector<288x256xbf16>, vector<32x256xf32> -> vector<32x256xf32>
    %c0_213 = arith.constant 0 : index
    %c0_214 = arith.constant 0 : index
    %302 = vector.load %arg19[%c0_213, %c0_214] : memref<32x1xf32, #tpu.memory_space<vmem>>, vector<32x1xf32>
    %303 = vector.broadcast %302 : vector<32x1xf32> to vector<32x256xf32>
    %304 = arith.addf %301, %303 : vector<32x256xf32>
    %305 = arith.mulf %304, %304 : vector<32x256xf32>
    %cst_215 = arith.constant dense<0.000000e+00> : vector<256xf32>
    %306 = vector.multi_reduction <add>, %305, %cst_215 [0] : vector<32x256xf32> to vector<256xf32>
    %307 = vector.shape_cast %306 : vector<256xf32> to vector<1x256xf32>
    %cst_216 = arith.constant 3.200000e+01 : f32
    %308 = vector.broadcast %cst_216 : f32 to vector<1x256xf32>
    %309 = arith.divf %307, %308 : vector<1x256xf32>
    %cst_217 = arith.constant 9.99999993E-9 : f32
    %310 = vector.broadcast %cst_217 : f32 to vector<1x256xf32>
    %311 = arith.addf %309, %310 : vector<1x256xf32>
    %312 = math.rsqrt %311 : vector<1x256xf32>
    %313 = vector.broadcast %312 : vector<1x256xf32> to vector<32x256xf32>
    %314 = arith.mulf %304, %313 : vector<32x256xf32>
    %cst_218 = arith.constant 0.000000e+00 : f32
    %315 = vector.broadcast %cst_218 : f32 to vector<32x256xf32>
    %316 = arith.cmpf oge, %314, %315 : vector<32x256xf32>
    %cst_219 = arith.constant 2.000000e-01 : f32
    %317 = vector.broadcast %cst_219 : f32 to vector<32x256xf32>
    %318 = arith.mulf %317, %314 : vector<32x256xf32>
    %319 = arith.select %316, %314, %318 : vector<32x256xi1>, vector<32x256xf32>
    %320 = arith.truncf %319 : vector<32x256xf32> to vector<32x256xbf16>
    %c0_220 = arith.constant 0 : index
    %c0_221 = arith.constant 0 : index
    %c0_222 = arith.constant 0 : index
    %321 = vector.load %arg17[%c0_220, %c0_221, %c0_222] : memref<9x256x256xbf16, #tpu.memory_space<vmem>>, vector<1x256x256xbf16>
    %322 = vector.shape_cast %321 : vector<1x256x256xbf16> to vector<256x256xbf16>
    %cst_223 = arith.constant dense<0.000000e+00> : vector<32x256xf32>
    %323 = tpu.matmul %320, %322, %cst_223 {dimension_numbers = #tpu.dot_dimension_numbers<[1], [0], [0], [1], [0, 0, 1, 1], [], []>} : vector<32x256xbf16>, vector<256x256xbf16>, vector<32x256xf32> -> vector<32x256xf32>
    %324 = arith.truncf %323 : vector<32x256xf32> to vector<32x256xbf16>
    %c1_224 = arith.constant 1 : index
    %c0_225 = arith.constant 0 : index
    %c0_226 = arith.constant 0 : index
    %325 = vector.load %arg17[%c1_224, %c0_225, %c0_226] : memref<9x256x256xbf16, #tpu.memory_space<vmem>>, vector<1x256x256xbf16>
    %326 = vector.shape_cast %325 : vector<1x256x256xbf16> to vector<256x256xbf16>
    %cst_227 = arith.constant dense<0.000000e+00> : vector<32x256xf32>
    %327 = tpu.matmul %320, %326, %cst_227 {dimension_numbers = #tpu.dot_dimension_numbers<[1], [0], [0], [1], [0, 0, 1, 1], [], []>} : vector<32x256xbf16>, vector<256x256xbf16>, vector<32x256xf32> -> vector<32x256xf32>
    %328 = arith.truncf %327 : vector<32x256xf32> to vector<32x256xbf16>
    %c2_228 = arith.constant 2 : index
    %c0_229 = arith.constant 0 : index
    %c0_230 = arith.constant 0 : index
    %329 = vector.load %arg17[%c2_228, %c0_229, %c0_230] : memref<9x256x256xbf16, #tpu.memory_space<vmem>>, vector<1x256x256xbf16>
    %330 = vector.shape_cast %329 : vector<1x256x256xbf16> to vector<256x256xbf16>
    %cst_231 = arith.constant dense<0.000000e+00> : vector<32x256xf32>
    %331 = tpu.matmul %320, %330, %cst_231 {dimension_numbers = #tpu.dot_dimension_numbers<[1], [0], [0], [1], [0, 0, 1, 1], [], []>} : vector<32x256xbf16>, vector<256x256xbf16>, vector<32x256xf32> -> vector<32x256xf32>
    %332 = arith.truncf %331 : vector<32x256xf32> to vector<32x256xbf16>
    %c3_232 = arith.constant 3 : index
    %c0_233 = arith.constant 0 : index
    %c0_234 = arith.constant 0 : index
    %333 = vector.load %arg17[%c3_232, %c0_233, %c0_234] : memref<9x256x256xbf16, #tpu.memory_space<vmem>>, vector<1x256x256xbf16>
    %334 = vector.shape_cast %333 : vector<1x256x256xbf16> to vector<256x256xbf16>
    %cst_235 = arith.constant dense<0.000000e+00> : vector<32x256xf32>
    %335 = tpu.matmul %320, %334, %cst_235 {dimension_numbers = #tpu.dot_dimension_numbers<[1], [0], [0], [1], [0, 0, 1, 1], [], []>} : vector<32x256xbf16>, vector<256x256xbf16>, vector<32x256xf32> -> vector<32x256xf32>
    %336 = arith.truncf %335 : vector<32x256xf32> to vector<32x256xbf16>
    %c4_236 = arith.constant 4 : index
    %c0_237 = arith.constant 0 : index
    %c0_238 = arith.constant 0 : index
    %337 = vector.load %arg17[%c4_236, %c0_237, %c0_238] : memref<9x256x256xbf16, #tpu.memory_space<vmem>>, vector<1x256x256xbf16>
    %338 = vector.shape_cast %337 : vector<1x256x256xbf16> to vector<256x256xbf16>
    %cst_239 = arith.constant dense<0.000000e+00> : vector<32x256xf32>
    %339 = tpu.matmul %320, %338, %cst_239 {dimension_numbers = #tpu.dot_dimension_numbers<[1], [0], [0], [1], [0, 0, 1, 1], [], []>} : vector<32x256xbf16>, vector<256x256xbf16>, vector<32x256xf32> -> vector<32x256xf32>
    %340 = arith.truncf %339 : vector<32x256xf32> to vector<32x256xbf16>
    %c5_240 = arith.constant 5 : index
    %c0_241 = arith.constant 0 : index
    %c0_242 = arith.constant 0 : index
    %341 = vector.load %arg17[%c5_240, %c0_241, %c0_242] : memref<9x256x256xbf16, #tpu.memory_space<vmem>>, vector<1x256x256xbf16>
    %342 = vector.shape_cast %341 : vector<1x256x256xbf16> to vector<256x256xbf16>
    %cst_243 = arith.constant dense<0.000000e+00> : vector<32x256xf32>
    %343 = tpu.matmul %320, %342, %cst_243 {dimension_numbers = #tpu.dot_dimension_numbers<[1], [0], [0], [1], [0, 0, 1, 1], [], []>} : vector<32x256xbf16>, vector<256x256xbf16>, vector<32x256xf32> -> vector<32x256xf32>
    %344 = arith.truncf %343 : vector<32x256xf32> to vector<32x256xbf16>
    %c6_244 = arith.constant 6 : index
    %c0_245 = arith.constant 0 : index
    %c0_246 = arith.constant 0 : index
    %345 = vector.load %arg17[%c6_244, %c0_245, %c0_246] : memref<9x256x256xbf16, #tpu.memory_space<vmem>>, vector<1x256x256xbf16>
    %346 = vector.shape_cast %345 : vector<1x256x256xbf16> to vector<256x256xbf16>
    %cst_247 = arith.constant dense<0.000000e+00> : vector<32x256xf32>
    %347 = tpu.matmul %320, %346, %cst_247 {dimension_numbers = #tpu.dot_dimension_numbers<[1], [0], [0], [1], [0, 0, 1, 1], [], []>} : vector<32x256xbf16>, vector<256x256xbf16>, vector<32x256xf32> -> vector<32x256xf32>
    %348 = arith.truncf %347 : vector<32x256xf32> to vector<32x256xbf16>
    %c7_248 = arith.constant 7 : index
    %c0_249 = arith.constant 0 : index
    %c0_250 = arith.constant 0 : index
    %349 = vector.load %arg17[%c7_248, %c0_249, %c0_250] : memref<9x256x256xbf16, #tpu.memory_space<vmem>>, vector<1x256x256xbf16>
    %350 = vector.shape_cast %349 : vector<1x256x256xbf16> to vector<256x256xbf16>
    %cst_251 = arith.constant dense<0.000000e+00> : vector<32x256xf32>
    %351 = tpu.matmul %320, %350, %cst_251 {dimension_numbers = #tpu.dot_dimension_numbers<[1], [0], [0], [1], [0, 0, 1, 1], [], []>} : vector<32x256xbf16>, vector<256x256xbf16>, vector<32x256xf32> -> vector<32x256xf32>
    %352 = arith.truncf %351 : vector<32x256xf32> to vector<32x256xbf16>
    %c8_252 = arith.constant 8 : index
    %c0_253 = arith.constant 0 : index
    %c0_254 = arith.constant 0 : index
    %353 = vector.load %arg17[%c8_252, %c0_253, %c0_254] : memref<9x256x256xbf16, #tpu.memory_space<vmem>>, vector<1x256x256xbf16>
    %354 = vector.shape_cast %353 : vector<1x256x256xbf16> to vector<256x256xbf16>
    %cst_255 = arith.constant dense<0.000000e+00> : vector<32x256xf32>
    %355 = tpu.matmul %320, %354, %cst_255 {dimension_numbers = #tpu.dot_dimension_numbers<[1], [0], [0], [1], [0, 0, 1, 1], [], []>} : vector<32x256xbf16>, vector<256x256xbf16>, vector<32x256xf32> -> vector<32x256xf32>
    %356 = arith.truncf %355 : vector<32x256xf32> to vector<32x256xbf16>
    %357 = tpu.concatenate %324, %328, %332, %336, %340, %344, %348, %352, %356 in 0 : vector<32x256xbf16>, vector<32x256xbf16>, vector<32x256xbf16>, vector<32x256xbf16>, vector<32x256xbf16>, vector<32x256xbf16>, vector<32x256xbf16>, vector<32x256xbf16>, vector<32x256xbf16> -> vector<288x256xbf16>
    %c0_256 = arith.constant 0 : index
    %c0_257 = arith.constant 0 : index
    %358 = vector.load %arg20[%c0_256, %c0_257] : memref<32x288xbf16, #tpu.memory_space<vmem>>, vector<32x288xbf16>
    %cst_258 = arith.constant dense<0.000000e+00> : vector<32x256xf32>
    %359 = tpu.matmul %358, %357, %cst_258 {dimension_numbers = #tpu.dot_dimension_numbers<[1], [0], [0], [1], [0, 0, 1, 1], [], []>} : vector<32x288xbf16>, vector<288x256xbf16>, vector<32x256xf32> -> vector<32x256xf32>
    %c0_259 = arith.constant 0 : index
    %c0_260 = arith.constant 0 : index
    %360 = vector.load %arg21[%c0_259, %c0_260] : memref<32x1xf32, #tpu.memory_space<vmem>>, vector<32x1xf32>
    %361 = vector.broadcast %360 : vector<32x1xf32> to vector<32x256xf32>
    %362 = arith.addf %359, %361 : vector<32x256xf32>
    %363 = arith.mulf %362, %362 : vector<32x256xf32>
    %cst_261 = arith.constant dense<0.000000e+00> : vector<256xf32>
    %364 = vector.multi_reduction <add>, %363, %cst_261 [0] : vector<32x256xf32> to vector<256xf32>
    %365 = vector.shape_cast %364 : vector<256xf32> to vector<1x256xf32>
    %cst_262 = arith.constant 3.200000e+01 : f32
    %366 = vector.broadcast %cst_262 : f32 to vector<1x256xf32>
    %367 = arith.divf %365, %366 : vector<1x256xf32>
    %cst_263 = arith.constant 9.99999993E-9 : f32
    %368 = vector.broadcast %cst_263 : f32 to vector<1x256xf32>
    %369 = arith.addf %367, %368 : vector<1x256xf32>
    %370 = math.rsqrt %369 : vector<1x256xf32>
    %371 = vector.broadcast %370 : vector<1x256xf32> to vector<32x256xf32>
    %372 = arith.mulf %362, %371 : vector<32x256xf32>
    %cst_264 = arith.constant 0.000000e+00 : f32
    %373 = vector.broadcast %cst_264 : f32 to vector<32x256xf32>
    %374 = arith.cmpf oge, %372, %373 : vector<32x256xf32>
    %cst_265 = arith.constant 2.000000e-01 : f32
    %375 = vector.broadcast %cst_265 : f32 to vector<32x256xf32>
    %376 = arith.mulf %375, %372 : vector<32x256xf32>
    %377 = arith.select %374, %372, %376 : vector<32x256xi1>, vector<32x256xf32>
    %c0_266 = arith.constant 0 : index
    %c0_267 = arith.constant 0 : index
    %378 = vector.load %arg22[%c0_266, %c0_267] : memref<3x32xbf16, #tpu.memory_space<vmem>>, vector<3x32xbf16>
    %379 = arith.truncf %377 : vector<32x256xf32> to vector<32x256xbf16>
    %cst_268 = arith.constant dense<0.000000e+00> : vector<3x256xf32>
    %380 = tpu.matmul %378, %379, %cst_268 {dimension_numbers = #tpu.dot_dimension_numbers<[1], [0], [0], [1], [0, 0, 1, 1], [], []>} : vector<3x32xbf16>, vector<32x256xbf16>, vector<3x256xf32> -> vector<3x256xf32>
    %c0_269 = arith.constant 0 : index
    %c0_270 = arith.constant 0 : index
    %381 = vector.load %arg23[%c0_269, %c0_270] : memref<3x1xf32, #tpu.memory_space<vmem>>, vector<3x1xf32>
    %382 = vector.broadcast %381 : vector<3x1xf32> to vector<3x256xf32>
    %383 = arith.addf %380, %382 : vector<3x256xf32>
    %c0_271 = arith.constant 0 : index
    %c0_272 = arith.constant 0 : index
    %384 = vector.load %arg24[%c0_271, %c0_272] : memref<3x32xbf16, #tpu.memory_space<vmem>>, vector<3x32xbf16>
    %385 = arith.truncf %261 : vector<32x256xf32> to vector<32x256xbf16>
    %cst_273 = arith.constant dense<0.000000e+00> : vector<3x256xf32>
    %386 = tpu.matmul %384, %385, %cst_273 {dimension_numbers = #tpu.dot_dimension_numbers<[1], [0], [0], [1], [0, 0, 1, 1], [], []>} : vector<3x32xbf16>, vector<32x256xbf16>, vector<3x256xf32> -> vector<3x256xf32>
    %c0_274 = arith.constant 0 : index
    %c0_275 = arith.constant 0 : index
    %387 = vector.load %arg25[%c0_274, %c0_275] : memref<3x1xf32, #tpu.memory_space<vmem>>, vector<3x1xf32>
    %388 = vector.broadcast %387 : vector<3x1xf32> to vector<3x256xf32>
    %389 = arith.addf %386, %388 : vector<3x256xf32>
    %cst_276 = arith.constant 5.000000e-01 : f32
    %390 = vector.broadcast %cst_276 : f32 to vector<3x256xf32>
    %391 = arith.mulf %390, %389 : vector<3x256xf32>
    %cst_277 = arith.constant 5.000000e-01 : f32
    %392 = vector.broadcast %cst_277 : f32 to vector<3x256xf32>
    %393 = arith.mulf %392, %383 : vector<3x256xf32>
    %394 = arith.addf %391, %393 : vector<3x256xf32>
    %c0_278 = arith.constant 0 : index
    %c0_279 = arith.constant 0 : index
    %c0_280 = arith.constant 0 : index
    %395 = vector.load %arg26[%c0_278, %c0_279, %c0_280] : memref<1x3x256xf32, #tpu.memory_space<vmem>>, vector<1x3x256xf32>
    %396 = vector.shape_cast %395 : vector<1x3x256xf32> to vector<3x256xf32>
    %397 = vector.shape_cast %394 : vector<3x256xf32> to vector<1x3x256xf32>
    tpu.vector_store %arg26[%c0_278, %c0_279, %c0_280], %397 {strides = array<i32>} : memref<1x3x256xf32, #tpu.memory_space<vmem>>, vector<1x3x256xf32>,
    return
  }
  func.func @transform_0(%arg0: i32) -> (i32, i32, i32) {
    %c0_i32 = arith.constant 0 : i32
    %c0_i32_0 = arith.constant 0 : i32
    %c0_i32_1 = arith.constant 0 : i32
    return %arg0, %c0_i32, %c0_i32_0 : i32, i32, i32
  }
  func.func @transform_1(%arg0: i32) -> (i32, i32) {
    %c0_i32 = arith.constant 0 : i32
    %c0_i32_0 = arith.constant 0 : i32
    %c0_i32_1 = arith.constant 0 : i32
    return %c0_i32, %c0_i32_0 : i32, i32
  }
  func.func @transform_2(%arg0: i32) -> (i32, i32) {
    %c0_i32 = arith.constant 0 : i32
    %c0_i32_0 = arith.constant 0 : i32
    %c0_i32_1 = arith.constant 0 : i32
    return %c0_i32, %c0_i32_0 : i32, i32
  }
  func.func @transform_3(%arg0: i32) -> (i32, i32) {
    %c0_i32 = arith.constant 0 : i32
    %c0_i32_0 = arith.constant 0 : i32
    %c0_i32_1 = arith.constant 0 : i32
    return %c0_i32, %c0_i32_0 : i32, i32
  }
  func.func @transform_4(%arg0: i32) -> (i32, i32) {
    %c0_i32 = arith.constant 0 : i32
    %c0_i32_0 = arith.constant 0 : i32
    %c0_i32_1 = arith.constant 0 : i32
    return %c0_i32, %c0_i32_0 : i32, i32
  }
  func.func @transform_5(%arg0: i32) -> (i32, i32) {
    %c0_i32 = arith.constant 0 : i32
    %c0_i32_0 = arith.constant 0 : i32
    %c0_i32_1 = arith.constant 0 : i32
    return %c0_i32, %c0_i32_0 : i32, i32
  }
  func.func @transform_6(%arg0: i32) -> (i32, i32) {
    %c0_i32 = arith.constant 0 : i32
    %c0_i32_0 = arith.constant 0 : i32
    %c0_i32_1 = arith.constant 0 : i32
    return %c0_i32, %c0_i32_0 : i32, i32
  }
  func.func @transform_7(%arg0: i32) -> (i32, i32) {
    %c0_i32 = arith.constant 0 : i32
    %c0_i32_0 = arith.constant 0 : i32
    %c0_i32_1 = arith.constant 0 : i32
    return %c0_i32, %c0_i32_0 : i32, i32
  }
  func.func @transform_8(%arg0: i32) -> (i32, i32, i32) {
    %c0_i32 = arith.constant 0 : i32
    %c0_i32_0 = arith.constant 0 : i32
    %c0_i32_1 = arith.constant 0 : i32
    %c0_i32_2 = arith.constant 0 : i32
    return %c0_i32, %c0_i32_0, %c0_i32_1 : i32, i32, i32
  }
  func.func @transform_9(%arg0: i32) -> (i32, i32) {
    %c0_i32 = arith.constant 0 : i32
    %c0_i32_0 = arith.constant 0 : i32
    %c0_i32_1 = arith.constant 0 : i32
    return %c0_i32, %c0_i32_0 : i32, i32
  }
  func.func @transform_10(%arg0: i32) -> (i32, i32, i32) {
    %c0_i32 = arith.constant 0 : i32
    %c0_i32_0 = arith.constant 0 : i32
    %c0_i32_1 = arith.constant 0 : i32
    %c0_i32_2 = arith.constant 0 : i32
    return %c0_i32, %c0_i32_0, %c0_i32_1 : i32, i32, i32
  }
  func.func @transform_11(%arg0: i32) -> (i32, i32) {
    %c0_i32 = arith.constant 0 : i32
    %c0_i32_0 = arith.constant 0 : i32
    %c0_i32_1 = arith.constant 0 : i32
    return %c0_i32, %c0_i32_0 : i32, i32
  }
  func.func @transform_12(%arg0: i32) -> (i32, i32) {
    %c0_i32 = arith.constant 0 : i32
    %c0_i32_0 = arith.constant 0 : i32
    %c0_i32_1 = arith.constant 0 : i32
    return %c0_i32, %c0_i32_0 : i32, i32
  }
  func.func @transform_13(%arg0: i32) -> (i32, i32) {
    %c0_i32 = arith.constant 0 : i32
    %c0_i32_0 = arith.constant 0 : i32
    %c0_i32_1 = arith.constant 0 : i32
    return %c0_i32, %c0_i32_0 : i32, i32
  }
  func.func @transform_14(%arg0: i32) -> (i32, i32) {
    %c0_i32 = arith.constant 0 : i32
    %c0_i32_0 = arith.constant 0 : i32
    %c0_i32_1 = arith.constant 0 : i32
    return %c0_i32, %c0_i32_0 : i32, i32
  }
  func.func @transform_15(%arg0: i32) -> (i32, i32) {
    %c0_i32 = arith.constant 0 : i32
    %c0_i32_0 = arith.constant 0 : i32
    %c0_i32_1 = arith.constant 0 : i32
    return %c0_i32, %c0_i32_0 : i32, i32
  }
  func.func @transform_16(%arg0: i32) -> (i32, i32, i32) {
    %c0_i32 = arith.constant 0 : i32
    %c0_i32_0 = arith.constant 0 : i32
    %c0_i32_1 = arith.constant 0 : i32
    %c0_i32_2 = arith.constant 0 : i32
    return %c0_i32, %c0_i32_0, %c0_i32_1 : i32, i32, i32
  }
  func.func @transform_17(%arg0: i32) -> (i32, i32) {
    %c0_i32 = arith.constant 0 : i32
    %c0_i32_0 = arith.constant 0 : i32
    %c0_i32_1 = arith.constant 0 : i32
    return %c0_i32, %c0_i32_0 : i32, i32
  }
  func.func @transform_18(%arg0: i32) -> (i32, i32) {
    %c0_i32 = arith.constant 0 : i32
    %c0_i32_0 = arith.constant 0 : i32
    %c0_i32_1 = arith.constant 0 : i32
    return %c0_i32, %c0_i32_0 : i32, i32
  }
  func.func @transform_19(%arg0: i32) -> (i32, i32) {
    %c0_i32 = arith.constant 0 : i32
    %c0_i32_0 = arith.constant 0 : i32
    %c0_i32_1 = arith.constant 0 : i32
    return %c0_i32, %c0_i32_0 : i32, i32
  }
  func.func @transform_20(%arg0: i32) -> (i32, i32) {
    %c0_i32 = arith.constant 0 : i32
    %c0_i32_0 = arith.constant 0 : i32
    %c0_i32_1 = arith.constant 0 : i32
    return %c0_i32, %c0_i32_0 : i32, i32
  }
  func.func @transform_21(%arg0: i32) -> (i32, i32) {
    %c0_i32 = arith.constant 0 : i32
    %c0_i32_0 = arith.constant 0 : i32
    %c0_i32_1 = arith.constant 0 : i32
    return %c0_i32, %c0_i32_0 : i32, i32
  }
  func.func @transform_22(%arg0: i32) -> (i32, i32) {
    %c0_i32 = arith.constant 0 : i32
    %c0_i32_0 = arith.constant 0 : i32
    %c0_i32_1 = arith.constant 0 : i32
    return %c0_i32, %c0_i32_0 : i32, i32
  }
  func.func @transform_23(%arg0: i32) -> (i32, i32) {
    %c0_i32 = arith.constant 0 : i32
    %c0_i32_0 = arith.constant 0 : i32
    %c0_i32_1 = arith.constant 0 : i32
    return %c0_i32, %c0_i32_0 : i32, i32
  }
  func.func @transform_24(%arg0: i32) -> (i32, i32) {
    %c0_i32 = arith.constant 0 : i32
    %c0_i32_0 = arith.constant 0 : i32
    %c0_i32_1 = arith.constant 0 : i32
    return %c0_i32, %c0_i32_0 : i32, i32
  }
  func.func @transform_25(%arg0: i32) -> (i32, i32, i32) {
    %c0_i32 = arith.constant 0 : i32
    %c0_i32_0 = arith.constant 0 : i32
    %c0_i32_1 = arith.constant 0 : i32
    return %arg0, %c0_i32, %c0_i32_0 : i32, i32, i32
  }
}

</mosaic_0001>

<bundles_post_ra>
// kernel: tpu_custom_call.1
= control target key start
LH: loop header
LB: loop body
LE: loop exit
PB: predicated region body
PF: predicated region fallthrough
CT: control target
= control target key end

     0   :  { %6 = vsyncpa [#allocation3], 0  ;;  %s128_s0 = inlined_call_operand.hbm [shape: f32[8,128], index: 0, kind: input, shape index: {}]   ;;  %s129_s1 = inlined_call_operand.hbm [shape: f32[8,128], index: 1, kind: output, shape index: {}]  }
   0x1   :  { %7 = vsyncpa [#allocation4], 0  ;;  %s91_s6 = smov [#allocation2]   ;;  %s43_s10 = scalar_lea.hbm %s128_s0, 128 }
   0x2   :  { %s14_s7 = sshll.u32 %s91_s6, 4  ;;  %p44_p0 = scmp.ne.s32.totalorder %s128_s0, %s43_s10  ;;  %s15_s7 = int_to_ptr.vmem [resolvable:$true] %s14_s7 }
   0x3   :  { %p47_p1 = scmp.lt.u32.totalorder %s43_s10, %s128_s0 }
   0x5   :  { %p49_p2 = pnand %p47_p1, %p44_p0 }
   0x7   :  { %52 = shalt.err (!%p49_p2)
}
   0x8   :  { %s53_s15 = scalar_lea.vmem %s15_s7, 128  ;;  %p58_p4 = scmp.lt.s32.totalorder %s15_s7, %s15_s7 }
   0x9   :  { %p54_p3 = scmp.ne.s32.totalorder %s15_s7, %s53_s15  ;;  %p59_p5 = scmp.lt.s32.totalorder %s53_s15, %s53_s15 }
   0xb   :  { %p60_p6 = por %p59_p5, %p58_p4 }
   0xd   :  { %p61_p7 = pnand %p60_p6, %p54_p3 }
   0xf   :  { %64 = shalt.err (!%p61_p7)
}
  0x10   :  { %17 = dma.hbm_to_vmem [thread:$0]  %s128_s0, 128, %s15_s7, [#allocation3]  }
  0x11   :  { %87 = dma.done.wait [#allocation3], 128  }
  0x12   :  { %88 = vsyncadd [#allocation3], 4294967168  ;;  %v21_v0 = vld [vmem:[#allocation2] sm:$0xff]  ;;  %s92_s18 = smov 3   ;;  %s93_s19 = smov [#allocation5]  }
  0x13   :  { %22 = vrot.lane.b32.xlu0 %v21_v0, %s92_s18  ;;  %s31_s20 = sshll.u32 %s93_s19, 4  ;;  %s32_s20 = int_to_ptr.vmem [resolvable:$true] %s31_s20 }
  0x14   :  { %s65_s21 = scalar_lea.vmem %s32_s20, 128  ;;  %p70_p9 = scmp.lt.s32.totalorder %s32_s20, %s32_s20 }
  0x15   :  { %p66_p8 = scmp.ne.s32.totalorder %s32_s20, %s65_s21  ;;  %p71_p10 = scmp.lt.s32.totalorder %s65_s21, %s65_s21 }
  0x17   :  { %p72_p11 = por %p71_p10, %p70_p9 }
  0x19   :  { %p73_p12 = pnand %p72_p11, %p66_p8 }
  0x85   :  { %v23_v1 = vpop.permute.xlu0 %22 }
  0x86   :  { %24 = vst [vmem:[#allocation5] sm:$0xff] %v23_v1 }
  0x87   :  { %76 = shalt.err (!%p73_p12)
}
  0x88   :  { %s77_s0 = scalar_lea.hbm %s129_s1, 128 }
  0x89   :  { %p78_p13 = scmp.ne.s32.totalorder %s129_s1, %s77_s0  ;;  %p81_p0 = scmp.lt.u32.totalorder %s77_s0, %s129_s1 }
  0x8b   :  { %p83_p1 = pnand %p81_p0, %p78_p13 }
  0x8d   :  { %86 = shalt.err (!%p83_p1)
}
  0x8e   :  { %34 = dma.vmem_to_hbm [thread:$0]  %s32_s20, 128, %s129_s1, [#allocation4]  }
  0x8f   :  { %89 = dma.done.wait [#allocation4], 128  }
  0x90   :  { %90 = vsyncadd [#allocation4], 4294967168 }
  0x91   :  { %38 = vsyncpa [#allocation3], 1 }
  0x92   :  { %39 = vsyncpa [#allocation4], 1 }

// kernel: forward.1
= control target key start
LH: loop header
LB: loop body
LE: loop exit
PB: predicated region body
PF: predicated region fallthrough
CT: control target
= control target key end

     0   :  { %s9617_s29 = smov 0   ;;  %s12277_s0 = inlined_call_operand.vmem [shape: bf16[2,32,1], index: 0, kind: input, shape index: {}]   ;;  %s12278_s1 = inlined_call_operand.vmem [shape: bf16[32,32], index: 1, kind: input, shape index: {}]   ;;  %s12279_s2 = inlined_call_operand.vmem [shape: f32[32,1], index: 2, kind: input, shape index: {}]   ;;  %s12280_s3 = inlined_call_operand.vmem [shape: bf16[32,512], index: 3, kind: input, shape index: {}]   ;;  %s12281_s4 = inlined_call_operand.vmem [shape: f32[32,1], index: 4, kind: input, shape index: {}]   ;;  %s12282_s5 = inlined_call_operand.vmem [shape: bf16[16,16], index: 5, kind: input, shape index: {}]   ;;  %s12283_s6 = inlined_call_operand.vmem [shape: bf16[32,288], index: 6, kind: input, shape index: {}]   ;;  %s12284_s7 = inlined_call_operand.vmem [shape: f32[32,1], index: 7, kind: input, shape index: {}]   ;;  %s12285_s8 = inlined_call_operand.vmem [shape: bf16[9,16,16], index: 8, kind: input, shape index: {}]   ;;  %s12286_s9 = inlined_call_operand.vmem [shape: bf16[16,64], index: 9, kind: input, shape index: {}]   ;;  %s12287_s10 = inlined_call_operand.vmem [shape: bf16[9,64,64], index: 10, kind: input, shape index: {}]   ;;  %s12288_s11 = inlined_call_operand.vmem [shape: bf16[32,288], index: 11, kind: input, shape index: {}]   ;;  %s12289_s12 = inlined_call_operand.vmem [shape: f32[32,1], index: 12, kind: input, shape index: {}]   ;;  %s12290_s13 = inlined_call_operand.vmem [shape: bf16[32,288], index: 13, kind: input, shape index: {}]   ;;  %s12291_s14 = inlined_call_operand.vmem [shape: f32[32,1], index: 14, kind: input, shape index: {}]   ;;  %s12292_s15 = inlined_call_operand.vmem [shape: bf16[64,256], index: 15, kind: input, shape index: {}]   ;;  %s12293_s16 = inlined_call_operand.vmem [shape: bf16[9,256,256], index: 16, kind: input, shape index: {}]   ;;  %s12294_s17 = inlined_call_operand.vmem [shape: bf16[32,288], index: 17, kind: input, shape index: {}]   ;;  %s12295_s18 = inlined_call_operand.vmem [shape: f32[32,1], index: 18, kind: input, shape index: {}]   ;;  %s12296_s19 = inlined_call_operand.vmem [shape: bf16[32,288], index: 19, kind: input, shape index: {}]   ;;  %s12297_s20 = inlined_call_operand.vmem [shape: f32[32,1], index: 20, kind: input, shape index: {}]   ;;  %s12298_s21 = inlined_call_operand.vmem [shape: bf16[3,32], index: 21, kind: input, shape index: {}]   ;;  %s12299_s22 = inlined_call_operand.vmem [shape: f32[3,1], index: 22, kind: input, shape index: {}]   ;;  %s12300_s23 = inlined_call_operand.vmem [shape: bf16[3,32], index: 23, kind: input, shape index: {}]   ;;  %s12301_s24 = inlined_call_operand.vmem [shape: f32[3,1], index: 24, kind: input, shape index: {}]   ;;  %s12302_s25 = inlined_call_operand.vmem [shape: f32[2,3,256], index: 25, kind: output, shape index: {}]  }
   0x1   :  { %12318 = sst [smem:[#allocation2_spill]] %s12277_s0 }
   0x2   :  { %12319 = sst [smem:[#allocation3_spill]] %s12278_s1 }
   0x3   :  { %12320 = sst [smem:[#allocation4_spill]] %s12279_s2 }
   0x4   :  { %12321 = sst [smem:[#allocation5_spill]] %s12280_s3 }
   0x5   :  { %12322 = sst [smem:[#allocation6_spill]] %s12281_s4 }
   0x6   :  { %12323 = sst [smem:[#allocation7_spill]] %s12282_s5 }
   0x7   :  { %12324 = sst [smem:[#allocation8_spill]] %s12283_s6 }
   0x8   :  { %12325 = sst [smem:[#allocation9_spill]] %s12284_s7 }
   0x9   :  { %12326 = sst [smem:[#allocation10_spill]] %s12285_s8 }
   0xa   :  { %12327 = sst [smem:[#allocation11_spill]] %s12286_s9 }
   0xb LB: > { %s7180_s2 = sadd.s32 4294967295, %s9484_s29   ;;  %p7184_p0 = scmp.ge.s32.totalorder %s9484_s29, 1  ;;  %s9484_s29 = sphi %s9617_s29, %s35_s29  }
   0xc   : > { %p687_p1 = scmp.lt.s32.totalorder %s9484_s29, 3 }
   0xe   : > { %p688_p2 = pnand %p7184_p0, %p687_p1 }
   0xf   : > { %p755_p3 = scmp.lt.s32.totalorder (!%p688_p2), %s7180_s2, 1  ;;  %s12328_s7 = sld [smem:[#allocation3_spill]] (!%p688_p2)  ;;  %vm800_vm0 = vcmask (!%p688_p2), 261120   ;;  %v12315_v4 = vmov (!%p688_p2), 0   ;;  %v2790_v22 = vld [vmem:[%s12289_s12] sm:$0xff] (!%p688_p2)  ;;  %v2792_v23 = vld [vmem:[%s12289_s12 + $0x10] sm:$0xff] (!%p688_p2)  ;;  %v872_v47 = vlaneseq (!%p688_p2) }
  0x10   : > { %691 = sbr.rel (%p688_p2) target bundleno = 4474 (0x117a), region = 120  ;;  %s12329_s8 = sld [smem:[#allocation2_spill]] (!%p688_p2)  ;;  %8628 = vset.pattern.permute.xlu0 (!%p688_p2), %v12315_v4  ;;  %8629 = vset.pattern.permute.xlu1 (!%p688_p2), %v12315_v4  ;;  %v3459_v24 = vld [vmem:[%s12291_s14] sm:$0xff] (!%p688_p2)  ;;  %v3461_v25 = vld [vmem:[%s12291_s14 + $0x10] sm:$0xff] (!%p688_p2)  ;;  %v2791_v38 = vld [vmem:[%s12289_s12 + $0x8] sm:$0xff] (!%p688_p2)  ;;  %vm1212_vm3 = vcmask (!%p688_p2), 130048  }
  0x11   : > { %s12330_s0 = sld [smem:[#allocation4_spill]] (!%p688_p2)  ;;  %s12331_s28 = sld [smem:[#allocation6_spill]] (!%p688_p2)  ;;  %v6023_v28 = vld [vmem:[%s12295_s18] sm:$0xff] (!%p688_p2)  ;;  %v6025_v29 = vld [vmem:[%s12295_s18 + $0x10] sm:$0xff] (!%p688_p2)  ;;  %v2793_v39 = vld [vmem:[%s12289_s12 + $0x18] sm:$0xff] (!%p688_p2)  ;;  %v873_v48 = vshrl.u32 (!%p688_p2), %v872_v47, 7 }
  0x12   : > { %s12332_s6 = sld [smem:[#allocation9_spill]] (!%p688_p2)  ;;  %v6778_v30 = vld [vmem:[%s12297_s20] sm:$0xff] (!%p688_p2)  ;;  %v6780_v31 = vld [vmem:[%s12297_s20 + $0x10] sm:$0xff] (!%p688_p2)  ;;  %v3460_v40 = vld [vmem:[%s12291_s14 + $0x8] sm:$0xff] (!%p688_p2)  ;;  %s12336_s5 = sld [smem:[#allocation8_spill]] (!%p688_p2)  ;;  %vm2052_vm10 = vcmask (!%p688_p2), 523264  }
  0x13   : > { %v7013_v32 = vld [vmem:[%s12299_s22] sm:$0x7] (!%p688_p2)  ;;  %v3462_v41 = vld [vmem:[%s12291_s14 + $0x18] sm:$0xff] (!%p688_p2)  ;;  %v6024_v42 = vld [vmem:[%s12295_s18 + $0x8] sm:$0xff] (!%p688_p2)  ;;  %v912_v52 = vsub.s32 (!%p688_p2), 2, %v873_v48  ;;  %v874_v57 = vsub.s32 (!%p688_p2), 0, %v873_v48 }
  0x14   : > { %v6026_v43 = vld [vmem:[%s12295_s18 + $0x18] sm:$0xff] (!%p688_p2)  ;;  %v6779_v44 = vld [vmem:[%s12297_s20 + $0x8] sm:$0xff] (!%p688_p2)  ;;  %v7064_v46 = vld [vmem:[%s12301_s24] sm:$0x7] (!%p688_p2) }
  0x15   : > { %v8632_v0 = vld [vmem:[%s12328_s7] sm:$0xff] (!%p688_p2)   ;;  %v8633_v3 = vld [vmem:[%s12328_s7 + $0x8] sm:$0xff] (!%p688_p2)   ;;  %s12333_s7 = sld [smem:[#allocation5_spill]] (!%p688_p2)  ;;  %v6781_v45 = vld [vmem:[%s12297_s20 + $0x18] sm:$0xff] (!%p688_p2) }
  0x16   : > { %8283 = vmatprep.mubr.msk.bf16.mxu0 (!%p688_p2), %vm800_vm0, %v8632_v0 }
  0x17   : > { %s12340_s2 = smov (!%p755_p3, %s7180_s2), 1  ;;  %v776_v5 = vld [vmem:[%s12330_s0 + $0x10] sm:$0xff]  ;;  %v777_v7 = vld [vmem:[%s12330_s0 + $0x18] sm:$0xff]  ;;  %v774_v9 = vld [vmem:[%s12330_s0] sm:$0xff] }
  0x18   : > { %s7983_s3 = sshll.u32 %s12340_s2, 4  ;;  %v775_v10 = vld [vmem:[%s12330_s0 + $0x8] sm:$0xff]  ;;  %v1030_v19 = vld [vmem:[%s12331_s28 + $0x10] sm:$0xff]  ;;  %v1758_v20 = vld [vmem:[%s12332_s6] sm:$0xff]  ;;  %s12334_s0 = sld [smem:[#allocation7_spill]] }
  0x19   : > { %s759_s27 = scalar_lea.vmem %s12329_s8, %s7983_s3  ;;  %v1760_v21 = vld [vmem:[%s12332_s6 + $0x10] sm:$0xff]  ;;  %v1028_v33 = vld [vmem:[%s12331_s28] sm:$0xff]  ;;  %v1029_v34 = vld [vmem:[%s12331_s28 + $0x8] sm:$0xff]  ;;  %s7984_s9 = sshll.u32 %s12340_s2, 3 }
  0x1a   : > { %v8630_v1 = vld [vmem:[%s759_s27] sm:$0xff]   ;;  %v8631_v2 = vld [vmem:[%s759_s27 + $0x8] sm:$0xff]   ;;  %1034 = vperm.xlu1 %8629, %v1028_v33   ;;  %v1031_v35 = vld [vmem:[%s12331_s28 + $0x18] sm:$0xff]  ;;  %s12335_s27 = sld [smem:[#allocation10_spill]]  ;;  %s764_s26 = scalar_lea.vmem %s12302_s25, %s7984_s9 }
  0x1b   : > { %8279 = vmatprep.subr.bf16.mxu0 %v8630_v1  ;;  %v8636_v26 = vld [vmem:[%s12333_s7 + $0x4] ss:$16 sps:$4 sm:$0xff]   ;;  %v8639_v27 = vld [vmem:[%s12333_s7 + $0xc] ss:$16 sps:$4 sm:$0xff]  }
  0x1c   : > { %8280 = vmatpush3.bf16.msra.mxu0 %v8630_v1  ;;  %1124 = vmatprep.mubr.bf16.mxu1 %v8636_v26  ;;  %v1759_v36 = vld [vmem:[%s12332_s6 + $0x8] sm:$0xff]  ;;  %v1761_v37 = vld [vmem:[%s12332_s6 + $0x18] sm:$0xff]  ;;  %s12337_s6 = sld [smem:[#allocation11_spill]] }
  0x1d   : > { %8281 = vmatprep.subr.bf16.mxu0 %v8631_v2 }
  0x1e   : > { %1039 = vperm.xlu1 %8629, %v1029_v34   ;;  %v906_v49 = vld [vmem:[%s12334_s0] sm:$0x4]  ;;  %v982_v50 = vld [vmem:[%s12334_s0 + $0x4] sm:$0x4]  ;;  %v858_v53 = vld [vmem:[%s12334_s0] sm:$0x1] }
  0x1f   : > { %v908_v51 = vpack.i.b16 %v906_v49, %v906_v49  ;;  %v944_v54 = vld [vmem:[%s12334_s0 + $0x4] sm:$0x1]  ;;  %v984_v55 = vpack.i.b16 %v982_v50, %v982_v50  ;;  %v870_v56 = vpack.i.b16 %v858_v53, %v858_v53  ;;  %v916_v59 = vshrl.u32 %v906_v49, 16  ;;  %v963_v33 = vld [vmem:[%s12334_s0 + $0x4] sm:$0x2] }
  0x20   : > { %8282 = vmatpush3.bf16.msra.mxu0 %v8631_v2  ;;  %v946_v58 = vpack.i.b16 %v944_v54, %v944_v54  ;;  %v992_v60 = vshrl.u32 %v982_v50, 16  ;;  %v878_v1 = vshrl.u32 %v858_v53, 16  ;;  %v954_v2 = vshrl.u32 %v944_v54, 16 }
  0x21   : > { %v913_v61 = vrot.slane %v908_v51, %v912_v52  ;;  %v989_v62 = vrot.slane %v984_v55, %v912_v52  ;;  %v875_v63 = vrot.slane %v870_v56, %v874_v57  ;;  %v973_v47 = vshrl.u32 %v963_v33, 16 }
  0x22   : > { %1049 = vperm.xlu1 %8629, %v1031_v35   ;;  %v951_v0 = vrot.slane %v946_v58, %v874_v57 }
  0x23   : > { %8284 = vmatmul.mubr.msk.bf16.vlgmr.msra.gmra.mrb[0].mxu0 %vm800_vm0, %v8633_v3  ;;  %v917_v3 = vpack.i.b16 %v916_v59, %v916_v59  ;;  %v974_v55 = vpack.i.b16 %v973_v47, %v973_v47 }
  0x24   : > { %1173 = vmatprep.mubr.bf16.mxu0 %v8639_v27 }
  0x26   : > { %1769 = vperm.xlu1 %8629, %v1759_v36  }
  0x2a   : > { %1779 = vperm.xlu1 %8629, %v1761_v37   ;;  %v965_v37 = vpack.i.b16 %v963_v33, %v963_v33 }
  0x2e   : > { %2801 = vperm.xlu1 %8629, %v2791_v38  }
  0x32   : > { %2811 = vperm.xlu1 %8629, %v2793_v39  }
  0x36   : > { %3470 = vperm.xlu1 %8629, %v3460_v40  }
  0x3a   : > { %3480 = vperm.xlu1 %8629, %v3462_v41  }
  0x3e   : > { %6034 = vperm.xlu1 %8629, %v6024_v42  }
  0x42   : > { %6044 = vperm.xlu1 %8629, %v6026_v43  }
  0x46   : > { %6789 = vperm.xlu1 %8629, %v6779_v44  }
  0x4a   : > { %6799 = vperm.xlu1 %8629, %v6781_v45  }
  0x4e   : > { %7067 = vperm.xlu1 %8629, %v7064_v46  }
  0xf6   : > { %v8285_v6 = vpop.f32.mrb[0].mxu0 }
  0xf7   : > { %v841_v8 = vpop.f32.mrb[1].mxu0  ;;  %v850_v12 = vadd.f32 %v8285_v6, %v776_v5  ;;  %v993_v5 = vpack.i.b16 %v992_v60, %v992_v60 }
  0xf8   : > { %v8286_v11 = vpop.f32.mrb[2].mxu0  ;;  %v842_v15 = vadd.f32 %v841_v8, %v774_v9 }
  0xf9   : > { %v853_v13 = vadd.f32 %v8286_v11, %v777_v7  ;;  %v844_v14 = vpop.f32.mrb[3].mxu0  ;;  %v879_v11 = vpack.i.b16 %v878_v1, %v878_v1 }
  0xfa   : > { %v845_v16 = vadd.f32 %v844_v14, %v775_v10  ;;  %v998_v14 = vrot.slane %v993_v5, %v912_v52 }
  0xfb   : > { %v857_v17 = vpack.c.bf16 %v853_v13, %v850_v12  ;;  %v955_v12 = vpack.i.b16 %v954_v2, %v954_v2  ;;  %v922_v13 = vrot.slane %v917_v3, %v912_v52 }
  0xfc   : > { %v856_v18 = vpack.c.bf16 %v845_v16, %v842_v15  ;;  %v925_v15 = vld [vmem:[%s12334_s0] sm:$0x8] }
  0xfd   : > { %v935_v40 = vshrl.u32 %v925_v15, 16 }
  0xfe   : > { %861 = vperm.xlu0 %8628, %v856_v18   ;;  %v931_v18 = vsub.s32 3, %v873_v48 }
  0xff   : > { %v936_v50 = vpack.i.b16 %v935_v40, %v935_v40 }
 0x101   : > { %v941_v58 = vrot.slane %v936_v50, %v931_v18 }
 0x102   : > { %866 = vperm.xlu0 %8628, %v857_v17   ;;  %v927_v17 = vpack.i.b16 %v925_v15, %v925_v15  ;;  %v8646_v15 = vld [vmem:[%s12335_s27] sm:$0xff]  }
 0x106   : > { %1044 = vperm.xlu0 %8628, %v1030_v19  }
 0x10a   : > { %1764 = vperm.xlu0 %8628, %v1758_v20  }
 0x10e   : > { %1774 = vperm.xlu0 %8628, %v1760_v21  }
 0x112   : > { %2796 = vperm.xlu0 %8628, %v2790_v22  }
 0x116   : > { %2806 = vperm.xlu0 %8628, %v2792_v23   ;;  %v1001_v23 = vld [vmem:[%s12334_s0 + $0x4] sm:$0x8] }
 0x117   : > { %v1003_v26 = vpack.i.b16 %v1001_v23, %v1001_v23  ;;  %v1011_v41 = vshrl.u32 %v1001_v23, 16 }
 0x119   : > { %v1008_v36 = vrot.slane %v1003_v26, %v931_v18  ;;  %v1012_v51 = vpack.i.b16 %v1011_v41, %v1011_v41 }
 0x11a   : > { %3465 = vperm.xlu0 %8628, %v3459_v24   ;;  %v884_v24 = vrot.slane %v879_v11, %v874_v57  ;;  %v8640_v11 = vld [vmem:[%s12333_s7 + $0x24] ss:$16 sps:$4 sm:$0xff]  }
 0x11b   : > { %v1017_v59 = vrot.slane %v1012_v51, %v931_v18 }
 0x11e   : > { %3475 = vperm.xlu0 %8628, %v3461_v25   ;;  %v960_v25 = vrot.slane %v955_v12, %v874_v57  ;;  %v8642_v12 = vld [vmem:[%s12333_s7 + $0x2c] ss:$16 sps:$4 sm:$0xff]  }
 0x122   : > { %6029 = vperm.xlu0 %8628, %v6023_v28  }
 0x126   : > { %6039 = vperm.xlu0 %8628, %v6025_v29   ;;  %v887_v29 = vld [vmem:[%s12334_s0] sm:$0x2] }
 0x127   : > { %v897_v43 = vshrl.u32 %v887_v29, 16 }
 0x129   : > { %v898_v54 = vpack.i.b16 %v897_v43, %v897_v43 }
 0x12a   : > { %6784 = vperm.xlu0 %8628, %v6778_v30   ;;  %v932_v30 = vrot.slane %v927_v17, %v931_v18  ;;  %v9824_v17 = vld [vmem:[%s12335_s27 + $0x8] sm:$0xff]   ;;  %v8649_v18 = vld [vmem:[%s12335_s27 + $0x20] sm:$0xff]  }
 0x12e   : > { %6794 = vperm.xlu0 %8628, %v6780_v31   ;;  %v889_v31 = vpack.i.b16 %v887_v29, %v887_v29 }
 0x132   : > { %7016 = vperm.xlu0 %8628, %v7013_v32   ;;  %v893_v32 = vsub.s32 1, %v873_v48 }
 0x134   : > { %v894_v42 = vrot.slane %v889_v31, %v893_v32  ;;  %v970_v46 = vrot.slane %v965_v37, %v893_v32 }
 0x17d   : > { %v9749_v6 = vpop.permute.xlu0 %861 }
 0x17e   : > { %v914_v7 = vmul.bf16 %v913_v61, %v9749_v6  ;;  %v990_v8 = vmul.bf16 %v989_v62, %v9749_v6  ;;  %v876_v9 = vmul.bf16 %v875_v63, %v9749_v6  ;;  %v952_v10 = vmul.bf16 %v951_v0, %v9749_v6 }
 0x17f   : > { %v923_v27 = vmul.bf16 %v922_v13, %v9749_v6  ;;  %v999_v28 = vmul.bf16 %v998_v14, %v9749_v6  ;;  %v885_v34 = vmul.bf16 %v884_v24, %v9749_v6  ;;  %v961_v35 = vmul.bf16 %v960_v25, %v9749_v6 }
 0x180   : > { %7989 = vmatprep.subr.bf16.mxu1 %v914_v7  ;;  %8017 = vmatprep.subr.bf16.mxu0 %v990_v8  ;;  %v933_v48 = vmul.bf16 %v932_v30, %v9749_v6  ;;  %v1009_v49 = vmul.bf16 %v1008_v36, %v9749_v6  ;;  %v895_v52 = vmul.bf16 %v894_v42, %v9749_v6 }
 0x181   : > { %7990 = vmatpush3.bf16.msra.mxu1 %v876_v9  ;;  %8018 = vmatpush3.bf16.msra.mxu0 %v952_v10  ;;  %v9758_v16 = vpop.permute.xlu0 %866  ;;  %v971_v53 = vmul.bf16 %v970_v46, %v9749_v6  ;;  %v1018_v1 = vmul.bf16 %v1017_v59, %v9749_v6  ;;  %v8634_v10 = vld [vmem:[%s12333_s7] ss:$16 sps:$4 sm:$0xff]  }
 0x182   : > { %v915_v19 = vmul.bf16 %v913_v61, %v9758_v16  ;;  %v991_v20 = vmul.bf16 %v989_v62, %v9758_v16  ;;  %v877_v21 = vmul.bf16 %v875_v63, %v9758_v16  ;;  %v953_v22 = vmul.bf16 %v951_v0, %v9758_v16 }
 0x183   : > { %v924_v38 = vmul.bf16 %v922_v13, %v9758_v16  ;;  %v1000_v39 = vmul.bf16 %v998_v14, %v9758_v16  ;;  %v886_v44 = vmul.bf16 %v884_v24, %v9758_v16  ;;  %v962_v45 = vmul.bf16 %v960_v25, %v9758_v16  ;;  %v8644_v13 = vld [vmem:[%s12333_s7 + $0x20] ss:$16 sps:$4 sm:$0xff]   ;;  %v8645_v14 = vld [vmem:[%s12333_s7 + $0x28] ss:$16 sps:$4 sm:$0xff]  }
 0x184   : > { %7991 = vmatprep.subr.bf16.mxu1 %v915_v19  ;;  %8019 = vmatprep.subr.bf16.mxu0 %v991_v20  ;;  %v934_v56 = vmul.bf16 %v932_v30, %v9758_v16  ;;  %v1010_v57 = vmul.bf16 %v1008_v36, %v9758_v16  ;;  %v896_v60 = vmul.bf16 %v894_v42, %v9758_v16  ;;  %v1035_v19 = vpop.permute.xlu1 %1034 }
 0x185   : > { %7992 = vmatpush3.bf16.msra.mxu1 %v877_v21  ;;  %8020 = vmatpush3.bf16.msra.mxu0 %v953_v22  ;;  %v972_v61 = vmul.bf16 %v970_v46, %v9758_v16  ;;  %v903_v62 = vrot.slane %v898_v54, %v893_v32  ;;  %v979_v63 = vrot.slane %v974_v55, %v893_v32  ;;  %v1045_v36 = vpop.permute.xlu0 %1044 }
 0x186   : > { %7993 = vmatprep.subr.bf16.mxu1 %v923_v27  ;;  %8021 = vmatprep.subr.bf16.mxu0 %v999_v28  ;;  %v942_v0 = vmul.bf16 %v941_v58, %v9749_v6  ;;  %v943_v5 = vmul.bf16 %v941_v58, %v9758_v16  ;;  %v1019_v7 = vmul.bf16 %v1017_v59, %v9758_v16 }
 0x187   : > { %v904_v2 = vmul.bf16 %v903_v62, %v9749_v6  ;;  %v980_v3 = vmul.bf16 %v979_v63, %v9749_v6  ;;  %v905_v8 = vmul.bf16 %v903_v62, %v9758_v16  ;;  %v981_v9 = vmul.bf16 %v979_v63, %v9758_v16  ;;  %v8637_v6 = vld [vmem:[%s12333_s7 + $0x8] ss:$16 sps:$4 sm:$0xff]   ;;  %v8647_v16 = vld [vmem:[%s12335_s27 + $0x10] sm:$0xff]  }
 0x188   : > { %v1040_v33 = vpop.permute.xlu1 %1039 }
 0x189   : > { %7994 = vmatpush3.bf16.msra.mxu1 %v885_v34  ;;  %8022 = vmatpush3.bf16.msra.mxu0 %v961_v35 }
 0x18a   : > { %7995 = vmatprep.subr.bf16.mxu1 %v924_v38  ;;  %8023 = vmatprep.subr.bf16.mxu0 %v1000_v39 }
 0x18c   : > { %v1050_v55 = vpop.permute.xlu1 %1049 }
 0x18d   : > { %7996 = vmatpush3.bf16.msra.mxu1 %v886_v44  ;;  %8024 = vmatpush3.bf16.msra.mxu0 %v962_v45 }
 0x18e   : > { %7997 = vmatprep.subr.bf16.mxu1 %v933_v48  ;;  %8025 = vmatprep.subr.bf16.mxu0 %v1009_v49 }
 0x191   : > { %7998 = vmatpush3.bf16.msra.mxu1 %v895_v52  ;;  %8026 = vmatpush3.bf16.msra.mxu0 %v971_v53 }
 0x192   : > { %7999 = vmatprep.subr.bf16.mxu1 %v934_v56  ;;  %8027 = vmatprep.subr.bf16.mxu0 %v1010_v57 }
 0x195   : > { %8000 = vmatpush3.bf16.msra.mxu1 %v896_v60  ;;  %8028 = vmatpush3.bf16.msra.mxu0 %v972_v61 }
 0x196   : > { %8001 = vmatprep.subr.bf16.mxu1 %v942_v0  ;;  %8029 = vmatprep.subr.bf16.mxu0 %v1018_v1  ;;  %v8650_v1 = vld [vmem:[%s12335_s27 + $0x18] sm:$0xff]  }
 0x199   : > { %8002 = vmatpush3.bf16.msra.mxu1 %v904_v2  ;;  %8030 = vmatpush3.bf16.msra.mxu0 %v980_v3  ;;  %v8651_v2 = vld [vmem:[%s12335_s27 + $0x30] sm:$0xff]   ;;  %v8652_v3 = vld [vmem:[%s12335_s27 + $0x28] sm:$0xff]  }
 0x19a   : > { %8003 = vmatprep.subr.bf16.mxu1 %v943_v5  ;;  %8031 = vmatprep.subr.bf16.mxu0 %v1019_v7  ;;  %v8653_v5 = vld [vmem:[%s12335_s27 + $0x40] sm:$0xff]   ;;  %v8654_v7 = vld [vmem:[%s12335_s27 + $0x38] sm:$0xff]  }
 0x19d   : > { %8004 = vmatpush3.bf16.msra.mxu1 %v905_v8  ;;  %8032 = vmatpush3.bf16.msra.mxu0 %v981_v9  ;;  %v8657_v8 = vld [vmem:[%s12336_s5 + $0x4] ss:$12 sps:$4 sm:$0xff]   ;;  %v8658_v9 = vld [vmem:[%s12336_s5 + $0x8] ss:$12 sps:$4 sm:$0xff]  }
 0x19e   : > { %8287 = vmatprep.subr.bf16.mxu0 %v8646_v15  ;;  %8299 = vmatprep.subr.bf16.mxu1 %v8647_v16 }
 0x1a0   : > { %1125 = vmatmul.mubr.bf16.vlgmr.msra.gmra.mrb[0].mxu1 %v8634_v10  ;;  %1174 = vmatmul.mubr.bf16.vlgmr.msra.gmra.mrb[4].mxu0 %v8637_v6 }
 0x1a1   : > { %1132 = vmatprep.mubr.bf16.mxu1 %v8640_v11  ;;  %1181 = vmatprep.mubr.bf16.mxu0 %v8642_v12 }
 0x1a2   : > { %8288 = vmatpush3.bf16.msra.mxu0 %v8646_v15  ;;  %8300 = vmatpush3.bf16.msra.mxu1 %v8647_v16 }
 0x1a3   : > { %8293 = vmatprep.subr.bf16.mxu0 %v9824_v17  ;;  %8311 = vmatprep.subr.bf16.mxu1 %v8649_v18 }
 0x1a8   : > { %1133 = vmatmul.mubr.bf16.gmra.mrb[4].mxu1 %v8644_v13  ;;  %1182 = vmatmul.mubr.bf16.gmra.mrb[8].mxu0 %v8645_v14 }
 0x273   : > { %v8005_v20 = vpop.f32.mrb[0].mxu1  ;;  %v8033_v21 = vpop.f32.mrb[4].mxu0 }
 0x274   : > { %v8006_v22 = vpop.f32.mrb[1].mxu1  ;;  %v8034_v23 = vpop.f32.mrb[5].mxu0 }
 0x275   : > { %v8007_v24 = vadd.f32 %v8006_v22, %v8005_v20  ;;  %v8035_v25 = vadd.f32 %v8034_v23, %v8033_v21  ;;  %v8008_v26 = vpop.f32.mrb[2].mxu1  ;;  %v8036_v27 = vpop.f32.mrb[6].mxu0 }
 0x276   : > { %v8009_v28 = vpop.f32.mrb[3].mxu1  ;;  %v8037_v29 = vpop.f32.mrb[7].mxu0 }
 0x277   : > { %v1127_v30 = vadd.f32 %v8007_v24, %v1035_v19  ;;  %v8010_v31 = vadd.f32 %v8009_v28, %v8008_v26  ;;  %v8038_v32 = vadd.f32 %v8037_v29, %v8036_v27 }
 0x279   : > { %v1176_v34 = vadd.f32 %v8035_v25, %v1127_v30  ;;  %v1130_v35 = vadd.f32 %v8010_v31, %v1040_v33 }
 0x27b   : > { %vm1190_vm1 = vcmp.ge.f32.partialorder %v1176_v34, 0.0  ;;  %v1194_v37 = vmul.f32 0.2, %v1176_v34  ;;  %v1179_v38 = vadd.f32 %v8038_v32, %v1130_v35  ;;  %v8011_v39 = vpop.f32.mrb[4].mxu1  ;;  %v8039_v40 = vpop.f32.mrb[8].mxu0 }
 0x27c   : > { %v8012_v41 = vpop.f32.mrb[5].mxu1  ;;  %v8040_v42 = vpop.f32.mrb[9].mxu0 }
 0x27d   : > { %vm1191_vm2 = vcmp.ge.f32.partialorder %v1179_v38, 0.0  ;;  %v1195_v43 = vmul.f32 0.2, %v1179_v38  ;;  %v8013_v44 = vadd.f32 %v8012_v41, %v8011_v39  ;;  %v8014_v45 = vpop.f32.mrb[6].mxu1  ;;  %v8042_v46 = vpop.f32.mrb[10].mxu0  ;;  %v1198_v47 = vsel %vm1190_vm1, %v1176_v34, %v1194_v37 }
 0x27e   : > { %v8041_v48 = vadd.f32 %v8040_v42, %v8039_v40  ;;  %v8015_v49 = vpop.f32.mrb[7].mxu1  ;;  %v8043_v50 = vpop.f32.mrb[11].mxu0 }
 0x27f   : > { %v1199_v51 = vsel %vm1191_vm2, %v1179_v38, %v1195_v43  ;;  %v1135_v52 = vadd.f32 %v8013_v44, %v1045_v36  ;;  %v8016_v53 = vadd.f32 %v8015_v49, %v8014_v45  ;;  %v8044_v54 = vadd.f32 %v8043_v50, %v8042_v46 }
 0x280   : > { %v1202_v56 = vpack.c.bf16 %v1199_v51, %v1198_v47 }
 0x281   : > { %v1184_v57 = vadd.f32 %v8041_v48, %v1135_v52  ;;  %v1138_v58 = vadd.f32 %v8016_v53, %v1050_v55 }
 0x282   : > { %8289 = vmatprep.mubr.msk.bf16.mxu0 %vm1212_vm3, %v1202_v56  ;;  %8301 = vmatprep.mubr.msk.bf16.mxu1 %vm1212_vm3, %v1202_v56 }
 0x283   : > { %v1196_v59 = vmul.f32 0.2, %v1184_v57  ;;  %v1187_v60 = vadd.f32 %v8044_v54, %v1138_v58  ;;  %vm1192_vm4 = vcmp.ge.f32.partialorder %v1184_v57, 0.0 }
 0x285   : > { %vm1193_vm5 = vcmp.ge.f32.partialorder %v1187_v60, 0.0  ;;  %v1197_v61 = vmul.f32 0.2, %v1187_v60  ;;  %v1200_v62 = vsel %vm1192_vm4, %v1184_v57, %v1196_v59 }
 0x287   : > { %v1201_v63 = vsel %vm1193_vm5, %v1187_v60, %v1197_v61  ;;  %v8659_v60 = vld [vmem:[%s12336_s5 + $0x20] ss:$12 sps:$4 sm:$0xff]  }
 0x288   : > { %v1203_v0 = vpack.c.bf16 %v1201_v63, %v1200_v62 }
 0x28a   : > { %8290 = vmatmul.mubr.msk.bf16.vlgmr.msra.gmra.mrb[12].mxu0 %vm1212_vm3, %v1203_v0  ;;  %8302 = vmatmul.mubr.msk.bf16.vlgmr.msra.gmra.mrb[8].mxu1 %vm1212_vm3, %v1203_v0 }
 0x28b   : > { %8295 = vmatprep.mubr.msk.bf16.mxu0 %vm1212_vm3, %v1202_v56  ;;  %8313 = vmatprep.mubr.msk.bf16.mxu1 %vm1212_vm3, %v1202_v56 }
 0x28c   : > { %8294 = vmatpush3.bf16.msra.mxu0 %v9824_v17  ;;  %8312 = vmatpush3.bf16.msra.mxu1 %v8649_v18 }
 0x28d   : > { %8305 = vmatprep.subr.bf16.mxu0 %v8650_v1  ;;  %8323 = vmatprep.subr.bf16.mxu1 %v8651_v2 }
 0x292   : > { %8296 = vmatmul.mubr.msk.bf16.vlgmr.msra.gmra.mrb[16].mxu0 %vm1212_vm3, %v1203_v0  ;;  %8314 = vmatmul.mubr.msk.bf16.vlgmr.msra.gmra.mrb[12].mxu1 %vm1212_vm3, %v1203_v0 }
 0x293   : > { %8307 = vmatprep.mubr.msk.bf16.mxu0 %vm1212_vm3, %v1202_v56  ;;  %8325 = vmatprep.mubr.msk.bf16.mxu1 %vm1212_vm3, %v1202_v56 }
 0x294   : > { %8306 = vmatpush3.bf16.msra.mxu0 %v8650_v1  ;;  %8324 = vmatpush3.bf16.msra.mxu1 %v8651_v2  ;;  %v8660_v1 = vld [vmem:[%s12336_s5 + $0x1c] ss:$12 sps:$4 sm:$0xff]   ;;  %v8662_v2 = vld [vmem:[%s12336_s5 + $0x18] ss:$12 sps:$4 sm:$0xff]  }
 0x295   : > { %8317 = vmatprep.subr.bf16.mxu0 %v8652_v3  ;;  %8335 = vmatprep.subr.bf16.mxu1 %v8653_v5 }
 0x29a   : > { %8308 = vmatmul.mubr.msk.bf16.vlgmr.msra.gmra.mrb[20].mxu0 %vm1212_vm3, %v1203_v0  ;;  %8326 = vmatmul.mubr.msk.bf16.vlgmr.msra.gmra.mrb[16].mxu1 %vm1212_vm3, %v1203_v0 }
 0x29b   : > { %8319 = vmatprep.mubr.msk.bf16.mxu0 %vm1212_vm3, %v1202_v56  ;;  %8337 = vmatprep.mubr.msk.bf16.mxu1 %vm1212_vm3, %v1202_v56 }
 0x29c   : > { %8318 = vmatpush3.bf16.msra.mxu0 %v8652_v3  ;;  %8336 = vmatpush3.bf16.msra.mxu1 %v8653_v5  ;;  %v8663_v3 = vld [vmem:[%s12337_s6] sm:$0xff]  }
 0x29d   : > { %8329 = vmatprep.subr.bf16.mxu0 %v8654_v7  ;;  %v9902_v5 = vld [vmem:[%s12287_s10] sm:$0xff]  }
 0x2a2   : > { %8320 = vmatmul.mubr.msk.bf16.vlgmr.msra.gmra.mrb[24].mxu0 %vm1212_vm3, %v1203_v0  ;;  %8338 = vmatmul.mubr.msk.bf16.vlgmr.msra.gmra.mrb[20].mxu1 %vm1212_vm3, %v1203_v0 }
 0x2a3   : > { %8331 = vmatprep.mubr.msk.bf16.mxu0 %vm1212_vm3, %v1202_v56  ;;  %8330 = vmatpush3.bf16.msra.mxu0 %v8654_v7  ;;  %v9907_v7 = vld [vmem:[%s12287_s10 + $0x20] sm:$0xff]  }
 0x2a4   : > { %8345 = vmatprep.mubr.msk.bf16.mxu1 %vm800_vm0, %v8658_v9  ;;  %v9921_v9 = vld [vmem:[%s12287_s10 + $0x30] sm:$0xff]  }
 0x2aa   : > { %8332 = vmatmul.mubr.msk.bf16.vlgmr.msra.gmra.mrb[28].mxu0 %vm1212_vm3, %v1203_v0  ;;  %v8655_v0 = vld [vmem:[%s12336_s5] ss:$12 sps:$4 sm:$0xff]  }
 0x2ab   : > { %1850 = vmatprep.mubr.bf16.mxu0 %v8657_v8  ;;  %v9914_v8 = vld [vmem:[%s12287_s10 + $0x28] sm:$0xff]  }
 0x35d   : > { %v8291_v10 = vpop.f32.mrb[12].mxu0  ;;  %v9871_v6 = vpop.f32.mrb[8].mxu1 }
 0x35e   : > { %v1253_v11 = vpop.f32.mrb[13].mxu0  ;;  %v9873_v12 = vpop.f32.mrb[9].mxu1 }
 0x35f   : > { %v8292_v13 = vpop.f32.mrb[14].mxu0  ;;  %v9875_v14 = vpop.f32.mrb[10].mxu1 }
 0x360   : > { %v1269_v15 = vpack.c.bf16 %v8292_v13, %v8291_v10  ;;  %v1389_v16 = vpack.c.bf16 %v9875_v14, %v9871_v6  ;;  %v1256_v17 = vpop.f32.mrb[15].mxu0  ;;  %v1376_v18 = vpop.f32.mrb[11].mxu1 }
 0x361   : > { %v1268_v19 = vpack.c.bf16 %v1256_v17, %v1253_v11  ;;  %v1388_v20 = vpack.c.bf16 %v1376_v18, %v9873_v12  ;;  %v1765_v17 = vpop.permute.xlu0 %1764 }
 0x365   : > { %v8297_v21 = vpop.f32.mrb[16].mxu0  ;;  %v8315_v22 = vpop.f32.mrb[12].mxu1 }
 0x366   : > { %v1313_v23 = vpop.f32.mrb[17].mxu0  ;;  %v1493_v24 = vpop.f32.mrb[13].mxu1 }
 0x367   : > { %v8298_v25 = vpop.f32.mrb[18].mxu0  ;;  %v8316_v26 = vpop.f32.mrb[14].mxu1 }
 0x368   : > { %v1329_v27 = vpack.c.bf16 %v8298_v25, %v8297_v21  ;;  %v1509_v28 = vpack.c.bf16 %v8316_v26, %v8315_v22  ;;  %v1316_v29 = vpop.f32.mrb[19].mxu0  ;;  %v1496_v30 = vpop.f32.mrb[15].mxu1 }
 0x369   : > { %v1328_v31 = vpack.c.bf16 %v1316_v29, %v1313_v23  ;;  %v1508_v32 = vpack.c.bf16 %v1496_v30, %v1493_v24  ;;  %v1770_v21 = vpop.permute.xlu1 %1769 }
 0x36b   : > { %8072 = vmatprep.subr.bf16.mxu0 %v1508_v32 }
 0x36c   : > { %8073 = vmatpush3.bf16.msra.mxu0 %v1268_v19 }
 0x36d   : > { %v8309_v33 = vpop.f32.mrb[20].mxu0  ;;  %v8327_v34 = vpop.f32.mrb[16].mxu1  ;;  %8074 = vmatprep.subr.bf16.mxu0 %v1509_v28 }
 0x36e   : > { %v1433_v35 = vpop.f32.mrb[21].mxu0  ;;  %v1613_v36 = vpop.f32.mrb[17].mxu1 }
 0x36f   : > { %v8310_v37 = vpop.f32.mrb[22].mxu0  ;;  %v8328_v38 = vpop.f32.mrb[18].mxu1 }
 0x370   : > { %v1449_v39 = vpack.c.bf16 %v8310_v37, %v8309_v33  ;;  %v1629_v40 = vpack.c.bf16 %v8328_v38, %v8327_v34  ;;  %v1436_v41 = vpop.f32.mrb[23].mxu0  ;;  %v1616_v42 = vpop.f32.mrb[19].mxu1  ;;  %8075 = vmatpush3.bf16.msra.mxu0 %v1269_v15 }
 0x371   : > { %v1448_v43 = vpack.c.bf16 %v1436_v41, %v1433_v35  ;;  %v1628_v44 = vpack.c.bf16 %v1616_v42, %v1613_v36  ;;  %v1780_v37 = vpop.permute.xlu1 %1779 }
 0x375   : > { %v8321_v45 = vpop.f32.mrb[24].mxu0  ;;  %v8339_v46 = vpop.f32.mrb[20].mxu1 }
 0x376   : > { %v1553_v47 = vpop.f32.mrb[25].mxu0  ;;  %v1733_v48 = vpop.f32.mrb[21].mxu1 }
 0x377   : > { %v8322_v49 = vpop.f32.mrb[26].mxu0  ;;  %v8340_v50 = vpop.f32.mrb[22].mxu1 }
 0x378   : > { %v1569_v51 = vpack.c.bf16 %v8322_v49, %v8321_v45  ;;  %v1749_v52 = vpack.c.bf16 %v8340_v50, %v8339_v46  ;;  %v1556_v53 = vpop.f32.mrb[27].mxu0  ;;  %v1736_v54 = vpop.f32.mrb[23].mxu1 }
 0x379   : > { %v1568_v55 = vpack.c.bf16 %v1556_v53, %v1553_v47  ;;  %v1748_v56 = vpack.c.bf16 %v1736_v54, %v1733_v48 }
 0x37b   : > { %8076 = vmatprep.subr.bf16.mxu0 %v1568_v55  ;;  %8341 = vmatprep.subr.bf16.mxu1 %v1748_v56 }
 0x37c   : > { %8077 = vmatpush3.bf16.msra.mxu0 %v1328_v31  ;;  %8342 = vmatpush3.bf16.msra.mxu1 %v1748_v56  ;;  %v1775_v31 = vpop.permute.xlu0 %1774 }
 0x37d   : > { %v8333_v57 = vpop.f32.mrb[28].mxu0  ;;  %8078 = vmatprep.subr.bf16.mxu0 %v1569_v51  ;;  %8343 = vmatprep.subr.bf16.mxu1 %v1749_v52 }
 0x37e   : > { %v1673_v58 = vpop.f32.mrb[29].mxu0 }
 0x37f   : > { %v8334_v59 = vpop.f32.mrb[30].mxu0 }
 0x380   : > { %v1689_v61 = vpack.c.bf16 %v8334_v59, %v8333_v57  ;;  %v1676_v62 = vpop.f32.mrb[31].mxu0  ;;  %8079 = vmatpush3.bf16.msra.mxu0 %v1329_v27  ;;  %8344 = vmatpush3.bf16.msra.mxu1 %v1749_v52 }
 0x381   : > { %v1688_v63 = vpack.c.bf16 %v1676_v62, %v1673_v58  ;;  %8080 = vmatprep.subr.bf16.mxu0 %v1628_v44  ;;  %8349 = vmatprep.subr.bf16.mxu1 %v8663_v3 }
 0x383   : > { %8346 = vmatmul.mubr.msk.bf16.vlgmr.msra.gmra.mrb[24].mxu1 %vm800_vm0, %v8659_v60 }
 0x384   : > { %8081 = vmatpush3.bf16.msra.mxu0 %v1388_v20  ;;  %8350 = vmatpush3.bf16.msra.mxu1 %v8663_v3 }
 0x385   : > { %8082 = vmatprep.subr.bf16.mxu0 %v1629_v40  ;;  %8355 = vmatprep.subr.bf16.mxu1 %v9902_v5 }
 0x388   : > { %8083 = vmatpush3.bf16.msra.mxu0 %v1389_v16 }
 0x389   : > { %8084 = vmatprep.subr.bf16.mxu0 %v1688_v63 }
 0x38c   : > { %8085 = vmatpush3.bf16.msra.mxu0 %v1448_v43 }
 0x38d   : > { %8086 = vmatprep.subr.bf16.mxu0 %v1689_v61 }
 0x390   : > { %8087 = vmatpush3.bf16.msra.mxu0 %v1449_v39 }
 0x391   : > { %8367 = vmatprep.subr.bf16.mxu0 %v9907_v7 }
 0x393   : > { %1851 = vmatmul.mubr.bf16.vlgmr.msra.gmra.mrb[32].mxu0 %v8655_v0 }
 0x394   : > { %1858 = vmatprep.mubr.bf16.mxu0 %v8660_v1  ;;  %8368 = vmatpush3.bf16.msra.mxu0 %v9907_v7 }
 0x395   : > { %8369 = vmatprep.subr.bf16.mxu0 %v9914_v8 }
 0x398   : > { %8370 = vmatpush3.bf16.msra.mxu0 %v9914_v8 }
 0x399   : > { %8371 = vmatprep.subr.bf16.mxu0 %v9921_v9 }
 0x39b   : > { %1859 = vmatmul.mubr.bf16.gmra.mrb[36].mxu0 %v8662_v2 }
 0x39c   : > { %8372 = vmatpush3.bf16.msra.mxu0 %v9921_v9 }
 0x456   : > { %v8347_v10 = vpop.f32.mrb[24].mxu1 }
 0x457   : > { %v1901_v6 = vpop.f32.mrb[25].mxu1 }
 0x458   : > { %v8348_v11 = vpop.f32.mrb[26].mxu1 }
 0x459   : > { %v1904_v12 = vpop.f32.mrb[27].mxu1 }
 0x466   : > { %v8088_v13 = vpop.f32.mrb[32].mxu0 }
 0x467   : > { %v8089_v14 = vpop.f32.mrb[33].mxu0 }
 0x468   : > { %v8090_v15 = vadd.f32 %v8089_v14, %v8088_v13  ;;  %v8091_v16 = vpop.f32.mrb[34].mxu0  ;;  %v9942_v13 = vld [vmem:[%s12287_s10 + $0x10] sm:$0xff]   ;;  %v9950_v14 = vld [vmem:[%s12287_s10 + $0x18] sm:$0xff]  }
 0x469   : > { %v8092_v18 = vpop.f32.mrb[35].mxu0 }
 0x46a   : > { %v8093_v19 = vadd.f32 %v8092_v18, %v8091_v16  ;;  %v1853_v20 = vadd.f32 %v8090_v15, %v1765_v17  ;;  %v9955_v15 = vld [vmem:[%s12287_s10 + $0x38] sm:$0xff]   ;;  %v9964_v16 = vld [vmem:[%s12287_s10 + $0x40] sm:$0xff]  }
 0x46b   : > { %8373 = vmatprep.subr.bf16.mxu0 %v9955_v15  ;;  %v9969_v17 = vld [vmem:[%s12287_s10 + $0x60] sm:$0xff]  }
 0x46c   : > { %v1902_v22 = vadd.f32 %v1901_v6, %v1853_v20  ;;  %v1856_v23 = vadd.f32 %v8093_v19, %v1770_v21  ;;  %8374 = vmatpush3.bf16.msra.mxu0 %v9955_v15 }
 0x46d   : > { %8391 = vmatprep.subr.bf16.mxu0 %v9969_v17 }
 0x46e   : > { %v1916_v24 = vmul.f32 %v1902_v22, %v1902_v22  ;;  %v1905_v25 = vadd.f32 %v1904_v12, %v1856_v23  ;;  %v8094_v26 = vpop.f32.mrb[36].mxu0  ;;  %v9933_v12 = vld [vmem:[%s12287_s10 + $0x8] sm:$0xff]  }
 0x46f   : > { %v8095_v27 = vpop.f32.mrb[37].mxu0 }
 0x470   : > { %v1917_v28 = vmul.f32 %v1905_v25, %v1905_v25  ;;  %v8096_v29 = vadd.f32 %v8095_v27, %v8094_v26  ;;  %v8097_v30 = vpop.f32.mrb[38].mxu0  ;;  %v1920_v33 = vsel %vm1212_vm3, %v1916_v24, 0.0  ;;  %v9984_v24 = vld [vmem:[%s12287_s10 + $0x48] sm:$0xff]   ;;  %v10004_v26 = vld [vmem:[%s12287_s10 + $0x50] sm:$0xff]  }
 0x471   : > { %v8098_v32 = vpop.f32.mrb[39].mxu0  ;;  %v10009_v27 = vld [vmem:[%s12287_s10 + $0x70] sm:$0xff]  }
 0x472   : > { %v1921_v34 = vsel %vm1212_vm3, %v1917_v28, 0.0  ;;  %v1861_v35 = vadd.f32 %v8096_v29, %v1775_v31  ;;  %v8099_v36 = vadd.f32 %v8098_v32, %v8097_v30  ;;  %v10020_v28 = vld [vmem:[%s12287_s10 + $0x58] sm:$0xff]   ;;  %v10034_v30 = vld [vmem:[%s12287_s10 + $0x80] sm:$0xff]   ;;  %v10048_v32 = vld [vmem:[%s12287_s10 + $0x88] sm:$0xff]  }
 0x473   : > { %v1922_v38 = vadd.f32 %v1921_v34, %v1920_v33  ;;  %v10025_v29 = vld [vmem:[%s12287_s10 + $0x78] sm:$0xff]   ;;  %v10039_v31 = vld [vmem:[%s12287_s10 + $0xa0] sm:$0xff]   ;;  %v10053_v33 = vld [vmem:[%s12287_s10 + $0xa8] sm:$0xff]  }
 0x474   : > { %v1910_v39 = vadd.f32 %v8347_v10, %v1861_v35  ;;  %v1864_v40 = vadd.f32 %v8099_v36, %v1780_v37  ;;  %v10068_v34 = vld [vmem:[%s12287_s10 + $0x90] sm:$0xff]   ;;  %v10083_v36 = vld [vmem:[%s12287_s10 + $0x98] sm:$0xff]  }
 0x475   : > { %v10075_v35 = vld [vmem:[%s12287_s10 + $0xb0] sm:$0xff]   ;;  %v10089_v37 = vld [vmem:[%s12287_s10 + $0xb8] sm:$0xff]  }
 0x476   : > { %v1918_v41 = vmul.f32 %v1910_v39, %v1910_v39  ;;  %v1913_v42 = vadd.f32 %v8348_v11, %v1864_v40  ;;  %v10112_v40 = vld [vmem:[%s12287_s10 + $0xc8] sm:$0xff]  }
 0x478   : > { %v1923_v43 = vsel %vm1212_vm3, %v1918_v41, 0.0  ;;  %v1919_v44 = vmul.f32 %v1913_v42, %v1913_v42  ;;  %v10119_v41 = vld [vmem:[%s12287_s10 + $0xe8] sm:$0xff]  }
 0x479   : > { %v1924_v45 = vadd.f32 %v1923_v43, %v1922_v38  ;;  %v10097_v38 = vld [vmem:[%s12287_s10 + $0xc0] sm:$0xff]   ;;  %v10138_v43 = vld [vmem:[%s12287_s10 + $0xf0] sm:$0xff]  }
 0x47a   : > { %v1925_v46 = vsel %vm1212_vm3, %v1919_v44, 0.0  ;;  %v10147_v44 = vld [vmem:[%s12287_s10 + $0xd8] sm:$0xff]  }
 0x47b   : > { %v1926_v47 = vadd.f32 %v1925_v46, %v1924_v45  ;;  %v10153_v45 = vld [vmem:[%s12287_s10 + $0xf8] sm:$0xff]   ;;  %v10161_v46 = vld [vmem:[%s12287_s10 + $0x100] sm:$0xff]  }
 0x47d   : > { %v1927_v48 = vrot.slane %v1926_v47, 4 }
 0x47f   : > { %v1928_v49 = vadd.f32 %v1927_v48, %v1926_v47  ;;  %v10170_v47 = vld [vmem:[%s12287_s10 + $0x108] sm:$0xff]   ;;  %v10183_v48 = vld [vmem:[%s12287_s10 + $0x110] sm:$0xff]  }
 0x481   : > { %v1929_v50 = vrot.slane %v1928_v49, 2 }
 0x483   : > { %v1930_v51 = vadd.f32 %v1929_v50, %v1928_v49  ;;  %v10190_v49 = vld [vmem:[%s12287_s10 + $0x118] sm:$0xff]   ;;  %v8702_v50 = vld [vmem:[%s12288_s11 + $0x4] ss:$12 sps:$4 sm:$0xff]  }
 0x485   : > { %v1931_v52 = vrot.slane %v1930_v51, 1 }
 0x487   : > { %v1932_v53 = vadd.f32 %v1931_v52, %v1930_v51  ;;  %v8705_v51 = vld [vmem:[%s12288_s11 + $0x8] ss:$12 sps:$4 sm:$0xff]  }
 0x489   : > { %v1934_v54 = vmul.f32 0.03125, %v1932_v53 }
 0x48b   : > { %v1935_v55 = vadd.f32 1e-08, %v1934_v54 }
 0x48d   : > { %9176 = vrsqrt.f32 %v1935_v55 }
 0x497   : > { %v9177_v56 = vpop.eup %9176 }
 0x498   : > { %v1940_v57 = vmul.f32 %v9177_v56, %v1913_v42  ;;  %v1937_v58 = vmul.f32 %v9177_v56, %v1902_v22  ;;  %v1938_v59 = vmul.f32 %v9177_v56, %v1905_v25  ;;  %v1939_v60 = vmul.f32 %v9177_v56, %v1910_v39  ;;  %v9989_v25 = vld [vmem:[%s12287_s10 + $0x68] sm:$0xff]   ;;  %v10103_v39 = vld [vmem:[%s12287_s10 + $0xe0] sm:$0xff]   ;;  %v10130_v42 = vld [vmem:[%s12287_s10 + $0xd0] sm:$0xff]  }
 0x49a   : > { %vm1944_vm6 = vcmp.ge.f32.partialorder %v1940_v57, 0.0  ;;  %v1948_v61 = vmul.f32 0.2, %v1940_v57  ;;  %vm1941_vm7 = vcmp.ge.f32.partialorder %v1937_v58, 0.0  ;;  %vm1942_vm8 = vcmp.ge.f32.partialorder %v1938_v59, 0.0 }
 0x49b   : > { %v1945_v62 = vmul.f32 0.2, %v1937_v58  ;;  %v1946_v63 = vmul.f32 0.2, %v1938_v59  ;;  %vm1943_vm9 = vcmp.ge.f32.partialorder %v1939_v60, 0.0 }
 0x49c   : > { %v1952_v0 = vsel %vm1944_vm6, %v1940_v57, %v1948_v61  ;;  %v1947_v1 = vmul.f32 0.2, %v1939_v60 }
 0x49d   : > { %v1949_v2 = vsel %vm1941_vm7, %v1937_v58, %v1945_v62  ;;  %v1950_v3 = vsel %vm1942_vm8, %v1938_v59, %v1946_v63 }
 0x49e   : > { %v1953_v10 = vpack.c.bf16 %v1950_v3, %v1949_v2  ;;  %v1951_v6 = vsel %vm1943_vm9, %v1939_v60, %v1947_v1 }
 0x49f   : > { %v1954_v11 = vpack.c.bf16 %v1952_v0, %v1951_v6 }
 0x4a0   : > { %8351 = vmatprep.mubr.msk.bf16.mxu1 %vm1212_vm3, %v1953_v10 }
 0x4a1   : > { %8352 = vmatmul.mubr.msk.bf16.vlgmr.msra.gmra.mrb[28].mxu1 %vm1212_vm3, %v1954_v11 }
 0x4a2   : > { %8356 = vmatpush3.bf16.msra.mxu1 %v9902_v5 }
 0x4a3   : > { %8357 = vmatprep.subr.bf16.mxu1 %v9933_v12 }
 0x4a6   : > { %8358 = vmatpush3.bf16.msra.mxu1 %v9933_v12 }
 0x4a7   : > { %8359 = vmatprep.subr.bf16.mxu1 %v9942_v13 }
 0x4aa   : > { %8360 = vmatpush3.bf16.msra.mxu1 %v9942_v13 }
 0x4ab   : > { %8361 = vmatprep.subr.bf16.mxu1 %v9950_v14 }
 0x4ae   : > { %8362 = vmatpush3.bf16.msra.mxu1 %v9950_v14 }
 0x4af   : > { %8379 = vmatprep.subr.bf16.mxu1 %v9964_v16 }
 0x574   : > { %v8353_v18 = vpop.f32.mrb[28].mxu1 }
 0x575   : > { %v2003_v19 = vpop.f32.mrb[29].mxu1 }
 0x576   : > { %v8354_v20 = vpop.f32.mrb[30].mxu1 }
 0x577   : > { %v9973_v21 = vpack.c.bf16 %v8354_v20, %v8353_v18  ;;  %v2006_v22 = vpop.f32.mrb[31].mxu1 }
 0x578   : > { %v9975_v23 = vpack.c.bf16 %v2006_v22, %v2003_v19 }
 0x57a   : > { %8363 = vmatprep.mubr.msk.bf16.mxu1 %vm2052_vm10, %v9975_v23  ;;  %8375 = vmatprep.mubr.msk.bf16.mxu0 %vm2052_vm10, %v9975_v23 }
 0x57b   : > { %8364 = vmatmul.mubr.msk.bf16.vlgmr.msra.gmra.mrb[32].mxu1 %vm2052_vm10, %v9973_v21  ;;  %8376 = vmatmul.mubr.msk.bf16.vlgmr.msra.gmra.mrb[40].mxu0 %vm2052_vm10, %v9973_v21 }
 0x57c   : > { %8380 = vmatpush3.bf16.msra.mxu1 %v9964_v16  ;;  %8392 = vmatpush3.bf16.msra.mxu0 %v9969_v17 }
 0x57d   : > { %8387 = vmatprep.mubr.msk.bf16.mxu1 %vm2052_vm10, %v9975_v23  ;;  %8399 = vmatprep.mubr.msk.bf16.mxu0 %vm2052_vm10, %v9975_v23 }
 0x57e   : > { %8381 = vmatprep.subr.bf16.mxu1 %v9984_v24  ;;  %8393 = vmatprep.subr.bf16.mxu0 %v9989_v25 }
 0x580   : > { %8382 = vmatpush3.bf16.msra.mxu1 %v9984_v24  ;;  %8394 = vmatpush3.bf16.msra.mxu0 %v9989_v25 }
 0x581   : > { %8383 = vmatprep.subr.bf16.mxu1 %v10004_v26  ;;  %8395 = vmatprep.subr.bf16.mxu0 %v10009_v27 }
 0x584   : > { %8384 = vmatpush3.bf16.msra.mxu1 %v10004_v26  ;;  %8396 = vmatpush3.bf16.msra.mxu0 %v10009_v27 }
 0x585   : > { %8385 = vmatprep.subr.bf16.mxu1 %v10020_v28  ;;  %8397 = vmatprep.subr.bf16.mxu0 %v10025_v29 }
 0x588   : > { %8386 = vmatpush3.bf16.msra.mxu1 %v10020_v28  ;;  %8398 = vmatpush3.bf16.msra.mxu0 %v10025_v29 }
 0x589   : > { %8403 = vmatprep.subr.bf16.mxu1 %v10034_v30  ;;  %8415 = vmatprep.subr.bf16.mxu0 %v10039_v31 }
 0x58b   : > { %8388 = vmatmul.mubr.msk.bf16.vlgmr.msra.gmra.mrb[36].mxu1 %vm2052_vm10, %v9973_v21  ;;  %8400 = vmatmul.mubr.msk.bf16.vlgmr.msra.gmra.mrb[44].mxu0 %vm2052_vm10, %v9973_v21 }
 0x58c   : > { %8404 = vmatpush3.bf16.msra.mxu1 %v10034_v30  ;;  %8411 = vmatprep.mubr.msk.bf16.mxu1 %vm2052_vm10, %v9975_v23 }
 0x58d   : > { %8416 = vmatpush3.bf16.msra.mxu0 %v10039_v31  ;;  %8423 = vmatprep.mubr.msk.bf16.mxu0 %vm2052_vm10, %v9975_v23 }
 0x58e   : > { %8405 = vmatprep.subr.bf16.mxu1 %v10048_v32  ;;  %8417 = vmatprep.subr.bf16.mxu0 %v10053_v33 }
 0x590   : > { %8406 = vmatpush3.bf16.msra.mxu1 %v10048_v32 }
 0x591   : > { %8418 = vmatpush3.bf16.msra.mxu0 %v10053_v33  ;;  %8407 = vmatprep.subr.bf16.mxu1 %v10068_v34 }
 0x592   : > { %8419 = vmatprep.subr.bf16.mxu0 %v10075_v35 }
 0x594   : > { %8408 = vmatpush3.bf16.msra.mxu1 %v10068_v34 }
 0x595   : > { %8420 = vmatpush3.bf16.msra.mxu0 %v10075_v35  ;;  %8409 = vmatprep.subr.bf16.mxu1 %v10083_v36 }
 0x596   : > { %8421 = vmatprep.subr.bf16.mxu0 %v10089_v37 }
 0x598   : > { %8410 = vmatpush3.bf16.msra.mxu1 %v10083_v36 }
 0x599   : > { %8422 = vmatpush3.bf16.msra.mxu0 %v10089_v37  ;;  %8427 = vmatprep.subr.bf16.mxu1 %v10097_v38 }
 0x59a   : > { %8439 = vmatprep.subr.bf16.mxu0 %v10103_v39 }
 0x59b   : > { %8412 = vmatmul.mubr.msk.bf16.vlgmr.msra.gmra.mrb[40].mxu1 %vm2052_vm10, %v9973_v21 }
 0x59c   : > { %8424 = vmatmul.mubr.msk.bf16.vlgmr.msra.gmra.mrb[48].mxu0 %vm2052_vm10, %v9973_v21  ;;  %8428 = vmatpush3.bf16.msra.mxu1 %v10097_v38 }
 0x59d   : > { %8435 = vmatprep.mubr.msk.bf16.mxu1 %vm2052_vm10, %v9975_v23  ;;  %8440 = vmatpush3.bf16.msra.mxu0 %v10103_v39 }
 0x59e   : > { %8447 = vmatprep.mubr.msk.bf16.mxu0 %vm2052_vm10, %v9975_v23  ;;  %8429 = vmatprep.subr.bf16.mxu1 %v10112_v40 }
 0x59f   : > { %8441 = vmatprep.subr.bf16.mxu0 %v10119_v41 }
 0x5a0   : > { %8430 = vmatpush3.bf16.msra.mxu1 %v10112_v40 }
 0x5a1   : > { %8442 = vmatpush3.bf16.msra.mxu0 %v10119_v41  ;;  %8431 = vmatprep.subr.bf16.mxu1 %v10130_v42 }
 0x5a2   : > { %8443 = vmatprep.subr.bf16.mxu0 %v10138_v43 }
 0x5a4   : > { %8432 = vmatpush3.bf16.msra.mxu1 %v10130_v42 }
 0x5a5   : > { %8444 = vmatpush3.bf16.msra.mxu0 %v10138_v43  ;;  %8433 = vmatprep.subr.bf16.mxu1 %v10147_v44 }
 0x5a6   : > { %8445 = vmatprep.subr.bf16.mxu0 %v10153_v45 }
 0x5a8   : > { %8434 = vmatpush3.bf16.msra.mxu1 %v10147_v44 }
 0x5a9   : > { %8446 = vmatpush3.bf16.msra.mxu0 %v10153_v45  ;;  %8451 = vmatprep.subr.bf16.mxu1 %v10161_v46 }
 0x5ab   : > { %8436 = vmatmul.mubr.msk.bf16.vlgmr.msra.gmra.mrb[44].mxu1 %vm2052_vm10, %v9973_v21 }
 0x5ac   : > { %8448 = vmatmul.mubr.msk.bf16.vlgmr.msra.gmra.mrb[52].mxu0 %vm2052_vm10, %v9973_v21  ;;  %8452 = vmatpush3.bf16.msra.mxu1 %v10161_v46 }
 0x5ad   : > { %8459 = vmatprep.mubr.msk.bf16.mxu1 %vm2052_vm10, %v9975_v23  ;;  %8453 = vmatprep.subr.bf16.mxu1 %v10170_v47 }
 0x5ae   : > { %2882 = vmatprep.mubr.bf16.mxu0 %v8702_v50 }
 0x5b0   : > { %8454 = vmatpush3.bf16.msra.mxu1 %v10170_v47 }
 0x5b1   : > { %8455 = vmatprep.subr.bf16.mxu1 %v10183_v48 }
 0x5b4   : > { %8456 = vmatpush3.bf16.msra.mxu1 %v10183_v48 }
 0x5b5   : > { %8457 = vmatprep.subr.bf16.mxu1 %v10190_v49 }
 0x5b8   : > { %8458 = vmatpush3.bf16.msra.mxu1 %v10190_v49 }
 0x5bb   : > { %8460 = vmatmul.mubr.msk.bf16.vlgmr.msra.gmra.mrb[48].mxu1 %vm2052_vm10, %v9973_v21 }
 0x5bc   : > { %8467 = vmatprep.mubr.msk.bf16.mxu1 %vm800_vm0, %v8705_v51 }
 0x64e   : > { %v8365_v52 = vpop.f32.mrb[32].mxu1  ;;  %v8377_v53 = vpop.f32.mrb[40].mxu0 }
 0x64f   : > { %v2093_v54 = vpop.f32.mrb[33].mxu1  ;;  %v2177_v55 = vpop.f32.mrb[41].mxu0 }
 0x650   : > { %v8366_v56 = vpop.f32.mrb[34].mxu1  ;;  %v8378_v57 = vpop.f32.mrb[42].mxu0 }
 0x651   : > { %v2109_v58 = vpack.c.bf16 %v8366_v56, %v8365_v52  ;;  %v2193_v59 = vpack.c.bf16 %v8378_v57, %v8377_v53  ;;  %v2096_v60 = vpop.f32.mrb[35].mxu1  ;;  %v2180_v61 = vpop.f32.mrb[43].mxu0 }
 0x652   : > { %v2108_v62 = vpack.c.bf16 %v2096_v60, %v2093_v54  ;;  %v2192_v63 = vpack.c.bf16 %v2180_v61, %v2177_v55 }
 0x65e   : > { %v8389_v0 = vpop.f32.mrb[36].mxu1  ;;  %v8401_v1 = vpop.f32.mrb[44].mxu0 }
 0x65f   : > { %v2261_v2 = vpop.f32.mrb[37].mxu1  ;;  %v2345_v3 = vpop.f32.mrb[45].mxu0 }
 0x660   : > { %v8390_v10 = vpop.f32.mrb[38].mxu1  ;;  %v8402_v6 = vpop.f32.mrb[46].mxu0 }
 0x661   : > { %v2277_v11 = vpack.c.bf16 %v8390_v10, %v8389_v0  ;;  %v2361_v18 = vpack.c.bf16 %v8402_v6, %v8401_v1  ;;  %v2264_v19 = vpop.f32.mrb[39].mxu1  ;;  %v2348_v20 = vpop.f32.mrb[47].mxu0 }
 0x662   : > { %v2276_v21 = vpack.c.bf16 %v2264_v19, %v2261_v2  ;;  %v2360_v22 = vpack.c.bf16 %v2348_v20, %v2345_v3 }
 0x66e   : > { %v8413_v23 = vpop.f32.mrb[40].mxu1 }
 0x66f   : > { %v8425_v50 = vpop.f32.mrb[48].mxu0  ;;  %v2429_v51 = vpop.f32.mrb[41].mxu1 }
 0x670   : > { %v2513_v52 = vpop.f32.mrb[49].mxu0  ;;  %v8414_v53 = vpop.f32.mrb[42].mxu1 }
 0x671   : > { %v2445_v56 = vpack.c.bf16 %v8414_v53, %v8413_v23  ;;  %v8426_v54 = vpop.f32.mrb[50].mxu0  ;;  %v2432_v55 = vpop.f32.mrb[43].mxu1 }
 0x672   : > { %v2529_v57 = vpack.c.bf16 %v8426_v54, %v8425_v50  ;;  %v2444_v60 = vpack.c.bf16 %v2432_v55, %v2429_v51  ;;  %v2516_v61 = vpop.f32.mrb[51].mxu0 }
 0x673   : > { %v2528_v4 = vpack.c.bf16 %v2516_v61, %v2513_v52 }
 0x674   : > { %8161 = vmatprep.subr.bf16.mxu0 %v2444_v60 }
 0x675   : > { %8162 = vmatpush3.bf16.msra.mxu0 %v2108_v62 }
 0x676   : > { %8163 = vmatprep.subr.bf16.mxu0 %v2445_v56  ;;  %v8703_v56 = vld [vmem:[%s12288_s11 + $0x1c] ss:$12 sps:$4 sm:$0xff]  }
 0x679   : > { %8164 = vmatpush3.bf16.msra.mxu0 %v2109_v58 }
 0x67a   : > { %8165 = vmatprep.subr.bf16.mxu0 %v2528_v4 }
 0x67d   : > { %8166 = vmatpush3.bf16.msra.mxu0 %v2192_v63  ;;  %v8700_v63 = vld [vmem:[%s12288_s11] ss:$12 sps:$4 sm:$0xff]  }
 0x67e   : > { %v8437_v0 = vpop.f32.mrb[44].mxu1  ;;  %8167 = vmatprep.subr.bf16.mxu0 %v2529_v57  ;;  %v2802_v57 = vpop.permute.xlu1 %2801 }
 0x67f   : > { %v8449_v1 = vpop.f32.mrb[52].mxu0  ;;  %v2597_v2 = vpop.f32.mrb[45].mxu1 }
 0x680   : > { %v2681_v3 = vpop.f32.mrb[53].mxu0  ;;  %v8438_v10 = vpop.f32.mrb[46].mxu1 }
 0x681   : > { %v2613_v6 = vpack.c.bf16 %v8438_v10, %v8437_v0  ;;  %v8450_v19 = vpop.f32.mrb[54].mxu0  ;;  %v2600_v20 = vpop.f32.mrb[47].mxu1  ;;  %8168 = vmatpush3.bf16.msra.mxu0 %v2193_v59 }
 0x682   : > { %v2697_v23 = vpack.c.bf16 %v8450_v19, %v8449_v1  ;;  %v2612_v50 = vpack.c.bf16 %v2600_v20, %v2597_v2  ;;  %v2684_v51 = vpop.f32.mrb[55].mxu0 }
 0x683   : > { %v2696_v52 = vpack.c.bf16 %v2684_v51, %v2681_v3 }
 0x684   : > { %8169 = vmatprep.subr.bf16.mxu0 %v2612_v50 }
 0x685   : > { %8170 = vmatpush3.bf16.msra.mxu0 %v2276_v21 }
 0x686   : > { %8171 = vmatprep.subr.bf16.mxu0 %v2613_v6 }
 0x689   : > { %8172 = vmatpush3.bf16.msra.mxu0 %v2277_v11  ;;  %v8706_v11 = vld [vmem:[%s12288_s11 + $0x18] ss:$12 sps:$4 sm:$0xff]  }
 0x68a   : > { %8173 = vmatprep.subr.bf16.mxu0 %v2696_v52  ;;  %v2812_v52 = vpop.permute.xlu1 %2811 }
 0x68d   : > { %8174 = vmatpush3.bf16.msra.mxu0 %v2360_v22 }
 0x68e   : > { %v8461_v4 = vpop.f32.mrb[48].mxu1  ;;  %8175 = vmatprep.subr.bf16.mxu0 %v2697_v23 }
 0x68f   : > { %v2765_v58 = vpop.f32.mrb[49].mxu1 }
 0x690   : > { %v8462_v62 = vpop.f32.mrb[50].mxu1 }
 0x691   : > { %v2781_v53 = vpack.c.bf16 %v8462_v62, %v8461_v4  ;;  %v2768_v59 = vpop.f32.mrb[51].mxu1  ;;  %8176 = vmatpush3.bf16.msra.mxu0 %v2361_v18  ;;  %v8707_v18 = vld [vmem:[%s12288_s11 + $0x20] ss:$12 sps:$4 sm:$0xff]  }
 0x692   : > { %v2780_v21 = vpack.c.bf16 %v2768_v59, %v2765_v58  ;;  %8495 = vmatprep.subr.bf16.mxu0 %v9964_v16 }
 0x694   : > { %2883 = vmatmul.mubr.bf16.vlgmr.msra.gmra.mrb[56].mxu0 %v8700_v63  ;;  %8463 = vmatprep.subr.bf16.mxu1 %v2780_v21 }
 0x695   : > { %8464 = vmatpush3.bf16.msra.mxu1 %v2780_v21  ;;  %2890 = vmatprep.mubr.bf16.mxu0 %v8703_v56 }
 0x696   : > { %8465 = vmatprep.subr.bf16.mxu1 %v2781_v53  ;;  %8496 = vmatpush3.bf16.msra.mxu0 %v9964_v16  ;;  %v2797_v16 = vpop.permute.xlu0 %2796 }
 0x697   : > { %8497 = vmatprep.subr.bf16.mxu0 %v9984_v24 }
 0x699   : > { %8466 = vmatpush3.bf16.msra.mxu1 %v2781_v53 }
 0x69a   : > { %8471 = vmatprep.subr.bf16.mxu1 %v9902_v5  ;;  %8498 = vmatpush3.bf16.msra.mxu0 %v9984_v24  ;;  %v2807_v55 = vpop.permute.xlu0 %2806 }
 0x69b   : > { %8499 = vmatprep.subr.bf16.mxu0 %v10004_v26 }
 0x69c   : > { %2891 = vmatmul.mubr.bf16.gmra.mrb[60].mxu0 %v8706_v11  ;;  %8468 = vmatmul.mubr.msk.bf16.vlgmr.msra.gmra.mrb[52].mxu1 %vm800_vm0, %v8707_v18 }
 0x69d   : > { %8472 = vmatpush3.bf16.msra.mxu1 %v9902_v5 }
 0x69e   : > { %8473 = vmatprep.subr.bf16.mxu1 %v9933_v12  ;;  %8500 = vmatpush3.bf16.msra.mxu0 %v10004_v26 }
 0x69f   : > { %8501 = vmatprep.subr.bf16.mxu0 %v10020_v28 }
 0x6a1   : > { %8474 = vmatpush3.bf16.msra.mxu1 %v9933_v12 }
 0x6a2   : > { %8475 = vmatprep.subr.bf16.mxu1 %v9942_v13  ;;  %8502 = vmatpush3.bf16.msra.mxu0 %v10020_v28 }
 0x6a3   : > { %8519 = vmatprep.subr.bf16.mxu0 %v10034_v30 }
 0x6a5   : > { %8476 = vmatpush3.bf16.msra.mxu1 %v9942_v13 }
 0x6a6   : > { %8477 = vmatprep.subr.bf16.mxu1 %v9950_v14 }
 0x6a9   : > { %8478 = vmatpush3.bf16.msra.mxu1 %v9950_v14 }
 0x6aa   : > { %8483 = vmatprep.subr.bf16.mxu1 %v9907_v7 }
 0x767   : > { %v8177_v5 = vpop.f32.mrb[56].mxu0 }
 0x768   : > { %v8178_v24 = vpop.f32.mrb[57].mxu0 }
 0x769   : > { %v8179_v26 = vadd.f32 %v8178_v24, %v8177_v5  ;;  %v8180_v22 = vpop.f32.mrb[58].mxu0 }
 0x76a   : > { %v8181_v12 = vpop.f32.mrb[59].mxu0 }
 0x76b   : > { %v8182_v54 = vadd.f32 %v8181_v12, %v8180_v22  ;;  %v2885_v61 = vadd.f32 %v8179_v26, %v2797_v16 }
 0x76d   : > { %v2888_v10 = vadd.f32 %v8182_v54, %v2802_v57 }
 0x76f   : > { %v8183_v28 = vpop.f32.mrb[60].mxu0  ;;  %v8469_v60 = vpop.f32.mrb[52].mxu1 }
 0x770   : > { %v8184_v0 = vpop.f32.mrb[61].mxu0  ;;  %v2933_v13 = vpop.f32.mrb[53].mxu1 }
 0x771   : > { %v8185_v1 = vadd.f32 %v8184_v0, %v8183_v28  ;;  %v2934_v2 = vadd.f32 %v2933_v13, %v2885_v61  ;;  %v8186_v3 = vpop.f32.mrb[62].mxu0  ;;  %v8470_v14 = vpop.f32.mrb[54].mxu1 }
 0x772   : > { %v8187_v6 = vpop.f32.mrb[63].mxu0  ;;  %v2936_v19 = vpop.f32.mrb[55].mxu1 }
 0x773   : > { %v2893_v20 = vadd.f32 %v8185_v1, %v2807_v55  ;;  %v2948_v23 = vmul.f32 %v2934_v2, %v2934_v2  ;;  %v8188_v50 = vadd.f32 %v8187_v6, %v8186_v3  ;;  %v2937_v51 = vadd.f32 %v2936_v19, %v2888_v10 }
 0x775   : > { %v2942_v4 = vadd.f32 %v8469_v60, %v2893_v20  ;;  %v2896_v58 = vadd.f32 %v8188_v50, %v2812_v52  ;;  %v2949_v62 = vmul.f32 %v2937_v51, %v2937_v51  ;;  %v2952_v53 = vsel %vm2052_vm10, %v2948_v23, 0.0 }
 0x777   : > { %v2950_v63 = vmul.f32 %v2942_v4, %v2942_v4  ;;  %v2945_v59 = vadd.f32 %v8470_v14, %v2896_v58  ;;  %v2953_v56 = vsel %vm2052_vm10, %v2949_v62, 0.0 }
 0x778   : > { %v2954_v21 = vadd.f32 %v2953_v56, %v2952_v53 }
 0x779   : > { %v2951_v11 = vmul.f32 %v2945_v59, %v2945_v59  ;;  %v2955_v18 = vsel %vm2052_vm10, %v2950_v63, 0.0 }
 0x77a   : > { %v2956_v5 = vadd.f32 %v2955_v18, %v2954_v21 }
 0x77b   : > { %v2957_v16 = vsel %vm2052_vm10, %v2951_v11, 0.0 }
 0x77c   : > { %v2958_v24 = vadd.f32 %v2957_v16, %v2956_v5 }
 0x77e   : > { %v2959_v26 = vrot.slane %v2958_v24, 4 }
 0x780   : > { %v2960_v22 = vadd.f32 %v2959_v26, %v2958_v24 }
 0x782   : > { %v2961_v12 = vrot.slane %v2960_v22, 2 }
 0x784   : > { %v2962_v54 = vadd.f32 %v2961_v12, %v2960_v22 }
 0x786   : > { %v2963_v55 = vrot.slane %v2962_v54, 1 }
 0x788   : > { %v2964_v57 = vadd.f32 %v2963_v55, %v2962_v54 }
 0x78a   : > { %v2965_v28 = vmul.f32 0.03125, %v2964_v57 }
 0x78c   : > { %v2966_v60 = vadd.f32 1e-08, %v2965_v28 }
 0x78e   : > { %9178 = vrsqrt.f32 %v2966_v60 }
 0x798   : > { %v9179_v61 = vpop.eup %9178 }
 0x799   : > { %v2968_v0 = vmul.f32 %v9179_v61, %v2934_v2  ;;  %v2969_v13 = vmul.f32 %v9179_v61, %v2937_v51  ;;  %v2970_v1 = vmul.f32 %v9179_v61, %v2942_v4  ;;  %v2971_v3 = vmul.f32 %v9179_v61, %v2945_v59 }
 0x79b   : > { %vm2972_vm11 = vcmp.ge.f32.partialorder %v2968_v0, 0.0  ;;  %vm2973_vm12 = vcmp.ge.f32.partialorder %v2969_v13, 0.0  ;;  %v2976_v14 = vmul.f32 0.2, %v2968_v0  ;;  %v2977_v10 = vmul.f32 0.2, %v2969_v13 }
 0x79c   : > { %vm2974_vm13 = vcmp.ge.f32.partialorder %v2970_v1, 0.0  ;;  %vm2975_vm14 = vcmp.ge.f32.partialorder %v2971_v3, 0.0  ;;  %v2978_v6 = vmul.f32 0.2, %v2970_v1  ;;  %v2979_v19 = vmul.f32 0.2, %v2971_v3 }
 0x79d   : > { %v2980_v20 = vsel %vm2972_vm11, %v2968_v0, %v2976_v14  ;;  %v2981_v23 = vsel %vm2973_vm12, %v2969_v13, %v2977_v10  ;;  %v8712_v0 = vld [vmem:[%s12290_s13 + $0x20] ss:$12 sps:$4 sm:$0xff]  }
 0x79e   : > { %v10239_v50 = vpack.c.bf16 %v2981_v23, %v2980_v20  ;;  %v2982_v52 = vsel %vm2974_vm13, %v2970_v1, %v2978_v6  ;;  %v2983_v58 = vsel %vm2975_vm14, %v2971_v3, %v2979_v19  ;;  %v12338_v1 = vmov 0   ;;  %v8708_v20 = vld [vmem:[%s12290_s13] ss:$12 sps:$4 sm:$0xff]   ;;  %v8713_v23 = vld [vmem:[%s12290_s13 + $0x1c] ss:$12 sps:$4 sm:$0xff]  }
 0x79f   : > { %v10241_v62 = vpack.c.bf16 %v2983_v58, %v2982_v52  ;;  %v8718_v52 = vld [vmem:[%s12292_s15 + $0x4] ss:$8 sps:$4 sm:$0xff]   ;;  %v8716_v58 = vld [vmem:[%s12292_s15] ss:$8 sps:$4 sm:$0xff]  }
 0x7a0   : > { %8479 = vmatprep.mubr.msk.bf16.mxu1 %vm2052_vm10, %v10239_v50  ;;  %8503 = vmatprep.mubr.msk.bf16.mxu0 %vm2052_vm10, %v10239_v50 }
 0x7a1   : > { %8480 = vmatmul.mubr.msk.bf16.vlgmr.msra.gmra.mrb[56].mxu1 %vm2052_vm10, %v10241_v62  ;;  %8504 = vmatmul.mubr.msk.bf16.vlgmr.msra.gmra.mrb[64].mxu0 %vm2052_vm10, %v10241_v62 }
 0x7a2   : > { %8484 = vmatpush3.bf16.msra.mxu1 %v9907_v7  ;;  %8520 = vmatpush3.bf16.msra.mxu0 %v10034_v30  ;;  %v8710_v7 = vld [vmem:[%s12290_s13 + $0x4] ss:$12 sps:$4 sm:$0xff]  }
 0x7a3   : > { %8491 = vmatprep.mubr.msk.bf16.mxu1 %vm2052_vm10, %v10239_v50  ;;  %8527 = vmatprep.mubr.msk.bf16.mxu0 %vm2052_vm10, %v10239_v50 }
 0x7a4   : > { %8485 = vmatprep.subr.bf16.mxu1 %v9914_v8  ;;  %8521 = vmatprep.subr.bf16.mxu0 %v10048_v32 }
 0x7a6   : > { %8486 = vmatpush3.bf16.msra.mxu1 %v9914_v8  ;;  %8522 = vmatpush3.bf16.msra.mxu0 %v10048_v32  ;;  %v8711_v8 = vld [vmem:[%s12290_s13 + $0x8] ss:$12 sps:$4 sm:$0xff]  }
 0x7a7   : > { %8487 = vmatprep.subr.bf16.mxu1 %v9921_v9  ;;  %8523 = vmatprep.subr.bf16.mxu0 %v10068_v34 }
 0x7aa   : > { %8488 = vmatpush3.bf16.msra.mxu1 %v9921_v9  ;;  %8524 = vmatpush3.bf16.msra.mxu0 %v10068_v34 }
 0x7ab   : > { %8489 = vmatprep.subr.bf16.mxu1 %v9955_v15  ;;  %8525 = vmatprep.subr.bf16.mxu0 %v10083_v36 }
 0x7ae   : > { %8490 = vmatpush3.bf16.msra.mxu1 %v9955_v15  ;;  %8526 = vmatpush3.bf16.msra.mxu0 %v10083_v36 }
 0x7af   : > { %8507 = vmatprep.subr.bf16.mxu1 %v9969_v17  ;;  %8543 = vmatprep.subr.bf16.mxu0 %v10097_v38 }
 0x7b1   : > { %8492 = vmatmul.mubr.msk.bf16.vlgmr.msra.gmra.mrb[60].mxu1 %vm2052_vm10, %v10241_v62  ;;  %8528 = vmatmul.mubr.msk.bf16.vlgmr.msra.gmra.mrb[68].mxu0 %vm2052_vm10, %v10241_v62 }
 0x7b2   : > { %8508 = vmatpush3.bf16.msra.mxu1 %v9969_v17  ;;  %8515 = vmatprep.mubr.msk.bf16.mxu1 %vm2052_vm10, %v10239_v50 }
 0x7b3   : > { %8544 = vmatpush3.bf16.msra.mxu0 %v10097_v38  ;;  %8551 = vmatprep.mubr.msk.bf16.mxu0 %vm2052_vm10, %v10239_v50 }
 0x7b4   : > { %8509 = vmatprep.subr.bf16.mxu1 %v9989_v25  ;;  %8545 = vmatprep.subr.bf16.mxu0 %v10112_v40 }
 0x7b6   : > { %8510 = vmatpush3.bf16.msra.mxu1 %v9989_v25 }
 0x7b7   : > { %8546 = vmatpush3.bf16.msra.mxu0 %v10112_v40  ;;  %8511 = vmatprep.subr.bf16.mxu1 %v10009_v27 }
 0x7b8   : > { %8547 = vmatprep.subr.bf16.mxu0 %v10130_v42 }
 0x7ba   : > { %8512 = vmatpush3.bf16.msra.mxu1 %v10009_v27 }
 0x7bb   : > { %8548 = vmatpush3.bf16.msra.mxu0 %v10130_v42  ;;  %8513 = vmatprep.subr.bf16.mxu1 %v10025_v29 }
 0x7bc   : > { %8549 = vmatprep.subr.bf16.mxu0 %v10147_v44 }
 0x7be   : > { %8514 = vmatpush3.bf16.msra.mxu1 %v10025_v29 }
 0x7bf   : > { %8550 = vmatpush3.bf16.msra.mxu0 %v10147_v44  ;;  %8531 = vmatprep.subr.bf16.mxu1 %v10039_v31 }
 0x7c0   : > { %8567 = vmatprep.subr.bf16.mxu0 %v10161_v46 }
 0x7c1   : > { %8516 = vmatmul.mubr.msk.bf16.vlgmr.msra.gmra.mrb[64].mxu1 %vm2052_vm10, %v10241_v62 }
 0x7c2   : > { %8552 = vmatmul.mubr.msk.bf16.vlgmr.msra.gmra.mrb[72].mxu0 %vm2052_vm10, %v10241_v62  ;;  %8532 = vmatpush3.bf16.msra.mxu1 %v10039_v31 }
 0x7c3   : > { %8539 = vmatprep.mubr.msk.bf16.mxu1 %vm2052_vm10, %v10239_v50  ;;  %8568 = vmatpush3.bf16.msra.mxu0 %v10161_v46 }
 0x7c4   : > { %8575 = vmatprep.mubr.msk.bf16.mxu0 %vm2052_vm10, %v10239_v50  ;;  %8533 = vmatprep.subr.bf16.mxu1 %v10053_v33 }
 0x7c5   : > { %8569 = vmatprep.subr.bf16.mxu0 %v10170_v47 }
 0x7c6   : > { %8534 = vmatpush3.bf16.msra.mxu1 %v10053_v33 }
 0x7c7   : > { %8570 = vmatpush3.bf16.msra.mxu0 %v10170_v47  ;;  %8535 = vmatprep.subr.bf16.mxu1 %v10075_v35 }
 0x7c8   : > { %8571 = vmatprep.subr.bf16.mxu0 %v10183_v48 }
 0x7ca   : > { %8536 = vmatpush3.bf16.msra.mxu1 %v10075_v35 }
 0x7cb   : > { %8572 = vmatpush3.bf16.msra.mxu0 %v10183_v48  ;;  %8537 = vmatprep.subr.bf16.mxu1 %v10089_v37 }
 0x7cc   : > { %8573 = vmatprep.subr.bf16.mxu0 %v10190_v49 }
 0x7ce   : > { %8538 = vmatpush3.bf16.msra.mxu1 %v10089_v37 }
 0x7cf   : > { %8574 = vmatpush3.bf16.msra.mxu0 %v10190_v49  ;;  %8555 = vmatprep.subr.bf16.mxu1 %v10103_v39 }
 0x7d1   : > { %8540 = vmatmul.mubr.msk.bf16.vlgmr.msra.gmra.mrb[68].mxu1 %vm2052_vm10, %v10241_v62 }
 0x7d2   : > { %8576 = vmatmul.mubr.msk.bf16.vlgmr.msra.gmra.mrb[76].mxu0 %vm2052_vm10, %v10241_v62  ;;  %8556 = vmatpush3.bf16.msra.mxu1 %v10103_v39 }
 0x7d3   : > { %8563 = vmatprep.mubr.msk.bf16.mxu1 %vm2052_vm10, %v10239_v50  ;;  %8557 = vmatprep.subr.bf16.mxu1 %v10119_v41  ;;  %v8715_v50 = vld [vmem:[%s12290_s13 + $0x18] ss:$12 sps:$4 sm:$0xff]  }
 0x7d4   : > { %8583 = vmatprep.mubr.msk.bf16.mxu0 %vm800_vm0, %v8711_v8  ;;  %v8724_v8 = vld [vmem:[%s12292_s15 + $0x24] ss:$8 sps:$4 sm:$0xff]  }
 0x7d6   : > { %8558 = vmatpush3.bf16.msra.mxu1 %v10119_v41 }
 0x7d7   : > { %8559 = vmatprep.subr.bf16.mxu1 %v10138_v43 }
 0x7da   : > { %8560 = vmatpush3.bf16.msra.mxu1 %v10138_v43 }
 0x7db   : > { %8561 = vmatprep.subr.bf16.mxu1 %v10153_v45 }
 0x7de   : > { %8562 = vmatpush3.bf16.msra.mxu1 %v10153_v45 }
 0x7e1   : > { %8564 = vmatmul.mubr.msk.bf16.vlgmr.msra.gmra.mrb[72].mxu1 %vm2052_vm10, %v10241_v62  ;;  %v8721_v62 = vld [vmem:[%s12292_s15 + $0x14] ss:$8 sps:$4 sm:$0xff]  }
 0x7e2   : > { %3551 = vmatprep.mubr.bf16.mxu1 %v8710_v7  ;;  %v8719_v7 = vld [vmem:[%s12292_s15 + $0x10] ss:$8 sps:$4 sm:$0xff]  }
 0x874   : > { %v8481_v9 = vpop.f32.mrb[56].mxu1  ;;  %v10340_v15 = vpop.f32.mrb[64].mxu0 }
 0x875   : > { %v3026_v17 = vpop.f32.mrb[57].mxu1  ;;  %v3128_v25 = vpop.f32.mrb[65].mxu0 }
 0x876   : > { %v8482_v27 = vpop.f32.mrb[58].mxu1  ;;  %v10342_v29 = vpop.f32.mrb[66].mxu0 }
 0x877   : > { %v3042_v30 = vpack.c.bf16 %v8482_v27, %v8481_v9  ;;  %v3144_v31 = vpack.c.bf16 %v10342_v29, %v10340_v15  ;;  %v3029_v32 = vpop.f32.mrb[59].mxu1  ;;  %v3131_v33 = vpop.f32.mrb[67].mxu0  ;;  %v8722_v9 = vld [vmem:[%s12292_s15 + $0x20] ss:$8 sps:$4 sm:$0xff]   ;;  %v8727_v15 = vld [vmem:[%s12292_s15 + $0x34] ss:$8 sps:$4 sm:$0xff]  }
 0x878   : > { %v3041_v34 = vpack.c.bf16 %v3029_v32, %v3026_v17  ;;  %v3143_v35 = vpack.c.bf16 %v3131_v33, %v3128_v25  ;;  %v8725_v17 = vld [vmem:[%s12292_s15 + $0x30] ss:$8 sps:$4 sm:$0xff]   ;;  %v8730_v25 = vld [vmem:[%s12293_s16 + $0x4] ss:$8 sps:$4 sm:$0xff]   ;;  %v8731_v27 = vld [vmem:[%s12293_s16 + $0x100] ss:$8 sps:$4 sm:$0xff]  }
 0x879   : > { %v8733_v29 = vld [vmem:[%s12293_s16 + $0x104] ss:$8 sps:$4 sm:$0xff]   ;;  %v8743_v33 = vld [vmem:[%s12293_s16 + $0x120] ss:$8 sps:$4 sm:$0xff]  }
 0x87a   : > { %v8745_v32 = vld [vmem:[%s12293_s16 + $0x124] ss:$8 sps:$4 sm:$0xff]  }
 0x884   : > { %v8493_v36 = vpop.f32.mrb[60].mxu1  ;;  %v8529_v37 = vpop.f32.mrb[68].mxu0 }
 0x885   : > { %v3077_v38 = vpop.f32.mrb[61].mxu1  ;;  %v3230_v39 = vpop.f32.mrb[69].mxu0 }
 0x886   : > { %v8494_v40 = vpop.f32.mrb[62].mxu1  ;;  %v8530_v41 = vpop.f32.mrb[70].mxu0 }
 0x887   : > { %v3093_v42 = vpack.c.bf16 %v8494_v40, %v8493_v36  ;;  %v3246_v43 = vpack.c.bf16 %v8530_v41, %v8529_v37  ;;  %v3080_v44 = vpop.f32.mrb[63].mxu1  ;;  %v3233_v45 = vpop.f32.mrb[71].mxu0  ;;  %v8757_v36 = vld [vmem:[%s12293_s16 + $0x144] ss:$8 sps:$4 sm:$0xff]   ;;  %v8755_v37 = vld [vmem:[%s12293_s16 + $0x140] ss:$8 sps:$4 sm:$0xff]  }
 0x888   : > { %v3092_v46 = vpack.c.bf16 %v3080_v44, %v3077_v38  ;;  %v3245_v47 = vpack.c.bf16 %v3233_v45, %v3230_v39  ;;  %v8763_v38 = vld [vmem:[%s12293_s16 + $0x154] ss:$8 sps:$4 sm:$0xff]   ;;  %v8761_v39 = vld [vmem:[%s12293_s16 + $0x150] ss:$8 sps:$4 sm:$0xff]   ;;  %v8769_v40 = vld [vmem:[%s12293_s16 + $0x164] ss:$8 sps:$4 sm:$0xff]  }
 0x889   : > { %v8767_v41 = vld [vmem:[%s12293_s16 + $0x160] ss:$8 sps:$4 sm:$0xff]   ;;  %v8781_v44 = vld [vmem:[%s12293_s16 + $0x184] ss:$8 sps:$4 sm:$0xff]  }
 0x88a   : > { %8247 = vmatprep.subr.bf16.mxu1 %v3245_v47  ;;  %v8779_v45 = vld [vmem:[%s12293_s16 + $0x180] ss:$8 sps:$4 sm:$0xff]   ;;  %v8785_v47 = vld [vmem:[%s12293_s16 + $0x190] ss:$8 sps:$4 sm:$0xff]  }
 0x88b   : > { %8248 = vmatpush3.bf16.msra.mxu1 %v3041_v34  ;;  %v8751_v34 = vld [vmem:[%s12293_s16 + $0x134] ss:$8 sps:$4 sm:$0xff]  }
 0x88c   : > { %8249 = vmatprep.subr.bf16.mxu1 %v3246_v43  ;;  %v8773_v43 = vld [vmem:[%s12293_s16 + $0x170] ss:$8 sps:$4 sm:$0xff]  }
 0x88f   : > { %8250 = vmatpush3.bf16.msra.mxu1 %v3042_v30  ;;  %v8739_v30 = vld [vmem:[%s12293_s16 + $0x114] ss:$8 sps:$4 sm:$0xff]  }
 0x894   : > { %v8517_v48 = vpop.f32.mrb[64].mxu1 }
 0x895   : > { %v8553_v49 = vpop.f32.mrb[72].mxu0  ;;  %v3179_v2 = vpop.f32.mrb[65].mxu1 }
 0x896   : > { %v3332_v51 = vpop.f32.mrb[73].mxu0  ;;  %v8518_v4 = vpop.f32.mrb[66].mxu1 }
 0x897   : > { %v3195_v63 = vpack.c.bf16 %v8518_v4, %v8517_v48  ;;  %v8554_v53 = vpop.f32.mrb[74].mxu0  ;;  %v3182_v59 = vpop.f32.mrb[67].mxu1  ;;  %v8793_v48 = vld [vmem:[%s12293_s16 + $0x1a4] ss:$8 sps:$4 sm:$0xff]  }
 0x898   : > { %v3348_v56 = vpack.c.bf16 %v8554_v53, %v8553_v49  ;;  %v3194_v21 = vpack.c.bf16 %v3182_v59, %v3179_v2  ;;  %v3335_v11 = vpop.f32.mrb[75].mxu0  ;;  %v8791_v49 = vld [vmem:[%s12293_s16 + $0x1a0] ss:$8 sps:$4 sm:$0xff]   ;;  %v8799_v2 = vld [vmem:[%s12293_s16 + $0x1b4] ss:$8 sps:$4 sm:$0xff]  }
 0x899   : > { %v3347_v18 = vpack.c.bf16 %v3335_v11, %v3332_v51  ;;  %v8797_v51 = vld [vmem:[%s12293_s16 + $0x1b0] ss:$8 sps:$4 sm:$0xff]   ;;  %v8805_v4 = vld [vmem:[%s12293_s16 + $0x1c4] ss:$8 sps:$4 sm:$0xff]   ;;  %v8803_v59 = vld [vmem:[%s12293_s16 + $0x1c0] ss:$8 sps:$4 sm:$0xff]  }
 0x8a4   : > { %v8541_v5 = vpop.f32.mrb[68].mxu1 }
 0x8a5   : > { %v8577_v16 = vpop.f32.mrb[76].mxu0  ;;  %v3281_v24 = vpop.f32.mrb[69].mxu1 }
 0x8a6   : > { %v3434_v26 = vpop.f32.mrb[77].mxu0  ;;  %v8542_v22 = vpop.f32.mrb[70].mxu1 }
 0x8a7   : > { %v3297_v12 = vpack.c.bf16 %v8542_v22, %v8541_v5  ;;  %v8578_v54 = vpop.f32.mrb[78].mxu0  ;;  %v3284_v55 = vpop.f32.mrb[71].mxu1  ;;  %v8817_v5 = vld [vmem:[%s12293_s16 + $0x1e4] ss:$8 sps:$4 sm:$0xff]  }
 0x8a8   : > { %v3450_v57 = vpack.c.bf16 %v8578_v54, %v8577_v16  ;;  %v3296_v28 = vpack.c.bf16 %v3284_v55, %v3281_v24  ;;  %v3437_v60 = vpop.f32.mrb[79].mxu0  ;;  %v8815_v16 = vld [vmem:[%s12293_s16 + $0x1e0] ss:$8 sps:$4 sm:$0xff]   ;;  %v3466_v54 = vpop.permute.xlu0 %3465 }
 0x8a9   : > { %v3449_v61 = vpack.c.bf16 %v3437_v60, %v3434_v26  ;;  %v3471_v60 = vpop.permute.xlu1 %3470 }
 0x8aa   : > { %8251 = vmatprep.subr.bf16.mxu1 %v3296_v28 }
 0x8ab   : > { %8579 = vmatprep.subr.bf16.mxu0 %v3449_v61  ;;  %8252 = vmatpush3.bf16.msra.mxu1 %v3092_v46  ;;  %v8787_v46 = vld [vmem:[%s12293_s16 + $0x194] ss:$8 sps:$4 sm:$0xff]  }
 0x8ac   : > { %8580 = vmatpush3.bf16.msra.mxu0 %v3449_v61  ;;  %8253 = vmatprep.subr.bf16.mxu1 %v3297_v12 }
 0x8ad   : > { %8581 = vmatprep.subr.bf16.mxu0 %v3450_v57 }
 0x8af   : > { %8254 = vmatpush3.bf16.msra.mxu1 %v3093_v42  ;;  %v8775_v42 = vld [vmem:[%s12293_s16 + $0x174] ss:$8 sps:$4 sm:$0xff]  }
 0x8b0   : > { %8582 = vmatpush3.bf16.msra.mxu0 %v3450_v57  ;;  %8255 = vmatprep.subr.bf16.mxu1 %v3347_v18  ;;  %v8809_v18 = vld [vmem:[%s12293_s16 + $0x1d0] ss:$8 sps:$4 sm:$0xff]  }
 0x8b1   : > { %3709 = vmatprep.subr.bf16.mxu0 %v8718_v52 }
 0x8b3   : > { %8256 = vmatpush3.bf16.msra.mxu1 %v3143_v35  ;;  %8584 = vmatmul.mubr.msk.bf16.vlgmr.msra.gmra.mrb[80].mxu0 %vm800_vm0, %v8712_v0  ;;  %v8749_v35 = vld [vmem:[%s12293_s16 + $0x130] ss:$8 sps:$4 sm:$0xff]  }
 0x8b4   : > { %v8565_v13 = vpop.f32.mrb[72].mxu1  ;;  %8257 = vmatprep.subr.bf16.mxu1 %v3348_v56  ;;  %3741 = vmatprep.mubr.bf16.mxu0 %v12338_v1 }
 0x8b5   : > { %v3383_v3 = vpop.f32.mrb[73].mxu1  ;;  %3710 = vmatpush1.bf16.msra.mxu0 %v8716_v58 }
 0x8b6   : > { %v8566_v14 = vpop.f32.mrb[74].mxu1  ;;  %3711 = vmatprep.subr.bf16.mxu0 %v8721_v62 }
 0x8b7   : > { %v3399_v10 = vpack.c.bf16 %v8566_v14, %v8565_v13  ;;  %v3386_v6 = vpop.f32.mrb[75].mxu1  ;;  %8258 = vmatpush3.bf16.msra.mxu1 %v3144_v31  ;;  %v8737_v31 = vld [vmem:[%s12293_s16 + $0x110] ss:$8 sps:$4 sm:$0xff]  }
 0x8b8   : > { %v3398_v19 = vpack.c.bf16 %v3386_v6, %v3383_v3 }
 0x8b9   : > { %3712 = vmatpush1.bf16.msra.mxu0 %v8719_v7 }
 0x8ba   : > { %8259 = vmatprep.subr.bf16.mxu1 %v3398_v19  ;;  %3713 = vmatprep.subr.bf16.mxu0 %v8724_v8  ;;  %v3481_v8 = vpop.permute.xlu1 %3480 }
 0x8bb   : > { %8260 = vmatpush3.bf16.msra.mxu1 %v3194_v21  ;;  %v8811_v21 = vld [vmem:[%s12293_s16 + $0x1d4] ss:$8 sps:$4 sm:$0xff]  }
 0x8bc   : > { %8261 = vmatprep.subr.bf16.mxu1 %v3399_v10 }
 0x8bd   : > { %3714 = vmatpush1.bf16.msra.mxu0 %v8722_v9 }
 0x8be   : > { %3715 = vmatprep.subr.bf16.mxu0 %v8727_v15 }
 0x8bf   : > { %8262 = vmatpush3.bf16.msra.mxu1 %v3195_v63 }
 0x8c0   : > { %4208 = vmatprep.subr.bf16.mxu1 %v8733_v29 }
 0x8c1   : > { %3716 = vmatpush1.bf16.msra.mxu0 %v8725_v17 }
 0x8c2   : > { %3552 = vmatmul.mubr.bf16.vlgmr.msra.gmra.mrb[76].mxu1 %v8708_v20  ;;  %3958 = vmatprep.subr.bf16.mxu0 %v8730_v25 }
 0x8c3   : > { %3559 = vmatprep.mubr.bf16.mxu1 %v8713_v23  ;;  %4209 = vmatpush1.bf16.msra.mxu1 %v8731_v27  ;;  %v3476_v23 = vpop.permute.xlu0 %3475 }
 0x8c4   : > { %4210 = vmatprep.subr.bf16.mxu1 %v8739_v30 }
 0x8c7   : > { %4211 = vmatpush1.bf16.msra.mxu1 %v8737_v31 }
 0x8c8   : > { %4212 = vmatprep.subr.bf16.mxu1 %v8745_v32 }
 0x8ca   : > { %3560 = vmatmul.mubr.bf16.gmra.mrb[80].mxu1 %v8715_v50 }
 0x8cb   : > { %4213 = vmatpush1.bf16.msra.mxu1 %v8743_v33 }
 0x8cc   : > { %4214 = vmatprep.subr.bf16.mxu1 %v8751_v34 }
 0x8cf   : > { %4215 = vmatpush1.bf16.msra.mxu1 %v8749_v35 }
 0x8d0   : > { %4216 = vmatprep.subr.bf16.mxu1 %v8757_v36 }
 0x8d3   : > { %4217 = vmatpush1.bf16.msra.mxu1 %v8755_v37 }
 0x8d4   : > { %4218 = vmatprep.subr.bf16.mxu1 %v8763_v38 }
 0x8d7   : > { %4219 = vmatpush1.bf16.msra.mxu1 %v8761_v39 }
 0x8d8   : > { %4220 = vmatprep.subr.bf16.mxu1 %v8769_v40 }
 0x8db   : > { %4221 = vmatpush1.bf16.msra.mxu1 %v8767_v41 }
 0x8dc   : > { %4222 = vmatprep.subr.bf16.mxu1 %v8775_v42 }
 0x8df   : > { %4223 = vmatpush1.bf16.msra.mxu1 %v8773_v43 }
 0x8e0   : > { %4224 = vmatprep.subr.bf16.mxu1 %v8781_v44 }
 0x8e3   : > { %4225 = vmatpush1.bf16.msra.mxu1 %v8779_v45 }
 0x8e4   : > { %4226 = vmatprep.subr.bf16.mxu1 %v8787_v46 }
 0x8e7   : > { %4227 = vmatpush1.bf16.msra.mxu1 %v8785_v47 }
 0x8e8   : > { %4228 = vmatprep.subr.bf16.mxu1 %v8793_v48 }
 0x8eb   : > { %4229 = vmatpush1.bf16.msra.mxu1 %v8791_v49 }
 0x8ec   : > { %4230 = vmatprep.subr.bf16.mxu1 %v8799_v2 }
 0x8ef   : > { %4231 = vmatpush1.bf16.msra.mxu1 %v8797_v51 }
 0x8f0   : > { %4232 = vmatprep.subr.bf16.mxu1 %v8805_v4 }
 0x8f3   : > { %4233 = vmatpush1.bf16.msra.mxu1 %v8803_v59  ;;  %v8728_v59 = vld [vmem:[%s12293_s16] ss:$8 sps:$4 sm:$0xff]  }
 0x8f4   : > { %4234 = vmatprep.subr.bf16.mxu1 %v8811_v21 }
 0x8f7   : > { %4235 = vmatpush1.bf16.msra.mxu1 %v8809_v18  ;;  %v8734_v18 = vld [vmem:[%s12293_s16 + $0x10] ss:$8 sps:$4 sm:$0xff]  }
 0x8f8   : > { %4236 = vmatprep.subr.bf16.mxu1 %v8817_v5  ;;  %v8742_v5 = vld [vmem:[%s12293_s16 + $0x24] ss:$8 sps:$4 sm:$0xff]  }
 0x8fb   : > { %4237 = vmatpush1.bf16.msra.mxu1 %v8815_v16  ;;  %v8740_v16 = vld [vmem:[%s12293_s16 + $0x20] ss:$8 sps:$4 sm:$0xff]  }
 0x986   : > { %v8585_v63 = vpop.f32.mrb[80].mxu0 }
 0x987   : > { %v3602_v53 = vpop.f32.mrb[81].mxu0 }
 0x988   : > { %v8586_v56 = vpop.f32.mrb[82].mxu0 }
 0x989   : > { %v3605_v11 = vpop.f32.mrb[83].mxu0 }
 0x995   : > { %v8263_v24 = vpop.f32.mrb[76].mxu1 }
 0x996   : > { %v8264_v26 = vpop.f32.mrb[77].mxu1 }
 0x997   : > { %v8265_v22 = vadd.f32 %v8264_v26, %v8263_v24  ;;  %v8266_v12 = vpop.f32.mrb[78].mxu1  ;;  %v8748_v24 = vld [vmem:[%s12293_s16 + $0x34] ss:$8 sps:$4 sm:$0xff]   ;;  %v8746_v26 = vld [vmem:[%s12293_s16 + $0x30] ss:$8 sps:$4 sm:$0xff]  }
 0x998   : > { %v8267_v55 = vpop.f32.mrb[79].mxu1 }
 0x999   : > { %v8268_v57 = vadd.f32 %v8267_v55, %v8266_v12  ;;  %v3554_v28 = vadd.f32 %v8265_v22, %v3466_v54  ;;  %v8754_v22 = vld [vmem:[%s12293_s16 + $0x44] ss:$8 sps:$4 sm:$0xff]   ;;  %v8752_v12 = vld [vmem:[%s12293_s16 + $0x40] ss:$8 sps:$4 sm:$0xff]   ;;  %v8760_v54 = vld [vmem:[%s12293_s16 + $0x54] ss:$8 sps:$4 sm:$0xff]  }
 0x99a   : > { %v8758_v55 = vld [vmem:[%s12293_s16 + $0x50] ss:$8 sps:$4 sm:$0xff]  }
 0x99b   : > { %v3603_v61 = vadd.f32 %v3602_v53, %v3554_v28  ;;  %v3557_v0 = vadd.f32 %v8268_v57, %v3471_v60  ;;  %v8766_v57 = vld [vmem:[%s12293_s16 + $0x64] ss:$8 sps:$4 sm:$0xff]   ;;  %v8764_v28 = vld [vmem:[%s12293_s16 + $0x60] ss:$8 sps:$4 sm:$0xff]   ;;  %v8772_v60 = vld [vmem:[%s12293_s16 + $0x74] ss:$8 sps:$4 sm:$0xff]  }
 0x99d   : > { %v3617_v13 = vmul.f32 %v3603_v61, %v3603_v61  ;;  %v3606_v3 = vadd.f32 %v3605_v11, %v3557_v0  ;;  %v8269_v14 = vpop.f32.mrb[80].mxu1  ;;  %v8736_v11 = vld [vmem:[%s12293_s16 + $0x14] ss:$8 sps:$4 sm:$0xff]   ;;  %v8778_v0 = vld [vmem:[%s12293_s16 + $0x84] ss:$8 sps:$4 sm:$0xff]  }
 0x99e   : > { %v8270_v10 = vpop.f32.mrb[81].mxu1 }
 0x99f   : > { %v3618_v6 = vmul.f32 %v3606_v3, %v3606_v3  ;;  %v8271_v19 = vadd.f32 %v8270_v10, %v8269_v14  ;;  %v8272_v20 = vpop.f32.mrb[82].mxu1  ;;  %v3621_v52 = vsel %vm2052_vm10, %v3617_v13, 0.0  ;;  %v8776_v13 = vld [vmem:[%s12293_s16 + $0x80] ss:$8 sps:$4 sm:$0xff]   ;;  %v8782_v14 = vld [vmem:[%s12293_s16 + $0x90] ss:$8 sps:$4 sm:$0xff]  }
 0x9a0   : > { %v8273_v50 = vpop.f32.mrb[83].mxu1  ;;  %v8790_v10 = vld [vmem:[%s12293_s16 + $0xa4] ss:$8 sps:$4 sm:$0xff]  }
 0x9a1   : > { %v3622_v58 = vsel %vm2052_vm10, %v3618_v6, 0.0  ;;  %v3562_v62 = vadd.f32 %v8271_v19, %v3476_v23  ;;  %v8274_v7 = vadd.f32 %v8273_v50, %v8272_v20  ;;  %v8788_v6 = vld [vmem:[%s12293_s16 + $0xa0] ss:$8 sps:$4 sm:$0xff]   ;;  %v8796_v19 = vld [vmem:[%s12293_s16 + $0xb4] ss:$8 sps:$4 sm:$0xff]  }
 0x9a2   : > { %v3623_v9 = vadd.f32 %v3622_v58, %v3621_v52  ;;  %v8794_v20 = vld [vmem:[%s12293_s16 + $0xb0] ss:$8 sps:$4 sm:$0xff]   ;;  %v8802_v23 = vld [vmem:[%s12293_s16 + $0xc4] ss:$8 sps:$4 sm:$0xff]   ;;  %v8800_v50 = vld [vmem:[%s12293_s16 + $0xc0] ss:$8 sps:$4 sm:$0xff]  }
 0x9a3   : > { %v3611_v15 = vadd.f32 %v8585_v63, %v3562_v62  ;;  %v3565_v17 = vadd.f32 %v8274_v7, %v3481_v8  ;;  %v8808_v52 = vld [vmem:[%s12293_s16 + $0xd4] ss:$8 sps:$4 sm:$0xff]   ;;  %v8806_v58 = vld [vmem:[%s12293_s16 + $0xd0] ss:$8 sps:$4 sm:$0xff]   ;;  %v8814_v62 = vld [vmem:[%s12293_s16 + $0xe4] ss:$8 sps:$4 sm:$0xff]  }
 0x9a4   : > { %v8812_v7 = vld [vmem:[%s12293_s16 + $0xe0] ss:$8 sps:$4 sm:$0xff]   ;;  %v8818_v8 = vld [vmem:[%s12293_s16 + $0xf0] ss:$8 sps:$4 sm:$0xff]  }
 0x9a5   : > { %v3619_v25 = vmul.f32 %v3611_v15, %v3611_v15  ;;  %v3614_v27 = vadd.f32 %v8586_v56, %v3565_v17  ;;  %v8823_v17 = vld [vmem:[%s12293_s16 + $0x1f4] ss:$8 sps:$4 sm:$0xff]  }
 0x9a6   : > { %4238 = vmatprep.subr.bf16.mxu1 %v8823_v17  ;;  %v8896_v17 = vld [vmem:[%s12293_s16 + $0x2c0] ss:$8 sps:$4 sm:$0xff]  }
 0x9a7   : > { %v3624_v29 = vsel %vm2052_vm10, %v3619_v25, 0.0  ;;  %v3620_v30 = vmul.f32 %v3614_v27, %v3614_v27  ;;  %v8826_v25 = vld [vmem:[%s12293_s16 + $0x204] ss:$8 sps:$4 sm:$0xff]  }
 0x9a8   : > { %v3625_v31 = vadd.f32 %v3624_v29, %v3623_v9  ;;  %v8820_v9 = vld [vmem:[%s12293_s16 + $0xf4] ss:$8 sps:$4 sm:$0xff]  }
 0x9a9   : > { %v3626_v32 = vsel %vm2052_vm10, %v3620_v30, 0.0 }
 0x9aa   : > { %v3627_v33 = vadd.f32 %v3626_v32, %v3625_v31 }
 0x9ac   : > { %v3628_v34 = vrot.slane %v3627_v33, 4 }
 0x9ae   : > { %v3629_v35 = vadd.f32 %v3628_v34, %v3627_v33 }
 0x9b0   : > { %v3630_v36 = vrot.slane %v3629_v35, 2 }
 0x9b2   : > { %v3631_v37 = vadd.f32 %v3630_v36, %v3629_v35  ;;  %v8824_v35 = vld [vmem:[%s12293_s16 + $0x200] ss:$8 sps:$4 sm:$0xff]  }
 0x9b3   : > { %v8827_v36 = vld [vmem:[%s12293_s16 + $0x300] ss:$8 sps:$4 sm:$0xff]  }
 0x9b4   : > { %v3632_v38 = vrot.slane %v3631_v37, 1 }
 0x9b6   : > { %v3633_v39 = vadd.f32 %v3632_v38, %v3631_v37  ;;  %v8832_v37 = vld [vmem:[%s12293_s16 + $0x214] ss:$8 sps:$4 sm:$0xff]  }
 0x9b7   : > { %v8835_v38 = vld [vmem:[%s12293_s16 + $0x314] ss:$8 sps:$4 sm:$0xff]  }
 0x9b8   : > { %v3634_v40 = vmul.f32 0.03125, %v3633_v39 }
 0x9ba   : > { %v3635_v41 = vadd.f32 1e-08, %v3634_v40  ;;  %v8830_v40 = vld [vmem:[%s12293_s16 + $0x210] ss:$8 sps:$4 sm:$0xff]  }
 0x9bc   : > { %9180 = vrsqrt.f32 %v3635_v41  ;;  %v8833_v41 = vld [vmem:[%s12293_s16 + $0x310] ss:$8 sps:$4 sm:$0xff]  }
 0x9c6   : > { %v9181_v42 = vpop.eup %9180 }
 0x9c7   : > { %v3640_v43 = vmul.f32 %v9181_v42, %v3614_v27  ;;  %v3637_v44 = vmul.f32 %v9181_v42, %v3603_v61  ;;  %v3638_v45 = vmul.f32 %v9181_v42, %v3606_v3  ;;  %v3639_v46 = vmul.f32 %v9181_v42, %v3611_v15  ;;  %v8770_v61 = vld [vmem:[%s12293_s16 + $0x70] ss:$8 sps:$4 sm:$0xff]   ;;  %v8784_v3 = vld [vmem:[%s12293_s16 + $0x94] ss:$8 sps:$4 sm:$0xff]   ;;  %v8829_v27 = vld [vmem:[%s12293_s16 + $0x304] ss:$8 sps:$4 sm:$0xff]  }
 0x9c8   : > { %v8821_v15 = vld [vmem:[%s12293_s16 + $0x1f0] ss:$8 sps:$4 sm:$0xff]  }
 0x9c9   : > { %v3648_v47 = vmul.f32 0.2, %v3640_v43  ;;  %vm3641_vm15 = vcmp.ge.f32.partialorder %v3637_v44, 0.0  ;;  %vm3642_vm1 = vcmp.ge.f32.partialorder %v3638_v45, 0.0  ;;  %v3645_v48 = vmul.f32 0.2, %v3637_v44  ;;  %4239 = vmatpush1.bf16.msra.mxu1 %v8821_v15 }
 0x9ca   : > { %v3646_v49 = vmul.f32 0.2, %v3638_v45  ;;  %vm3643_vm2 = vcmp.ge.f32.partialorder %v3639_v46, 0.0  ;;  %vm3644_vm3 = vcmp.ge.f32.partialorder %v3640_v43, 0.0  ;;  %v3647_v2 = vmul.f32 0.2, %v3639_v46  ;;  %4708 = vmatprep.subr.bf16.mxu1 %v8829_v27 }
 0x9cb   : > { %v3649_v51 = vsel %vm3641_vm15, %v3637_v44, %v3645_v48  ;;  %v3652_v4 = vsel %vm3644_vm3, %v3640_v43, %v3648_v47  ;;  %v8838_v43 = vld [vmem:[%s12293_s16 + $0x224] ss:$8 sps:$4 sm:$0xff]   ;;  %v8904_v27 = vld [vmem:[%s12293_s16 + $0x2d4] ss:$8 sps:$4 sm:$0xff]  }
 0x9cc   : > { %v3650_v63 = vsel %vm3642_vm1, %v3638_v45, %v3646_v49  ;;  %v3651_v53 = vsel %vm3643_vm2, %v3639_v46, %v3647_v2  ;;  %v8841_v44 = vld [vmem:[%s12293_s16 + $0x324] ss:$8 sps:$4 sm:$0xff]   ;;  %v8836_v49 = vld [vmem:[%s12293_s16 + $0x220] ss:$8 sps:$4 sm:$0xff]  }
 0x9cd   : > { %v3653_v56 = vpack.c.bf16 %v3650_v63, %v3649_v51  ;;  %v3654_v21 = vpack.c.bf16 %v3652_v4, %v3651_v53  ;;  %v8839_v2 = vld [vmem:[%s12293_s16 + $0x320] ss:$8 sps:$4 sm:$0xff]   ;;  %v8844_v51 = vld [vmem:[%s12293_s16 + $0x234] ss:$8 sps:$4 sm:$0xff]   ;;  %v8842_v63 = vld [vmem:[%s12293_s16 + $0x230] ss:$8 sps:$4 sm:$0xff]  }
 0x9ce   : > { %v8847_v4 = vld [vmem:[%s12293_s16 + $0x334] ss:$8 sps:$4 sm:$0xff]   ;;  %v8845_v53 = vld [vmem:[%s12293_s16 + $0x330] ss:$8 sps:$4 sm:$0xff]   ;;  %v8901_v15 = vld [vmem:[%s12293_s16 + $0x3c4] ss:$8 sps:$4 sm:$0xff]  }
 0x9cf   : > { %7417 = vmatmul.mubr.msk.bf16.vlgmr.msra.gmra.mrb[84].mxu0 %vm2052_vm10, %v3653_v56  ;;  %v8853_v56 = vld [vmem:[%s12293_s16 + $0x344] ss:$8 sps:$4 sm:$0xff]  }
 0x9d0   : > { %3751 = vmatprep.mubr.bf16.mxu0 %v12338_v1  ;;  %3959 = vmatpush1.bf16.msra.mxu0 %v8728_v59  ;;  %v8850_v59 = vld [vmem:[%s12293_s16 + $0x244] ss:$8 sps:$4 sm:$0xff]  }
 0x9d1   : > { %3960 = vmatprep.subr.bf16.mxu0 %v8736_v11  ;;  %v8851_v11 = vld [vmem:[%s12293_s16 + $0x340] ss:$8 sps:$4 sm:$0xff]  }
 0x9d4   : > { %3961 = vmatpush1.bf16.msra.mxu0 %v8734_v18  ;;  %v8856_v18 = vld [vmem:[%s12293_s16 + $0x254] ss:$8 sps:$4 sm:$0xff]  }
 0x9d5   : > { %3962 = vmatprep.subr.bf16.mxu0 %v8742_v5  ;;  %v8859_v5 = vld [vmem:[%s12293_s16 + $0x354] ss:$8 sps:$4 sm:$0xff]  }
 0x9d7   : > { %7418 = vmatmul.mubr.msk.bf16.gmra.mrb[88].mxu0 %vm2052_vm10, %v3654_v21  ;;  %v8848_v21 = vld [vmem:[%s12293_s16 + $0x240] ss:$8 sps:$4 sm:$0xff]  }
 0x9d8   : > { %3963 = vmatpush1.bf16.msra.mxu0 %v8740_v16  ;;  %v8854_v16 = vld [vmem:[%s12293_s16 + $0x250] ss:$8 sps:$4 sm:$0xff]  }
 0x9d9   : > { %3964 = vmatprep.subr.bf16.mxu0 %v8748_v24  ;;  %v8857_v24 = vld [vmem:[%s12293_s16 + $0x350] ss:$8 sps:$4 sm:$0xff]  }
 0x9dc   : > { %3965 = vmatpush1.bf16.msra.mxu0 %v8746_v26  ;;  %v8862_v26 = vld [vmem:[%s12293_s16 + $0x264] ss:$8 sps:$4 sm:$0xff]  }
 0x9dd   : > { %3966 = vmatprep.subr.bf16.mxu0 %v8754_v22  ;;  %v8865_v22 = vld [vmem:[%s12293_s16 + $0x364] ss:$8 sps:$4 sm:$0xff]  }
 0x9e0   : > { %3967 = vmatpush1.bf16.msra.mxu0 %v8752_v12  ;;  %v8860_v12 = vld [vmem:[%s12293_s16 + $0x260] ss:$8 sps:$4 sm:$0xff]  }
 0x9e1   : > { %3968 = vmatprep.subr.bf16.mxu0 %v8760_v54  ;;  %v8863_v54 = vld [vmem:[%s12293_s16 + $0x360] ss:$8 sps:$4 sm:$0xff]  }
 0x9e4   : > { %3969 = vmatpush1.bf16.msra.mxu0 %v8758_v55  ;;  %v8868_v55 = vld [vmem:[%s12293_s16 + $0x274] ss:$8 sps:$4 sm:$0xff]  }
 0x9e5   : > { %3970 = vmatprep.subr.bf16.mxu0 %v8766_v57  ;;  %v8871_v57 = vld [vmem:[%s12293_s16 + $0x374] ss:$8 sps:$4 sm:$0xff]  }
 0x9e8   : > { %3971 = vmatpush1.bf16.msra.mxu0 %v8764_v28  ;;  %v8866_v28 = vld [vmem:[%s12293_s16 + $0x270] ss:$8 sps:$4 sm:$0xff]  }
 0x9e9   : > { %3972 = vmatprep.subr.bf16.mxu0 %v8772_v60  ;;  %v8869_v60 = vld [vmem:[%s12293_s16 + $0x370] ss:$8 sps:$4 sm:$0xff]  }
 0x9ec   : > { %3973 = vmatpush1.bf16.msra.mxu0 %v8770_v61  ;;  %v8874_v61 = vld [vmem:[%s12293_s16 + $0x284] ss:$8 sps:$4 sm:$0xff]  }
 0x9ed   : > { %3974 = vmatprep.subr.bf16.mxu0 %v8778_v0  ;;  %v8877_v0 = vld [vmem:[%s12293_s16 + $0x384] ss:$8 sps:$4 sm:$0xff]  }
 0x9f0   : > { %3975 = vmatpush1.bf16.msra.mxu0 %v8776_v13  ;;  %v8872_v13 = vld [vmem:[%s12293_s16 + $0x280] ss:$8 sps:$4 sm:$0xff]  }
 0x9f1   : > { %3976 = vmatprep.subr.bf16.mxu0 %v8784_v3  ;;  %v8875_v3 = vld [vmem:[%s12293_s16 + $0x380] ss:$8 sps:$4 sm:$0xff]  }
 0x9f4   : > { %3977 = vmatpush1.bf16.msra.mxu0 %v8782_v14  ;;  %v8880_v14 = vld [vmem:[%s12293_s16 + $0x294] ss:$8 sps:$4 sm:$0xff]  }
 0x9f5   : > { %3978 = vmatprep.subr.bf16.mxu0 %v8790_v10  ;;  %v8883_v10 = vld [vmem:[%s12293_s16 + $0x394] ss:$8 sps:$4 sm:$0xff]  }
 0x9f8   : > { %3979 = vmatpush1.bf16.msra.mxu0 %v8788_v6  ;;  %v8878_v6 = vld [vmem:[%s12293_s16 + $0x290] ss:$8 sps:$4 sm:$0xff]  }
 0x9f9   : > { %3980 = vmatprep.subr.bf16.mxu0 %v8796_v19  ;;  %v8881_v19 = vld [vmem:[%s12293_s16 + $0x390] ss:$8 sps:$4 sm:$0xff]  }
 0x9fc   : > { %3981 = vmatpush1.bf16.msra.mxu0 %v8794_v20  ;;  %v8886_v20 = vld [vmem:[%s12293_s16 + $0x2a4] ss:$8 sps:$4 sm:$0xff]  }
 0x9fd   : > { %3982 = vmatprep.subr.bf16.mxu0 %v8802_v23  ;;  %v8889_v23 = vld [vmem:[%s12293_s16 + $0x3a4] ss:$8 sps:$4 sm:$0xff]  }
 0xa00   : > { %3983 = vmatpush1.bf16.msra.mxu0 %v8800_v50  ;;  %v8884_v50 = vld [vmem:[%s12293_s16 + $0x2a0] ss:$8 sps:$4 sm:$0xff]  }
 0xa01   : > { %3984 = vmatprep.subr.bf16.mxu0 %v8808_v52  ;;  %v8887_v52 = vld [vmem:[%s12293_s16 + $0x3a0] ss:$8 sps:$4 sm:$0xff]  }
 0xa04   : > { %3985 = vmatpush1.bf16.msra.mxu0 %v8806_v58  ;;  %v8892_v58 = vld [vmem:[%s12293_s16 + $0x2b4] ss:$8 sps:$4 sm:$0xff]  }
 0xa05   : > { %3986 = vmatprep.subr.bf16.mxu0 %v8814_v62  ;;  %v8895_v62 = vld [vmem:[%s12293_s16 + $0x3b4] ss:$8 sps:$4 sm:$0xff]  }
 0xa08   : > { %3987 = vmatpush1.bf16.msra.mxu0 %v8812_v7  ;;  %v8890_v7 = vld [vmem:[%s12293_s16 + $0x2b0] ss:$8 sps:$4 sm:$0xff]  }
 0xa09   : > { %3988 = vmatprep.subr.bf16.mxu0 %v8820_v9  ;;  %v8898_v9 = vld [vmem:[%s12293_s16 + $0x2c4] ss:$8 sps:$4 sm:$0xff]  }
 0xa0c   : > { %3989 = vmatpush1.bf16.msra.mxu0 %v8818_v8  ;;  %v8893_v8 = vld [vmem:[%s12293_s16 + $0x3b0] ss:$8 sps:$4 sm:$0xff]  }
 0xa0d   : > { %4458 = vmatprep.subr.bf16.mxu0 %v8826_v25  ;;  %v8899_v25 = vld [vmem:[%s12293_s16 + $0x3c0] ss:$8 sps:$4 sm:$0xff]  }
 0xaa2   : > { %v3743_v29 = vpop.f32.mrb[84].mxu0 }
 0xaa3   : > { %v3745_v30 = vpop.f32.mrb[85].mxu0 }
 0xaa4   : > { %v3747_v31 = vpop.f32.mrb[86].mxu0 }
 0xaa5   : > { %v10592_v32 = vpack.c.bf16 %v3747_v31, %v3743_v29  ;;  %v3749_v33 = vpop.f32.mrb[87].mxu0  ;;  %v8907_v29 = vld [vmem:[%s12293_s16 + $0x3d4] ss:$8 sps:$4 sm:$0xff]   ;;  %v8905_v31 = vld [vmem:[%s12293_s16 + $0x3d0] ss:$8 sps:$4 sm:$0xff]  }
 0xaa6   : > { %v10594_v34 = vpack.c.bf16 %v3749_v33, %v3745_v30  ;;  %v8902_v30 = vld [vmem:[%s12293_s16 + $0x2d0] ss:$8 sps:$4 sm:$0xff]   ;;  %v8910_v33 = vld [vmem:[%s12293_s16 + $0x2e4] ss:$8 sps:$4 sm:$0xff]  }
 0xaa8   : > { %3990 = vmatprep.mubr.bf16.mxu0 %v10594_v34  ;;  %4240 = vmatprep.mubr.bf16.mxu1 %v10594_v34 }
 0xaa9   : > { %3991 = vmatmul.mubr.bf16.vlgmr.msra.gmra.mrb[92].mxu0 %v10592_v32  ;;  %4241 = vmatmul.mubr.bf16.vlgmr.msra.gmra.mrb[84].mxu1 %v10592_v32 }
 0xaaa   : > { %4459 = vmatpush1.bf16.msra.mxu0 %v8824_v35  ;;  %4709 = vmatpush1.bf16.msra.mxu1 %v8827_v36  ;;  %v3753_v39 = vpop.f32.mrb[88].mxu0  ;;  %v8913_v35 = vld [vmem:[%s12293_s16 + $0x3e4] ss:$8 sps:$4 sm:$0xff]   ;;  %v8908_v36 = vld [vmem:[%s12293_s16 + $0x2e0] ss:$8 sps:$4 sm:$0xff]  }
 0xaab   : > { %v3755_v42 = vpop.f32.mrb[89].mxu0  ;;  %4460 = vmatprep.subr.bf16.mxu0 %v8832_v37  ;;  %4710 = vmatprep.subr.bf16.mxu1 %v8835_v38  ;;  %v8911_v37 = vld [vmem:[%s12293_s16 + $0x3e0] ss:$8 sps:$4 sm:$0xff]   ;;  %v8916_v38 = vld [vmem:[%s12293_s16 + $0x2f4] ss:$8 sps:$4 sm:$0xff]  }
 0xaac   : > { %v3757_v45 = vpop.f32.mrb[90].mxu0 }
 0xaad   : > { %v10624_v46 = vpack.c.bf16 %v3757_v45, %v3753_v39  ;;  %v3759_v47 = vpop.f32.mrb[91].mxu0  ;;  %v8919_v39 = vld [vmem:[%s12293_s16 + $0x3f4] ss:$8 sps:$4 sm:$0xff]   ;;  %v8923_v45 = vld [vmem:[%s12293_s16 + $0x500] ss:$8 sps:$4 sm:$0xff]  }
 0xaae   : > { %v10626_v48 = vpack.c.bf16 %v3759_v47, %v3755_v42  ;;  %4461 = vmatpush1.bf16.msra.mxu0 %v8830_v40  ;;  %4711 = vmatpush1.bf16.msra.mxu1 %v8833_v41  ;;  %v8914_v40 = vld [vmem:[%s12293_s16 + $0x2f0] ss:$8 sps:$4 sm:$0xff]   ;;  %v8922_v42 = vld [vmem:[%s12293_s16 + $0x404] ss:$8 sps:$4 sm:$0xff]   ;;  %v8928_v47 = vld [vmem:[%s12293_s16 + $0x414] ss:$8 sps:$4 sm:$0xff]  }
 0xaaf   : > { %4462 = vmatprep.subr.bf16.mxu0 %v8838_v43  ;;  %4712 = vmatprep.subr.bf16.mxu1 %v8841_v44  ;;  %v8917_v41 = vld [vmem:[%s12293_s16 + $0x3f0] ss:$8 sps:$4 sm:$0xff]   ;;  %v8925_v43 = vld [vmem:[%s12293_s16 + $0x504] ss:$8 sps:$4 sm:$0xff]   ;;  %v8920_v44 = vld [vmem:[%s12293_s16 + $0x400] ss:$8 sps:$4 sm:$0xff]  }
 0xab0   : > { %4000 = vmatprep.mubr.bf16.mxu0 %v10626_v48  ;;  %4250 = vmatprep.mubr.bf16.mxu1 %v10626_v48 }
 0xab1   : > { %4001 = vmatmul.mubr.bf16.gmra.mrb[96].mxu0 %v10624_v46  ;;  %4251 = vmatmul.mubr.bf16.gmra.mrb[88].mxu1 %v10624_v46 }
 0xab2   : > { %4463 = vmatpush1.bf16.msra.mxu0 %v8836_v49  ;;  %4713 = vmatpush1.bf16.msra.mxu1 %v8839_v2  ;;  %v8931_v49 = vld [vmem:[%s12293_s16 + $0x514] ss:$8 sps:$4 sm:$0xff]   ;;  %v8926_v2 = vld [vmem:[%s12293_s16 + $0x410] ss:$8 sps:$4 sm:$0xff]  }
 0xab3   : > { %4490 = vmatprep.mubr.bf16.mxu0 %v10594_v34  ;;  %4740 = vmatprep.mubr.bf16.mxu1 %v10594_v34 }
 0xab4   : > { %4464 = vmatprep.subr.bf16.mxu0 %v8844_v51  ;;  %4714 = vmatprep.subr.bf16.mxu1 %v8847_v4  ;;  %v8929_v51 = vld [vmem:[%s12293_s16 + $0x510] ss:$8 sps:$4 sm:$0xff]   ;;  %v8934_v4 = vld [vmem:[%s12293_s16 + $0x424] ss:$8 sps:$4 sm:$0xff]  }
 0xab6   : > { %4465 = vmatpush1.bf16.msra.mxu0 %v8842_v63  ;;  %4715 = vmatpush1.bf16.msra.mxu1 %v8845_v53  ;;  %v8937_v63 = vld [vmem:[%s12293_s16 + $0x524] ss:$8 sps:$4 sm:$0xff]   ;;  %v8932_v53 = vld [vmem:[%s12293_s16 + $0x420] ss:$8 sps:$4 sm:$0xff]  }
 0xab7   : > { %4466 = vmatprep.subr.bf16.mxu0 %v8850_v59  ;;  %4716 = vmatprep.subr.bf16.mxu1 %v8853_v56  ;;  %v8935_v59 = vld [vmem:[%s12293_s16 + $0x520] ss:$8 sps:$4 sm:$0xff]   ;;  %v8940_v56 = vld [vmem:[%s12293_s16 + $0x434] ss:$8 sps:$4 sm:$0xff]  }
 0xaba   : > { %4467 = vmatpush1.bf16.msra.mxu0 %v8848_v21  ;;  %4717 = vmatpush1.bf16.msra.mxu1 %v8851_v11  ;;  %v8943_v21 = vld [vmem:[%s12293_s16 + $0x534] ss:$8 sps:$4 sm:$0xff]   ;;  %v8938_v11 = vld [vmem:[%s12293_s16 + $0x430] ss:$8 sps:$4 sm:$0xff]  }
 0xabb   : > { %4468 = vmatprep.subr.bf16.mxu0 %v8856_v18  ;;  %4718 = vmatprep.subr.bf16.mxu1 %v8859_v5  ;;  %v8941_v18 = vld [vmem:[%s12293_s16 + $0x530] ss:$8 sps:$4 sm:$0xff]   ;;  %v8946_v5 = vld [vmem:[%s12293_s16 + $0x444] ss:$8 sps:$4 sm:$0xff]  }
 0xabe   : > { %4469 = vmatpush1.bf16.msra.mxu0 %v8854_v16  ;;  %4719 = vmatpush1.bf16.msra.mxu1 %v8857_v24  ;;  %v8949_v16 = vld [vmem:[%s12293_s16 + $0x544] ss:$8 sps:$4 sm:$0xff]   ;;  %v8944_v24 = vld [vmem:[%s12293_s16 + $0x440] ss:$8 sps:$4 sm:$0xff]  }
 0xabf   : > { %4470 = vmatprep.subr.bf16.mxu0 %v8862_v26  ;;  %4720 = vmatprep.subr.bf16.mxu1 %v8865_v22  ;;  %v8947_v26 = vld [vmem:[%s12293_s16 + $0x540] ss:$8 sps:$4 sm:$0xff]   ;;  %v8952_v22 = vld [vmem:[%s12293_s16 + $0x454] ss:$8 sps:$4 sm:$0xff]  }
 0xac2   : > { %4471 = vmatpush1.bf16.msra.mxu0 %v8860_v12  ;;  %4721 = vmatpush1.bf16.msra.mxu1 %v8863_v54  ;;  %v8955_v12 = vld [vmem:[%s12293_s16 + $0x554] ss:$8 sps:$4 sm:$0xff]   ;;  %v8950_v54 = vld [vmem:[%s12293_s16 + $0x450] ss:$8 sps:$4 sm:$0xff]  }
 0xac3   : > { %4472 = vmatprep.subr.bf16.mxu0 %v8868_v55  ;;  %4722 = vmatprep.subr.bf16.mxu1 %v8871_v57  ;;  %v8953_v55 = vld [vmem:[%s12293_s16 + $0x550] ss:$8 sps:$4 sm:$0xff]   ;;  %v8958_v57 = vld [vmem:[%s12293_s16 + $0x464] ss:$8 sps:$4 sm:$0xff]  }
 0xac6   : > { %4473 = vmatpush1.bf16.msra.mxu0 %v8866_v28  ;;  %4723 = vmatpush1.bf16.msra.mxu1 %v8869_v60  ;;  %v8961_v28 = vld [vmem:[%s12293_s16 + $0x564] ss:$8 sps:$4 sm:$0xff]   ;;  %v8956_v60 = vld [vmem:[%s12293_s16 + $0x460] ss:$8 sps:$4 sm:$0xff]  }
 0xac7   : > { %4474 = vmatprep.subr.bf16.mxu0 %v8874_v61  ;;  %4724 = vmatprep.subr.bf16.mxu1 %v8877_v0  ;;  %v8959_v61 = vld [vmem:[%s12293_s16 + $0x560] ss:$8 sps:$4 sm:$0xff]   ;;  %v8964_v0 = vld [vmem:[%s12293_s16 + $0x474] ss:$8 sps:$4 sm:$0xff]  }
 0xaca   : > { %4475 = vmatpush1.bf16.msra.mxu0 %v8872_v13  ;;  %4725 = vmatpush1.bf16.msra.mxu1 %v8875_v3  ;;  %v8967_v13 = vld [vmem:[%s12293_s16 + $0x574] ss:$8 sps:$4 sm:$0xff]   ;;  %v8962_v3 = vld [vmem:[%s12293_s16 + $0x470] ss:$8 sps:$4 sm:$0xff]  }
 0xacb   : > { %4476 = vmatprep.subr.bf16.mxu0 %v8880_v14  ;;  %4726 = vmatprep.subr.bf16.mxu1 %v8883_v10  ;;  %v8965_v14 = vld [vmem:[%s12293_s16 + $0x570] ss:$8 sps:$4 sm:$0xff]   ;;  %v8970_v10 = vld [vmem:[%s12293_s16 + $0x484] ss:$8 sps:$4 sm:$0xff]  }
 0xace   : > { %4477 = vmatpush1.bf16.msra.mxu0 %v8878_v6  ;;  %4727 = vmatpush1.bf16.msra.mxu1 %v8881_v19  ;;  %v8973_v6 = vld [vmem:[%s12293_s16 + $0x584] ss:$8 sps:$4 sm:$0xff]   ;;  %v8968_v19 = vld [vmem:[%s12293_s16 + $0x480] ss:$8 sps:$4 sm:$0xff]  }
 0xacf   : > { %4478 = vmatprep.subr.bf16.mxu0 %v8886_v20  ;;  %4728 = vmatprep.subr.bf16.mxu1 %v8889_v23  ;;  %v8971_v20 = vld [vmem:[%s12293_s16 + $0x580] ss:$8 sps:$4 sm:$0xff]   ;;  %v8976_v23 = vld [vmem:[%s12293_s16 + $0x494] ss:$8 sps:$4 sm:$0xff]  }
 0xad2   : > { %4479 = vmatpush1.bf16.msra.mxu0 %v8884_v50  ;;  %4729 = vmatpush1.bf16.msra.mxu1 %v8887_v52  ;;  %v8979_v50 = vld [vmem:[%s12293_s16 + $0x594] ss:$8 sps:$4 sm:$0xff]   ;;  %v8974_v52 = vld [vmem:[%s12293_s16 + $0x490] ss:$8 sps:$4 sm:$0xff]  }
 0xad3   : > { %4480 = vmatprep.subr.bf16.mxu0 %v8892_v58  ;;  %4730 = vmatprep.subr.bf16.mxu1 %v8895_v62  ;;  %v8977_v58 = vld [vmem:[%s12293_s16 + $0x590] ss:$8 sps:$4 sm:$0xff]   ;;  %v8982_v62 = vld [vmem:[%s12293_s16 + $0x4a4] ss:$8 sps:$4 sm:$0xff]  }
 0xad6   : > { %4481 = vmatpush1.bf16.msra.mxu0 %v8890_v7  ;;  %4731 = vmatpush1.bf16.msra.mxu1 %v8893_v8  ;;  %v8985_v7 = vld [vmem:[%s12293_s16 + $0x5a4] ss:$8 sps:$4 sm:$0xff]   ;;  %v8980_v8 = vld [vmem:[%s12293_s16 + $0x4a0] ss:$8 sps:$4 sm:$0xff]  }
 0xad7   : > { %4482 = vmatprep.subr.bf16.mxu0 %v8898_v9  ;;  %4732 = vmatprep.subr.bf16.mxu1 %v8901_v15  ;;  %v8983_v9 = vld [vmem:[%s12293_s16 + $0x5a0] ss:$8 sps:$4 sm:$0xff]   ;;  %v8988_v15 = vld [vmem:[%s12293_s16 + $0x4b4] ss:$8 sps:$4 sm:$0xff]  }
 0xada   : > { %4483 = vmatpush1.bf16.msra.mxu0 %v8896_v17  ;;  %4733 = vmatpush1.bf16.msra.mxu1 %v8899_v25  ;;  %v8991_v17 = vld [vmem:[%s12293_s16 + $0x5b4] ss:$8 sps:$4 sm:$0xff]   ;;  %v8986_v25 = vld [vmem:[%s12293_s16 + $0x4b0] ss:$8 sps:$4 sm:$0xff]  }
 0xadb   : > { %4484 = vmatprep.subr.bf16.mxu0 %v8904_v27  ;;  %4734 = vmatprep.subr.bf16.mxu1 %v8907_v29  ;;  %v8989_v27 = vld [vmem:[%s12293_s16 + $0x5b0] ss:$8 sps:$4 sm:$0xff]   ;;  %v8994_v29 = vld [vmem:[%s12293_s16 + $0x4c4] ss:$8 sps:$4 sm:$0xff]  }
 0xade   : > { %4485 = vmatpush1.bf16.msra.mxu0 %v8902_v30  ;;  %4735 = vmatpush1.bf16.msra.mxu1 %v8905_v31  ;;  %v8997_v30 = vld [vmem:[%s12293_s16 + $0x5c4] ss:$8 sps:$4 sm:$0xff]   ;;  %v8992_v31 = vld [vmem:[%s12293_s16 + $0x4c0] ss:$8 sps:$4 sm:$0xff]  }
 0xadf   : > { %4486 = vmatprep.subr.bf16.mxu0 %v8910_v33  ;;  %4736 = vmatprep.subr.bf16.mxu1 %v8913_v35  ;;  %v8995_v33 = vld [vmem:[%s12293_s16 + $0x5c0] ss:$8 sps:$4 sm:$0xff]   ;;  %v9000_v35 = vld [vmem:[%s12293_s16 + $0x4d4] ss:$8 sps:$4 sm:$0xff]  }
 0xae2   : > { %4487 = vmatpush1.bf16.msra.mxu0 %v8908_v36  ;;  %4737 = vmatpush1.bf16.msra.mxu1 %v8911_v37  ;;  %v9003_v36 = vld [vmem:[%s12293_s16 + $0x5d4] ss:$8 sps:$4 sm:$0xff]   ;;  %v8998_v37 = vld [vmem:[%s12293_s16 + $0x4d0] ss:$8 sps:$4 sm:$0xff]  }
 0xae3   : > { %4488 = vmatprep.subr.bf16.mxu0 %v8916_v38  ;;  %4738 = vmatprep.subr.bf16.mxu1 %v8919_v39  ;;  %v9001_v38 = vld [vmem:[%s12293_s16 + $0x5d0] ss:$8 sps:$4 sm:$0xff]   ;;  %v9006_v39 = vld [vmem:[%s12293_s16 + $0x4e4] ss:$8 sps:$4 sm:$0xff]  }
 0xae6   : > { %4489 = vmatpush1.bf16.msra.mxu0 %v8914_v40  ;;  %4739 = vmatpush1.bf16.msra.mxu1 %v8917_v41  ;;  %v9009_v40 = vld [vmem:[%s12293_s16 + $0x5e4] ss:$8 sps:$4 sm:$0xff]   ;;  %v9004_v41 = vld [vmem:[%s12293_s16 + $0x4e0] ss:$8 sps:$4 sm:$0xff]  }
 0xae7   : > { %4958 = vmatprep.subr.bf16.mxu0 %v8922_v42  ;;  %5208 = vmatprep.subr.bf16.mxu1 %v8925_v43  ;;  %v9007_v42 = vld [vmem:[%s12293_s16 + $0x5e0] ss:$8 sps:$4 sm:$0xff]   ;;  %v9012_v43 = vld [vmem:[%s12293_s16 + $0x4f4] ss:$8 sps:$4 sm:$0xff]  }
 0xae9   : > { %4491 = vmatmul.mubr.bf16.vlgmr.msra.gmra.mrb[100].mxu0 %v10592_v32  ;;  %4741 = vmatmul.mubr.bf16.vlgmr.msra.gmra.mrb[92].mxu1 %v10592_v32 }
 0xaea   : > { %4500 = vmatprep.mubr.bf16.mxu0 %v10626_v48  ;;  %4750 = vmatprep.mubr.bf16.mxu1 %v10626_v48 }
 0xaeb   : > { %4959 = vmatpush1.bf16.msra.mxu0 %v8920_v44  ;;  %5209 = vmatpush1.bf16.msra.mxu1 %v8923_v45  ;;  %v9015_v44 = vld [vmem:[%s12293_s16 + $0x5f4] ss:$8 sps:$4 sm:$0xff]   ;;  %v9010_v45 = vld [vmem:[%s12293_s16 + $0x4f0] ss:$8 sps:$4 sm:$0xff]  }
 0xaec   : > { %4960 = vmatprep.subr.bf16.mxu0 %v8928_v47  ;;  %5210 = vmatprep.subr.bf16.mxu1 %v8931_v49  ;;  %v9013_v47 = vld [vmem:[%s12293_s16 + $0x5f0] ss:$8 sps:$4 sm:$0xff]   ;;  %v9018_v49 = vld [vmem:[%s12293_s16 + $0x604] ss:$8 sps:$4 sm:$0xff]  }
 0xaef   : > { %4961 = vmatpush1.bf16.msra.mxu0 %v8926_v2  ;;  %5211 = vmatpush1.bf16.msra.mxu1 %v8929_v51  ;;  %v9021_v2 = vld [vmem:[%s12293_s16 + $0x704] ss:$8 sps:$4 sm:$0xff]   ;;  %v9016_v51 = vld [vmem:[%s12293_s16 + $0x600] ss:$8 sps:$4 sm:$0xff]  }
 0xaf0   : > { %4962 = vmatprep.subr.bf16.mxu0 %v8934_v4  ;;  %5212 = vmatprep.subr.bf16.mxu1 %v8937_v63  ;;  %v9019_v4 = vld [vmem:[%s12293_s16 + $0x700] ss:$8 sps:$4 sm:$0xff]   ;;  %v9024_v63 = vld [vmem:[%s12293_s16 + $0x614] ss:$8 sps:$4 sm:$0xff]  }
 0xaf1   : > { %4501 = vmatmul.mubr.bf16.gmra.mrb[104].mxu0 %v10624_v46  ;;  %4751 = vmatmul.mubr.bf16.gmra.mrb[96].mxu1 %v10624_v46 }
 0xaf2   : > { %4990 = vmatprep.mubr.bf16.mxu0 %v10594_v34  ;;  %5240 = vmatprep.mubr.bf16.mxu1 %v10594_v34 }
 0xaf3   : > { %4963 = vmatpush1.bf16.msra.mxu0 %v8932_v53  ;;  %5213 = vmatpush1.bf16.msra.mxu1 %v8935_v59  ;;  %v9027_v53 = vld [vmem:[%s12293_s16 + $0x714] ss:$8 sps:$4 sm:$0xff]   ;;  %v9022_v59 = vld [vmem:[%s12293_s16 + $0x610] ss:$8 sps:$4 sm:$0xff]  }
 0xaf4   : > { %4964 = vmatprep.subr.bf16.mxu0 %v8940_v56  ;;  %5214 = vmatprep.subr.bf16.mxu1 %v8943_v21  ;;  %v9025_v56 = vld [vmem:[%s12293_s16 + $0x710] ss:$8 sps:$4 sm:$0xff]   ;;  %v9030_v21 = vld [vmem:[%s12293_s16 + $0x624] ss:$8 sps:$4 sm:$0xff]  }
 0xaf7   : > { %4965 = vmatpush1.bf16.msra.mxu0 %v8938_v11  ;;  %5215 = vmatpush1.bf16.msra.mxu1 %v8941_v18  ;;  %v9033_v11 = vld [vmem:[%s12293_s16 + $0x724] ss:$8 sps:$4 sm:$0xff]   ;;  %v9028_v18 = vld [vmem:[%s12293_s16 + $0x620] ss:$8 sps:$4 sm:$0xff]  }
 0xaf8   : > { %4966 = vmatprep.subr.bf16.mxu0 %v8946_v5  ;;  %5216 = vmatprep.subr.bf16.mxu1 %v8949_v16  ;;  %v9031_v5 = vld [vmem:[%s12293_s16 + $0x720] ss:$8 sps:$4 sm:$0xff]   ;;  %v9036_v16 = vld [vmem:[%s12293_s16 + $0x634] ss:$8 sps:$4 sm:$0xff]  }
 0xafb   : > { %4967 = vmatpush1.bf16.msra.mxu0 %v8944_v24  ;;  %5217 = vmatpush1.bf16.msra.mxu1 %v8947_v26  ;;  %v9039_v24 = vld [vmem:[%s12293_s16 + $0x734] ss:$8 sps:$4 sm:$0xff]   ;;  %v9034_v26 = vld [vmem:[%s12293_s16 + $0x630] ss:$8 sps:$4 sm:$0xff]  }
 0xafc   : > { %4968 = vmatprep.subr.bf16.mxu0 %v8952_v22  ;;  %5218 = vmatprep.subr.bf16.mxu1 %v8955_v12  ;;  %v9037_v22 = vld [vmem:[%s12293_s16 + $0x730] ss:$8 sps:$4 sm:$0xff]   ;;  %v9042_v12 = vld [vmem:[%s12293_s16 + $0x644] ss:$8 sps:$4 sm:$0xff]  }
 0xaff   : > { %4969 = vmatpush1.bf16.msra.mxu0 %v8950_v54  ;;  %5219 = vmatpush1.bf16.msra.mxu1 %v8953_v55  ;;  %v9045_v54 = vld [vmem:[%s12293_s16 + $0x744] ss:$8 sps:$4 sm:$0xff]   ;;  %v9040_v55 = vld [vmem:[%s12293_s16 + $0x640] ss:$8 sps:$4 sm:$0xff]  }
 0xb00   : > { %4970 = vmatprep.subr.bf16.mxu0 %v8958_v57  ;;  %5220 = vmatprep.subr.bf16.mxu1 %v8961_v28  ;;  %v9043_v57 = vld [vmem:[%s12293_s16 + $0x740] ss:$8 sps:$4 sm:$0xff]   ;;  %v9048_v28 = vld [vmem:[%s12293_s16 + $0x654] ss:$8 sps:$4 sm:$0xff]  }
 0xb03   : > { %4971 = vmatpush1.bf16.msra.mxu0 %v8956_v60  ;;  %5221 = vmatpush1.bf16.msra.mxu1 %v8959_v61  ;;  %v9051_v60 = vld [vmem:[%s12293_s16 + $0x754] ss:$8 sps:$4 sm:$0xff]   ;;  %v9046_v61 = vld [vmem:[%s12293_s16 + $0x650] ss:$8 sps:$4 sm:$0xff]  }
 0xb04   : > { %4972 = vmatprep.subr.bf16.mxu0 %v8964_v0  ;;  %5222 = vmatprep.subr.bf16.mxu1 %v8967_v13  ;;  %v9049_v0 = vld [vmem:[%s12293_s16 + $0x750] ss:$8 sps:$4 sm:$0xff]   ;;  %v9054_v13 = vld [vmem:[%s12293_s16 + $0x664] ss:$8 sps:$4 sm:$0xff]  }
 0xb07   : > { %4973 = vmatpush1.bf16.msra.mxu0 %v8962_v3  ;;  %5223 = vmatpush1.bf16.msra.mxu1 %v8965_v14  ;;  %v9057_v3 = vld [vmem:[%s12293_s16 + $0x764] ss:$8 sps:$4 sm:$0xff]   ;;  %v9052_v14 = vld [vmem:[%s12293_s16 + $0x660] ss:$8 sps:$4 sm:$0xff]  }
 0xb08   : > { %4974 = vmatprep.subr.bf16.mxu0 %v8970_v10  ;;  %5224 = vmatprep.subr.bf16.mxu1 %v8973_v6  ;;  %v9055_v10 = vld [vmem:[%s12293_s16 + $0x760] ss:$8 sps:$4 sm:$0xff]   ;;  %v9060_v6 = vld [vmem:[%s12293_s16 + $0x674] ss:$8 sps:$4 sm:$0xff]  }
 0xb0b   : > { %4975 = vmatpush1.bf16.msra.mxu0 %v8968_v19  ;;  %5225 = vmatpush1.bf16.msra.mxu1 %v8971_v20  ;;  %v9063_v19 = vld [vmem:[%s12293_s16 + $0x774] ss:$8 sps:$4 sm:$0xff]   ;;  %v9058_v20 = vld [vmem:[%s12293_s16 + $0x670] ss:$8 sps:$4 sm:$0xff]  }
 0xb0c   : > { %4976 = vmatprep.subr.bf16.mxu0 %v8976_v23  ;;  %5226 = vmatprep.subr.bf16.mxu1 %v8979_v50  ;;  %v9061_v23 = vld [vmem:[%s12293_s16 + $0x770] ss:$8 sps:$4 sm:$0xff]   ;;  %v9066_v50 = vld [vmem:[%s12293_s16 + $0x684] ss:$8 sps:$4 sm:$0xff]  }
 0xb0f   : > { %4977 = vmatpush1.bf16.msra.mxu0 %v8974_v52  ;;  %5227 = vmatpush1.bf16.msra.mxu1 %v8977_v58  ;;  %v9069_v52 = vld [vmem:[%s12293_s16 + $0x784] ss:$8 sps:$4 sm:$0xff]   ;;  %v9064_v58 = vld [vmem:[%s12293_s16 + $0x680] ss:$8 sps:$4 sm:$0xff]  }
 0xb10   : > { %4978 = vmatprep.subr.bf16.mxu0 %v8982_v62  ;;  %5228 = vmatprep.subr.bf16.mxu1 %v8985_v7  ;;  %v9067_v62 = vld [vmem:[%s12293_s16 + $0x780] ss:$8 sps:$4 sm:$0xff]   ;;  %v9072_v7 = vld [vmem:[%s12293_s16 + $0x694] ss:$8 sps:$4 sm:$0xff]  }
 0xb13   : > { %4979 = vmatpush1.bf16.msra.mxu0 %v8980_v8  ;;  %5229 = vmatpush1.bf16.msra.mxu1 %v8983_v9  ;;  %v9075_v8 = vld [vmem:[%s12293_s16 + $0x794] ss:$8 sps:$4 sm:$0xff]   ;;  %v9070_v9 = vld [vmem:[%s12293_s16 + $0x690] ss:$8 sps:$4 sm:$0xff]  }
 0xb14   : > { %4980 = vmatprep.subr.bf16.mxu0 %v8988_v15  ;;  %5230 = vmatprep.subr.bf16.mxu1 %v8991_v17  ;;  %v9073_v15 = vld [vmem:[%s12293_s16 + $0x790] ss:$8 sps:$4 sm:$0xff]   ;;  %v9078_v17 = vld [vmem:[%s12293_s16 + $0x6a4] ss:$8 sps:$4 sm:$0xff]  }
 0xb17   : > { %4981 = vmatpush1.bf16.msra.mxu0 %v8986_v25  ;;  %5231 = vmatpush1.bf16.msra.mxu1 %v8989_v27  ;;  %v9081_v25 = vld [vmem:[%s12293_s16 + $0x7a4] ss:$8 sps:$4 sm:$0xff]   ;;  %v9076_v27 = vld [vmem:[%s12293_s16 + $0x6a0] ss:$8 sps:$4 sm:$0xff]  }
 0xb18   : > { %4982 = vmatprep.subr.bf16.mxu0 %v8994_v29  ;;  %5232 = vmatprep.subr.bf16.mxu1 %v8997_v30  ;;  %v9079_v29 = vld [vmem:[%s12293_s16 + $0x7a0] ss:$8 sps:$4 sm:$0xff]   ;;  %v9084_v30 = vld [vmem:[%s12293_s16 + $0x6b4] ss:$8 sps:$4 sm:$0xff]  }
 0xb1b   : > { %4983 = vmatpush1.bf16.msra.mxu0 %v8992_v31  ;;  %5233 = vmatpush1.bf16.msra.mxu1 %v8995_v33  ;;  %v9087_v31 = vld [vmem:[%s12293_s16 + $0x7b4] ss:$8 sps:$4 sm:$0xff]   ;;  %v9082_v33 = vld [vmem:[%s12293_s16 + $0x6b0] ss:$8 sps:$4 sm:$0xff]  }
 0xb1c   : > { %4984 = vmatprep.subr.bf16.mxu0 %v9000_v35  ;;  %5234 = vmatprep.subr.bf16.mxu1 %v9003_v36  ;;  %v9085_v35 = vld [vmem:[%s12293_s16 + $0x7b0] ss:$8 sps:$4 sm:$0xff]   ;;  %v9090_v36 = vld [vmem:[%s12293_s16 + $0x6c4] ss:$8 sps:$4 sm:$0xff]  }
 0xb1f   : > { %4985 = vmatpush1.bf16.msra.mxu0 %v8998_v37  ;;  %5235 = vmatpush1.bf16.msra.mxu1 %v9001_v38  ;;  %v9093_v37 = vld [vmem:[%s12293_s16 + $0x7c4] ss:$8 sps:$4 sm:$0xff]   ;;  %v9088_v38 = vld [vmem:[%s12293_s16 + $0x6c0] ss:$8 sps:$4 sm:$0xff]  }
 0xb20   : > { %4986 = vmatprep.subr.bf16.mxu0 %v9006_v39  ;;  %5236 = vmatprep.subr.bf16.mxu1 %v9009_v40  ;;  %v9091_v39 = vld [vmem:[%s12293_s16 + $0x7c0] ss:$8 sps:$4 sm:$0xff]   ;;  %v9096_v40 = vld [vmem:[%s12293_s16 + $0x6d4] ss:$8 sps:$4 sm:$0xff]  }
 0xb23   : > { %4987 = vmatpush1.bf16.msra.mxu0 %v9004_v41  ;;  %5237 = vmatpush1.bf16.msra.mxu1 %v9007_v42  ;;  %v9099_v41 = vld [vmem:[%s12293_s16 + $0x7d4] ss:$8 sps:$4 sm:$0xff]   ;;  %v9094_v42 = vld [vmem:[%s12293_s16 + $0x6d0] ss:$8 sps:$4 sm:$0xff]  }
 0xb24   : > { %4988 = vmatprep.subr.bf16.mxu0 %v9012_v43  ;;  %5238 = vmatprep.subr.bf16.mxu1 %v9015_v44  ;;  %v9097_v43 = vld [vmem:[%s12293_s16 + $0x7d0] ss:$8 sps:$4 sm:$0xff]   ;;  %v9102_v44 = vld [vmem:[%s12293_s16 + $0x6e4] ss:$8 sps:$4 sm:$0xff]  }
 0xb27   : > { %4989 = vmatpush1.bf16.msra.mxu0 %v9010_v45  ;;  %5239 = vmatpush1.bf16.msra.mxu1 %v9013_v47  ;;  %v9105_v45 = vld [vmem:[%s12293_s16 + $0x7e4] ss:$8 sps:$4 sm:$0xff]   ;;  %v9100_v47 = vld [vmem:[%s12293_s16 + $0x6e0] ss:$8 sps:$4 sm:$0xff]  }
 0xb28   : > { %5458 = vmatprep.subr.bf16.mxu0 %v9018_v49  ;;  %5708 = vmatprep.subr.bf16.mxu1 %v9021_v2  ;;  %v9103_v49 = vld [vmem:[%s12293_s16 + $0x7e0] ss:$8 sps:$4 sm:$0xff]   ;;  %v9108_v2 = vld [vmem:[%s12293_s16 + $0x6f4] ss:$8 sps:$4 sm:$0xff]  }
 0xb2a   : > { %4991 = vmatmul.mubr.bf16.vlgmr.msra.gmra.mrb[108].mxu0 %v10592_v32  ;;  %5241 = vmatmul.mubr.bf16.vlgmr.msra.gmra.mrb[100].mxu1 %v10592_v32 }
 0xb2b   : > { %5000 = vmatprep.mubr.bf16.mxu0 %v10626_v48  ;;  %5250 = vmatprep.mubr.bf16.mxu1 %v10626_v48 }
 0xb2c   : > { %5459 = vmatpush1.bf16.msra.mxu0 %v9016_v51  ;;  %5709 = vmatpush1.bf16.msra.mxu1 %v9019_v4  ;;  %v9111_v51 = vld [vmem:[%s12293_s16 + $0x7f4] ss:$8 sps:$4 sm:$0xff]   ;;  %v9106_v4 = vld [vmem:[%s12293_s16 + $0x6f0] ss:$8 sps:$4 sm:$0xff]  }
 0xb2d   : > { %5460 = vmatprep.subr.bf16.mxu0 %v9024_v63  ;;  %5710 = vmatprep.subr.bf16.mxu1 %v9027_v53  ;;  %v9109_v63 = vld [vmem:[%s12293_s16 + $0x7f0] ss:$8 sps:$4 sm:$0xff]   ;;  %v9114_v53 = vld [vmem:[%s12293_s16 + $0x804] ss:$8 sps:$4 sm:$0xff]  }
 0xb30   : > { %5461 = vmatpush1.bf16.msra.mxu0 %v9022_v59  ;;  %5711 = vmatpush1.bf16.msra.mxu1 %v9025_v56  ;;  %v9112_v59 = vld [vmem:[%s12293_s16 + $0x800] ss:$8 sps:$4 sm:$0xff]   ;;  %v9117_v56 = vld [vmem:[%s12293_s16 + $0x814] ss:$8 sps:$4 sm:$0xff]  }
 0xb31   : > { %5462 = vmatprep.subr.bf16.mxu0 %v9030_v21  ;;  %5712 = vmatprep.subr.bf16.mxu1 %v9033_v11  ;;  %v9115_v21 = vld [vmem:[%s12293_s16 + $0x810] ss:$8 sps:$4 sm:$0xff]   ;;  %v9120_v11 = vld [vmem:[%s12293_s16 + $0x824] ss:$8 sps:$4 sm:$0xff]  }
 0xb32   : > { %5001 = vmatmul.mubr.bf16.gmra.mrb[112].mxu0 %v10624_v46  ;;  %5251 = vmatmul.mubr.bf16.gmra.mrb[104].mxu1 %v10624_v46 }
 0xb33   : > { %5490 = vmatprep.mubr.bf16.mxu0 %v10594_v34  ;;  %5740 = vmatprep.mubr.bf16.mxu1 %v10594_v34 }
 0xb34   : > { %5463 = vmatpush1.bf16.msra.mxu0 %v9028_v18  ;;  %5713 = vmatpush1.bf16.msra.mxu1 %v9031_v5  ;;  %v9118_v18 = vld [vmem:[%s12293_s16 + $0x820] ss:$8 sps:$4 sm:$0xff]   ;;  %v9123_v5 = vld [vmem:[%s12293_s16 + $0x834] ss:$8 sps:$4 sm:$0xff]  }
 0xb35   : > { %5464 = vmatprep.subr.bf16.mxu0 %v9036_v16  ;;  %5714 = vmatprep.subr.bf16.mxu1 %v9039_v24  ;;  %v9121_v16 = vld [vmem:[%s12293_s16 + $0x830] ss:$8 sps:$4 sm:$0xff]   ;;  %v9126_v24 = vld [vmem:[%s12293_s16 + $0x844] ss:$8 sps:$4 sm:$0xff]  }
 0xb38   : > { %5465 = vmatpush1.bf16.msra.mxu0 %v9034_v26  ;;  %5715 = vmatpush1.bf16.msra.mxu1 %v9037_v22  ;;  %v9124_v26 = vld [vmem:[%s12293_s16 + $0x840] ss:$8 sps:$4 sm:$0xff]   ;;  %v9129_v22 = vld [vmem:[%s12293_s16 + $0x854] ss:$8 sps:$4 sm:$0xff]  }
 0xb39   : > { %5466 = vmatprep.subr.bf16.mxu0 %v9042_v12  ;;  %5716 = vmatprep.subr.bf16.mxu1 %v9045_v54 }
 0xb3c   : > { %5467 = vmatpush1.bf16.msra.mxu0 %v9040_v55  ;;  %5717 = vmatpush1.bf16.msra.mxu1 %v9043_v57  ;;  %v9127_v55 = vld [vmem:[%s12293_s16 + $0x850] ss:$8 sps:$4 sm:$0xff]  }
 0xb3d   : > { %5468 = vmatprep.subr.bf16.mxu0 %v9048_v28  ;;  %5718 = vmatprep.subr.bf16.mxu1 %v9051_v60 }
 0xb40   : > { %5469 = vmatpush1.bf16.msra.mxu0 %v9046_v61  ;;  %5719 = vmatpush1.bf16.msra.mxu1 %v9049_v0  ;;  %v9132_v0 = vld [vmem:[%s12293_s16 + $0x864] ss:$8 sps:$4 sm:$0xff]  }
 0xb41   : > { %5470 = vmatprep.subr.bf16.mxu0 %v9054_v13  ;;  %5720 = vmatprep.subr.bf16.mxu1 %v9057_v3 }
 0xb44   : > { %5471 = vmatpush1.bf16.msra.mxu0 %v9052_v14  ;;  %5721 = vmatpush1.bf16.msra.mxu1 %v9055_v10 }
 0xb45   : > { %5472 = vmatprep.subr.bf16.mxu0 %v9060_v6  ;;  %5722 = vmatprep.subr.bf16.mxu1 %v9063_v19 }
 0xb48   : > { %5473 = vmatpush1.bf16.msra.mxu0 %v9058_v20  ;;  %5723 = vmatpush1.bf16.msra.mxu1 %v9061_v23  ;;  %v9130_v20 = vld [vmem:[%s12293_s16 + $0x860] ss:$8 sps:$4 sm:$0xff]   ;;  %v9135_v23 = vld [vmem:[%s12293_s16 + $0x874] ss:$8 sps:$4 sm:$0xff]  }
 0xb49   : > { %5474 = vmatprep.subr.bf16.mxu0 %v9066_v50  ;;  %5724 = vmatprep.subr.bf16.mxu1 %v9069_v52 }
 0xb4c   : > { %5475 = vmatpush1.bf16.msra.mxu0 %v9064_v58  ;;  %5725 = vmatpush1.bf16.msra.mxu1 %v9067_v62  ;;  %v9133_v58 = vld [vmem:[%s12293_s16 + $0x870] ss:$8 sps:$4 sm:$0xff]  }
 0xb4d   : > { %5476 = vmatprep.subr.bf16.mxu0 %v9072_v7  ;;  %5726 = vmatprep.subr.bf16.mxu1 %v9075_v8 }
 0xb50   : > { %5477 = vmatpush1.bf16.msra.mxu0 %v9070_v9  ;;  %5727 = vmatpush1.bf16.msra.mxu1 %v9073_v15  ;;  %v9138_v15 = vld [vmem:[%s12293_s16 + $0x884] ss:$8 sps:$4 sm:$0xff]  }
 0xb51   : > { %5478 = vmatprep.subr.bf16.mxu0 %v9078_v17  ;;  %5728 = vmatprep.subr.bf16.mxu1 %v9081_v25 }
 0xb54   : > { %5479 = vmatpush1.bf16.msra.mxu0 %v9076_v27  ;;  %5729 = vmatpush1.bf16.msra.mxu1 %v9079_v29 }
 0xb55   : > { %5480 = vmatprep.subr.bf16.mxu0 %v9084_v30  ;;  %5730 = vmatprep.subr.bf16.mxu1 %v9087_v31 }
 0xb58   : > { %5481 = vmatpush1.bf16.msra.mxu0 %v9082_v33  ;;  %5731 = vmatpush1.bf16.msra.mxu1 %v9085_v35  ;;  %v9136_v33 = vld [vmem:[%s12293_s16 + $0x880] ss:$8 sps:$4 sm:$0xff]   ;;  %v9141_v35 = vld [vmem:[%s12293_s16 + $0x894] ss:$8 sps:$4 sm:$0xff]  }
 0xb59   : > { %5482 = vmatprep.subr.bf16.mxu0 %v9090_v36  ;;  %5732 = vmatprep.subr.bf16.mxu1 %v9093_v37  ;;  %v9139_v36 = vld [vmem:[%s12293_s16 + $0x890] ss:$8 sps:$4 sm:$0xff]   ;;  %v9144_v37 = vld [vmem:[%s12293_s16 + $0x8a4] ss:$8 sps:$4 sm:$0xff]  }
 0xb5c   : > { %5483 = vmatpush1.bf16.msra.mxu0 %v9088_v38  ;;  %5733 = vmatpush1.bf16.msra.mxu1 %v9091_v39  ;;  %v9142_v38 = vld [vmem:[%s12293_s16 + $0x8a0] ss:$8 sps:$4 sm:$0xff]   ;;  %v9147_v39 = vld [vmem:[%s12293_s16 + $0x8b4] ss:$8 sps:$4 sm:$0xff]  }
 0xb5d   : > { %5484 = vmatprep.subr.bf16.mxu0 %v9096_v40  ;;  %5734 = vmatprep.subr.bf16.mxu1 %v9099_v41  ;;  %v9145_v40 = vld [vmem:[%s12293_s16 + $0x8b0] ss:$8 sps:$4 sm:$0xff]   ;;  %v9150_v41 = vld [vmem:[%s12293_s16 + $0x8c4] ss:$8 sps:$4 sm:$0xff]  }
 0xb60   : > { %5485 = vmatpush1.bf16.msra.mxu0 %v9094_v42  ;;  %5735 = vmatpush1.bf16.msra.mxu1 %v9097_v43  ;;  %v9148_v42 = vld [vmem:[%s12293_s16 + $0x8c0] ss:$8 sps:$4 sm:$0xff]   ;;  %v9153_v43 = vld [vmem:[%s12293_s16 + $0x8d4] ss:$8 sps:$4 sm:$0xff]  }
 0xb61   : > { %5486 = vmatprep.subr.bf16.mxu0 %v9102_v44  ;;  %5736 = vmatprep.subr.bf16.mxu1 %v9105_v45  ;;  %v9151_v44 = vld [vmem:[%s12293_s16 + $0x8d0] ss:$8 sps:$4 sm:$0xff]   ;;  %v9156_v45 = vld [vmem:[%s12293_s16 + $0x8e4] ss:$8 sps:$4 sm:$0xff]  }
 0xb64   : > { %5487 = vmatpush1.bf16.msra.mxu0 %v9100_v47  ;;  %5737 = vmatpush1.bf16.msra.mxu1 %v9103_v49  ;;  %v9154_v47 = vld [vmem:[%s12293_s16 + $0x8e0] ss:$8 sps:$4 sm:$0xff]   ;;  %v9159_v49 = vld [vmem:[%s12293_s16 + $0x8f4] ss:$8 sps:$4 sm:$0xff]  }
 0xb65   : > { %5488 = vmatprep.subr.bf16.mxu0 %v9108_v2  ;;  %5738 = vmatprep.subr.bf16.mxu1 %v9111_v51  ;;  %v9157_v2 = vld [vmem:[%s12293_s16 + $0x8f0] ss:$8 sps:$4 sm:$0xff]   ;;  %v9190_v51 = vld [vmem:[%s12293_s16 + $0x4] ss:$8 sps:$4 sm:$0xff]  }
 0xb68   : > { %5489 = vmatpush1.bf16.msra.mxu0 %v9106_v4  ;;  %5739 = vmatpush1.bf16.msra.mxu1 %v9109_v63  ;;  %v9191_v4 = vld [vmem:[%s12293_s16] ss:$8 sps:$4 sm:$0xff]   ;;  %v9192_v63 = vld [vmem:[%s12293_s16 + $0x14] ss:$8 sps:$4 sm:$0xff]  }
 0xb69   : > { %5958 = vmatprep.subr.bf16.mxu0 %v9114_v53  ;;  %v9193_v53 = vld [vmem:[%s12293_s16 + $0x10] ss:$8 sps:$4 sm:$0xff]  }
 0xb6b   : > { %5491 = vmatmul.mubr.bf16.vlgmr.msra.gmra.mrb[116].mxu0 %v10592_v32  ;;  %5741 = vmatmul.mubr.bf16.vlgmr.msra.gmra.mrb[108].mxu1 %v10592_v32 }
 0xb6c   : > { %5500 = vmatprep.mubr.bf16.mxu0 %v10626_v48  ;;  %5750 = vmatprep.mubr.bf16.mxu1 %v10626_v48 }
 0xb6d   : > { %5959 = vmatpush1.bf16.msra.mxu0 %v9112_v59  ;;  %v9194_v59 = vld [vmem:[%s12293_s16 + $0x24] ss:$8 sps:$4 sm:$0xff]  }
 0xb6e   : > { %5960 = vmatprep.subr.bf16.mxu0 %v9117_v56  ;;  %v9195_v56 = vld [vmem:[%s12293_s16 + $0x20] ss:$8 sps:$4 sm:$0xff]  }
 0xb71   : > { %5961 = vmatpush1.bf16.msra.mxu0 %v9115_v21  ;;  %v9196_v21 = vld [vmem:[%s12293_s16 + $0x34] ss:$8 sps:$4 sm:$0xff]  }
 0xb72   : > { %5962 = vmatprep.subr.bf16.mxu0 %v9120_v11  ;;  %v9197_v11 = vld [vmem:[%s12293_s16 + $0x30] ss:$8 sps:$4 sm:$0xff]  }
 0xb73   : > { %5501 = vmatmul.mubr.bf16.gmra.mrb[120].mxu0 %v10624_v46  ;;  %5751 = vmatmul.mubr.bf16.gmra.mrb[112].mxu1 %v10624_v46 }
 0xb74   : > { %5990 = vmatprep.mubr.bf16.mxu0 %v10594_v34 }
 0xb75   : > { %5963 = vmatpush1.bf16.msra.mxu0 %v9118_v18  ;;  %v9198_v18 = vld [vmem:[%s12293_s16 + $0x44] ss:$8 sps:$4 sm:$0xff]  }
 0xb76   : > { %5964 = vmatprep.subr.bf16.mxu0 %v9123_v5 }
 0xb79   : > { %5965 = vmatpush1.bf16.msra.mxu0 %v9121_v16 }
 0xb7a   : > { %5966 = vmatprep.subr.bf16.mxu0 %v9126_v24 }
 0xb7c   : > { %v3992_v12 = vpop.f32.mrb[92].mxu0  ;;  %v4242_v54 = vpop.f32.mrb[84].mxu1 }
 0xb7d   : > { %5967 = vmatpush1.bf16.msra.mxu0 %v9124_v26  ;;  %v3994_v57 = vpop.f32.mrb[93].mxu0  ;;  %v4244_v28 = vpop.f32.mrb[85].mxu1 }
 0xb7e   : > { %5968 = vmatprep.subr.bf16.mxu0 %v9129_v22  ;;  %v3996_v60 = vpop.f32.mrb[94].mxu0  ;;  %v4246_v61 = vpop.f32.mrb[86].mxu1  ;;  %v9199_v22 = vld [vmem:[%s12293_s16 + $0x40] ss:$8 sps:$4 sm:$0xff]  }
 0xb7f   : > { %v4011_v13 = vpack.c.bf16 %v3996_v60, %v3992_v12  ;;  %v4261_v3 = vpack.c.bf16 %v4246_v61, %v4242_v54  ;;  %v3998_v14 = vpop.f32.mrb[95].mxu0  ;;  %v4248_v10 = vpop.f32.mrb[87].mxu1 }
 0xb80   : > { %v4012_v6 = vpack.c.bf16 %v3998_v14, %v3994_v57  ;;  %v4262_v19 = vpack.c.bf16 %v4248_v10, %v4244_v28  ;;  %v9202_v14 = vld [vmem:[%s12293_s16 + $0x64] ss:$8 sps:$4 sm:$0xff]  }
 0xb81   : > { %5969 = vmatpush1.bf16.msra.mxu0 %v9127_v55  ;;  %v9200_v55 = vld [vmem:[%s12293_s16 + $0x54] ss:$8 sps:$4 sm:$0xff]  }
 0xb82   : > { %5970 = vmatprep.subr.bf16.mxu0 %v9132_v0  ;;  %6083 = vmatprep.subr.bf16.mxu1 %v4012_v6 }
 0xb83   : > { %6084 = vmatpush1.bf16.msra.mxu1 %v4011_v13 }
 0xb84   : > { %v4002_v50 = vpop.f32.mrb[96].mxu0  ;;  %v4252_v52 = vpop.f32.mrb[88].mxu1 }
 0xb85   : > { %5971 = vmatpush1.bf16.msra.mxu0 %v9130_v20  ;;  %v4004_v62 = vpop.f32.mrb[97].mxu0  ;;  %v4254_v7 = vpop.f32.mrb[89].mxu1 }
 0xb86   : > { %5972 = vmatprep.subr.bf16.mxu0 %v9135_v23  ;;  %v4006_v8 = vpop.f32.mrb[98].mxu0  ;;  %v4256_v9 = vpop.f32.mrb[90].mxu1  ;;  %v9203_v23 = vld [vmem:[%s12293_s16 + $0x60] ss:$8 sps:$4 sm:$0xff]  }
 0xb87   : > { %v4013_v17 = vpack.c.bf16 %v4006_v8, %v4002_v50  ;;  %v4263_v25 = vpack.c.bf16 %v4256_v9, %v4252_v52  ;;  %v4008_v27 = vpop.f32.mrb[99].mxu0  ;;  %v4258_v29 = vpop.f32.mrb[91].mxu1 }
 0xb88   : > { %v4014_v30 = vpack.c.bf16 %v4008_v27, %v4004_v62  ;;  %v4264_v31 = vpack.c.bf16 %v4258_v29, %v4254_v7  ;;  %v9206_v27 = vld [vmem:[%s12293_s16 + $0x84] ss:$8 sps:$4 sm:$0xff]   ;;  %v9207_v29 = vld [vmem:[%s12293_s16 + $0x80] ss:$8 sps:$4 sm:$0xff]  }
 0xb89   : > { %5973 = vmatpush1.bf16.msra.mxu0 %v9133_v58  ;;  %v9204_v58 = vld [vmem:[%s12293_s16 + $0x74] ss:$8 sps:$4 sm:$0xff]  }
 0xb8a   : > { %5974 = vmatprep.subr.bf16.mxu0 %v9138_v15  ;;  %6085 = vmatprep.subr.bf16.mxu1 %v4014_v30  ;;  %v9208_v30 = vld [vmem:[%s12293_s16 + $0x94] ss:$8 sps:$4 sm:$0xff]  }
 0xb8b   : > { %6086 = vmatpush1.bf16.msra.mxu1 %v4013_v17 }
 0xb8c   : > { %6087 = vmatprep.subr.bf16.mxu1 %v4262_v19 }
 0xb8d   : > { %5975 = vmatpush1.bf16.msra.mxu0 %v9136_v33  ;;  %v9210_v33 = vld [vmem:[%s12293_s16 + $0xa4] ss:$8 sps:$4 sm:$0xff]  }
 0xb8e   : > { %5976 = vmatprep.subr.bf16.mxu0 %v9141_v35  ;;  %v9211_v35 = vld [vmem:[%s12293_s16 + $0xa0] ss:$8 sps:$4 sm:$0xff]  }
 0xb8f   : > { %6088 = vmatpush1.bf16.msra.mxu1 %v4261_v3  ;;  %v9201_v3 = vld [vmem:[%s12293_s16 + $0x50] ss:$8 sps:$4 sm:$0xff]  }
 0xb90   : > { %6089 = vmatprep.subr.bf16.mxu1 %v4264_v31  ;;  %v9209_v31 = vld [vmem:[%s12293_s16 + $0x90] ss:$8 sps:$4 sm:$0xff]  }
 0xb91   : > { %5977 = vmatpush1.bf16.msra.mxu0 %v9139_v36  ;;  %v9212_v36 = vld [vmem:[%s12293_s16 + $0xb4] ss:$8 sps:$4 sm:$0xff]  }
 0xb92   : > { %5978 = vmatprep.subr.bf16.mxu0 %v9144_v37  ;;  %v9213_v37 = vld [vmem:[%s12293_s16 + $0xb0] ss:$8 sps:$4 sm:$0xff]  }
 0xb93   : > { %6090 = vmatpush1.bf16.msra.mxu1 %v4263_v25  ;;  %v9205_v25 = vld [vmem:[%s12293_s16 + $0x70] ss:$8 sps:$4 sm:$0xff]  }
 0xb95   : > { %5979 = vmatpush1.bf16.msra.mxu0 %v9142_v38  ;;  %v9214_v38 = vld [vmem:[%s12293_s16 + $0xc4] ss:$8 sps:$4 sm:$0xff]  }
 0xb96   : > { %5980 = vmatprep.subr.bf16.mxu0 %v9147_v39  ;;  %v9215_v39 = vld [vmem:[%s12293_s16 + $0xc0] ss:$8 sps:$4 sm:$0xff]  }
 0xb99   : > { %5981 = vmatpush1.bf16.msra.mxu0 %v9145_v40  ;;  %v9216_v40 = vld [vmem:[%s12293_s16 + $0xd4] ss:$8 sps:$4 sm:$0xff]  }
 0xb9a   : > { %5982 = vmatprep.subr.bf16.mxu0 %v9150_v41  ;;  %v9217_v41 = vld [vmem:[%s12293_s16 + $0xd0] ss:$8 sps:$4 sm:$0xff]  }
 0xb9d   : > { %5983 = vmatpush1.bf16.msra.mxu0 %v9148_v42  ;;  %v9218_v42 = vld [vmem:[%s12293_s16 + $0xe4] ss:$8 sps:$4 sm:$0xff]  }
 0xb9e   : > { %5984 = vmatprep.subr.bf16.mxu0 %v9153_v43  ;;  %v9219_v43 = vld [vmem:[%s12293_s16 + $0xe0] ss:$8 sps:$4 sm:$0xff]  }
 0xba1   : > { %5985 = vmatpush1.bf16.msra.mxu0 %v9151_v44  ;;  %v9220_v44 = vld [vmem:[%s12293_s16 + $0xf4] ss:$8 sps:$4 sm:$0xff]  }
 0xba2   : > { %5986 = vmatprep.subr.bf16.mxu0 %v9156_v45  ;;  %v9221_v45 = vld [vmem:[%s12293_s16 + $0xf0] ss:$8 sps:$4 sm:$0xff]  }
 0xba5   : > { %5987 = vmatpush1.bf16.msra.mxu0 %v9154_v47  ;;  %v9222_v47 = vld [vmem:[%s12293_s16 + $0x204] ss:$8 sps:$4 sm:$0xff]  }
 0xba6   : > { %5988 = vmatprep.subr.bf16.mxu0 %v9159_v49 }
 0xba9   : > { %5989 = vmatpush1.bf16.msra.mxu0 %v9157_v2 }
 0xbaa   : > { %6257 = vmatprep.subr.bf16.mxu0 %v9190_v51 }
 0xbac   : > { %5991 = vmatmul.mubr.bf16.vlgmr.msra.gmra.mrb[124].mxu0 %v10592_v32 }
 0xbad   : > { %6000 = vmatprep.mubr.bf16.mxu0 %v10626_v48  ;;  %6258 = vmatpush1.bf16.msra.mxu0 %v9191_v4 }
 0xbae   : > { %6259 = vmatprep.subr.bf16.mxu0 %v9192_v63  ;;  %v9162_v63 = vld [vmem:[%s12294_s17 + $0x4] ss:$12 sps:$4 sm:$0xff]  }
 0xbaf   : > { %6115 = vmatprep.mubr.bf16.mxu1 %v9162_v63 }
 0xbb1   : > { %6260 = vmatpush1.bf16.msra.mxu0 %v9193_v53 }
 0xbb2   : > { %6261 = vmatprep.subr.bf16.mxu0 %v9194_v59 }
 0xbb4   : > { %6001 = vmatmul.mubr.bf16.gmra.mrb[128].mxu0 %v10624_v46 }
 0xbb5   : > { %6262 = vmatpush1.bf16.msra.mxu0 %v9195_v56 }
 0xbb6   : > { %6263 = vmatprep.subr.bf16.mxu0 %v9196_v21 }
 0xbb9   : > { %6264 = vmatpush1.bf16.msra.mxu0 %v9197_v11 }
 0xbba   : > { %6265 = vmatprep.subr.bf16.mxu0 %v9198_v18 }
 0xbbc   : > { %v4492_v5 = vpop.f32.mrb[100].mxu0  ;;  %v4742_v16 = vpop.f32.mrb[92].mxu1 }
 0xbbd   : > { %v4494_v24 = vpop.f32.mrb[101].mxu0  ;;  %v4744_v26 = vpop.f32.mrb[93].mxu1  ;;  %6266 = vmatpush1.bf16.msra.mxu0 %v9199_v22 }
 0xbbe   : > { %v4496_v12 = vpop.f32.mrb[102].mxu0  ;;  %v4746_v54 = vpop.f32.mrb[94].mxu1  ;;  %6267 = vmatprep.subr.bf16.mxu0 %v9200_v55 }
 0xbbf   : > { %v4511_v57 = vpack.c.bf16 %v4496_v12, %v4492_v5  ;;  %v4761_v28 = vpack.c.bf16 %v4746_v54, %v4742_v16  ;;  %v4498_v60 = vpop.f32.mrb[103].mxu0  ;;  %v4748_v61 = vpop.f32.mrb[95].mxu1 }
 0xbc0   : > { %v4512_v0 = vpack.c.bf16 %v4498_v60, %v4494_v24  ;;  %v4762_v13 = vpack.c.bf16 %v4748_v61, %v4744_v26 }
 0xbc1   : > { %6268 = vmatpush1.bf16.msra.mxu0 %v9201_v3 }
 0xbc2   : > { %6091 = vmatprep.subr.bf16.mxu1 %v4512_v0  ;;  %6269 = vmatprep.subr.bf16.mxu0 %v9202_v14 }
 0xbc3   : > { %6092 = vmatpush1.bf16.msra.mxu1 %v4511_v57 }
 0xbc4   : > { %v4502_v10 = vpop.f32.mrb[104].mxu0  ;;  %v4752_v6 = vpop.f32.mrb[96].mxu1 }
 0xbc5   : > { %v4504_v19 = vpop.f32.mrb[105].mxu0  ;;  %v4754_v20 = vpop.f32.mrb[97].mxu1  ;;  %6270 = vmatpush1.bf16.msra.mxu0 %v9203_v23 }
 0xbc6   : > { %v4506_v50 = vpop.f32.mrb[106].mxu0  ;;  %v4756_v52 = vpop.f32.mrb[98].mxu1  ;;  %6271 = vmatprep.subr.bf16.mxu0 %v9204_v58 }
 0xbc7   : > { %v4513_v62 = vpack.c.bf16 %v4506_v50, %v4502_v10  ;;  %v4763_v7 = vpack.c.bf16 %v4756_v52, %v4752_v6  ;;  %v4508_v8 = vpop.f32.mrb[107].mxu0  ;;  %v4758_v9 = vpop.f32.mrb[99].mxu1 }
 0xbc8   : > { %v4514_v15 = vpack.c.bf16 %v4508_v8, %v4504_v19  ;;  %v4764_v17 = vpack.c.bf16 %v4758_v9, %v4754_v20 }
 0xbc9   : > { %6272 = vmatpush1.bf16.msra.mxu0 %v9205_v25 }
 0xbca   : > { %6093 = vmatprep.subr.bf16.mxu1 %v4514_v15  ;;  %6273 = vmatprep.subr.bf16.mxu0 %v9206_v27 }
 0xbcb   : > { %6094 = vmatpush1.bf16.msra.mxu1 %v4513_v62 }
 0xbcc   : > { %6095 = vmatprep.subr.bf16.mxu1 %v4762_v13 }
 0xbcd   : > { %6274 = vmatpush1.bf16.msra.mxu0 %v9207_v29 }
 0xbce   : > { %6275 = vmatprep.subr.bf16.mxu0 %v9208_v30 }
 0xbcf   : > { %6096 = vmatpush1.bf16.msra.mxu1 %v4761_v28 }
 0xbd0   : > { %6097 = vmatprep.subr.bf16.mxu1 %v4764_v17 }
 0xbd1   : > { %6276 = vmatpush1.bf16.msra.mxu0 %v9209_v31 }
 0xbd2   : > { %6277 = vmatprep.subr.bf16.mxu0 %v9210_v33 }
 0xbd3   : > { %6098 = vmatpush1.bf16.msra.mxu1 %v4763_v7 }
 0xbd5   : > { %6278 = vmatpush1.bf16.msra.mxu0 %v9211_v35 }
 0xbd6   : > { %6279 = vmatprep.subr.bf16.mxu0 %v9212_v36 }
 0xbd9   : > { %6280 = vmatpush1.bf16.msra.mxu0 %v9213_v37  ;;  %v9160_v37 = vld [vmem:[%s12294_s17] ss:$12 sps:$4 sm:$0xff]  }
 0xbda   : > { %6281 = vmatprep.subr.bf16.mxu0 %v9214_v38  ;;  %v9163_v38 = vld [vmem:[%s12294_s17 + $0x1c] ss:$12 sps:$4 sm:$0xff]  }
 0xbdd   : > { %6282 = vmatpush1.bf16.msra.mxu0 %v9215_v39  ;;  %v9165_v39 = vld [vmem:[%s12294_s17 + $0x18] ss:$12 sps:$4 sm:$0xff]  }
 0xbde   : > { %6283 = vmatprep.subr.bf16.mxu0 %v9216_v40 }
 0xbe1   : > { %6284 = vmatpush1.bf16.msra.mxu0 %v9217_v41 }
 0xbe2   : > { %6285 = vmatprep.subr.bf16.mxu0 %v9218_v42 }
 0xbe5   : > { %6286 = vmatpush1.bf16.msra.mxu0 %v9219_v43 }
 0xbe6   : > { %6287 = vmatprep.subr.bf16.mxu0 %v9220_v44 }
 0xbe9   : > { %6288 = vmatpush1.bf16.msra.mxu0 %v9221_v45 }
 0xbea   : > { %6371 = vmatprep.subr.bf16.mxu0 %v9222_v47 }
 0xbfd   : > { %v4992_v49 = vpop.f32.mrb[108].mxu0  ;;  %v5242_v2 = vpop.f32.mrb[100].mxu1 }
 0xbfe   : > { %v4994_v51 = vpop.f32.mrb[109].mxu0  ;;  %v5244_v4 = vpop.f32.mrb[101].mxu1 }
 0xbff   : > { %v4996_v53 = vpop.f32.mrb[110].mxu0  ;;  %v5246_v59 = vpop.f32.mrb[102].mxu1 }
 0xc00   : > { %v5011_v56 = vpack.c.bf16 %v4996_v53, %v4992_v49  ;;  %v5261_v21 = vpack.c.bf16 %v5246_v59, %v5242_v2  ;;  %v4998_v11 = vpop.f32.mrb[111].mxu0  ;;  %v5248_v18 = vpop.f32.mrb[103].mxu1  ;;  %v9166_v53 = vld [vmem:[%s12294_s17 + $0x8] ss:$12 sps:$4 sm:$0xff]   ;;  %v9223_v59 = vld [vmem:[%s12293_s16 + $0x104] ss:$8 sps:$4 sm:$0xff]  }
 0xc01   : > { %v5012_v5 = vpack.c.bf16 %v4998_v11, %v4994_v51  ;;  %v5262_v16 = vpack.c.bf16 %v5248_v18, %v5244_v4  ;;  %v9167_v11 = vld [vmem:[%s12294_s17 + $0x20] ss:$12 sps:$4 sm:$0xff]   ;;  %v9226_v18 = vld [vmem:[%s12293_s16 + $0x110] ss:$8 sps:$4 sm:$0xff]  }
 0xc03   : > { %6099 = vmatprep.subr.bf16.mxu1 %v5012_v5  ;;  %v9227_v5 = vld [vmem:[%s12293_s16 + $0x124] ss:$8 sps:$4 sm:$0xff]  }
 0xc04   : > { %6100 = vmatpush1.bf16.msra.mxu1 %v5011_v56  ;;  %v9224_v56 = vld [vmem:[%s12293_s16 + $0x100] ss:$8 sps:$4 sm:$0xff]  }
 0xc05   : > { %v5002_v24 = vpop.f32.mrb[112].mxu0  ;;  %v5252_v26 = vpop.f32.mrb[104].mxu1 }
 0xc06   : > { %v5004_v22 = vpop.f32.mrb[113].mxu0  ;;  %v5254_v12 = vpop.f32.mrb[105].mxu1 }
 0xc07   : > { %v5006_v54 = vpop.f32.mrb[114].mxu0  ;;  %v5256_v55 = vpop.f32.mrb[106].mxu1 }
 0xc08   : > { %v5013_v57 = vpack.c.bf16 %v5006_v54, %v5002_v24  ;;  %v5263_v28 = vpack.c.bf16 %v5256_v55, %v5252_v26  ;;  %v5008_v60 = vpop.f32.mrb[115].mxu0  ;;  %v5258_v61 = vpop.f32.mrb[107].mxu1  ;;  %v9229_v24 = vld [vmem:[%s12293_s16 + $0x134] ss:$8 sps:$4 sm:$0xff]   ;;  %v9230_v26 = vld [vmem:[%s12293_s16 + $0x130] ss:$8 sps:$4 sm:$0xff]  }
 0xc09   : > { %v5014_v0 = vpack.c.bf16 %v5008_v60, %v5004_v22  ;;  %v5264_v13 = vpack.c.bf16 %v5258_v61, %v5254_v12  ;;  %v9231_v22 = vld [vmem:[%s12293_s16 + $0x144] ss:$8 sps:$4 sm:$0xff]   ;;  %v9232_v12 = vld [vmem:[%s12293_s16 + $0x140] ss:$8 sps:$4 sm:$0xff]   ;;  %v9233_v54 = vld [vmem:[%s12293_s16 + $0x154] ss:$8 sps:$4 sm:$0xff]  }
 0xc0a   : > { %v9234_v55 = vld [vmem:[%s12293_s16 + $0x150] ss:$8 sps:$4 sm:$0xff]   ;;  %v9237_v60 = vld [vmem:[%s12293_s16 + $0x174] ss:$8 sps:$4 sm:$0xff]  }
 0xc0b   : > { %6101 = vmatprep.subr.bf16.mxu1 %v5014_v0  ;;  %v9238_v61 = vld [vmem:[%s12293_s16 + $0x170] ss:$8 sps:$4 sm:$0xff]   ;;  %v9239_v0 = vld [vmem:[%s12293_s16 + $0x184] ss:$8 sps:$4 sm:$0xff]  }
 0xc0c   : > { %6102 = vmatpush1.bf16.msra.mxu1 %v5013_v57  ;;  %v9235_v57 = vld [vmem:[%s12293_s16 + $0x164] ss:$8 sps:$4 sm:$0xff]  }
 0xc0d   : > { %6103 = vmatprep.subr.bf16.mxu1 %v5262_v16  ;;  %v9228_v16 = vld [vmem:[%s12293_s16 + $0x120] ss:$8 sps:$4 sm:$0xff]  }
 0xc10   : > { %6104 = vmatpush1.bf16.msra.mxu1 %v5261_v21  ;;  %v9225_v21 = vld [vmem:[%s12293_s16 + $0x114] ss:$8 sps:$4 sm:$0xff]  }
 0xc11   : > { %6105 = vmatprep.subr.bf16.mxu1 %v5264_v13  ;;  %v9240_v13 = vld [vmem:[%s12293_s16 + $0x180] ss:$8 sps:$4 sm:$0xff]  }
 0xc14   : > { %6106 = vmatpush1.bf16.msra.mxu1 %v5263_v28  ;;  %v9236_v28 = vld [vmem:[%s12293_s16 + $0x160] ss:$8 sps:$4 sm:$0xff]  }
 0xc3e   : > { %v5492_v3 = vpop.f32.mrb[116].mxu0  ;;  %v5742_v14 = vpop.f32.mrb[108].mxu1 }
 0xc3f   : > { %v5494_v10 = vpop.f32.mrb[117].mxu0  ;;  %v5744_v6 = vpop.f32.mrb[109].mxu1 }
 0xc40   : > { %v5496_v19 = vpop.f32.mrb[118].mxu0  ;;  %v5746_v20 = vpop.f32.mrb[110].mxu1 }
 0xc41   : > { %v5511_v23 = vpack.c.bf16 %v5496_v19, %v5492_v3  ;;  %v5761_v50 = vpack.c.bf16 %v5746_v20, %v5742_v14  ;;  %v5498_v52 = vpop.f32.mrb[119].mxu0  ;;  %v5748_v58 = vpop.f32.mrb[111].mxu1  ;;  %v9241_v3 = vld [vmem:[%s12293_s16 + $0x194] ss:$8 sps:$4 sm:$0xff]   ;;  %v9242_v14 = vld [vmem:[%s12293_s16 + $0x190] ss:$8 sps:$4 sm:$0xff]  }
 0xc42   : > { %v5512_v62 = vpack.c.bf16 %v5498_v52, %v5494_v10  ;;  %v5762_v7 = vpack.c.bf16 %v5748_v58, %v5744_v6  ;;  %v9243_v10 = vld [vmem:[%s12293_s16 + $0x1a4] ss:$8 sps:$4 sm:$0xff]   ;;  %v9244_v6 = vld [vmem:[%s12293_s16 + $0x1a0] ss:$8 sps:$4 sm:$0xff]   ;;  %v9245_v19 = vld [vmem:[%s12293_s16 + $0x1b4] ss:$8 sps:$4 sm:$0xff]  }
 0xc43   : > { %v9246_v20 = vld [vmem:[%s12293_s16 + $0x1b0] ss:$8 sps:$4 sm:$0xff]   ;;  %v9249_v52 = vld [vmem:[%s12293_s16 + $0x1d4] ss:$8 sps:$4 sm:$0xff]  }
 0xc44   : > { %6107 = vmatprep.subr.bf16.mxu1 %v5512_v62  ;;  %v9250_v58 = vld [vmem:[%s12293_s16 + $0x1d0] ss:$8 sps:$4 sm:$0xff]   ;;  %v9251_v62 = vld [vmem:[%s12293_s16 + $0x1e4] ss:$8 sps:$4 sm:$0xff]  }
 0xc45   : > { %6108 = vmatpush1.bf16.msra.mxu1 %v5511_v23  ;;  %v9247_v23 = vld [vmem:[%s12293_s16 + $0x1c4] ss:$8 sps:$4 sm:$0xff]  }
 0xc46   : > { %v5502_v8 = vpop.f32.mrb[120].mxu0  ;;  %v5752_v9 = vpop.f32.mrb[112].mxu1 }
 0xc47   : > { %v5504_v15 = vpop.f32.mrb[121].mxu0  ;;  %v5754_v17 = vpop.f32.mrb[113].mxu1 }
 0xc48   : > { %v5506_v25 = vpop.f32.mrb[122].mxu0  ;;  %v5756_v27 = vpop.f32.mrb[114].mxu1 }
 0xc49   : > { %v5513_v29 = vpack.c.bf16 %v5506_v25, %v5502_v8  ;;  %v5763_v30 = vpack.c.bf16 %v5756_v27, %v5752_v9  ;;  %v5508_v31 = vpop.f32.mrb[123].mxu0  ;;  %v5758_v33 = vpop.f32.mrb[115].mxu1  ;;  %v9253_v8 = vld [vmem:[%s12293_s16 + $0x1f4] ss:$8 sps:$4 sm:$0xff]   ;;  %v9254_v9 = vld [vmem:[%s12293_s16 + $0x1f0] ss:$8 sps:$4 sm:$0xff]  }
 0xc4a   : > { %v5514_v35 = vpack.c.bf16 %v5508_v31, %v5504_v15  ;;  %v5764_v36 = vpack.c.bf16 %v5758_v33, %v5754_v17  ;;  %v9255_v15 = vld [vmem:[%s12293_s16 + $0x304] ss:$8 sps:$4 sm:$0xff]   ;;  %v6030_v17 = vpop.permute.xlu0 %6029 }
 0xc4c   : > { %6109 = vmatprep.subr.bf16.mxu1 %v5514_v35 }
 0xc4d   : > { %6110 = vmatpush1.bf16.msra.mxu1 %v5513_v29 }
 0xc4e   : > { %6111 = vmatprep.subr.bf16.mxu1 %v5762_v7  ;;  %v9252_v7 = vld [vmem:[%s12293_s16 + $0x1e0] ss:$8 sps:$4 sm:$0xff]  }
 0xc51   : > { %6112 = vmatpush1.bf16.msra.mxu1 %v5761_v50  ;;  %v9248_v50 = vld [vmem:[%s12293_s16 + $0x1c0] ss:$8 sps:$4 sm:$0xff]  }
 0xc52   : > { %6113 = vmatprep.subr.bf16.mxu1 %v5764_v36 }
 0xc55   : > { %6114 = vmatpush1.bf16.msra.mxu1 %v5763_v30  ;;  %v6035_v30 = vpop.permute.xlu1 %6034 }
 0xc58   : > { %6116 = vmatmul.mubr.bf16.vlgmr.msra.gmra.mrb[116].mxu1 %v9160_v37 }
 0xc59   : > { %6125 = vmatprep.mubr.bf16.mxu1 %v9163_v38 }
 0xc60   : > { %6126 = vmatmul.mubr.bf16.gmra.mrb[120].mxu1 %v9165_v39 }
 0xc61   : > { %6168 = vmatprep.mubr.bf16.mxu1 %v12338_v1 }
 0xc7f   : > { %v5992_v40 = vpop.f32.mrb[124].mxu0 }
 0xc80   : > { %v5994_v41 = vpop.f32.mrb[125].mxu0 }
 0xc81   : > { %v5996_v42 = vpop.f32.mrb[126].mxu0 }
 0xc82   : > { %v6011_v43 = vpack.c.bf16 %v5996_v42, %v5992_v40  ;;  %v5998_v44 = vpop.f32.mrb[127].mxu0 }
 0xc83   : > { %v6012_v45 = vpack.c.bf16 %v5998_v44, %v5994_v41 }
 0xc85   : > { %6136 = vmatprep.subr.bf16.mxu1 %v6012_v45 }
 0xc86   : > { %6137 = vmatpush1.bf16.msra.mxu1 %v6011_v43  ;;  %v6040_v43 = vpop.permute.xlu0 %6039 }
 0xc87   : > { %v6002_v47 = vpop.f32.mrb[128].mxu0 }
 0xc88   : > { %v6004_v49 = vpop.f32.mrb[129].mxu0 }
 0xc89   : > { %v6006_v2 = vpop.f32.mrb[130].mxu0 }
 0xc8a   : > { %v6013_v51 = vpack.c.bf16 %v6006_v2, %v6002_v47  ;;  %v6008_v4 = vpop.f32.mrb[131].mxu0  ;;  %v6045_v2 = vpop.permute.xlu1 %6044 }
 0xc8b   : > { %v6014_v63 = vpack.c.bf16 %v6008_v4, %v6004_v49 }
 0xc8d   : > { %6138 = vmatprep.subr.bf16.mxu1 %v6014_v63 }
 0xc8e   : > { %6139 = vmatpush1.bf16.msra.mxu1 %v6013_v51 }
 0xc8f   : > { %6314 = vmatprep.subr.bf16.mxu1 %v9223_v59 }
 0xc91   : > { %7969 = vmatmul.mubr.msk.bf16.vlgmr.msra.gmra.mrb[116].mxu1 %vm800_vm0, %v9166_v53 }
 0xc92   : > { %6178 = vmatprep.mubr.bf16.mxu1 %v12338_v1  ;;  %6315 = vmatpush1.bf16.msra.mxu1 %v9224_v56 }
 0xc93   : > { %6316 = vmatprep.subr.bf16.mxu1 %v9225_v21 }
 0xc96   : > { %6317 = vmatpush1.bf16.msra.mxu1 %v9226_v18 }
 0xc97   : > { %6318 = vmatprep.subr.bf16.mxu1 %v9227_v5 }
 0xc99   : > { %7970 = vmatmul.mubr.msk.bf16.gmra.mrb[120].mxu1 %vm800_vm0, %v9167_v11 }
 0xc9a   : > { %6319 = vmatpush1.bf16.msra.mxu1 %v9228_v16 }
 0xc9b   : > { %6320 = vmatprep.subr.bf16.mxu1 %v9229_v24 }
 0xc9e   : > { %6321 = vmatpush1.bf16.msra.mxu1 %v9230_v26 }
 0xc9f   : > { %6322 = vmatprep.subr.bf16.mxu1 %v9231_v22 }
 0xca2   : > { %6323 = vmatpush1.bf16.msra.mxu1 %v9232_v12 }
 0xca3   : > { %6324 = vmatprep.subr.bf16.mxu1 %v9233_v54 }
 0xca6   : > { %6325 = vmatpush1.bf16.msra.mxu1 %v9234_v55 }
 0xca7   : > { %6326 = vmatprep.subr.bf16.mxu1 %v9235_v57 }
 0xcaa   : > { %6327 = vmatpush1.bf16.msra.mxu1 %v9236_v28 }
 0xcab   : > { %6328 = vmatprep.subr.bf16.mxu1 %v9237_v60 }
 0xcae   : > { %6329 = vmatpush1.bf16.msra.mxu1 %v9238_v61 }
 0xcaf   : > { %6330 = vmatprep.subr.bf16.mxu1 %v9239_v0 }
 0xcb2   : > { %6331 = vmatpush1.bf16.msra.mxu1 %v9240_v13 }
 0xcb3   : > { %6332 = vmatprep.subr.bf16.mxu1 %v9241_v3 }
 0xcb6   : > { %6333 = vmatpush1.bf16.msra.mxu1 %v9242_v14 }
 0xcb7   : > { %6334 = vmatprep.subr.bf16.mxu1 %v9243_v10 }
 0xcba   : > { %6335 = vmatpush1.bf16.msra.mxu1 %v9244_v6 }
 0xcbb   : > { %6336 = vmatprep.subr.bf16.mxu1 %v9245_v19 }
 0xcbe   : > { %6337 = vmatpush1.bf16.msra.mxu1 %v9246_v20 }
 0xcbf   : > { %6338 = vmatprep.subr.bf16.mxu1 %v9247_v23 }
 0xcc2   : > { %6339 = vmatpush1.bf16.msra.mxu1 %v9248_v50 }
 0xcc3   : > { %6340 = vmatprep.subr.bf16.mxu1 %v9249_v52 }
 0xcc6   : > { %6341 = vmatpush1.bf16.msra.mxu1 %v9250_v58 }
 0xcc7   : > { %6342 = vmatprep.subr.bf16.mxu1 %v9251_v62 }
 0xcca   : > { %6343 = vmatpush1.bf16.msra.mxu1 %v9252_v7 }
 0xccb   : > { %6344 = vmatprep.subr.bf16.mxu1 %v9253_v8 }
 0xcce   : > { %6345 = vmatpush1.bf16.msra.mxu1 %v9254_v9 }
 0xccf   : > { %6428 = vmatprep.subr.bf16.mxu1 %v9255_v15 }
 0xd64   : > { %v6170_v25 = vpop.f32.mrb[116].mxu1 }
 0xd65   : > { %v8587_v27 = vadd.f32 %v6170_v25, %v6030_v17  ;;  %v6172_v29 = vpop.f32.mrb[117].mxu1 }
 0xd66   : > { %v8588_v31 = vadd.f32 %v6172_v29, %v6030_v17  ;;  %v6174_v33 = vpop.f32.mrb[118].mxu1 }
 0xd67   : > { %v8589_v35 = vadd.f32 %v6174_v33, %v6035_v30  ;;  %v6176_v36 = vpop.f32.mrb[119].mxu1  ;;  %v6189_v38 = vmul.f32 %v8587_v27, %v8587_v27 }
 0xd68   : > { %v8590_v37 = vadd.f32 %v6176_v36, %v6035_v30  ;;  %v6190_v40 = vmul.f32 %v8588_v31, %v8588_v31 }
 0xd69   : > { %v6191_v39 = vmul.f32 %v8589_v35, %v8589_v35 }
 0xd6a   : > { %v6192_v41 = vmul.f32 %v8590_v37, %v8590_v37 }
 0xd6b   : > { %v6197_v42 = vadd.f32 %v6191_v39, %v6189_v38 }
 0xd6c   : > { %v6206_v44 = vadd.f32 %v6192_v41, %v6190_v40  ;;  %v6180_v45 = vpop.f32.mrb[120].mxu1 }
 0xd6d   : > { %v8591_v47 = vadd.f32 %v6180_v45, %v6040_v43  ;;  %v6182_v49 = vpop.f32.mrb[121].mxu1 }
 0xd6e   : > { %v8592_v51 = vadd.f32 %v6182_v49, %v6040_v43  ;;  %v6184_v4 = vpop.f32.mrb[122].mxu1 }
 0xd6f   : > { %v6193_v63 = vmul.f32 %v8591_v47, %v8591_v47  ;;  %v8593_v53 = vadd.f32 %v6184_v4, %v6045_v2  ;;  %v6186_v59 = vpop.f32.mrb[123].mxu1  ;;  %v9257_v4 = vld [vmem:[%s12293_s16 + $0x300] ss:$8 sps:$4 sm:$0xff]  }
 0xd70   : > { %v6194_v56 = vmul.f32 %v8592_v51, %v8592_v51  ;;  %v8594_v21 = vadd.f32 %v6186_v59, %v6045_v2  ;;  %v9260_v59 = vld [vmem:[%s12293_s16 + $0x210] ss:$8 sps:$4 sm:$0xff]  }
 0xd71   : > { %v6198_v11 = vadd.f32 %v6197_v42, %v6193_v63  ;;  %v6195_v18 = vmul.f32 %v8593_v53, %v8593_v53  ;;  %v9258_v63 = vld [vmem:[%s12293_s16 + $0x214] ss:$8 sps:$4 sm:$0xff]  }
 0xd72   : > { %v6207_v5 = vadd.f32 %v6206_v44, %v6194_v56  ;;  %v6196_v16 = vmul.f32 %v8594_v21, %v8594_v21  ;;  %v9261_v56 = vld [vmem:[%s12293_s16 + $0x310] ss:$8 sps:$4 sm:$0xff]  }
 0xd73   : > { %v6199_v24 = vadd.f32 %v6198_v11, %v6195_v18  ;;  %v9263_v11 = vld [vmem:[%s12293_s16 + $0x324] ss:$8 sps:$4 sm:$0xff]   ;;  %v9264_v18 = vld [vmem:[%s12293_s16 + $0x220] ss:$8 sps:$4 sm:$0xff]  }
 0xd74   : > { %v6208_v26 = vadd.f32 %v6207_v5, %v6196_v16  ;;  %v9265_v5 = vld [vmem:[%s12293_s16 + $0x320] ss:$8 sps:$4 sm:$0xff]   ;;  %v9266_v16 = vld [vmem:[%s12293_s16 + $0x234] ss:$8 sps:$4 sm:$0xff]  }
 0xd75   : > { %v6200_v22 = vrot.slane %v6199_v24, 4 }
 0xd76   : > { %v6209_v12 = vrot.slane %v6208_v26, 4 }
 0xd77   : > { %v6201_v54 = vadd.f32 %v6200_v22, %v6199_v24  ;;  %v9267_v24 = vld [vmem:[%s12293_s16 + $0x334] ss:$8 sps:$4 sm:$0xff]   ;;  %v9269_v22 = vld [vmem:[%s12293_s16 + $0x330] ss:$8 sps:$4 sm:$0xff]  }
 0xd78   : > { %v6210_v55 = vadd.f32 %v6209_v12, %v6208_v26  ;;  %v9268_v26 = vld [vmem:[%s12293_s16 + $0x230] ss:$8 sps:$4 sm:$0xff]   ;;  %v9270_v12 = vld [vmem:[%s12293_s16 + $0x244] ss:$8 sps:$4 sm:$0xff]  }
 0xd79   : > { %v6202_v57 = vrot.slane %v6201_v54, 2 }
 0xd7a   : > { %v6211_v28 = vrot.slane %v6210_v55, 2 }
 0xd7b   : > { %v6203_v60 = vadd.f32 %v6202_v57, %v6201_v54  ;;  %v9271_v54 = vld [vmem:[%s12293_s16 + $0x344] ss:$8 sps:$4 sm:$0xff]   ;;  %v9273_v57 = vld [vmem:[%s12293_s16 + $0x340] ss:$8 sps:$4 sm:$0xff]  }
 0xd7c   : > { %v6212_v61 = vadd.f32 %v6211_v28, %v6210_v55  ;;  %v9272_v55 = vld [vmem:[%s12293_s16 + $0x240] ss:$8 sps:$4 sm:$0xff]   ;;  %v9274_v28 = vld [vmem:[%s12293_s16 + $0x254] ss:$8 sps:$4 sm:$0xff]  }
 0xd7d   : > { %v6204_v0 = vrot.slane %v6203_v60, 1 }
 0xd7e   : > { %v6213_v13 = vrot.slane %v6212_v61, 1 }
 0xd7f   : > { %v6205_v3 = vadd.f32 %v6204_v0, %v6203_v60  ;;  %v9275_v60 = vld [vmem:[%s12293_s16 + $0x354] ss:$8 sps:$4 sm:$0xff]   ;;  %v9277_v0 = vld [vmem:[%s12293_s16 + $0x350] ss:$8 sps:$4 sm:$0xff]  }
 0xd80   : > { %v6214_v14 = vadd.f32 %v6213_v13, %v6212_v61  ;;  %v9276_v61 = vld [vmem:[%s12293_s16 + $0x250] ss:$8 sps:$4 sm:$0xff]   ;;  %v9278_v13 = vld [vmem:[%s12293_s16 + $0x264] ss:$8 sps:$4 sm:$0xff]  }
 0xd81   : > { %v6215_v10 = vmul.f32 0.03125, %v6205_v3  ;;  %v9279_v3 = vld [vmem:[%s12293_s16 + $0x364] ss:$8 sps:$4 sm:$0xff]  }
 0xd82   : > { %v6216_v6 = vmul.f32 0.03125, %v6214_v14  ;;  %v9280_v14 = vld [vmem:[%s12293_s16 + $0x260] ss:$8 sps:$4 sm:$0xff]  }
 0xd83   : > { %v6217_v19 = vadd.f32 1e-08, %v6215_v10  ;;  %v9281_v10 = vld [vmem:[%s12293_s16 + $0x360] ss:$8 sps:$4 sm:$0xff]  }
 0xd84   : > { %v6218_v20 = vadd.f32 1e-08, %v6216_v6  ;;  %v9282_v6 = vld [vmem:[%s12293_s16 + $0x274] ss:$8 sps:$4 sm:$0xff]  }
 0xd85   : > { %9182 = vrsqrt.f32 %v6217_v19  ;;  %v9283_v19 = vld [vmem:[%s12293_s16 + $0x374] ss:$8 sps:$4 sm:$0xff]  }
 0xd86   : > { %9184 = vrsqrt.f32 %v6218_v20  ;;  %v9284_v20 = vld [vmem:[%s12293_s16 + $0x270] ss:$8 sps:$4 sm:$0xff]  }
 0xd8f   : > { %v9183_v23 = vpop.eup %9182 }
 0xd90   : > { %v9185_v50 = vpop.eup %9184  ;;  %v6225_v52 = vmul.f32 %v9183_v23, %v8591_v47  ;;  %v6227_v58 = vmul.f32 %v9183_v23, %v8593_v53  ;;  %v6221_v62 = vmul.f32 %v9183_v23, %v8587_v27  ;;  %v6223_v7 = vmul.f32 %v9183_v23, %v8589_v35  ;;  %v9259_v53 = vld [vmem:[%s12293_s16 + $0x314] ss:$8 sps:$4 sm:$0xff]   ;;  %v9285_v23 = vld [vmem:[%s12293_s16 + $0x370] ss:$8 sps:$4 sm:$0xff]  }
 0xd91   : > { %v6226_v8 = vmul.f32 %v9185_v50, %v8592_v51  ;;  %v6228_v9 = vmul.f32 %v9185_v50, %v8594_v21  ;;  %v6222_v15 = vmul.f32 %v9185_v50, %v8588_v31  ;;  %v6224_v17 = vmul.f32 %v9185_v50, %v8590_v37  ;;  %v9256_v51 = vld [vmem:[%s12293_s16 + $0x200] ss:$8 sps:$4 sm:$0xff]   ;;  %v9262_v21 = vld [vmem:[%s12293_s16 + $0x224] ss:$8 sps:$4 sm:$0xff]  }
 0xd92   : > { %vm6233_vm4 = vcmp.ge.f32.partialorder %v6225_v52, 0.0  ;;  %vm6235_vm5 = vcmp.ge.f32.partialorder %v6227_v58, 0.0  ;;  %v6241_v25 = vmul.f32 0.2, %v6225_v52  ;;  %v6243_v29 = vmul.f32 0.2, %v6227_v58 }
 0xd93   : > { %vm6234_vm6 = vcmp.ge.f32.partialorder %v6226_v8, 0.0  ;;  %vm6236_vm7 = vcmp.ge.f32.partialorder %v6228_v9, 0.0  ;;  %v6242_v30 = vmul.f32 0.2, %v6226_v8  ;;  %v6244_v33 = vmul.f32 0.2, %v6228_v9 }
 0xd94   : > { %v6249_v36 = vsel %vm6233_vm4, %v6225_v52, %v6241_v25  ;;  %v6251_v38 = vsel %vm6235_vm5, %v6227_v58, %v6243_v29  ;;  %vm6230_vm8 = vcmp.ge.f32.partialorder %v6222_v15, 0.0  ;;  %vm6232_vm9 = vcmp.ge.f32.partialorder %v6224_v17, 0.0  ;;  %v9286_v50 = vld [vmem:[%s12293_s16 + $0x284] ss:$8 sps:$4 sm:$0xff]   ;;  %v9288_v58 = vld [vmem:[%s12293_s16 + $0x280] ss:$8 sps:$4 sm:$0xff]  }
 0xd95   : > { %v11522_v39 = vpack.c.bf16 %v6251_v38, %v6249_v36  ;;  %v6250_v27 = vsel %vm6234_vm6, %v6226_v8, %v6242_v30  ;;  %v6252_v35 = vsel %vm6236_vm7, %v6228_v9, %v6244_v33  ;;  %v6238_v40 = vmul.f32 0.2, %v6222_v15  ;;  %v9287_v52 = vld [vmem:[%s12293_s16 + $0x384] ss:$8 sps:$4 sm:$0xff]   ;;  %v9291_v8 = vld [vmem:[%s12293_s16 + $0x394] ss:$8 sps:$4 sm:$0xff]  }
 0xd96   : > { %v11524_v41 = vpack.c.bf16 %v6252_v35, %v6250_v27  ;;  %v6240_v31 = vmul.f32 0.2, %v6224_v17  ;;  %vm6229_vm10 = vcmp.ge.f32.partialorder %v6221_v62, 0.0  ;;  %vm6231_vm11 = vcmp.ge.f32.partialorder %v6223_v7, 0.0  ;;  %v9292_v9 = vld [vmem:[%s12293_s16 + $0x290] ss:$8 sps:$4 sm:$0xff]  }
 0xd97   : > { %v6246_v37 = vsel %vm6230_vm8, %v6222_v15, %v6238_v40  ;;  %v6237_v42 = vmul.f32 0.2, %v6221_v62  ;;  %v6239_v43 = vmul.f32 0.2, %v6223_v7  ;;  %v9293_v15 = vld [vmem:[%s12293_s16 + $0x390] ss:$8 sps:$4 sm:$0xff]  }
 0xd98   : > { %v6248_v44 = vsel %vm6232_vm9, %v6224_v17, %v6240_v31  ;;  %v9294_v17 = vld [vmem:[%s12293_s16 + $0x2a4] ss:$8 sps:$4 sm:$0xff]   ;;  %v9296_v29 = vld [vmem:[%s12293_s16 + $0x2a0] ss:$8 sps:$4 sm:$0xff]   ;;  %v9298_v33 = vld [vmem:[%s12293_s16 + $0x2b4] ss:$8 sps:$4 sm:$0xff]  }
 0xd99   : > { %v11526_v45 = vpack.c.bf16 %v6248_v44, %v6246_v37  ;;  %v6245_v47 = vsel %vm6229_vm10, %v6221_v62, %v6237_v42  ;;  %v6247_v49 = vsel %vm6231_vm11, %v6223_v7, %v6239_v43  ;;  %v9289_v62 = vld [vmem:[%s12293_s16 + $0x380] ss:$8 sps:$4 sm:$0xff]   ;;  %v9290_v7 = vld [vmem:[%s12293_s16 + $0x294] ss:$8 sps:$4 sm:$0xff]   ;;  %v9295_v25 = vld [vmem:[%s12293_s16 + $0x3a4] ss:$8 sps:$4 sm:$0xff]  }
 0xd9a   : > { %v11528_v2 = vpack.c.bf16 %v6247_v49, %v6245_v47  ;;  %v9297_v30 = vld [vmem:[%s12293_s16 + $0x3a0] ss:$8 sps:$4 sm:$0xff]   ;;  %v9299_v36 = vld [vmem:[%s12293_s16 + $0x3b4] ss:$8 sps:$4 sm:$0xff]   ;;  %v9300_v38 = vld [vmem:[%s12293_s16 + $0x2b0] ss:$8 sps:$4 sm:$0xff]  }
 0xd9b   : > { %6289 = vmatprep.mubr.bf16.mxu0 %v11526_v45  ;;  %6346 = vmatprep.mubr.bf16.mxu1 %v11526_v45  ;;  %v9301_v27 = vld [vmem:[%s12293_s16 + $0x3b0] ss:$8 sps:$4 sm:$0xff]   ;;  %v9302_v35 = vld [vmem:[%s12293_s16 + $0x2c4] ss:$8 sps:$4 sm:$0xff]   ;;  %v9304_v31 = vld [vmem:[%s12293_s16 + $0x2c0] ss:$8 sps:$4 sm:$0xff]  }
 0xd9c   : > { %6290 = vmatmul.mubr.bf16.vlgmr.msra.gmra.mrb[132].mxu0 %v11528_v2  ;;  %6347 = vmatmul.mubr.bf16.vlgmr.msra.gmra.mrb[124].mxu1 %v11528_v2  ;;  %v9303_v40 = vld [vmem:[%s12293_s16 + $0x3c4] ss:$8 sps:$4 sm:$0xff]   ;;  %v9305_v37 = vld [vmem:[%s12293_s16 + $0x3c0] ss:$8 sps:$4 sm:$0xff]   ;;  %v9306_v42 = vld [vmem:[%s12293_s16 + $0x2d4] ss:$8 sps:$4 sm:$0xff]  }
 0xd9d   : > { %6372 = vmatpush1.bf16.msra.mxu0 %v9256_v51  ;;  %6429 = vmatpush1.bf16.msra.mxu1 %v9257_v4  ;;  %v9307_v43 = vld [vmem:[%s12293_s16 + $0x3d4] ss:$8 sps:$4 sm:$0xff]   ;;  %v9308_v44 = vld [vmem:[%s12293_s16 + $0x2d0] ss:$8 sps:$4 sm:$0xff]   ;;  %v9310_v49 = vld [vmem:[%s12293_s16 + $0x2e4] ss:$8 sps:$4 sm:$0xff]  }
 0xd9e   : > { %6299 = vmatprep.mubr.bf16.mxu0 %v11524_v41  ;;  %6356 = vmatprep.mubr.bf16.mxu1 %v11524_v41  ;;  %v9309_v47 = vld [vmem:[%s12293_s16 + $0x3d0] ss:$8 sps:$4 sm:$0xff]   ;;  %v9311_v51 = vld [vmem:[%s12293_s16 + $0x3e4] ss:$8 sps:$4 sm:$0xff]   ;;  %v9312_v4 = vld [vmem:[%s12293_s16 + $0x2e0] ss:$8 sps:$4 sm:$0xff]  }
 0xd9f   : > { %6373 = vmatprep.subr.bf16.mxu0 %v9258_v63  ;;  %6430 = vmatprep.subr.bf16.mxu1 %v9259_v53  ;;  %v9313_v63 = vld [vmem:[%s12293_s16 + $0x3e0] ss:$8 sps:$4 sm:$0xff]   ;;  %v9314_v53 = vld [vmem:[%s12293_s16 + $0x2f4] ss:$8 sps:$4 sm:$0xff]  }
 0xda1   : > { %6374 = vmatpush1.bf16.msra.mxu0 %v9260_v59  ;;  %6431 = vmatpush1.bf16.msra.mxu1 %v9261_v56  ;;  %v9315_v59 = vld [vmem:[%s12293_s16 + $0x3f4] ss:$8 sps:$4 sm:$0xff]   ;;  %v9316_v56 = vld [vmem:[%s12293_s16 + $0x2f0] ss:$8 sps:$4 sm:$0xff]  }
 0xda2   : > { %6375 = vmatprep.subr.bf16.mxu0 %v9262_v21  ;;  %6432 = vmatprep.subr.bf16.mxu1 %v9263_v11  ;;  %v9317_v21 = vld [vmem:[%s12293_s16 + $0x3f0] ss:$8 sps:$4 sm:$0xff]   ;;  %v9318_v11 = vld [vmem:[%s12293_s16 + $0x404] ss:$8 sps:$4 sm:$0xff]  }
 0xda4   : > { %6300 = vmatmul.mubr.bf16.gmra.mrb[136].mxu0 %v11522_v39  ;;  %6357 = vmatmul.mubr.bf16.gmra.mrb[128].mxu1 %v11522_v39 }
 0xda5   : > { %6376 = vmatpush1.bf16.msra.mxu0 %v9264_v18  ;;  %6433 = vmatpush1.bf16.msra.mxu1 %v9265_v5  ;;  %v9319_v18 = vld [vmem:[%s12293_s16 + $0x504] ss:$8 sps:$4 sm:$0xff]   ;;  %v9320_v5 = vld [vmem:[%s12293_s16 + $0x400] ss:$8 sps:$4 sm:$0xff]  }
 0xda6   : > { %6403 = vmatprep.mubr.bf16.mxu0 %v11526_v45  ;;  %6460 = vmatprep.mubr.bf16.mxu1 %v11526_v45 }
 0xda7   : > { %6377 = vmatprep.subr.bf16.mxu0 %v9266_v16  ;;  %6434 = vmatprep.subr.bf16.mxu1 %v9267_v24  ;;  %v9321_v16 = vld [vmem:[%s12293_s16 + $0x500] ss:$8 sps:$4 sm:$0xff]   ;;  %v9322_v24 = vld [vmem:[%s12293_s16 + $0x414] ss:$8 sps:$4 sm:$0xff]  }
 0xda9   : > { %6378 = vmatpush1.bf16.msra.mxu0 %v9268_v26  ;;  %6435 = vmatpush1.bf16.msra.mxu1 %v9269_v22  ;;  %v9323_v26 = vld [vmem:[%s12293_s16 + $0x514] ss:$8 sps:$4 sm:$0xff]   ;;  %v9324_v22 = vld [vmem:[%s12293_s16 + $0x410] ss:$8 sps:$4 sm:$0xff]  }
 0xdaa   : > { %6379 = vmatprep.subr.bf16.mxu0 %v9270_v12  ;;  %6436 = vmatprep.subr.bf16.mxu1 %v9271_v54  ;;  %v9325_v12 = vld [vmem:[%s12293_s16 + $0x510] ss:$8 sps:$4 sm:$0xff]   ;;  %v9326_v54 = vld [vmem:[%s12293_s16 + $0x424] ss:$8 sps:$4 sm:$0xff]  }
 0xdad   : > { %6380 = vmatpush1.bf16.msra.mxu0 %v9272_v55  ;;  %6437 = vmatpush1.bf16.msra.mxu1 %v9273_v57  ;;  %v9327_v55 = vld [vmem:[%s12293_s16 + $0x524] ss:$8 sps:$4 sm:$0xff]   ;;  %v9328_v57 = vld [vmem:[%s12293_s16 + $0x420] ss:$8 sps:$4 sm:$0xff]  }
 0xdae   : > { %6381 = vmatprep.subr.bf16.mxu0 %v9274_v28  ;;  %6438 = vmatprep.subr.bf16.mxu1 %v9275_v60  ;;  %v9329_v28 = vld [vmem:[%s12293_s16 + $0x520] ss:$8 sps:$4 sm:$0xff]   ;;  %v9330_v60 = vld [vmem:[%s12293_s16 + $0x434] ss:$8 sps:$4 sm:$0xff]  }
 0xdb1   : > { %6382 = vmatpush1.bf16.msra.mxu0 %v9276_v61  ;;  %6439 = vmatpush1.bf16.msra.mxu1 %v9277_v0  ;;  %v9331_v61 = vld [vmem:[%s12293_s16 + $0x534] ss:$8 sps:$4 sm:$0xff]   ;;  %v9332_v0 = vld [vmem:[%s12293_s16 + $0x430] ss:$8 sps:$4 sm:$0xff]  }
 0xdb2   : > { %6383 = vmatprep.subr.bf16.mxu0 %v9278_v13  ;;  %6440 = vmatprep.subr.bf16.mxu1 %v9279_v3  ;;  %v9333_v13 = vld [vmem:[%s12293_s16 + $0x530] ss:$8 sps:$4 sm:$0xff]   ;;  %v9334_v3 = vld [vmem:[%s12293_s16 + $0x444] ss:$8 sps:$4 sm:$0xff]  }
 0xdb5   : > { %6384 = vmatpush1.bf16.msra.mxu0 %v9280_v14  ;;  %6441 = vmatpush1.bf16.msra.mxu1 %v9281_v10  ;;  %v9335_v14 = vld [vmem:[%s12293_s16 + $0x544] ss:$8 sps:$4 sm:$0xff]   ;;  %v9336_v10 = vld [vmem:[%s12293_s16 + $0x440] ss:$8 sps:$4 sm:$0xff]  }
 0xdb6   : > { %6385 = vmatprep.subr.bf16.mxu0 %v9282_v6  ;;  %6442 = vmatprep.subr.bf16.mxu1 %v9283_v19  ;;  %v9337_v6 = vld [vmem:[%s12293_s16 + $0x540] ss:$8 sps:$4 sm:$0xff]   ;;  %v9338_v19 = vld [vmem:[%s12293_s16 + $0x454] ss:$8 sps:$4 sm:$0xff]  }
 0xdb9   : > { %6386 = vmatpush1.bf16.msra.mxu0 %v9284_v20  ;;  %6443 = vmatpush1.bf16.msra.mxu1 %v9285_v23  ;;  %v9339_v20 = vld [vmem:[%s12293_s16 + $0x554] ss:$8 sps:$4 sm:$0xff]   ;;  %v9340_v23 = vld [vmem:[%s12293_s16 + $0x450] ss:$8 sps:$4 sm:$0xff]  }
 0xdba   : > { %6387 = vmatprep.subr.bf16.mxu0 %v9286_v50  ;;  %6444 = vmatprep.subr.bf16.mxu1 %v9287_v52  ;;  %v9341_v50 = vld [vmem:[%s12293_s16 + $0x550] ss:$8 sps:$4 sm:$0xff]   ;;  %v9342_v52 = vld [vmem:[%s12293_s16 + $0x464] ss:$8 sps:$4 sm:$0xff]  }
 0xdbd   : > { %6388 = vmatpush1.bf16.msra.mxu0 %v9288_v58  ;;  %6445 = vmatpush1.bf16.msra.mxu1 %v9289_v62  ;;  %v9343_v58 = vld [vmem:[%s12293_s16 + $0x564] ss:$8 sps:$4 sm:$0xff]   ;;  %v9344_v62 = vld [vmem:[%s12293_s16 + $0x460] ss:$8 sps:$4 sm:$0xff]  }
 0xdbe   : > { %6389 = vmatprep.subr.bf16.mxu0 %v9290_v7  ;;  %6446 = vmatprep.subr.bf16.mxu1 %v9291_v8  ;;  %v9345_v7 = vld [vmem:[%s12293_s16 + $0x560] ss:$8 sps:$4 sm:$0xff]   ;;  %v9346_v8 = vld [vmem:[%s12293_s16 + $0x474] ss:$8 sps:$4 sm:$0xff]  }
 0xdc1   : > { %6390 = vmatpush1.bf16.msra.mxu0 %v9292_v9  ;;  %6447 = vmatpush1.bf16.msra.mxu1 %v9293_v15  ;;  %v9347_v9 = vld [vmem:[%s12293_s16 + $0x574] ss:$8 sps:$4 sm:$0xff]   ;;  %v9348_v15 = vld [vmem:[%s12293_s16 + $0x470] ss:$8 sps:$4 sm:$0xff]  }
 0xdc2   : > { %6391 = vmatprep.subr.bf16.mxu0 %v9294_v17  ;;  %6448 = vmatprep.subr.bf16.mxu1 %v9295_v25  ;;  %v9349_v17 = vld [vmem:[%s12293_s16 + $0x570] ss:$8 sps:$4 sm:$0xff]   ;;  %v9350_v25 = vld [vmem:[%s12293_s16 + $0x484] ss:$8 sps:$4 sm:$0xff]  }
 0xdc5   : > { %6392 = vmatpush1.bf16.msra.mxu0 %v9296_v29  ;;  %6449 = vmatpush1.bf16.msra.mxu1 %v9297_v30  ;;  %v9351_v29 = vld [vmem:[%s12293_s16 + $0x584] ss:$8 sps:$4 sm:$0xff]   ;;  %v9352_v30 = vld [vmem:[%s12293_s16 + $0x480] ss:$8 sps:$4 sm:$0xff]  }
 0xdc6   : > { %6393 = vmatprep.subr.bf16.mxu0 %v9298_v33  ;;  %6450 = vmatprep.subr.bf16.mxu1 %v9299_v36  ;;  %v9353_v33 = vld [vmem:[%s12293_s16 + $0x580] ss:$8 sps:$4 sm:$0xff]   ;;  %v9354_v36 = vld [vmem:[%s12293_s16 + $0x494] ss:$8 sps:$4 sm:$0xff]  }
 0xdc9   : > { %6394 = vmatpush1.bf16.msra.mxu0 %v9300_v38  ;;  %6451 = vmatpush1.bf16.msra.mxu1 %v9301_v27  ;;  %v9355_v38 = vld [vmem:[%s12293_s16 + $0x594] ss:$8 sps:$4 sm:$0xff]   ;;  %v9356_v27 = vld [vmem:[%s12293_s16 + $0x490] ss:$8 sps:$4 sm:$0xff]  }
 0xdca   : > { %6395 = vmatprep.subr.bf16.mxu0 %v9302_v35  ;;  %6452 = vmatprep.subr.bf16.mxu1 %v9303_v40  ;;  %v9357_v35 = vld [vmem:[%s12293_s16 + $0x590] ss:$8 sps:$4 sm:$0xff]   ;;  %v9358_v40 = vld [vmem:[%s12293_s16 + $0x4a4] ss:$8 sps:$4 sm:$0xff]  }
 0xdcd   : > { %6396 = vmatpush1.bf16.msra.mxu0 %v9304_v31  ;;  %6453 = vmatpush1.bf16.msra.mxu1 %v9305_v37  ;;  %v9359_v31 = vld [vmem:[%s12293_s16 + $0x5a4] ss:$8 sps:$4 sm:$0xff]   ;;  %v9360_v37 = vld [vmem:[%s12293_s16 + $0x4a0] ss:$8 sps:$4 sm:$0xff]  }
 0xdce   : > { %6397 = vmatprep.subr.bf16.mxu0 %v9306_v42  ;;  %6454 = vmatprep.subr.bf16.mxu1 %v9307_v43  ;;  %v9361_v42 = vld [vmem:[%s12293_s16 + $0x5a0] ss:$8 sps:$4 sm:$0xff]   ;;  %v9362_v43 = vld [vmem:[%s12293_s16 + $0x4b4] ss:$8 sps:$4 sm:$0xff]  }
 0xdd1   : > { %6398 = vmatpush1.bf16.msra.mxu0 %v9308_v44  ;;  %6455 = vmatpush1.bf16.msra.mxu1 %v9309_v47  ;;  %v9363_v44 = vld [vmem:[%s12293_s16 + $0x5b4] ss:$8 sps:$4 sm:$0xff]   ;;  %v9364_v47 = vld [vmem:[%s12293_s16 + $0x4b0] ss:$8 sps:$4 sm:$0xff]  }
 0xdd2   : > { %6399 = vmatprep.subr.bf16.mxu0 %v9310_v49  ;;  %6456 = vmatprep.subr.bf16.mxu1 %v9311_v51  ;;  %v9365_v49 = vld [vmem:[%s12293_s16 + $0x5b0] ss:$8 sps:$4 sm:$0xff]   ;;  %v9366_v51 = vld [vmem:[%s12293_s16 + $0x4c4] ss:$8 sps:$4 sm:$0xff]  }
 0xdd5   : > { %6400 = vmatpush1.bf16.msra.mxu0 %v9312_v4  ;;  %6457 = vmatpush1.bf16.msra.mxu1 %v9313_v63  ;;  %v9367_v4 = vld [vmem:[%s12293_s16 + $0x5c4] ss:$8 sps:$4 sm:$0xff]   ;;  %v9368_v63 = vld [vmem:[%s12293_s16 + $0x4c0] ss:$8 sps:$4 sm:$0xff]  }
 0xdd6   : > { %6401 = vmatprep.subr.bf16.mxu0 %v9314_v53  ;;  %6458 = vmatprep.subr.bf16.mxu1 %v9315_v59  ;;  %v9369_v53 = vld [vmem:[%s12293_s16 + $0x5c0] ss:$8 sps:$4 sm:$0xff]   ;;  %v9370_v59 = vld [vmem:[%s12293_s16 + $0x4d4] ss:$8 sps:$4 sm:$0xff]  }
 0xdd9   : > { %6402 = vmatpush1.bf16.msra.mxu0 %v9316_v56  ;;  %6459 = vmatpush1.bf16.msra.mxu1 %v9317_v21  ;;  %v9371_v56 = vld [vmem:[%s12293_s16 + $0x5d4] ss:$8 sps:$4 sm:$0xff]   ;;  %v9372_v21 = vld [vmem:[%s12293_s16 + $0x4d0] ss:$8 sps:$4 sm:$0xff]  }
 0xdda   : > { %6485 = vmatprep.subr.bf16.mxu0 %v9318_v11  ;;  %6542 = vmatprep.subr.bf16.mxu1 %v9319_v18  ;;  %v9373_v11 = vld [vmem:[%s12293_s16 + $0x5d0] ss:$8 sps:$4 sm:$0xff]   ;;  %v9374_v18 = vld [vmem:[%s12293_s16 + $0x4e4] ss:$8 sps:$4 sm:$0xff]  }
 0xddc   : > { %6404 = vmatmul.mubr.bf16.vlgmr.msra.gmra.mrb[140].mxu0 %v11528_v2  ;;  %6461 = vmatmul.mubr.bf16.vlgmr.msra.gmra.mrb[132].mxu1 %v11528_v2 }
 0xddd   : > { %6413 = vmatprep.mubr.bf16.mxu0 %v11524_v41  ;;  %6470 = vmatprep.mubr.bf16.mxu1 %v11524_v41 }
 0xdde   : > { %6486 = vmatpush1.bf16.msra.mxu0 %v9320_v5  ;;  %6543 = vmatpush1.bf16.msra.mxu1 %v9321_v16  ;;  %v9375_v5 = vld [vmem:[%s12293_s16 + $0x5e4] ss:$8 sps:$4 sm:$0xff]   ;;  %v9376_v16 = vld [vmem:[%s12293_s16 + $0x4e0] ss:$8 sps:$4 sm:$0xff]  }
 0xddf   : > { %6487 = vmatprep.subr.bf16.mxu0 %v9322_v24  ;;  %6544 = vmatprep.subr.bf16.mxu1 %v9323_v26  ;;  %v9377_v24 = vld [vmem:[%s12293_s16 + $0x5e0] ss:$8 sps:$4 sm:$0xff]   ;;  %v9378_v26 = vld [vmem:[%s12293_s16 + $0x4f4] ss:$8 sps:$4 sm:$0xff]  }
 0xde2   : > { %6488 = vmatpush1.bf16.msra.mxu0 %v9324_v22  ;;  %6545 = vmatpush1.bf16.msra.mxu1 %v9325_v12  ;;  %v9379_v22 = vld [vmem:[%s12293_s16 + $0x5f4] ss:$8 sps:$4 sm:$0xff]   ;;  %v9380_v12 = vld [vmem:[%s12293_s16 + $0x4f0] ss:$8 sps:$4 sm:$0xff]  }
 0xde3   : > { %6489 = vmatprep.subr.bf16.mxu0 %v9326_v54  ;;  %6546 = vmatprep.subr.bf16.mxu1 %v9327_v55  ;;  %v9381_v54 = vld [vmem:[%s12293_s16 + $0x5f0] ss:$8 sps:$4 sm:$0xff]   ;;  %v9382_v55 = vld [vmem:[%s12293_s16 + $0x604] ss:$8 sps:$4 sm:$0xff]  }
 0xde4   : > { %6414 = vmatmul.mubr.bf16.gmra.mrb[144].mxu0 %v11522_v39  ;;  %6471 = vmatmul.mubr.bf16.gmra.mrb[136].mxu1 %v11522_v39 }
 0xde5   : > { %6517 = vmatprep.mubr.bf16.mxu0 %v11526_v45  ;;  %6574 = vmatprep.mubr.bf16.mxu1 %v11526_v45 }
 0xde6   : > { %6490 = vmatpush1.bf16.msra.mxu0 %v9328_v57  ;;  %6547 = vmatpush1.bf16.msra.mxu1 %v9329_v28  ;;  %v9383_v57 = vld [vmem:[%s12293_s16 + $0x704] ss:$8 sps:$4 sm:$0xff]   ;;  %v9384_v28 = vld [vmem:[%s12293_s16 + $0x600] ss:$8 sps:$4 sm:$0xff]  }
 0xde7   : > { %6491 = vmatprep.subr.bf16.mxu0 %v9330_v60  ;;  %6548 = vmatprep.subr.bf16.mxu1 %v9331_v61  ;;  %v9385_v60 = vld [vmem:[%s12293_s16 + $0x700] ss:$8 sps:$4 sm:$0xff]   ;;  %v9386_v61 = vld [vmem:[%s12293_s16 + $0x614] ss:$8 sps:$4 sm:$0xff]  }
 0xdea   : > { %6492 = vmatpush1.bf16.msra.mxu0 %v9332_v0  ;;  %6549 = vmatpush1.bf16.msra.mxu1 %v9333_v13  ;;  %v9387_v0 = vld [vmem:[%s12293_s16 + $0x714] ss:$8 sps:$4 sm:$0xff]   ;;  %v9388_v13 = vld [vmem:[%s12293_s16 + $0x610] ss:$8 sps:$4 sm:$0xff]  }
 0xdeb   : > { %6493 = vmatprep.subr.bf16.mxu0 %v9334_v3  ;;  %6550 = vmatprep.subr.bf16.mxu1 %v9335_v14  ;;  %v9389_v3 = vld [vmem:[%s12293_s16 + $0x710] ss:$8 sps:$4 sm:$0xff]   ;;  %v9390_v14 = vld [vmem:[%s12293_s16 + $0x624] ss:$8 sps:$4 sm:$0xff]  }
 0xdee   : > { %6494 = vmatpush1.bf16.msra.mxu0 %v9336_v10  ;;  %6551 = vmatpush1.bf16.msra.mxu1 %v9337_v6  ;;  %v9391_v10 = vld [vmem:[%s12293_s16 + $0x724] ss:$8 sps:$4 sm:$0xff]   ;;  %v9392_v6 = vld [vmem:[%s12293_s16 + $0x620] ss:$8 sps:$4 sm:$0xff]  }
 0xdef   : > { %6495 = vmatprep.subr.bf16.mxu0 %v9338_v19  ;;  %6552 = vmatprep.subr.bf16.mxu1 %v9339_v20  ;;  %v9393_v19 = vld [vmem:[%s12293_s16 + $0x720] ss:$8 sps:$4 sm:$0xff]   ;;  %v9394_v20 = vld [vmem:[%s12293_s16 + $0x634] ss:$8 sps:$4 sm:$0xff]  }
 0xdf2   : > { %6496 = vmatpush1.bf16.msra.mxu0 %v9340_v23  ;;  %6553 = vmatpush1.bf16.msra.mxu1 %v9341_v50  ;;  %v9395_v23 = vld [vmem:[%s12293_s16 + $0x734] ss:$8 sps:$4 sm:$0xff]   ;;  %v9396_v50 = vld [vmem:[%s12293_s16 + $0x630] ss:$8 sps:$4 sm:$0xff]  }
 0xdf3   : > { %6497 = vmatprep.subr.bf16.mxu0 %v9342_v52  ;;  %6554 = vmatprep.subr.bf16.mxu1 %v9343_v58  ;;  %v9397_v52 = vld [vmem:[%s12293_s16 + $0x730] ss:$8 sps:$4 sm:$0xff]   ;;  %v9398_v58 = vld [vmem:[%s12293_s16 + $0x644] ss:$8 sps:$4 sm:$0xff]  }
 0xdf6   : > { %6498 = vmatpush1.bf16.msra.mxu0 %v9344_v62  ;;  %6555 = vmatpush1.bf16.msra.mxu1 %v9345_v7  ;;  %v9399_v62 = vld [vmem:[%s12293_s16 + $0x744] ss:$8 sps:$4 sm:$0xff]   ;;  %v9400_v7 = vld [vmem:[%s12293_s16 + $0x640] ss:$8 sps:$4 sm:$0xff]  }
 0xdf7   : > { %6499 = vmatprep.subr.bf16.mxu0 %v9346_v8  ;;  %6556 = vmatprep.subr.bf16.mxu1 %v9347_v9  ;;  %v9401_v8 = vld [vmem:[%s12293_s16 + $0x740] ss:$8 sps:$4 sm:$0xff]   ;;  %v9402_v9 = vld [vmem:[%s12293_s16 + $0x654] ss:$8 sps:$4 sm:$0xff]  }
 0xdfa   : > { %6500 = vmatpush1.bf16.msra.mxu0 %v9348_v15  ;;  %6557 = vmatpush1.bf16.msra.mxu1 %v9349_v17  ;;  %v9403_v15 = vld [vmem:[%s12293_s16 + $0x754] ss:$8 sps:$4 sm:$0xff]   ;;  %v9404_v17 = vld [vmem:[%s12293_s16 + $0x650] ss:$8 sps:$4 sm:$0xff]  }
 0xdfb   : > { %6501 = vmatprep.subr.bf16.mxu0 %v9350_v25  ;;  %6558 = vmatprep.subr.bf16.mxu1 %v9351_v29  ;;  %v9405_v25 = vld [vmem:[%s12293_s16 + $0x750] ss:$8 sps:$4 sm:$0xff]   ;;  %v9406_v29 = vld [vmem:[%s12293_s16 + $0x664] ss:$8 sps:$4 sm:$0xff]  }
 0xdfe   : > { %6502 = vmatpush1.bf16.msra.mxu0 %v9352_v30  ;;  %6559 = vmatpush1.bf16.msra.mxu1 %v9353_v33  ;;  %v9407_v30 = vld [vmem:[%s12293_s16 + $0x764] ss:$8 sps:$4 sm:$0xff]   ;;  %v9408_v33 = vld [vmem:[%s12293_s16 + $0x660] ss:$8 sps:$4 sm:$0xff]  }
 0xdff   : > { %6503 = vmatprep.subr.bf16.mxu0 %v9354_v36  ;;  %6560 = vmatprep.subr.bf16.mxu1 %v9355_v38  ;;  %v9409_v36 = vld [vmem:[%s12293_s16 + $0x760] ss:$8 sps:$4 sm:$0xff]   ;;  %v9410_v38 = vld [vmem:[%s12293_s16 + $0x674] ss:$8 sps:$4 sm:$0xff]  }
 0xe02   : > { %6504 = vmatpush1.bf16.msra.mxu0 %v9356_v27  ;;  %6561 = vmatpush1.bf16.msra.mxu1 %v9357_v35  ;;  %v9411_v27 = vld [vmem:[%s12293_s16 + $0x774] ss:$8 sps:$4 sm:$0xff]   ;;  %v9412_v35 = vld [vmem:[%s12293_s16 + $0x670] ss:$8 sps:$4 sm:$0xff]  }
 0xe03   : > { %6505 = vmatprep.subr.bf16.mxu0 %v9358_v40  ;;  %6562 = vmatprep.subr.bf16.mxu1 %v9359_v31  ;;  %v9413_v40 = vld [vmem:[%s12293_s16 + $0x770] ss:$8 sps:$4 sm:$0xff]   ;;  %v9414_v31 = vld [vmem:[%s12293_s16 + $0x684] ss:$8 sps:$4 sm:$0xff]  }
 0xe06   : > { %6506 = vmatpush1.bf16.msra.mxu0 %v9360_v37  ;;  %6563 = vmatpush1.bf16.msra.mxu1 %v9361_v42  ;;  %v9415_v37 = vld [vmem:[%s12293_s16 + $0x784] ss:$8 sps:$4 sm:$0xff]   ;;  %v9416_v42 = vld [vmem:[%s12293_s16 + $0x680] ss:$8 sps:$4 sm:$0xff]  }
 0xe07   : > { %6507 = vmatprep.subr.bf16.mxu0 %v9362_v43  ;;  %6564 = vmatprep.subr.bf16.mxu1 %v9363_v44  ;;  %v9417_v43 = vld [vmem:[%s12293_s16 + $0x780] ss:$8 sps:$4 sm:$0xff]   ;;  %v9418_v44 = vld [vmem:[%s12293_s16 + $0x694] ss:$8 sps:$4 sm:$0xff]  }
 0xe0a   : > { %6508 = vmatpush1.bf16.msra.mxu0 %v9364_v47  ;;  %6565 = vmatpush1.bf16.msra.mxu1 %v9365_v49  ;;  %v9419_v47 = vld [vmem:[%s12293_s16 + $0x794] ss:$8 sps:$4 sm:$0xff]   ;;  %v9420_v49 = vld [vmem:[%s12293_s16 + $0x690] ss:$8 sps:$4 sm:$0xff]  }
 0xe0b   : > { %6509 = vmatprep.subr.bf16.mxu0 %v9366_v51  ;;  %6566 = vmatprep.subr.bf16.mxu1 %v9367_v4  ;;  %v9421_v51 = vld [vmem:[%s12293_s16 + $0x790] ss:$8 sps:$4 sm:$0xff]   ;;  %v9422_v4 = vld [vmem:[%s12293_s16 + $0x6a4] ss:$8 sps:$4 sm:$0xff]  }
 0xe0e   : > { %6510 = vmatpush1.bf16.msra.mxu0 %v9368_v63  ;;  %6567 = vmatpush1.bf16.msra.mxu1 %v9369_v53  ;;  %v9423_v63 = vld [vmem:[%s12293_s16 + $0x7a4] ss:$8 sps:$4 sm:$0xff]   ;;  %v9424_v53 = vld [vmem:[%s12293_s16 + $0x6a0] ss:$8 sps:$4 sm:$0xff]  }
 0xe0f   : > { %6511 = vmatprep.subr.bf16.mxu0 %v9370_v59  ;;  %6568 = vmatprep.subr.bf16.mxu1 %v9371_v56  ;;  %v9425_v59 = vld [vmem:[%s12293_s16 + $0x7a0] ss:$8 sps:$4 sm:$0xff]   ;;  %v9426_v56 = vld [vmem:[%s12293_s16 + $0x6b4] ss:$8 sps:$4 sm:$0xff]  }
 0xe12   : > { %6512 = vmatpush1.bf16.msra.mxu0 %v9372_v21  ;;  %6569 = vmatpush1.bf16.msra.mxu1 %v9373_v11  ;;  %v9427_v21 = vld [vmem:[%s12293_s16 + $0x7b4] ss:$8 sps:$4 sm:$0xff]   ;;  %v9428_v11 = vld [vmem:[%s12293_s16 + $0x6b0] ss:$8 sps:$4 sm:$0xff]  }
 0xe13   : > { %6513 = vmatprep.subr.bf16.mxu0 %v9374_v18  ;;  %6570 = vmatprep.subr.bf16.mxu1 %v9375_v5  ;;  %v9429_v18 = vld [vmem:[%s12293_s16 + $0x7b0] ss:$8 sps:$4 sm:$0xff]   ;;  %v9430_v5 = vld [vmem:[%s12293_s16 + $0x6c4] ss:$8 sps:$4 sm:$0xff]  }
 0xe16   : > { %6514 = vmatpush1.bf16.msra.mxu0 %v9376_v16  ;;  %6571 = vmatpush1.bf16.msra.mxu1 %v9377_v24  ;;  %v9431_v16 = vld [vmem:[%s12293_s16 + $0x7c4] ss:$8 sps:$4 sm:$0xff]   ;;  %v9432_v24 = vld [vmem:[%s12293_s16 + $0x6c0] ss:$8 sps:$4 sm:$0xff]  }
 0xe17   : > { %6515 = vmatprep.subr.bf16.mxu0 %v9378_v26  ;;  %6572 = vmatprep.subr.bf16.mxu1 %v9379_v22  ;;  %v9433_v26 = vld [vmem:[%s12293_s16 + $0x7c0] ss:$8 sps:$4 sm:$0xff]   ;;  %v9434_v22 = vld [vmem:[%s12293_s16 + $0x6d4] ss:$8 sps:$4 sm:$0xff]  }
 0xe1a   : > { %6516 = vmatpush1.bf16.msra.mxu0 %v9380_v12  ;;  %6573 = vmatpush1.bf16.msra.mxu1 %v9381_v54  ;;  %v9435_v12 = vld [vmem:[%s12293_s16 + $0x7d4] ss:$8 sps:$4 sm:$0xff]   ;;  %v9436_v54 = vld [vmem:[%s12293_s16 + $0x6d0] ss:$8 sps:$4 sm:$0xff]  }
 0xe1b   : > { %6599 = vmatprep.subr.bf16.mxu0 %v9382_v55  ;;  %6656 = vmatprep.subr.bf16.mxu1 %v9383_v57  ;;  %v9437_v55 = vld [vmem:[%s12293_s16 + $0x7d0] ss:$8 sps:$4 sm:$0xff]   ;;  %v9438_v57 = vld [vmem:[%s12293_s16 + $0x6e4] ss:$8 sps:$4 sm:$0xff]  }
 0xe1d   : > { %6518 = vmatmul.mubr.bf16.vlgmr.msra.gmra.mrb[148].mxu0 %v11528_v2  ;;  %6575 = vmatmul.mubr.bf16.vlgmr.msra.gmra.mrb[140].mxu1 %v11528_v2 }
 0xe1e   : > { %6527 = vmatprep.mubr.bf16.mxu0 %v11524_v41  ;;  %6584 = vmatprep.mubr.bf16.mxu1 %v11524_v41 }
 0xe1f   : > { %6600 = vmatpush1.bf16.msra.mxu0 %v9384_v28  ;;  %6657 = vmatpush1.bf16.msra.mxu1 %v9385_v60  ;;  %v9439_v28 = vld [vmem:[%s12293_s16 + $0x7e4] ss:$8 sps:$4 sm:$0xff]   ;;  %v9440_v60 = vld [vmem:[%s12293_s16 + $0x6e0] ss:$8 sps:$4 sm:$0xff]  }
 0xe20   : > { %6601 = vmatprep.subr.bf16.mxu0 %v9386_v61  ;;  %6658 = vmatprep.subr.bf16.mxu1 %v9387_v0  ;;  %v9441_v61 = vld [vmem:[%s12293_s16 + $0x7e0] ss:$8 sps:$4 sm:$0xff]   ;;  %v9442_v0 = vld [vmem:[%s12293_s16 + $0x6f4] ss:$8 sps:$4 sm:$0xff]  }
 0xe23   : > { %6602 = vmatpush1.bf16.msra.mxu0 %v9388_v13  ;;  %6659 = vmatpush1.bf16.msra.mxu1 %v9389_v3  ;;  %v9443_v13 = vld [vmem:[%s12293_s16 + $0x7f4] ss:$8 sps:$4 sm:$0xff]   ;;  %v9444_v3 = vld [vmem:[%s12293_s16 + $0x6f0] ss:$8 sps:$4 sm:$0xff]  }
 0xe24   : > { %6603 = vmatprep.subr.bf16.mxu0 %v9390_v14  ;;  %6660 = vmatprep.subr.bf16.mxu1 %v9391_v10  ;;  %v9445_v14 = vld [vmem:[%s12293_s16 + $0x7f0] ss:$8 sps:$4 sm:$0xff]   ;;  %v9446_v10 = vld [vmem:[%s12293_s16 + $0x804] ss:$8 sps:$4 sm:$0xff]  }
 0xe25   : > { %6528 = vmatmul.mubr.bf16.gmra.mrb[152].mxu0 %v11522_v39  ;;  %6585 = vmatmul.mubr.bf16.gmra.mrb[144].mxu1 %v11522_v39 }
 0xe26   : > { %6631 = vmatprep.mubr.bf16.mxu0 %v11526_v45  ;;  %6688 = vmatprep.mubr.bf16.mxu1 %v11526_v45 }
 0xe27   : > { %6604 = vmatpush1.bf16.msra.mxu0 %v9392_v6  ;;  %6661 = vmatpush1.bf16.msra.mxu1 %v9393_v19  ;;  %v9447_v6 = vld [vmem:[%s12293_s16 + $0x800] ss:$8 sps:$4 sm:$0xff]   ;;  %v9448_v19 = vld [vmem:[%s12293_s16 + $0x814] ss:$8 sps:$4 sm:$0xff]  }
 0xe28   : > { %6605 = vmatprep.subr.bf16.mxu0 %v9394_v20  ;;  %6662 = vmatprep.subr.bf16.mxu1 %v9395_v23  ;;  %v9449_v20 = vld [vmem:[%s12293_s16 + $0x810] ss:$8 sps:$4 sm:$0xff]   ;;  %v9450_v23 = vld [vmem:[%s12293_s16 + $0x824] ss:$8 sps:$4 sm:$0xff]  }
 0xe2b   : > { %6606 = vmatpush1.bf16.msra.mxu0 %v9396_v50  ;;  %6663 = vmatpush1.bf16.msra.mxu1 %v9397_v52  ;;  %v9451_v50 = vld [vmem:[%s12293_s16 + $0x820] ss:$8 sps:$4 sm:$0xff]   ;;  %v9452_v52 = vld [vmem:[%s12293_s16 + $0x834] ss:$8 sps:$4 sm:$0xff]  }
 0xe2c   : > { %6607 = vmatprep.subr.bf16.mxu0 %v9398_v58  ;;  %6664 = vmatprep.subr.bf16.mxu1 %v9399_v62  ;;  %v9453_v58 = vld [vmem:[%s12293_s16 + $0x830] ss:$8 sps:$4 sm:$0xff]   ;;  %v9454_v62 = vld [vmem:[%s12293_s16 + $0x844] ss:$8 sps:$4 sm:$0xff]  }
 0xe2f   : > { %6608 = vmatpush1.bf16.msra.mxu0 %v9400_v7  ;;  %6665 = vmatpush1.bf16.msra.mxu1 %v9401_v8  ;;  %v9455_v8 = vld [vmem:[%s12293_s16 + $0x840] ss:$8 sps:$4 sm:$0xff]  }
 0xe30   : > { %6609 = vmatprep.subr.bf16.mxu0 %v9402_v9  ;;  %6666 = vmatprep.subr.bf16.mxu1 %v9403_v15 }
 0xe33   : > { %6610 = vmatpush1.bf16.msra.mxu0 %v9404_v17  ;;  %6667 = vmatpush1.bf16.msra.mxu1 %v9405_v25  ;;  %v9456_v17 = vld [vmem:[%s12293_s16 + $0x854] ss:$8 sps:$4 sm:$0xff]  }
 0xe34   : > { %6611 = vmatprep.subr.bf16.mxu0 %v9406_v29  ;;  %6668 = vmatprep.subr.bf16.mxu1 %v9407_v30 }
 0xe37   : > { %6612 = vmatpush1.bf16.msra.mxu0 %v9408_v33  ;;  %6669 = vmatpush1.bf16.msra.mxu1 %v9409_v36 }
 0xe38   : > { %6613 = vmatprep.subr.bf16.mxu0 %v9410_v38  ;;  %6670 = vmatprep.subr.bf16.mxu1 %v9411_v27 }
 0xe3b   : > { %6614 = vmatpush1.bf16.msra.mxu0 %v9412_v35  ;;  %6671 = vmatpush1.bf16.msra.mxu1 %v9413_v40  ;;  %v9457_v40 = vld [vmem:[%s12293_s16 + $0x850] ss:$8 sps:$4 sm:$0xff]  }
 0xe3c   : > { %6615 = vmatprep.subr.bf16.mxu0 %v9414_v31  ;;  %6672 = vmatprep.subr.bf16.mxu1 %v9415_v37  ;;  %v9458_v31 = vld [vmem:[%s12293_s16 + $0x864] ss:$8 sps:$4 sm:$0xff]  }
 0xe3f   : > { %6616 = vmatpush1.bf16.msra.mxu0 %v9416_v42  ;;  %6673 = vmatpush1.bf16.msra.mxu1 %v9417_v43  ;;  %v9459_v43 = vld [vmem:[%s12293_s16 + $0x860] ss:$8 sps:$4 sm:$0xff]  }
 0xe40   : > { %6617 = vmatprep.subr.bf16.mxu0 %v9418_v44  ;;  %6674 = vmatprep.subr.bf16.mxu1 %v9419_v47 }
 0xe43   : > { %6618 = vmatpush1.bf16.msra.mxu0 %v9420_v49  ;;  %6675 = vmatpush1.bf16.msra.mxu1 %v9421_v51  ;;  %v9460_v49 = vld [vmem:[%s12293_s16 + $0x874] ss:$8 sps:$4 sm:$0xff]  }
 0xe44   : > { %6619 = vmatprep.subr.bf16.mxu0 %v9422_v4  ;;  %6676 = vmatprep.subr.bf16.mxu1 %v9423_v63 }
 0xe47   : > { %6620 = vmatpush1.bf16.msra.mxu0 %v9424_v53  ;;  %6677 = vmatpush1.bf16.msra.mxu1 %v9425_v59 }
 0xe48   : > { %6621 = vmatprep.subr.bf16.mxu0 %v9426_v56  ;;  %6678 = vmatprep.subr.bf16.mxu1 %v9427_v21 }
 0xe4b   : > { %6622 = vmatpush1.bf16.msra.mxu0 %v9428_v11  ;;  %6679 = vmatpush1.bf16.msra.mxu1 %v9429_v18  ;;  %v9461_v18 = vld [vmem:[%s12293_s16 + $0x870] ss:$8 sps:$4 sm:$0xff]  }
 0xe4c   : > { %6623 = vmatprep.subr.bf16.mxu0 %v9430_v5  ;;  %6680 = vmatprep.subr.bf16.mxu1 %v9431_v16  ;;  %v9462_v5 = vld [vmem:[%s12293_s16 + $0x884] ss:$8 sps:$4 sm:$0xff]   ;;  %v9463_v16 = vld [vmem:[%s12293_s16 + $0x880] ss:$8 sps:$4 sm:$0xff]  }
 0xe4f   : > { %6624 = vmatpush1.bf16.msra.mxu0 %v9432_v24  ;;  %6681 = vmatpush1.bf16.msra.mxu1 %v9433_v26  ;;  %v9464_v24 = vld [vmem:[%s12293_s16 + $0x894] ss:$8 sps:$4 sm:$0xff]   ;;  %v9465_v26 = vld [vmem:[%s12293_s16 + $0x890] ss:$8 sps:$4 sm:$0xff]  }
 0xe50   : > { %6625 = vmatprep.subr.bf16.mxu0 %v9434_v22  ;;  %6682 = vmatprep.subr.bf16.mxu1 %v9435_v12  ;;  %v9466_v22 = vld [vmem:[%s12293_s16 + $0x8a4] ss:$8 sps:$4 sm:$0xff]   ;;  %v9467_v12 = vld [vmem:[%s12293_s16 + $0x8a0] ss:$8 sps:$4 sm:$0xff]  }
 0xe53   : > { %6626 = vmatpush1.bf16.msra.mxu0 %v9436_v54  ;;  %6683 = vmatpush1.bf16.msra.mxu1 %v9437_v55  ;;  %v9468_v54 = vld [vmem:[%s12293_s16 + $0x8b4] ss:$8 sps:$4 sm:$0xff]   ;;  %v9469_v55 = vld [vmem:[%s12293_s16 + $0x8b0] ss:$8 sps:$4 sm:$0xff]  }
 0xe54   : > { %6627 = vmatprep.subr.bf16.mxu0 %v9438_v57  ;;  %6684 = vmatprep.subr.bf16.mxu1 %v9439_v28  ;;  %v9470_v57 = vld [vmem:[%s12293_s16 + $0x8c4] ss:$8 sps:$4 sm:$0xff]   ;;  %v9471_v28 = vld [vmem:[%s12293_s16 + $0x8c0] ss:$8 sps:$4 sm:$0xff]  }
 0xe57   : > { %6628 = vmatpush1.bf16.msra.mxu0 %v9440_v60  ;;  %6685 = vmatpush1.bf16.msra.mxu1 %v9441_v61  ;;  %v9472_v60 = vld [vmem:[%s12293_s16 + $0x8d4] ss:$8 sps:$4 sm:$0xff]   ;;  %v9473_v61 = vld [vmem:[%s12293_s16 + $0x8d0] ss:$8 sps:$4 sm:$0xff]  }
 0xe58   : > { %6629 = vmatprep.subr.bf16.mxu0 %v9442_v0  ;;  %6686 = vmatprep.subr.bf16.mxu1 %v9443_v13  ;;  %v9474_v0 = vld [vmem:[%s12293_s16 + $0x8e4] ss:$8 sps:$4 sm:$0xff]   ;;  %v9475_v13 = vld [vmem:[%s12293_s16 + $0x8e0] ss:$8 sps:$4 sm:$0xff]  }
 0xe5b   : > { %6630 = vmatpush1.bf16.msra.mxu0 %v9444_v3  ;;  %6687 = vmatpush1.bf16.msra.mxu1 %v9445_v14  ;;  %v9476_v3 = vld [vmem:[%s12293_s16 + $0x8f4] ss:$8 sps:$4 sm:$0xff]   ;;  %v9477_v14 = vld [vmem:[%s12293_s16 + $0x8f0] ss:$8 sps:$4 sm:$0xff]  }
 0xe5c   : > { %6713 = vmatprep.subr.bf16.mxu0 %v9446_v10 }
 0xe5e   : > { %6632 = vmatmul.mubr.bf16.vlgmr.msra.gmra.mrb[156].mxu0 %v11528_v2  ;;  %6689 = vmatmul.mubr.bf16.vlgmr.msra.gmra.mrb[148].mxu1 %v11528_v2 }
 0xe5f   : > { %6641 = vmatprep.mubr.bf16.mxu0 %v11524_v41  ;;  %6698 = vmatprep.mubr.bf16.mxu1 %v11524_v41 }
 0xe60   : > { %6714 = vmatpush1.bf16.msra.mxu0 %v9447_v6 }
 0xe61   : > { %6715 = vmatprep.subr.bf16.mxu0 %v9448_v19 }
 0xe64   : > { %6716 = vmatpush1.bf16.msra.mxu0 %v9449_v20 }
 0xe65   : > { %6717 = vmatprep.subr.bf16.mxu0 %v9450_v23 }
 0xe66   : > { %6642 = vmatmul.mubr.bf16.gmra.mrb[160].mxu0 %v11522_v39  ;;  %6699 = vmatmul.mubr.bf16.gmra.mrb[152].mxu1 %v11522_v39 }
 0xe67   : > { %6745 = vmatprep.mubr.bf16.mxu0 %v11526_v45 }
 0xe68   : > { %6718 = vmatpush1.bf16.msra.mxu0 %v9451_v50 }
 0xe69   : > { %6719 = vmatprep.subr.bf16.mxu0 %v9452_v52 }
 0xe6c   : > { %6720 = vmatpush1.bf16.msra.mxu0 %v9453_v58 }
 0xe6d   : > { %6721 = vmatprep.subr.bf16.mxu0 %v9454_v62 }
 0xe6f   : > { %v6291_v45 = vpop.f32.mrb[132].mxu0  ;;  %v6348_v7 = vpop.f32.mrb[124].mxu1 }
 0xe70   : > { %6722 = vmatpush1.bf16.msra.mxu0 %v9455_v8  ;;  %v6293_v9 = vpop.f32.mrb[133].mxu0  ;;  %v6350_v15 = vpop.f32.mrb[125].mxu1 }
 0xe71   : > { %6723 = vmatprep.subr.bf16.mxu0 %v9456_v17  ;;  %v6295_v25 = vpop.f32.mrb[134].mxu0  ;;  %v6352_v29 = vpop.f32.mrb[126].mxu1 }
 0xe72   : > { %v6310_v30 = vpack.c.bf16 %v6295_v25, %v6291_v45  ;;  %v6367_v33 = vpack.c.bf16 %v6352_v29, %v6348_v7  ;;  %v6297_v36 = vpop.f32.mrb[135].mxu0  ;;  %v6354_v38 = vpop.f32.mrb[127].mxu1 }
 0xe73   : > { %v6311_v27 = vpack.c.bf16 %v6297_v36, %v6293_v9  ;;  %v6368_v35 = vpack.c.bf16 %v6354_v38, %v6350_v15 }
 0xe74   : > { %6724 = vmatpush1.bf16.msra.mxu0 %v9457_v40 }
 0xe75   : > { %6725 = vmatprep.subr.bf16.mxu0 %v9458_v31  ;;  %6838 = vmatprep.subr.bf16.mxu1 %v6311_v27 }
 0xe76   : > { %6839 = vmatpush1.bf16.msra.mxu1 %v6310_v30 }
 0xe77   : > { %v6301_v37 = vpop.f32.mrb[136].mxu0  ;;  %v6358_v42 = vpop.f32.mrb[128].mxu1 }
 0xe78   : > { %6726 = vmatpush1.bf16.msra.mxu0 %v9459_v43  ;;  %v6303_v44 = vpop.f32.mrb[137].mxu0  ;;  %v6360_v47 = vpop.f32.mrb[129].mxu1 }
 0xe79   : > { %6727 = vmatprep.subr.bf16.mxu0 %v9460_v49  ;;  %v6305_v51 = vpop.f32.mrb[138].mxu0  ;;  %v6362_v4 = vpop.f32.mrb[130].mxu1 }
 0xe7a   : > { %v6312_v63 = vpack.c.bf16 %v6305_v51, %v6301_v37  ;;  %v6369_v53 = vpack.c.bf16 %v6362_v4, %v6358_v42  ;;  %v6307_v59 = vpop.f32.mrb[139].mxu0  ;;  %v6364_v56 = vpop.f32.mrb[131].mxu1  ;;  %v9170_v37 = vld [vmem:[%s12296_s19 + $0x4] ss:$12 sps:$4 sm:$0xff]  }
 0xe7b   : > { %v6313_v21 = vpack.c.bf16 %v6307_v59, %v6303_v44  ;;  %v6370_v11 = vpack.c.bf16 %v6364_v56, %v6360_v47  ;;  %6870 = vmatprep.mubr.bf16.mxu1 %v9170_v37 }
 0xe7c   : > { %6728 = vmatpush1.bf16.msra.mxu0 %v9461_v18 }
 0xe7d   : > { %6729 = vmatprep.subr.bf16.mxu0 %v9462_v5  ;;  %6840 = vmatprep.subr.bf16.mxu1 %v6313_v21 }
 0xe7e   : > { %6841 = vmatpush1.bf16.msra.mxu1 %v6312_v63 }
 0xe7f   : > { %6842 = vmatprep.subr.bf16.mxu1 %v6368_v35 }
 0xe80   : > { %6730 = vmatpush1.bf16.msra.mxu0 %v9463_v16 }
 0xe81   : > { %6731 = vmatprep.subr.bf16.mxu0 %v9464_v24 }
 0xe82   : > { %6843 = vmatpush1.bf16.msra.mxu1 %v6367_v33 }
 0xe83   : > { %6844 = vmatprep.subr.bf16.mxu1 %v6370_v11 }
 0xe84   : > { %6732 = vmatpush1.bf16.msra.mxu0 %v9465_v26 }
 0xe85   : > { %6733 = vmatprep.subr.bf16.mxu0 %v9466_v22 }
 0xe86   : > { %6845 = vmatpush1.bf16.msra.mxu1 %v6369_v53 }
 0xe88   : > { %6734 = vmatpush1.bf16.msra.mxu0 %v9467_v12 }
 0xe89   : > { %6735 = vmatprep.subr.bf16.mxu0 %v9468_v54 }
 0xe8c   : > { %6736 = vmatpush1.bf16.msra.mxu0 %v9469_v55 }
 0xe8d   : > { %6737 = vmatprep.subr.bf16.mxu0 %v9470_v57 }
 0xe90   : > { %6738 = vmatpush1.bf16.msra.mxu0 %v9471_v28 }
 0xe91   : > { %6739 = vmatprep.subr.bf16.mxu0 %v9472_v60 }
 0xe94   : > { %6740 = vmatpush1.bf16.msra.mxu0 %v9473_v61 }
 0xe95   : > { %6741 = vmatprep.subr.bf16.mxu0 %v9474_v0 }
 0xe98   : > { %6742 = vmatpush1.bf16.msra.mxu0 %v9475_v13 }
 0xe99   : > { %6743 = vmatprep.subr.bf16.mxu0 %v9476_v3 }
 0xe9c   : > { %6744 = vmatpush1.bf16.msra.mxu0 %v9477_v14 }
 0xe9f   : > { %6746 = vmatmul.mubr.bf16.vlgmr.msra.gmra.mrb[164].mxu0 %v11528_v2 }
 0xea0   : > { %6755 = vmatprep.mubr.bf16.mxu0 %v11524_v41 }
 0xea7   : > { %6756 = vmatmul.mubr.bf16.gmra.mrb[168].mxu0 %v11522_v39 }
 0xea8   : > { %7054 = vmatprep.mubr.bf16.mxu0 %v12338_v1 }
 0xeaf   : > { %v6405_v10 = vpop.f32.mrb[140].mxu0  ;;  %v6462_v6 = vpop.f32.mrb[132].mxu1 }
 0xeb0   : > { %v6407_v19 = vpop.f32.mrb[141].mxu0  ;;  %v6464_v20 = vpop.f32.mrb[133].mxu1 }
 0xeb1   : > { %v6409_v23 = vpop.f32.mrb[142].mxu0  ;;  %v6466_v50 = vpop.f32.mrb[134].mxu1 }
 0xeb2   : > { %v6424_v52 = vpack.c.bf16 %v6409_v23, %v6405_v10  ;;  %v6481_v58 = vpack.c.bf16 %v6466_v50, %v6462_v6  ;;  %v6411_v62 = vpop.f32.mrb[143].mxu0  ;;  %v6468_v45 = vpop.f32.mrb[135].mxu1 }
 0xeb3   : > { %v6425_v7 = vpack.c.bf16 %v6411_v62, %v6407_v19  ;;  %v6482_v8 = vpack.c.bf16 %v6468_v45, %v6464_v20 }
 0xeb5   : > { %6846 = vmatprep.subr.bf16.mxu1 %v6425_v7 }
 0xeb6   : > { %6847 = vmatpush1.bf16.msra.mxu1 %v6424_v52 }
 0xeb7   : > { %v6415_v2 = vpop.f32.mrb[144].mxu0  ;;  %v6472_v41 = vpop.f32.mrb[136].mxu1 }
 0xeb8   : > { %v6417_v9 = vpop.f32.mrb[145].mxu0  ;;  %v6474_v39 = vpop.f32.mrb[137].mxu1 }
 0xeb9   : > { %v6419_v15 = vpop.f32.mrb[146].mxu0  ;;  %v6476_v17 = vpop.f32.mrb[138].mxu1 }
 0xeba   : > { %v6426_v25 = vpack.c.bf16 %v6419_v15, %v6415_v2  ;;  %v6483_v29 = vpack.c.bf16 %v6476_v17, %v6472_v41  ;;  %v6421_v30 = vpop.f32.mrb[147].mxu0  ;;  %v6478_v33 = vpop.f32.mrb[139].mxu1  ;;  %v9173_v15 = vld [vmem:[%s12296_s19 + $0x18] ss:$12 sps:$4 sm:$0xff]  }
 0xebb   : > { %v6427_v36 = vpack.c.bf16 %v6421_v30, %v6417_v9  ;;  %v6484_v38 = vpack.c.bf16 %v6478_v33, %v6474_v39  ;;  %v9168_v9 = vld [vmem:[%s12296_s19] ss:$12 sps:$4 sm:$0xff]   ;;  %v9171_v39 = vld [vmem:[%s12296_s19 + $0x1c] ss:$12 sps:$4 sm:$0xff]  }
 0xebd   : > { %6848 = vmatprep.subr.bf16.mxu1 %v6427_v36 }
 0xebe   : > { %6849 = vmatpush1.bf16.msra.mxu1 %v6426_v25 }
 0xebf   : > { %6850 = vmatprep.subr.bf16.mxu1 %v6482_v8 }
 0xec2   : > { %6851 = vmatpush1.bf16.msra.mxu1 %v6481_v58 }
 0xec3   : > { %6852 = vmatprep.subr.bf16.mxu1 %v6484_v38 }
 0xec6   : > { %6853 = vmatpush1.bf16.msra.mxu1 %v6483_v29 }
 0xef0   : > { %v6519_v27 = vpop.f32.mrb[148].mxu0  ;;  %v6576_v35 = vpop.f32.mrb[140].mxu1 }
 0xef1   : > { %v6521_v40 = vpop.f32.mrb[149].mxu0  ;;  %v6578_v31 = vpop.f32.mrb[141].mxu1 }
 0xef2   : > { %v6523_v42 = vpop.f32.mrb[150].mxu0  ;;  %v6580_v43 = vpop.f32.mrb[142].mxu1 }
 0xef3   : > { %v6538_v44 = vpack.c.bf16 %v6523_v42, %v6519_v27  ;;  %v6595_v47 = vpack.c.bf16 %v6580_v43, %v6576_v35  ;;  %v6525_v49 = vpop.f32.mrb[151].mxu0  ;;  %v6582_v51 = vpop.f32.mrb[143].mxu1  ;;  %v9174_v42 = vld [vmem:[%s12296_s19 + $0x8] ss:$12 sps:$4 sm:$0xff]   ;;  %v9175_v43 = vld [vmem:[%s12296_s19 + $0x20] ss:$12 sps:$4 sm:$0xff]  }
 0xef4   : > { %v6539_v4 = vpack.c.bf16 %v6525_v49, %v6521_v40  ;;  %v6596_v63 = vpack.c.bf16 %v6582_v51, %v6578_v31 }
 0xef6   : > { %6854 = vmatprep.subr.bf16.mxu1 %v6539_v4  ;;  %v6790_v4 = vpop.permute.xlu1 %6789 }
 0xef7   : > { %6855 = vmatpush1.bf16.msra.mxu1 %v6538_v44  ;;  %v6785_v44 = vpop.permute.xlu0 %6784 }
 0xef8   : > { %v6529_v53 = vpop.f32.mrb[152].mxu0  ;;  %v6586_v59 = vpop.f32.mrb[144].mxu1 }
 0xef9   : > { %v6531_v56 = vpop.f32.mrb[153].mxu0  ;;  %v6588_v21 = vpop.f32.mrb[145].mxu1 }
 0xefa   : > { %v6533_v11 = vpop.f32.mrb[154].mxu0  ;;  %v6590_v18 = vpop.f32.mrb[146].mxu1 }
 0xefb   : > { %v6540_v5 = vpack.c.bf16 %v6533_v11, %v6529_v53  ;;  %v6597_v16 = vpack.c.bf16 %v6590_v18, %v6586_v59  ;;  %v6535_v24 = vpop.f32.mrb[155].mxu0  ;;  %v6592_v26 = vpop.f32.mrb[147].mxu1 }
 0xefc   : > { %v6541_v22 = vpack.c.bf16 %v6535_v24, %v6531_v56  ;;  %v6598_v12 = vpack.c.bf16 %v6592_v26, %v6588_v21  ;;  %v6795_v26 = vpop.permute.xlu0 %6794 }
 0xefe   : > { %6856 = vmatprep.subr.bf16.mxu1 %v6541_v22 }
 0xeff   : > { %6857 = vmatpush1.bf16.msra.mxu1 %v6540_v5 }
 0xf00   : > { %6858 = vmatprep.subr.bf16.mxu1 %v6596_v63 }
 0xf03   : > { %6859 = vmatpush1.bf16.msra.mxu1 %v6595_v47 }
 0xf04   : > { %6860 = vmatprep.subr.bf16.mxu1 %v6598_v12 }
 0xf07   : > { %6861 = vmatpush1.bf16.msra.mxu1 %v6597_v16 }
 0xf31   : > { %v6633_v54 = vpop.f32.mrb[156].mxu0  ;;  %v6690_v55 = vpop.f32.mrb[148].mxu1 }
 0xf32   : > { %v6635_v57 = vpop.f32.mrb[157].mxu0  ;;  %v6692_v28 = vpop.f32.mrb[149].mxu1 }
 0xf33   : > { %v6637_v60 = vpop.f32.mrb[158].mxu0  ;;  %v6694_v61 = vpop.f32.mrb[150].mxu1 }
 0xf34   : > { %v6652_v0 = vpack.c.bf16 %v6637_v60, %v6633_v54  ;;  %v6709_v13 = vpack.c.bf16 %v6694_v61, %v6690_v55  ;;  %v6639_v3 = vpop.f32.mrb[159].mxu0  ;;  %v6696_v14 = vpop.f32.mrb[151].mxu1 }
 0xf35   : > { %v6653_v10 = vpack.c.bf16 %v6639_v3, %v6635_v57  ;;  %v6710_v6 = vpack.c.bf16 %v6696_v14, %v6692_v28  ;;  %v6800_v57 = vpop.permute.xlu1 %6799 }
 0xf37   : > { %6862 = vmatprep.subr.bf16.mxu1 %v6653_v10 }
 0xf38   : > { %6863 = vmatpush1.bf16.msra.mxu1 %v6652_v0 }
 0xf39   : > { %v6643_v19 = vpop.f32.mrb[160].mxu0  ;;  %v6700_v20 = vpop.f32.mrb[152].mxu1 }
 0xf3a   : > { %v6645_v23 = vpop.f32.mrb[161].mxu0  ;;  %v6702_v50 = vpop.f32.mrb[153].mxu1 }
 0xf3b   : > { %v6647_v52 = vpop.f32.mrb[162].mxu0  ;;  %v6704_v58 = vpop.f32.mrb[154].mxu1 }
 0xf3c   : > { %v6654_v62 = vpack.c.bf16 %v6647_v52, %v6643_v19  ;;  %v6711_v45 = vpack.c.bf16 %v6704_v58, %v6700_v20  ;;  %v6649_v7 = vpop.f32.mrb[163].mxu0  ;;  %v6706_v8 = vpop.f32.mrb[155].mxu1 }
 0xf3d   : > { %v6655_v2 = vpack.c.bf16 %v6649_v7, %v6645_v23  ;;  %v6712_v41 = vpack.c.bf16 %v6706_v8, %v6702_v50 }
 0xf3f   : > { %6864 = vmatprep.subr.bf16.mxu1 %v6655_v2 }
 0xf40   : > { %6865 = vmatpush1.bf16.msra.mxu1 %v6654_v62 }
 0xf41   : > { %6866 = vmatprep.subr.bf16.mxu1 %v6710_v6 }
 0xf44   : > { %6867 = vmatpush1.bf16.msra.mxu1 %v6709_v13 }
 0xf45   : > { %6868 = vmatprep.subr.bf16.mxu1 %v6712_v41 }
 0xf48   : > { %6869 = vmatpush1.bf16.msra.mxu1 %v6711_v45 }
 0xf4b   : > { %6871 = vmatmul.mubr.bf16.vlgmr.msra.gmra.mrb[156].mxu1 %v9168_v9 }
 0xf4c   : > { %6880 = vmatprep.mubr.bf16.mxu1 %v9171_v39 }
 0xf53   : > { %6881 = vmatmul.mubr.bf16.gmra.mrb[160].mxu1 %v9173_v15 }
 0xf54   : > { %6923 = vmatprep.mubr.bf16.mxu1 %v12338_v1 }
 0xf72   : > { %v6747_v17 = vpop.f32.mrb[164].mxu0 }
 0xf73   : > { %v6749_v25 = vpop.f32.mrb[165].mxu0 }
 0xf74   : > { %v6751_v29 = vpop.f32.mrb[166].mxu0 }
 0xf75   : > { %v6766_v30 = vpack.c.bf16 %v6751_v29, %v6747_v17  ;;  %v6753_v33 = vpop.f32.mrb[167].mxu0 }
 0xf76   : > { %v6767_v36 = vpack.c.bf16 %v6753_v33, %v6749_v25 }
 0xf78   : > { %6891 = vmatprep.subr.bf16.mxu1 %v6767_v36 }
 0xf79   : > { %6892 = vmatpush1.bf16.msra.mxu1 %v6766_v30 }
 0xf7a   : > { %v6757_v38 = vpop.f32.mrb[168].mxu0 }
 0xf7b   : > { %v6759_v27 = vpop.f32.mrb[169].mxu0 }
 0xf7c   : > { %v6761_v35 = vpop.f32.mrb[170].mxu0 }
 0xf7d   : > { %v6768_v40 = vpack.c.bf16 %v6761_v35, %v6757_v38  ;;  %v6763_v31 = vpop.f32.mrb[171].mxu0 }
 0xf7e   : > { %v6769_v37 = vpack.c.bf16 %v6763_v31, %v6759_v27 }
 0xf80   : > { %6893 = vmatprep.subr.bf16.mxu1 %v6769_v37 }
 0xf81   : > { %6894 = vmatpush1.bf16.msra.mxu1 %v6768_v40 }
 0xf84   : > { %7977 = vmatmul.mubr.msk.bf16.vlgmr.msra.gmra.mrb[156].mxu1 %vm800_vm0, %v9174_v42 }
 0xf85   : > { %6933 = vmatprep.mubr.bf16.mxu1 %v12338_v1 }
 0xf8c   : > { %7978 = vmatmul.mubr.msk.bf16.gmra.mrb[160].mxu1 %vm800_vm0, %v9175_v43 }
0x1057   : > { %v6925_v47 = vpop.f32.mrb[156].mxu1 }
0x1058   : > { %v8595_v49 = vadd.f32 %v6925_v47, %v6785_v44  ;;  %v6927_v51 = vpop.f32.mrb[157].mxu1 }
0x1059   : > { %v8596_v63 = vadd.f32 %v6927_v51, %v6785_v44  ;;  %v6929_v53 = vpop.f32.mrb[158].mxu1 }
0x105a   : > { %v8597_v59 = vadd.f32 %v6929_v53, %v6790_v4  ;;  %v6931_v56 = vpop.f32.mrb[159].mxu1  ;;  %v6944_v11 = vmul.f32 %v8595_v49, %v8595_v49 }
0x105b   : > { %v8598_v21 = vadd.f32 %v6931_v56, %v6790_v4  ;;  %v6945_v5 = vmul.f32 %v8596_v63, %v8596_v63 }
0x105c   : > { %v6946_v18 = vmul.f32 %v8597_v59, %v8597_v59 }
0x105d   : > { %v6947_v16 = vmul.f32 %v8598_v21, %v8598_v21 }
0x105e   : > { %v6952_v24 = vadd.f32 %v6946_v18, %v6944_v11 }
0x105f   : > { %v6961_v22 = vadd.f32 %v6947_v16, %v6945_v5  ;;  %v6935_v12 = vpop.f32.mrb[160].mxu1 }
0x1060   : > { %v8599_v54 = vadd.f32 %v6935_v12, %v6795_v26  ;;  %v6937_v55 = vpop.f32.mrb[161].mxu1 }
0x1061   : > { %v8600_v28 = vadd.f32 %v6937_v55, %v6795_v26  ;;  %v6939_v60 = vpop.f32.mrb[162].mxu1 }
0x1062   : > { %v6948_v61 = vmul.f32 %v8599_v54, %v8599_v54  ;;  %v8601_v0 = vadd.f32 %v6939_v60, %v6800_v57  ;;  %v6941_v13 = vpop.f32.mrb[163].mxu1  ;;  %v7063_v60 = vld [vmem:[%s12300_s23] sm:$0x3] }
0x1063   : > { %v6949_v3 = vmul.f32 %v8600_v28, %v8600_v28  ;;  %v8602_v14 = vadd.f32 %v6941_v13, %v6800_v57 }
0x1064   : > { %v6953_v10 = vadd.f32 %v6952_v24, %v6948_v61  ;;  %v6950_v6 = vmul.f32 %v8601_v0, %v8601_v0 }
0x1065   : > { %v6962_v19 = vadd.f32 %v6961_v22, %v6949_v3  ;;  %v6951_v20 = vmul.f32 %v8602_v14, %v8602_v14  ;;  %v7017_v3 = vpop.permute.xlu0 %7016 }
0x1066   : > { %v6954_v23 = vadd.f32 %v6953_v10, %v6950_v6 }
0x1067   : > { %v6963_v50 = vadd.f32 %v6962_v19, %v6951_v20 }
0x1068   : > { %v6955_v52 = vrot.slane %v6954_v23, 4 }
0x1069   : > { %v6964_v58 = vrot.slane %v6963_v50, 4 }
0x106a   : > { %v6956_v62 = vadd.f32 %v6955_v52, %v6954_v23 }
0x106b   : > { %v6965_v45 = vadd.f32 %v6964_v58, %v6963_v50 }
0x106c   : > { %v6957_v7 = vrot.slane %v6956_v62, 2 }
0x106d   : > { %v6966_v8 = vrot.slane %v6965_v45, 2 }
0x106e   : > { %v6958_v2 = vadd.f32 %v6957_v7, %v6956_v62 }
0x106f   : > { %v6967_v41 = vadd.f32 %v6966_v8, %v6965_v45 }
0x1070   : > { %v6959_v9 = vrot.slane %v6958_v2, 1 }
0x1071   : > { %v6968_v39 = vrot.slane %v6967_v41, 1 }
0x1072   : > { %v6960_v15 = vadd.f32 %v6959_v9, %v6958_v2 }
0x1073   : > { %v6969_v17 = vadd.f32 %v6968_v39, %v6967_v41 }
0x1074   : > { %v6970_v25 = vmul.f32 0.03125, %v6960_v15 }
0x1075   : > { %v6971_v29 = vmul.f32 0.03125, %v6969_v17 }
0x1076   : > { %v6972_v30 = vadd.f32 1e-08, %v6970_v25 }
0x1077   : > { %v6973_v33 = vadd.f32 1e-08, %v6971_v29 }
0x1078   : > { %9186 = vrsqrt.f32 %v6972_v30 }
0x1079   : > { %9188 = vrsqrt.f32 %v6973_v33 }
0x1082   : > { %v9187_v36 = vpop.eup %9186 }
0x1083   : > { %v9189_v38 = vpop.eup %9188  ;;  %v6982_v27 = vmul.f32 %v9187_v36, %v8601_v0  ;;  %v6976_v35 = vmul.f32 %v9187_v36, %v8595_v49  ;;  %v6978_v40 = vmul.f32 %v9187_v36, %v8597_v59  ;;  %v6980_v31 = vmul.f32 %v9187_v36, %v8599_v54 }
0x1084   : > { %v6983_v37 = vmul.f32 %v9189_v38, %v8602_v14  ;;  %v6977_v42 = vmul.f32 %v9189_v38, %v8596_v63  ;;  %v6979_v43 = vmul.f32 %v9189_v38, %v8598_v21  ;;  %v6981_v44 = vmul.f32 %v9189_v38, %v8600_v28  ;;  %v7008_v28 = vld [vmem:[%s12298_s21] sm:$0x3] }
0x1085   : > { %vm6990_vm12 = vcmp.ge.f32.partialorder %v6982_v27, 0.0  ;;  %v6998_v47 = vmul.f32 0.2, %v6982_v27  ;;  %vm6984_vm13 = vcmp.ge.f32.partialorder %v6976_v35, 0.0  ;;  %vm6986_vm14 = vcmp.ge.f32.partialorder %v6978_v40, 0.0 }
0x1086   : > { %vm6991_vm15 = vcmp.ge.f32.partialorder %v6983_v37, 0.0  ;;  %v6999_v51 = vmul.f32 0.2, %v6983_v37  ;;  %vm6985_vm1 = vcmp.ge.f32.partialorder %v6977_v42, 0.0  ;;  %vm6987_vm2 = vcmp.ge.f32.partialorder %v6979_v43, 0.0 }
0x1087   : > { %v7006_v4 = vsel %vm6990_vm12, %v6982_v27, %v6998_v47  ;;  %v6993_v53 = vmul.f32 0.2, %v6977_v42  ;;  %v6995_v56 = vmul.f32 0.2, %v6979_v43  ;;  %v6992_v11 = vmul.f32 0.2, %v6976_v35 }
0x1088   : > { %v6994_v18 = vmul.f32 0.2, %v6978_v40  ;;  %vm6989_vm3 = vcmp.ge.f32.partialorder %v6981_v44, 0.0  ;;  %v6997_v49 = vmul.f32 0.2, %v6981_v44  ;;  %v7007_v59 = vsel %vm6991_vm15, %v6983_v37, %v6999_v51 }
0x1089   : > { %v7001_v5 = vsel %vm6985_vm1, %v6977_v42, %v6993_v53  ;;  %v7003_v63 = vsel %vm6987_vm2, %v6979_v43, %v6995_v56  ;;  %v7000_v21 = vsel %vm6984_vm13, %v6976_v35, %v6992_v11  ;;  %vm6988_vm4 = vcmp.ge.f32.partialorder %v6980_v31, 0.0 }
0x108a   : > { %v7010_v16 = vpack.c.bf16 %v7003_v63, %v7001_v5  ;;  %v7002_v24 = vsel %vm6986_vm14, %v6978_v40, %v6994_v18  ;;  %v7005_v26 = vsel %vm6989_vm3, %v6981_v44, %v6997_v49  ;;  %v6996_v22 = vmul.f32 0.2, %v6980_v31 }
0x108b   : > { %v7009_v12 = vpack.c.bf16 %v7002_v24, %v7000_v21  ;;  %v7012_v54 = vpack.c.bf16 %v7007_v59, %v7005_v26 }
0x108c   : > { %7022 = vmatprep.subr.bf16.mxu0 %v7010_v16  ;;  %v7004_v55 = vsel %vm6988_vm4, %v6980_v31, %v6996_v22 }
0x108d   : > { %7023 = vmatpush1.bf16.msra.mxu0 %v7009_v12  ;;  %v7011_v57 = vpack.c.bf16 %v7006_v4, %v7004_v55 }
0x108e   : > { %7024 = vmatprep.subr.bf16.mxu0 %v7012_v54 }
0x1091   : > { %7025 = vmatpush1.bf16.msra.mxu0 %v7011_v57 }
0x1092   : > { %7073 = vmatprep.subr.bf16.mxu0 %v10594_v34 }
0x1094   : > { %7979 = vmatmul.mubr.msk.bf16.vlgmr.msra.gmra.mrb[172].mxu0 %vm800_vm0, %v7008_v28 }
0x1095   : > { %7074 = vmatpush1.bf16.msra.mxu0 %v10592_v32  ;;  %7105 = vmatprep.mubr.bf16.mxu0 %v12338_v1  ;;  %v7068_v32 = vpop.permute.xlu1 %7067 }
0x1096   : > { %7075 = vmatprep.subr.bf16.mxu0 %v10626_v48 }
0x1099   : > { %7076 = vmatpush1.bf16.msra.mxu0 %v10624_v46 }
0x109c   : > { %7980 = vmatmul.mubr.msk.bf16.vlgmr.msra.gmra.mrb[176].mxu0 %vm800_vm0, %v7063_v60 }
0x1167   : > { %v7056_v61 = vpop.f32.mrb[172].mxu0 }
0x1168   : > { %v7058_v0 = vpop.f32.mrb[173].mxu0  ;;  %v7057_v14 = vadd.f32 %v7056_v61, %v7017_v3 }
0x1169   : > { %v7060_v34 = vpop.f32.mrb[174].mxu0  ;;  %v7059_v10 = vadd.f32 %v7058_v0, %v7017_v3 }
0x116a   : > { %v7061_v13 = vpop.f32.mrb[175].mxu0  ;;  %v7116_v20 = vmul.f32 0.5, %v7057_v14 }
0x116b   : > { %v7117_v52 = vmul.f32 0.5, %v7059_v10 }
0x116f   : > { %v7107_v1 = vpop.f32.mrb[176].mxu0 }
0x1170   : > { %v7108_v6 = vadd.f32 %v7107_v1, %v7068_v32  ;;  %v7109_v48 = vpop.f32.mrb[177].mxu0 }
0x1171   : > { %v7110_v19 = vadd.f32 %v7109_v48, %v7068_v32  ;;  %v7111_v46 = vpop.f32.mrb[178].mxu0 }
0x1172   : > { %v7114_v23 = vmul.f32 0.5, %v7108_v6  ;;  %v7112_v50 = vpop.f32.mrb[179].mxu0 }
0x1173   : > { %v7115_v58 = vmul.f32 0.5, %v7110_v19 }
0x1174   : > { %v7118_v62 = vadd.f32 %v7116_v20, %v7114_v23 }
0x1175   : > { %v7119_v45 = vadd.f32 %v7117_v52, %v7115_v58 }
0x1177   : > { %v7122_v7 = vcombine.low %v7118_v62, %v7119_v45 }
0x1179   : > { %7124 = vst [vmem:[%s764_s26] sm:$0x77] %v7122_v7 }
0x117a PF: > { %s35_s29 = sadd.s32 1, %s9484_s29  }
0x117b   : > { %p32_p4 = scmp.ge.s32.totalorder %s35_s29, 4  }
0x117d   :  { %34 = sbr.rel (!%p32_p4) target bundleno = 11 (0xb), region = 174 }

</bundles_post_ra>
